<compile_context>
chip_gen: v5e
topology: v5e:2x2
jax: 0.10.0
libtpu: 0.0.40
codegen_flags: <defaults>
</compile_context>

<pallas_src>
import jax
import jax.numpy as jnp
from jax.experimental import pallas as pl
from jax.experimental.pallas import tpu as pltpu

_M_TILE_CAP = 512              # rows of the im2col matrix per tile
_K_TILE_CAP = 2048             # patch depth (K) per tile
_VMEM_LIMIT = 32 * 1024 * 1024  # raise v5e's 16 MiB default; safe on v6e/v7x


def _choose_tile(n, cap, split_for_parallel=False):
    """Tile size + (possibly padded) total extent for a dimension of size n."""
    if n <= cap:
        # Guarantee >=2 grid units along M so both v7x TensorCores get work
        # even when one tile would cover the whole dimension.
        if split_for_parallel and n >= 256 and n % 16 == 0:
            return n // 2, n
        return n, n
    for t in (cap, cap // 2, cap // 4):
        if n % t == 0:
            return t, n
    return cap, ((n + cap - 1) // cap) * cap


# ----------------------------- Pallas kernel --------------------------------

def _apply_pre_act(a, pre_act):
    if pre_act == "lrelu":          # LeakyReLU(0.2)
        return jnp.where(a >= 0, a, a * 0.2)
    if pre_act == "relu":
        return jnp.maximum(a, 0.0)
    return a


def _make_mm_kernel(n_src, has_bias, pre_act, post_tanh, n_k):
    """Conv-as-matmul kernel over a (phase, m-tile, k-tile) grid.

    refs = x_0..x_{S-1}, w_0..w_{S-1}, [bias], out, stat_sum, stat_sq, acc.
    Each k step accumulates sum_s dot(pre_act(x_s), w_s) into the f32 VMEM
    accumulator; the finalize step adds the bias, emits per-(phase, m-tile)
    channel sum / sum-of-squares partials (fused BatchNorm statistics) and the
    (optionally tanh'd) output tile.
    """
    def kernel(*refs):
        xs = refs[:n_src]
        ws = refs[n_src:2 * n_src]
        pos = 2 * n_src
        b_ref = refs[pos] if has_bias else None
        pos += 1 if has_bias else 0
        o_ref, s_ref, q_ref = refs[pos:pos + 3]
        acc_ref = refs[pos + 3]

        @pl.when(pl.program_id(2) == 0)
        def _():
            acc_ref[...] = jnp.zeros_like(acc_ref)

        part = jnp.dot(_apply_pre_act(xs[0][0], pre_act), ws[0][0],
                       preferred_element_type=jnp.float32)
        for s in range(1, n_src):
            part += jnp.dot(_apply_pre_act(xs[s][0], pre_act), ws[s][0],
                            preferred_element_type=jnp.float32)
        acc_ref[...] += part

        @pl.when(pl.program_id(2) == n_k - 1)
        def _():
            r = acc_ref[...]
            if has_bias:
                r = r + b_ref[...]
            # Fused BatchNorm partials (zero-padded rows contribute 0; layers
            # with a bias never feed a norm, so the bias offset is harmless).
            s_ref[0, 0] = jnp.sum(r, axis=0, keepdims=True)
            q_ref[0, 0] = jnp.sum(r * r, axis=0, keepdims=True)
            if post_tanh:
                r = jnp.tanh(r)
            o_ref[0] = r.astype(o_ref.dtype)

    return kernel


# --------------------------- pallas_call wrapper -----------------------------

def fused_conv_matmul(lhs_list, w_list, bias, *, pre_act="none",
                      post_tanh=False, out_dtype=jnp.bfloat16):
    """out = post( sum_s pre_act(lhs_s) @ w_s  (+ bias) ), plus fused channel
    sum / sum-of-squares of the pre-activation result.

    lhs_s: (P, M, K) bf16, w_s: (P, K, C) bf16.  Returns (out (P, M, C),
    channel_sum (C,) f32, channel_sumsq (C,) f32).
    """
    n_src = len(lhs_list)
    P, M, K0 = lhs_list[0].shape
    C = w_list[0].shape[-1]
    for a, w in zip(lhs_list, w_list):
        assert a.shape == (P, M, K0) and w.shape == (P, K0, C)

    tm, Mp = _choose_tile(M, _M_TILE_CAP, split_for_parallel=(P == 1))
    tk, Kp = _choose_tile(K0, _K_TILE_CAP)
    if Mp != M or Kp != K0:
        lhs_list = [jnp.pad(a, ((0, 0), (0, Mp - M), (0, Kp - K0)))
                    for a in lhs_list]
    if Kp != K0:
        w_list = [jnp.pad(w, ((0, 0), (0, Kp - K0), (0, 0))) for w in w_list]
    n_m, n_k = Mp // tm, Kp // tk

    in_specs = [pl.BlockSpec((1, tm, tk), lambda p, m, k: (p, m, k))
                for _ in range(n_src)]
    # Weight block index is independent of m (and of k when n_k == 1, the
    # common case), so the weights stay VMEM resident across m-tiles.
    in_specs += [pl.BlockSpec((1, tk, C), lambda p, m, k: (p, k, 0))
                 for _ in range(n_src)]
    args = list(lhs_list) + list(w_list)
    if bias is not None:
        in_specs.append(pl.BlockSpec((1, C), lambda p, m, k: (0, 0)))
        args.append(bias.reshape(1, C).astype(jnp.float32))

    kernel = _make_mm_kernel(n_src, bias is not None, pre_act, post_tanh, n_k)
    out, s_part, q_part = pl.pallas_call(
        kernel,
        out_shape=(jax.ShapeDtypeStruct((P, Mp, C), out_dtype),
                   jax.ShapeDtypeStruct((P, n_m, 1, C), jnp.float32),
                   jax.ShapeDtypeStruct((P, n_m, 1, C), jnp.float32)),
        grid=(P, n_m, n_k),
        in_specs=in_specs,
        out_specs=(pl.BlockSpec((1, tm, C), lambda p, m, k: (p, m, 0)),
                   pl.BlockSpec((1, 1, 1, C), lambda p, m, k: (p, m, 0, 0)),
                   pl.BlockSpec((1, 1, 1, C), lambda p, m, k: (p, m, 0, 0))),
        scratch_shapes=[pltpu.VMEM((tm, C), jnp.float32)],
        compiler_params=pltpu.CompilerParams(
            dimension_semantics=("parallel", "parallel", "arbitrary"),
            vmem_limit_bytes=_VMEM_LIMIT),
    )(*args)
    if Mp != M:
        out = out[:, :M]
    return out, jnp.sum(s_part, axis=(0, 1, 2)), jnp.sum(q_part, axis=(0, 1, 2))


# --------------------------- BatchNorm (deferred) ----------------------------

def affine_from_stats(ch_sum, ch_sumsq, gamma, beta, count, eps=1e-5):
    """Training-mode BatchNorm2d (biased batch variance) folded into a
    per-channel affine, from the fused sum / sum-of-squares.
    TODO(synk): E[x^2]-E[x]^2 can cancel for large-mean activations; a
    shifted/Welford accumulation would be safer with trained parameters."""
    mean = ch_sum / count
    var = jnp.maximum(ch_sumsq / count - mean * mean, 0.0)
    scale = gamma * jax.lax.rsqrt(var + eps)
    shift = beta - mean * scale
    return scale, shift


# ------------------------- conv glue (patch building) -----------------------

def _normalize_input(x_raw, scale, shift):
    """Apply the deferred per-channel BN affine (fused by XLA into the patch
    build) and cast to bf16.  scale=None means identity."""
    if scale is None:
        return x_raw.astype(jnp.bfloat16)
    return (x_raw.astype(jnp.float32) * scale + shift).astype(jnp.bfloat16)


def conv_down(x_raw, scale, shift, w_m, *, pre_act):
    """Conv2d(k=4, s=2, p=1, bias=False) on NHWC.  The activation runs inside
    the matmul kernel (act(0)=0 keeps zero padding exact); per-channel sum /
    sumsq of the output come back fused for a following BatchNorm."""
    N, H, W, C = x_raw.shape
    Ho, Wo = H // 2, W // 2
    xn = _normalize_input(x_raw, scale, shift)
    xp = jnp.pad(xn, ((0, 0), (1, 1), (1, 1), (0, 0)))
    # TODO(synk): this im2col is still XLA glue (~4-5x activation bytes);
    # fusing it needs Element-offset index maps or manual halo DMA.
    cols = [xp[:, kh:kh + 2 * Ho:2, kw:kw + 2 * Wo:2, :]
            for kh in range(4) for kw in range(4)]
    patches = jnp.stack(cols, axis=3).reshape(1, N * Ho * Wo, 16 * C)
    out, s, q = fused_conv_matmul([patches], [w_m[None]], None, pre_act=pre_act)
    return out[0].reshape(N, Ho, Wo, -1), s, q


def _phase_patches(x_raw, scale, shift):
    """Per-output-phase 2x2 stride-1 taps for the sub-pixel ConvTranspose."""
    N, h, w, C = x_raw.shape
    xn = _normalize_input(x_raw, scale, shift)
    xp = jnp.pad(xn, ((0, 0), (1, 1), (1, 1), (0, 0)))
    phases = []
    for ry in range(2):
        for rx in range(2):
            cols = [xp[:, ry + dy:ry + dy + h, rx + dx:rx + dx + w, :]
                    for dy in range(2) for dx in range(2)]
            phases.append(jnp.stack(cols, axis=3).reshape(N * h * w, 4 * C))
    return jnp.stack(phases, axis=0)                         # (4, N*h*w, 4*C)


def conv_transpose_up(sources, wqs, bias, *, post_tanh, out_dtype=jnp.bfloat16):
    """ConvTranspose2d(k=4, s=2, p=1) on NHWC via sub-pixel decomposition
    (4 output phases, each a stride-1 2x2 conv -> no zero-insertion).  The skip
    concat is fused: every (raw, scale, shift) source gets its own lhs / weight
    K-chunk inside the same kernel, so the concatenated activation is never
    materialized.  uprelu (ReLU) runs inside the kernel."""
    N, h, w, _ = sources[0][0].shape
    Cout = wqs[0].shape[-1]
    lhs_list = [_phase_patches(r, sc, sh) for (r, sc, sh) in sources]
    y, ssum, ssq = fused_conv_matmul(lhs_list, list(wqs), bias, pre_act="relu",
                                     post_tanh=post_tanh, out_dtype=out_dtype)
    y = y.reshape(2, 2, N, h, w, Cout)
    # TODO(synk): a phase-interleaved out_spec (pairing the two column phases
    # per grid step) would remove this strided interleave copy.
    out = jnp.transpose(y, (2, 3, 0, 4, 1, 5)).reshape(N, 2 * h, 2 * w, Cout)
    return out, ssum, ssq


# ------------------------------ parameters ---------------------------------

def _conv_w_to_matmul(w):
    # PyTorch Conv2d weight (Cout, Cin, 4, 4) -> (kh*kw*Cin, Cout), bf16.
    Cout, Cin = w.shape[0], w.shape[1]
    return jnp.transpose(w, (2, 3, 1, 0)).reshape(16 * Cin, Cout).astype(jnp.bfloat16)


def _convT_w_to_phase_matmul(w):
    # PyTorch ConvTranspose2d weight (Cin, Cout, 4, 4) -> per-output-phase 2x2
    # conv weights (4, 4*Cin, Cout).  Phase p = 2*ry + rx; patch order (dy, dx,
    # cin); tap (dy, dx) of phase (ry, rx) uses kernel element (3-ry-2dy, 3-rx-2dx).
    Cin, Cout = w.shape[0], w.shape[1]
    phases = []
    for ry in range(2):
        for rx in range(2):
            taps = [w[:, :, 3 - ry - 2 * dy, 3 - rx - 2 * dx]
                    for dy in range(2) for dx in range(2)]       # each (Cin, Cout)
            phases.append(jnp.stack(taps, axis=0).reshape(4 * Cin, Cout))
    return jnp.stack(phases, axis=0).astype(jnp.bfloat16)


def init_unet_params(key, input_nc, output_nc, num_downs, ngf):
    # Build block specs innermost -> outermost, mirroring UNetGenerator.__init__.
    specs = [dict(outer=ngf * 8, inner=ngf * 8, kind="innermost")]
    for _ in range(num_downs - 5):
        specs.append(dict(outer=ngf * 8, inner=ngf * 8, kind="middle"))
    specs.append(dict(outer=ngf * 4, inner=ngf * 8, kind="middle"))
    specs.append(dict(outer=ngf * 2, inner=ngf * 4, kind="middle"))
    specs.append(dict(outer=ngf, inner=ngf * 2, kind="middle"))
    specs.append(dict(outer=output_nc, inner=ngf, kind="outermost"))
    specs = specs[::-1]  # outermost -> innermost

    blocks = []
    for s in specs:
        outer, inner, kind = s["outer"], s["inner"], s["kind"]
        in_nc = input_nc if kind == "outermost" else outer
        up_in = inner if kind == "innermost" else inner * 2
        key, k1, k2, k3 = jax.random.split(key, 4)
        p = dict(kind=kind)
        # norm_layer == BatchNorm2d => use_bias=False everywhere except the
        # outermost upconv (which has a bias by construction).
        wd = 0.05 * jax.random.normal(k1, (inner, in_nc, 4, 4), jnp.float32)
        p["wd_m"] = _conv_w_to_matmul(wd)
        wu = 0.05 * jax.random.normal(k2, (up_in, outer, 4, 4), jnp.float32)
        if kind == "innermost":
            p["wu_qs"] = [_convT_w_to_phase_matmul(wu)]
        else:
            # Split along the input channels of torch.cat([x, model(x)], 1):
            # first `inner` channels = skip x, remaining = submodule output u.
            p["wu_qs"] = [_convT_w_to_phase_matmul(wu[:inner]),
                          _convT_w_to_phase_matmul(wu[inner:])]
        p["bu"] = (0.05 * jax.random.normal(k3, (outer,), jnp.float32)
                   if kind == "outermost" else None)
        if kind == "middle":               # downnorm only on middle blocks
            p["dn_g"] = jnp.ones((inner,), jnp.float32)
            p["dn_b"] = jnp.zeros((inner,), jnp.float32)
        if kind != "outermost":            # upnorm on middle + innermost blocks
            p["un_g"] = jnp.ones((outer,), jnp.float32)
            p["un_b"] = jnp.zeros((outer,), jnp.float32)
        blocks.append(p)
    return blocks


# ------------------------------- forward -----------------------------------
# Tensors flow as (raw, scale, shift): the true module value is raw*scale+shift,
# with the pending BatchNorm affine applied by the consuming conv's patch build.
# Skips carry raw x: the reference's in-place LeakyReLU on the skip is absorbed
# by the consumer's ReLU (ReLU o LeakyReLU == ReLU), so semantics are preserved.
# torch.cat([x, model(x)], 1) is never materialized: the two halves stay
# separate sources consumed by the parent's fused up-conv kernel.

def unet_block_forward(blocks, idx, x_raw, x_scale, x_shift):
    p = blocks[idx]
    kind = p["kind"]
    if kind == "outermost":
        h, _, _ = conv_down(x_raw, None, None, p["wd_m"], pre_act="none")   # downconv
        sources = unet_block_forward(blocks, idx + 1, h, None, None)
        y, _, _ = conv_transpose_up(sources, p["wu_qs"], p["bu"],
                                    post_tanh=True, out_dtype=jnp.float32)  # uprelu, upconv, tanh
        return y

    # downrelu (LeakyReLU 0.2, in-kernel) + downconv (+ fused downnorm stats)
    h, hs, hq = conv_down(x_raw, x_scale, x_shift, p["wd_m"], pre_act="lrelu")
    N, Ho, Wo, _ = h.shape
    if kind == "innermost":
        sub_sources = [(h, None, None)]
    else:
        dn_scale, dn_shift = affine_from_stats(hs, hq, p["dn_g"], p["dn_b"],
                                               N * Ho * Wo)                # downnorm (deferred)
        sub_sources = unet_block_forward(blocks, idx + 1, h, dn_scale, dn_shift)

    # uprelu + upconv (+ fused upnorm stats); skip concat fused as extra source
    u, us, uq = conv_transpose_up(sub_sources, p["wu_qs"], None, post_tanh=False)
    Nu, Hu, Wu, _ = u.shape
    un_scale, un_shift = affine_from_stats(us, uq, p["un_g"], p["un_b"],
                                           Nu * Hu * Wu)                   # upnorm (deferred)

    # torch.cat([x, model(x)], 1) -> kept as two un-concatenated sources.
    return [(x_raw, x_scale, x_shift), (u, un_scale, un_shift)]


def unet_generator_forward(blocks, x_nchw):
    x = jnp.transpose(x_nchw, (0, 2, 3, 1))          # NCHW -> NHWC
    y = unet_block_forward(blocks, 0, x, None, None)
    return jnp.transpose(y, (0, 3, 1, 2))            # NHWC -> NCHW


# --------------------------------- main -------------------------------------

if __name__ == "__main__":
    input_nc, output_nc, num_downs, ngf = 3, 3, 5, 8   # 32x32 -> 1x1 at the bottleneck
    key = jax.random.PRNGKey(0)
    kx, kp = jax.random.split(key)
    x = jax.random.normal(kx, (2, input_nc, 32, 32), jnp.float32)

    blocks = init_unet_params(kp, input_nc, output_nc, num_downs, ngf)

    fwd = jax.jit(lambda xx: unet_generator_forward(blocks, xx))
    y = jax.block_until_ready(fwd(x))

    assert y.shape == (2, output_nc, 32, 32), y.shape
    assert bool(jnp.all(jnp.isfinite(y)))
    assert bool(jnp.all(jnp.abs(y) <= 1.0 + 1e-6))  # final Tanh
    print("KERNEL_OK")
</pallas_src>

<mosaic_0001>
module attributes {stable_mosaic.version = 11 : i64} {
  func.func @kernel(%arg0: i32, %arg1: i32, %arg2: i32, %arg3: memref<1x256x48xbf16, #tpu.memory_space<vmem>>, %arg4: memref<1x48x8xbf16, #tpu.memory_space<vmem>>, %arg5: memref<1x256x8xbf16, #tpu.memory_space<vmem>>, %arg6: memref<1x1x1x8xf32, #tpu.memory_space<vmem>>, %arg7: memref<1x1x1x8xf32, #tpu.memory_space<vmem>>, %arg8: memref<256x8xf32, #tpu.memory_space<vmem>>) attributes {dimension_semantics = [#tpu.dimension_semantics<parallel>, #tpu.dimension_semantics<parallel>, #tpu.dimension_semantics<arbitrary>], iteration_bounds = array<i64: 1, 2, 1>, scalar_prefetch = 0 : i64, scratch_operands = 1 : i64, tpu.core_type = #tpu.core_type<tc>, window_params = [{transform_indices = @transform_0, window_bounds = array<i64: 1, 256, 48>}, {transform_indices = @transform_1, window_bounds = array<i64: 1, 48, 8>}, {transform_indices = @transform_2, window_bounds = array<i64: 1, 256, 8>}, {transform_indices = @transform_3, window_bounds = array<i64: 1, 1, 1, 8>}, {transform_indices = @transform_4, window_bounds = array<i64: 1, 1, 1, 8>}]} {
    %c0_i32 = arith.constant 0 : i32
    %0 = arith.cmpi eq, %arg2, %c0_i32 : i32
    %1 = arith.extui %0 : i1 to i32
    %c0_i32_0 = arith.constant 0 : i32
    %2 = arith.cmpi ne, %1, %c0_i32_0 : i32
    scf.if %2 {
      %cst_12 = arith.constant 0.000000e+00 : f32
      %14 = vector.broadcast %cst_12 : f32 to vector<256x8xf32>
      %c0_13 = arith.constant 0 : index
      %c0_14 = arith.constant 0 : index
      %15 = vector.load %arg8[%c0_13, %c0_14] : memref<256x8xf32, #tpu.memory_space<vmem>>, vector<256x8xf32>
      tpu.vector_store %arg8[%c0_13, %c0_14], %14 {strides = array<i32>} : memref<256x8xf32, #tpu.memory_space<vmem>>, vector<256x8xf32>,
    } else {
    }
    %c0 = arith.constant 0 : index
    %c0_1 = arith.constant 0 : index
    %c0_2 = arith.constant 0 : index
    %3 = vector.load %arg3[%c0, %c0_1, %c0_2] : memref<1x256x48xbf16, #tpu.memory_space<vmem>>, vector<1x256x48xbf16>
    %4 = vector.shape_cast %3 : vector<1x256x48xbf16> to vector<256x48xbf16>
    %c0_3 = arith.constant 0 : index
    %c0_4 = arith.constant 0 : index
    %c0_5 = arith.constant 0 : index
    %5 = vector.load %arg4[%c0_3, %c0_4, %c0_5] : memref<1x48x8xbf16, #tpu.memory_space<vmem>>, vector<1x48x8xbf16>
    %6 = vector.shape_cast %5 : vector<1x48x8xbf16> to vector<48x8xbf16>
    %cst = arith.constant dense<0.000000e+00> : vector<256x8xf32>
    %7 = tpu.matmul %4, %6, %cst {dimension_numbers = #tpu.dot_dimension_numbers<[1], [0], [0], [1], [0, 0, 1, 1], [], []>} : vector<256x48xbf16>, vector<48x8xbf16>, vector<256x8xf32> -> vector<256x8xf32>
    %c0_6 = arith.constant 0 : index
    %c0_7 = arith.constant 0 : index
    %8 = vector.load %arg8[%c0_6, %c0_7] : memref<256x8xf32, #tpu.memory_space<vmem>>, vector<256x8xf32>
    %9 = arith.addf %8, %7 : vector<256x8xf32>
    %c0_8 = arith.constant 0 : index
    %c0_9 = arith.constant 0 : index
    %10 = vector.load %arg8[%c0_8, %c0_9] : memref<256x8xf32, #tpu.memory_space<vmem>>, vector<256x8xf32>
    tpu.vector_store %arg8[%c0_8, %c0_9], %9 {strides = array<i32>} : memref<256x8xf32, #tpu.memory_space<vmem>>, vector<256x8xf32>,
    %c0_i32_10 = arith.constant 0 : i32
    %11 = arith.cmpi eq, %arg2, %c0_i32_10 : i32
    %12 = arith.extui %11 : i1 to i32
    %c0_i32_11 = arith.constant 0 : i32
    %13 = arith.cmpi ne, %12, %c0_i32_11 : i32
    scf.if %13 {
      %c0_12 = arith.constant 0 : index
      %c0_13 = arith.constant 0 : index
      %14 = vector.load %arg8[%c0_12, %c0_13] : memref<256x8xf32, #tpu.memory_space<vmem>>, vector<256x8xf32>
      %cst_14 = arith.constant dense<0.000000e+00> : vector<8xf32>
      %15 = vector.multi_reduction <add>, %14, %cst_14 [0] : vector<256x8xf32> to vector<8xf32>
      %16 = vector.shape_cast %15 : vector<8xf32> to vector<1x8xf32>
      %c0_15 = arith.constant 0 : index
      %c0_16 = arith.constant 0 : index
      %c0_17 = arith.constant 0 : index
      %c0_18 = arith.constant 0 : index
      %17 = vector.load %arg6[%c0_15, %c0_16, %c0_17, %c0_18] : memref<1x1x1x8xf32, #tpu.memory_space<vmem>>, vector<1x1x1x8xf32>
      %18 = vector.shape_cast %17 : vector<1x1x1x8xf32> to vector<1x8xf32>
      %19 = vector.shape_cast %16 : vector<1x8xf32> to vector<1x1x1x8xf32>
      tpu.vector_store %arg6[%c0_15, %c0_16, %c0_17, %c0_18], %19 {strides = array<i32>} : memref<1x1x1x8xf32, #tpu.memory_space<vmem>>, vector<1x1x1x8xf32>,
      %20 = arith.mulf %14, %14 : vector<256x8xf32>
      %cst_19 = arith.constant dense<0.000000e+00> : vector<8xf32>
      %21 = vector.multi_reduction <add>, %20, %cst_19 [0] : vector<256x8xf32> to vector<8xf32>
      %22 = vector.shape_cast %21 : vector<8xf32> to vector<1x8xf32>
      %c0_20 = arith.constant 0 : index
      %c0_21 = arith.constant 0 : index
      %c0_22 = arith.constant 0 : index
      %c0_23 = arith.constant 0 : index
      %23 = vector.load %arg7[%c0_20, %c0_21, %c0_22, %c0_23] : memref<1x1x1x8xf32, #tpu.memory_space<vmem>>, vector<1x1x1x8xf32>
      %24 = vector.shape_cast %23 : vector<1x1x1x8xf32> to vector<1x8xf32>
      %25 = vector.shape_cast %22 : vector<1x8xf32> to vector<1x1x1x8xf32>
      tpu.vector_store %arg7[%c0_20, %c0_21, %c0_22, %c0_23], %25 {strides = array<i32>} : memref<1x1x1x8xf32, #tpu.memory_space<vmem>>, vector<1x1x1x8xf32>,
      %26 = arith.truncf %14 : vector<256x8xf32> to vector<256x8xbf16>
      %c0_24 = arith.constant 0 : index
      %c0_25 = arith.constant 0 : index
      %c0_26 = arith.constant 0 : index
      %27 = vector.load %arg5[%c0_24, %c0_25, %c0_26] : memref<1x256x8xbf16, #tpu.memory_space<vmem>>, vector<1x256x8xbf16>
      %28 = vector.shape_cast %27 : vector<1x256x8xbf16> to vector<256x8xbf16>
      %29 = vector.shape_cast %26 : vector<256x8xbf16> to vector<1x256x8xbf16>
      tpu.vector_store %arg5[%c0_24, %c0_25, %c0_26], %29 {strides = array<i32>} : memref<1x256x8xbf16, #tpu.memory_space<vmem>>, vector<1x256x8xbf16>,
    } else {
    }
    return
  }
  func.func @transform_0(%arg0: i32, %arg1: i32, %arg2: i32) -> (i32, i32, i32) {
    %c0_i32 = arith.constant 0 : i32
    return %arg0, %arg1, %arg2 : i32, i32, i32
  }
  func.func @transform_1(%arg0: i32, %arg1: i32, %arg2: i32) -> (i32, i32, i32) {
    %c0_i32 = arith.constant 0 : i32
    %c0_i32_0 = arith.constant 0 : i32
    return %arg0, %arg2, %c0_i32 : i32, i32, i32
  }
  func.func @transform_2(%arg0: i32, %arg1: i32, %arg2: i32) -> (i32, i32, i32) {
    %c0_i32 = arith.constant 0 : i32
    %c0_i32_0 = arith.constant 0 : i32
    return %arg0, %arg1, %c0_i32 : i32, i32, i32
  }
  func.func @transform_3(%arg0: i32, %arg1: i32, %arg2: i32) -> (i32, i32, i32, i32) {
    %c0_i32 = arith.constant 0 : i32
    %c0_i32_0 = arith.constant 0 : i32
    %c0_i32_1 = arith.constant 0 : i32
    return %arg0, %arg1, %c0_i32, %c0_i32_0 : i32, i32, i32, i32
  }
  func.func @transform_4(%arg0: i32, %arg1: i32, %arg2: i32) -> (i32, i32, i32, i32) {
    %c0_i32 = arith.constant 0 : i32
    %c0_i32_0 = arith.constant 0 : i32
    %c0_i32_1 = arith.constant 0 : i32
    return %arg0, %arg1, %c0_i32, %c0_i32_0 : i32, i32, i32, i32
  }
}

module attributes {stable_mosaic.version = 11 : i64} {
  func.func @kernel(%arg0: i32, %arg1: i32, %arg2: i32, %arg3: memref<1x128x128xbf16, #tpu.memory_space<vmem>>, %arg4: memref<1x128x16xbf16, #tpu.memory_space<vmem>>, %arg5: memref<1x128x16xbf16, #tpu.memory_space<vmem>>, %arg6: memref<1x1x1x16xf32, #tpu.memory_space<vmem>>, %arg7: memref<1x1x1x16xf32, #tpu.memory_space<vmem>>, %arg8: memref<128x16xf32, #tpu.memory_space<vmem>>) attributes {dimension_semantics = [#tpu.dimension_semantics<parallel>, #tpu.dimension_semantics<parallel>, #tpu.dimension_semantics<arbitrary>], iteration_bounds = array<i64: 1, 1, 1>, scalar_prefetch = 0 : i64, scratch_operands = 1 : i64, tpu.core_type = #tpu.core_type<tc>, window_params = [{transform_indices = @transform_0, window_bounds = array<i64: 1, 128, 128>}, {transform_indices = @transform_1, window_bounds = array<i64: 1, 128, 16>}, {transform_indices = @transform_2, window_bounds = array<i64: 1, 128, 16>}, {transform_indices = @transform_3, window_bounds = array<i64: 1, 1, 1, 16>}, {transform_indices = @transform_4, window_bounds = array<i64: 1, 1, 1, 16>}]} {
    %c0_i32 = arith.constant 0 : i32
    %0 = arith.cmpi eq, %arg2, %c0_i32 : i32
    %1 = arith.extui %0 : i1 to i32
    %c0_i32_0 = arith.constant 0 : i32
    %2 = arith.cmpi ne, %1, %c0_i32_0 : i32
    scf.if %2 {
      %cst_14 = arith.constant 0.000000e+00 : f32
      %19 = vector.broadcast %cst_14 : f32 to vector<128x16xf32>
      %c0_15 = arith.constant 0 : index
      %c0_16 = arith.constant 0 : index
      %20 = vector.load %arg8[%c0_15, %c0_16] : memref<128x16xf32, #tpu.memory_space<vmem>>, vector<128x16xf32>
      tpu.vector_store %arg8[%c0_15, %c0_16], %19 {strides = array<i32>} : memref<128x16xf32, #tpu.memory_space<vmem>>, vector<128x16xf32>,
    } else {
    }
    %c0 = arith.constant 0 : index
    %c0_1 = arith.constant 0 : index
    %c0_2 = arith.constant 0 : index
    %3 = vector.load %arg3[%c0, %c0_1, %c0_2] : memref<1x128x128xbf16, #tpu.memory_space<vmem>>, vector<1x128x128xbf16>
    %4 = vector.shape_cast %3 : vector<1x128x128xbf16> to vector<128x128xbf16>
    %cst = arith.constant 0.000000e+00 : bf16
    %5 = vector.broadcast %cst : bf16 to vector<128x128xbf16>
    %6 = arith.cmpf oge, %4, %5 : vector<128x128xbf16>
    %cst_3 = arith.constant 2.001950e-01 : bf16
    %7 = vector.broadcast %cst_3 : bf16 to vector<128x128xbf16>
    %8 = arith.mulf %4, %7 : vector<128x128xbf16>
    %9 = arith.select %6, %4, %8 : vector<128x128xi1>, vector<128x128xbf16>
    %c0_4 = arith.constant 0 : index
    %c0_5 = arith.constant 0 : index
    %c0_6 = arith.constant 0 : index
    %10 = vector.load %arg4[%c0_4, %c0_5, %c0_6] : memref<1x128x16xbf16, #tpu.memory_space<vmem>>, vector<1x128x16xbf16>
    %11 = vector.shape_cast %10 : vector<1x128x16xbf16> to vector<128x16xbf16>
    %cst_7 = arith.constant dense<0.000000e+00> : vector<128x16xf32>
    %12 = tpu.matmul %9, %11, %cst_7 {dimension_numbers = #tpu.dot_dimension_numbers<[1], [0], [0], [1], [0, 0, 1, 1], [], []>} : vector<128x128xbf16>, vector<128x16xbf16>, vector<128x16xf32> -> vector<128x16xf32>
    %c0_8 = arith.constant 0 : index
    %c0_9 = arith.constant 0 : index
    %13 = vector.load %arg8[%c0_8, %c0_9] : memref<128x16xf32, #tpu.memory_space<vmem>>, vector<128x16xf32>
    %14 = arith.addf %13, %12 : vector<128x16xf32>
    %c0_10 = arith.constant 0 : index
    %c0_11 = arith.constant 0 : index
    %15 = vector.load %arg8[%c0_10, %c0_11] : memref<128x16xf32, #tpu.memory_space<vmem>>, vector<128x16xf32>
    tpu.vector_store %arg8[%c0_10, %c0_11], %14 {strides = array<i32>} : memref<128x16xf32, #tpu.memory_space<vmem>>, vector<128x16xf32>,
    %c0_i32_12 = arith.constant 0 : i32
    %16 = arith.cmpi eq, %arg2, %c0_i32_12 : i32
    %17 = arith.extui %16 : i1 to i32
    %c0_i32_13 = arith.constant 0 : i32
    %18 = arith.cmpi ne, %17, %c0_i32_13 : i32
    scf.if %18 {
      %c0_14 = arith.constant 0 : index
      %c0_15 = arith.constant 0 : index
      %19 = vector.load %arg8[%c0_14, %c0_15] : memref<128x16xf32, #tpu.memory_space<vmem>>, vector<128x16xf32>
      %cst_16 = arith.constant dense<0.000000e+00> : vector<16xf32>
      %20 = vector.multi_reduction <add>, %19, %cst_16 [0] : vector<128x16xf32> to vector<16xf32>
      %21 = vector.shape_cast %20 : vector<16xf32> to vector<1x16xf32>
      %c0_17 = arith.constant 0 : index
      %c0_18 = arith.constant 0 : index
      %c0_19 = arith.constant 0 : index
      %c0_20 = arith.constant 0 : index
      %22 = vector.load %arg6[%c0_17, %c0_18, %c0_19, %c0_20] : memref<1x1x1x16xf32, #tpu.memory_space<vmem>>, vector<1x1x1x16xf32>
      %23 = vector.shape_cast %22 : vector<1x1x1x16xf32> to vector<1x16xf32>
      %24 = vector.shape_cast %21 : vector<1x16xf32> to vector<1x1x1x16xf32>
      tpu.vector_store %arg6[%c0_17, %c0_18, %c0_19, %c0_20], %24 {strides = array<i32>} : memref<1x1x1x16xf32, #tpu.memory_space<vmem>>, vector<1x1x1x16xf32>,
      %25 = arith.mulf %19, %19 : vector<128x16xf32>
      %cst_21 = arith.constant dense<0.000000e+00> : vector<16xf32>
      %26 = vector.multi_reduction <add>, %25, %cst_21 [0] : vector<128x16xf32> to vector<16xf32>
      %27 = vector.shape_cast %26 : vector<16xf32> to vector<1x16xf32>
      %c0_22 = arith.constant 0 : index
      %c0_23 = arith.constant 0 : index
      %c0_24 = arith.constant 0 : index
      %c0_25 = arith.constant 0 : index
      %28 = vector.load %arg7[%c0_22, %c0_23, %c0_24, %c0_25] : memref<1x1x1x16xf32, #tpu.memory_space<vmem>>, vector<1x1x1x16xf32>
      %29 = vector.shape_cast %28 : vector<1x1x1x16xf32> to vector<1x16xf32>
      %30 = vector.shape_cast %27 : vector<1x16xf32> to vector<1x1x1x16xf32>
      tpu.vector_store %arg7[%c0_22, %c0_23, %c0_24, %c0_25], %30 {strides = array<i32>} : memref<1x1x1x16xf32, #tpu.memory_space<vmem>>, vector<1x1x1x16xf32>,
      %31 = arith.truncf %19 : vector<128x16xf32> to vector<128x16xbf16>
      %c0_26 = arith.constant 0 : index
      %c0_27 = arith.constant 0 : index
      %c0_28 = arith.constant 0 : index
      %32 = vector.load %arg5[%c0_26, %c0_27, %c0_28] : memref<1x128x16xbf16, #tpu.memory_space<vmem>>, vector<1x128x16xbf16>
      %33 = vector.shape_cast %32 : vector<1x128x16xbf16> to vector<128x16xbf16>
      %34 = vector.shape_cast %31 : vector<128x16xbf16> to vector<1x128x16xbf16>
      tpu.vector_store %arg5[%c0_26, %c0_27, %c0_28], %34 {strides = array<i32>} : memref<1x128x16xbf16, #tpu.memory_space<vmem>>, vector<1x128x16xbf16>,
    } else {
    }
    return
  }
  func.func @transform_0(%arg0: i32, %arg1: i32, %arg2: i32) -> (i32, i32, i32) {
    %c0_i32 = arith.constant 0 : i32
    return %arg0, %arg1, %arg2 : i32, i32, i32
  }
  func.func @transform_1(%arg0: i32, %arg1: i32, %arg2: i32) -> (i32, i32, i32) {
    %c0_i32 = arith.constant 0 : i32
    %c0_i32_0 = arith.constant 0 : i32
    return %arg0, %arg2, %c0_i32 : i32, i32, i32
  }
  func.func @transform_2(%arg0: i32, %arg1: i32, %arg2: i32) -> (i32, i32, i32) {
    %c0_i32 = arith.constant 0 : i32
    %c0_i32_0 = arith.constant 0 : i32
    return %arg0, %arg1, %c0_i32 : i32, i32, i32
  }
  func.func @transform_3(%arg0: i32, %arg1: i32, %arg2: i32) -> (i32, i32, i32, i32) {
    %c0_i32 = arith.constant 0 : i32
    %c0_i32_0 = arith.constant 0 : i32
    %c0_i32_1 = arith.constant 0 : i32
    return %arg0, %arg1, %c0_i32, %c0_i32_0 : i32, i32, i32, i32
  }
  func.func @transform_4(%arg0: i32, %arg1: i32, %arg2: i32) -> (i32, i32, i32, i32) {
    %c0_i32 = arith.constant 0 : i32
    %c0_i32_0 = arith.constant 0 : i32
    %c0_i32_1 = arith.constant 0 : i32
    return %arg0, %arg1, %c0_i32, %c0_i32_0 : i32, i32, i32, i32
  }
}

module attributes {stable_mosaic.version = 11 : i64} {
  func.func @kernel(%arg0: i32, %arg1: i32, %arg2: i32, %arg3: memref<1x32x256xbf16, #tpu.memory_space<vmem>>, %arg4: memref<1x256x32xbf16, #tpu.memory_space<vmem>>, %arg5: memref<1x32x32xbf16, #tpu.memory_space<vmem>>, %arg6: memref<1x1x1x32xf32, #tpu.memory_space<vmem>>, %arg7: memref<1x1x1x32xf32, #tpu.memory_space<vmem>>, %arg8: memref<32x32xf32, #tpu.memory_space<vmem>>) attributes {dimension_semantics = [#tpu.dimension_semantics<parallel>, #tpu.dimension_semantics<parallel>, #tpu.dimension_semantics<arbitrary>], iteration_bounds = array<i64: 1, 1, 1>, scalar_prefetch = 0 : i64, scratch_operands = 1 : i64, tpu.core_type = #tpu.core_type<tc>, window_params = [{transform_indices = @transform_0, window_bounds = array<i64: 1, 32, 256>}, {transform_indices = @transform_1, window_bounds = array<i64: 1, 256, 32>}, {transform_indices = @transform_2, window_bounds = array<i64: 1, 32, 32>}, {transform_indices = @transform_3, window_bounds = array<i64: 1, 1, 1, 32>}, {transform_indices = @transform_4, window_bounds = array<i64: 1, 1, 1, 32>}]} {
    %c0_i32 = arith.constant 0 : i32
    %0 = arith.cmpi eq, %arg2, %c0_i32 : i32
    %1 = arith.extui %0 : i1 to i32
    %c0_i32_0 = arith.constant 0 : i32
    %2 = arith.cmpi ne, %1, %c0_i32_0 : i32
    scf.if %2 {
      %cst_14 = arith.constant 0.000000e+00 : f32
      %19 = vector.broadcast %cst_14 : f32 to vector<32x32xf32>
      %c0_15 = arith.constant 0 : index
      %c0_16 = arith.constant 0 : index
      %20 = vector.load %arg8[%c0_15, %c0_16] : memref<32x32xf32, #tpu.memory_space<vmem>>, vector<32x32xf32>
      tpu.vector_store %arg8[%c0_15, %c0_16], %19 {strides = array<i32>} : memref<32x32xf32, #tpu.memory_space<vmem>>, vector<32x32xf32>,
    } else {
    }
    %c0 = arith.constant 0 : index
    %c0_1 = arith.constant 0 : index
    %c0_2 = arith.constant 0 : index
    %3 = vector.load %arg3[%c0, %c0_1, %c0_2] : memref<1x32x256xbf16, #tpu.memory_space<vmem>>, vector<1x32x256xbf16>
    %4 = vector.shape_cast %3 : vector<1x32x256xbf16> to vector<32x256xbf16>
    %cst = arith.constant 0.000000e+00 : bf16
    %5 = vector.broadcast %cst : bf16 to vector<32x256xbf16>
    %6 = arith.cmpf oge, %4, %5 : vector<32x256xbf16>
    %cst_3 = arith.constant 2.001950e-01 : bf16
    %7 = vector.broadcast %cst_3 : bf16 to vector<32x256xbf16>
    %8 = arith.mulf %4, %7 : vector<32x256xbf16>
    %9 = arith.select %6, %4, %8 : vector<32x256xi1>, vector<32x256xbf16>
    %c0_4 = arith.constant 0 : index
    %c0_5 = arith.constant 0 : index
    %c0_6 = arith.constant 0 : index
    %10 = vector.load %arg4[%c0_4, %c0_5, %c0_6] : memref<1x256x32xbf16, #tpu.memory_space<vmem>>, vector<1x256x32xbf16>
    %11 = vector.shape_cast %10 : vector<1x256x32xbf16> to vector<256x32xbf16>
    %cst_7 = arith.constant dense<0.000000e+00> : vector<32x32xf32>
    %12 = tpu.matmul %9, %11, %cst_7 {dimension_numbers = #tpu.dot_dimension_numbers<[1], [0], [0], [1], [0, 0, 1, 1], [], []>} : vector<32x256xbf16>, vector<256x32xbf16>, vector<32x32xf32> -> vector<32x32xf32>
    %c0_8 = arith.constant 0 : index
    %c0_9 = arith.constant 0 : index
    %13 = vector.load %arg8[%c0_8, %c0_9] : memref<32x32xf32, #tpu.memory_space<vmem>>, vector<32x32xf32>
    %14 = arith.addf %13, %12 : vector<32x32xf32>
    %c0_10 = arith.constant 0 : index
    %c0_11 = arith.constant 0 : index
    %15 = vector.load %arg8[%c0_10, %c0_11] : memref<32x32xf32, #tpu.memory_space<vmem>>, vector<32x32xf32>
    tpu.vector_store %arg8[%c0_10, %c0_11], %14 {strides = array<i32>} : memref<32x32xf32, #tpu.memory_space<vmem>>, vector<32x32xf32>,
    %c0_i32_12 = arith.constant 0 : i32
    %16 = arith.cmpi eq, %arg2, %c0_i32_12 : i32
    %17 = arith.extui %16 : i1 to i32
    %c0_i32_13 = arith.constant 0 : i32
    %18 = arith.cmpi ne, %17, %c0_i32_13 : i32
    scf.if %18 {
      %c0_14 = arith.constant 0 : index
      %c0_15 = arith.constant 0 : index
      %19 = vector.load %arg8[%c0_14, %c0_15] : memref<32x32xf32, #tpu.memory_space<vmem>>, vector<32x32xf32>
      %cst_16 = arith.constant dense<0.000000e+00> : vector<32xf32>
      %20 = vector.multi_reduction <add>, %19, %cst_16 [0] : vector<32x32xf32> to vector<32xf32>
      %21 = vector.shape_cast %20 : vector<32xf32> to vector<1x32xf32>
      %c0_17 = arith.constant 0 : index
      %c0_18 = arith.constant 0 : index
      %c0_19 = arith.constant 0 : index
      %c0_20 = arith.constant 0 : index
      %22 = vector.load %arg6[%c0_17, %c0_18, %c0_19, %c0_20] : memref<1x1x1x32xf32, #tpu.memory_space<vmem>>, vector<1x1x1x32xf32>
      %23 = vector.shape_cast %22 : vector<1x1x1x32xf32> to vector<1x32xf32>
      %24 = vector.shape_cast %21 : vector<1x32xf32> to vector<1x1x1x32xf32>
      tpu.vector_store %arg6[%c0_17, %c0_18, %c0_19, %c0_20], %24 {strides = array<i32>} : memref<1x1x1x32xf32, #tpu.memory_space<vmem>>, vector<1x1x1x32xf32>,
      %25 = arith.mulf %19, %19 : vector<32x32xf32>
      %cst_21 = arith.constant dense<0.000000e+00> : vector<32xf32>
      %26 = vector.multi_reduction <add>, %25, %cst_21 [0] : vector<32x32xf32> to vector<32xf32>
      %27 = vector.shape_cast %26 : vector<32xf32> to vector<1x32xf32>
      %c0_22 = arith.constant 0 : index
      %c0_23 = arith.constant 0 : index
      %c0_24 = arith.constant 0 : index
      %c0_25 = arith.constant 0 : index
      %28 = vector.load %arg7[%c0_22, %c0_23, %c0_24, %c0_25] : memref<1x1x1x32xf32, #tpu.memory_space<vmem>>, vector<1x1x1x32xf32>
      %29 = vector.shape_cast %28 : vector<1x1x1x32xf32> to vector<1x32xf32>
      %30 = vector.shape_cast %27 : vector<1x32xf32> to vector<1x1x1x32xf32>
      tpu.vector_store %arg7[%c0_22, %c0_23, %c0_24, %c0_25], %30 {strides = array<i32>} : memref<1x1x1x32xf32, #tpu.memory_space<vmem>>, vector<1x1x1x32xf32>,
      %31 = arith.truncf %19 : vector<32x32xf32> to vector<32x32xbf16>
      %c0_26 = arith.constant 0 : index
      %c0_27 = arith.constant 0 : index
      %c0_28 = arith.constant 0 : index
      %32 = vector.load %arg5[%c0_26, %c0_27, %c0_28] : memref<1x32x32xbf16, #tpu.memory_space<vmem>>, vector<1x32x32xbf16>
      %33 = vector.shape_cast %32 : vector<1x32x32xbf16> to vector<32x32xbf16>
      %34 = vector.shape_cast %31 : vector<32x32xbf16> to vector<1x32x32xbf16>
      tpu.vector_store %arg5[%c0_26, %c0_27, %c0_28], %34 {strides = array<i32>} : memref<1x32x32xbf16, #tpu.memory_space<vmem>>, vector<1x32x32xbf16>,
    } else {
    }
    return
  }
  func.func @transform_0(%arg0: i32, %arg1: i32, %arg2: i32) -> (i32, i32, i32) {
    %c0_i32 = arith.constant 0 : i32
    return %arg0, %arg1, %arg2 : i32, i32, i32
  }
  func.func @transform_1(%arg0: i32, %arg1: i32, %arg2: i32) -> (i32, i32, i32) {
    %c0_i32 = arith.constant 0 : i32
    %c0_i32_0 = arith.constant 0 : i32
    return %arg0, %arg2, %c0_i32 : i32, i32, i32
  }
  func.func @transform_2(%arg0: i32, %arg1: i32, %arg2: i32) -> (i32, i32, i32) {
    %c0_i32 = arith.constant 0 : i32
    %c0_i32_0 = arith.constant 0 : i32
    return %arg0, %arg1, %c0_i32 : i32, i32, i32
  }
  func.func @transform_3(%arg0: i32, %arg1: i32, %arg2: i32) -> (i32, i32, i32, i32) {
    %c0_i32 = arith.constant 0 : i32
    %c0_i32_0 = arith.constant 0 : i32
    %c0_i32_1 = arith.constant 0 : i32
    return %arg0, %arg1, %c0_i32, %c0_i32_0 : i32, i32, i32, i32
  }
  func.func @transform_4(%arg0: i32, %arg1: i32, %arg2: i32) -> (i32, i32, i32, i32) {
    %c0_i32 = arith.constant 0 : i32
    %c0_i32_0 = arith.constant 0 : i32
    %c0_i32_1 = arith.constant 0 : i32
    return %arg0, %arg1, %c0_i32, %c0_i32_0 : i32, i32, i32, i32
  }
}

module attributes {stable_mosaic.version = 11 : i64} {
  func.func @kernel(%arg0: i32, %arg1: i32, %arg2: i32, %arg3: memref<1x8x512xbf16, #tpu.memory_space<vmem>>, %arg4: memref<1x512x64xbf16, #tpu.memory_space<vmem>>, %arg5: memref<1x8x64xbf16, #tpu.memory_space<vmem>>, %arg6: memref<1x1x1x64xf32, #tpu.memory_space<vmem>>, %arg7: memref<1x1x1x64xf32, #tpu.memory_space<vmem>>, %arg8: memref<8x64xf32, #tpu.memory_space<vmem>>) attributes {dimension_semantics = [#tpu.dimension_semantics<parallel>, #tpu.dimension_semantics<parallel>, #tpu.dimension_semantics<arbitrary>], iteration_bounds = array<i64: 1, 1, 1>, scalar_prefetch = 0 : i64, scratch_operands = 1 : i64, tpu.core_type = #tpu.core_type<tc>, window_params = [{transform_indices = @transform_0, window_bounds = array<i64: 1, 8, 512>}, {transform_indices = @transform_1, window_bounds = array<i64: 1, 512, 64>}, {transform_indices = @transform_2, window_bounds = array<i64: 1, 8, 64>}, {transform_indices = @transform_3, window_bounds = array<i64: 1, 1, 1, 64>}, {transform_indices = @transform_4, window_bounds = array<i64: 1, 1, 1, 64>}]} {
    %c0_i32 = arith.constant 0 : i32
    %0 = arith.cmpi eq, %arg2, %c0_i32 : i32
    %1 = arith.extui %0 : i1 to i32
    %c0_i32_0 = arith.constant 0 : i32
    %2 = arith.cmpi ne, %1, %c0_i32_0 : i32
    scf.if %2 {
      %cst_14 = arith.constant 0.000000e+00 : f32
      %19 = vector.broadcast %cst_14 : f32 to vector<8x64xf32>
      %c0_15 = arith.constant 0 : index
      %c0_16 = arith.constant 0 : index
      %20 = vector.load %arg8[%c0_15, %c0_16] : memref<8x64xf32, #tpu.memory_space<vmem>>, vector<8x64xf32>
      tpu.vector_store %arg8[%c0_15, %c0_16], %19 {strides = array<i32>} : memref<8x64xf32, #tpu.memory_space<vmem>>, vector<8x64xf32>,
    } else {
    }
    %c0 = arith.constant 0 : index
    %c0_1 = arith.constant 0 : index
    %c0_2 = arith.constant 0 : index
    %3 = vector.load %arg3[%c0, %c0_1, %c0_2] : memref<1x8x512xbf16, #tpu.memory_space<vmem>>, vector<1x8x512xbf16>
    %4 = vector.shape_cast %3 : vector<1x8x512xbf16> to vector<8x512xbf16>
    %cst = arith.constant 0.000000e+00 : bf16
    %5 = vector.broadcast %cst : bf16 to vector<8x512xbf16>
    %6 = arith.cmpf oge, %4, %5 : vector<8x512xbf16>
    %cst_3 = arith.constant 2.001950e-01 : bf16
    %7 = vector.broadcast %cst_3 : bf16 to vector<8x512xbf16>
    %8 = arith.mulf %4, %7 : vector<8x512xbf16>
    %9 = arith.select %6, %4, %8 : vector<8x512xi1>, vector<8x512xbf16>
    %c0_4 = arith.constant 0 : index
    %c0_5 = arith.constant 0 : index
    %c0_6 = arith.constant 0 : index
    %10 = vector.load %arg4[%c0_4, %c0_5, %c0_6] : memref<1x512x64xbf16, #tpu.memory_space<vmem>>, vector<1x512x64xbf16>
    %11 = vector.shape_cast %10 : vector<1x512x64xbf16> to vector<512x64xbf16>
    %cst_7 = arith.constant dense<0.000000e+00> : vector<8x64xf32>
    %12 = tpu.matmul %9, %11, %cst_7 {dimension_numbers = #tpu.dot_dimension_numbers<[1], [0], [0], [1], [0, 0, 1, 1], [], []>} : vector<8x512xbf16>, vector<512x64xbf16>, vector<8x64xf32> -> vector<8x64xf32>
    %c0_8 = arith.constant 0 : index
    %c0_9 = arith.constant 0 : index
    %13 = vector.load %arg8[%c0_8, %c0_9] : memref<8x64xf32, #tpu.memory_space<vmem>>, vector<8x64xf32>
    %14 = arith.addf %13, %12 : vector<8x64xf32>
    %c0_10 = arith.constant 0 : index
    %c0_11 = arith.constant 0 : index
    %15 = vector.load %arg8[%c0_10, %c0_11] : memref<8x64xf32, #tpu.memory_space<vmem>>, vector<8x64xf32>
    tpu.vector_store %arg8[%c0_10, %c0_11], %14 {strides = array<i32>} : memref<8x64xf32, #tpu.memory_space<vmem>>, vector<8x64xf32>,
    %c0_i32_12 = arith.constant 0 : i32
    %16 = arith.cmpi eq, %arg2, %c0_i32_12 : i32
    %17 = arith.extui %16 : i1 to i32
    %c0_i32_13 = arith.constant 0 : i32
    %18 = arith.cmpi ne, %17, %c0_i32_13 : i32
    scf.if %18 {
      %c0_14 = arith.constant 0 : index
      %c0_15 = arith.constant 0 : index
      %19 = vector.load %arg8[%c0_14, %c0_15] : memref<8x64xf32, #tpu.memory_space<vmem>>, vector<8x64xf32>
      %cst_16 = arith.constant dense<0.000000e+00> : vector<64xf32>
      %20 = vector.multi_reduction <add>, %19, %cst_16 [0] : vector<8x64xf32> to vector<64xf32>
      %21 = vector.shape_cast %20 : vector<64xf32> to vector<1x64xf32>
      %c0_17 = arith.constant 0 : index
      %c0_18 = arith.constant 0 : index
      %c0_19 = arith.constant 0 : index
      %c0_20 = arith.constant 0 : index
      %22 = vector.load %arg6[%c0_17, %c0_18, %c0_19, %c0_20] : memref<1x1x1x64xf32, #tpu.memory_space<vmem>>, vector<1x1x1x64xf32>
      %23 = vector.shape_cast %22 : vector<1x1x1x64xf32> to vector<1x64xf32>
      %24 = vector.shape_cast %21 : vector<1x64xf32> to vector<1x1x1x64xf32>
      tpu.vector_store %arg6[%c0_17, %c0_18, %c0_19, %c0_20], %24 {strides = array<i32>} : memref<1x1x1x64xf32, #tpu.memory_space<vmem>>, vector<1x1x1x64xf32>,
      %25 = arith.mulf %19, %19 : vector<8x64xf32>
      %cst_21 = arith.constant dense<0.000000e+00> : vector<64xf32>
      %26 = vector.multi_reduction <add>, %25, %cst_21 [0] : vector<8x64xf32> to vector<64xf32>
      %27 = vector.shape_cast %26 : vector<64xf32> to vector<1x64xf32>
      %c0_22 = arith.constant 0 : index
      %c0_23 = arith.constant 0 : index
      %c0_24 = arith.constant 0 : index
      %c0_25 = arith.constant 0 : index
      %28 = vector.load %arg7[%c0_22, %c0_23, %c0_24, %c0_25] : memref<1x1x1x64xf32, #tpu.memory_space<vmem>>, vector<1x1x1x64xf32>
      %29 = vector.shape_cast %28 : vector<1x1x1x64xf32> to vector<1x64xf32>
      %30 = vector.shape_cast %27 : vector<1x64xf32> to vector<1x1x1x64xf32>
      tpu.vector_store %arg7[%c0_22, %c0_23, %c0_24, %c0_25], %30 {strides = array<i32>} : memref<1x1x1x64xf32, #tpu.memory_space<vmem>>, vector<1x1x1x64xf32>,
      %31 = arith.truncf %19 : vector<8x64xf32> to vector<8x64xbf16>
      %c0_26 = arith.constant 0 : index
      %c0_27 = arith.constant 0 : index
      %c0_28 = arith.constant 0 : index
      %32 = vector.load %arg5[%c0_26, %c0_27, %c0_28] : memref<1x8x64xbf16, #tpu.memory_space<vmem>>, vector<1x8x64xbf16>
      %33 = vector.shape_cast %32 : vector<1x8x64xbf16> to vector<8x64xbf16>
      %34 = vector.shape_cast %31 : vector<8x64xbf16> to vector<1x8x64xbf16>
      tpu.vector_store %arg5[%c0_26, %c0_27, %c0_28], %34 {strides = array<i32>} : memref<1x8x64xbf16, #tpu.memory_space<vmem>>, vector<1x8x64xbf16>,
    } else {
    }
    return
  }
  func.func @transform_0(%arg0: i32, %arg1: i32, %arg2: i32) -> (i32, i32, i32) {
    %c0_i32 = arith.constant 0 : i32
    return %arg0, %arg1, %arg2 : i32, i32, i32
  }
  func.func @transform_1(%arg0: i32, %arg1: i32, %arg2: i32) -> (i32, i32, i32) {
    %c0_i32 = arith.constant 0 : i32
    %c0_i32_0 = arith.constant 0 : i32
    return %arg0, %arg2, %c0_i32 : i32, i32, i32
  }
  func.func @transform_2(%arg0: i32, %arg1: i32, %arg2: i32) -> (i32, i32, i32) {
    %c0_i32 = arith.constant 0 : i32
    %c0_i32_0 = arith.constant 0 : i32
    return %arg0, %arg1, %c0_i32 : i32, i32, i32
  }
  func.func @transform_3(%arg0: i32, %arg1: i32, %arg2: i32) -> (i32, i32, i32, i32) {
    %c0_i32 = arith.constant 0 : i32
    %c0_i32_0 = arith.constant 0 : i32
    %c0_i32_1 = arith.constant 0 : i32
    return %arg0, %arg1, %c0_i32, %c0_i32_0 : i32, i32, i32, i32
  }
  func.func @transform_4(%arg0: i32, %arg1: i32, %arg2: i32) -> (i32, i32, i32, i32) {
    %c0_i32 = arith.constant 0 : i32
    %c0_i32_0 = arith.constant 0 : i32
    %c0_i32_1 = arith.constant 0 : i32
    return %arg0, %arg1, %c0_i32, %c0_i32_0 : i32, i32, i32, i32
  }
}

module attributes {stable_mosaic.version = 11 : i64} {
  func.func @kernel(%arg0: i32, %arg1: i32, %arg2: i32, %arg3: memref<1x2x1024xbf16, #tpu.memory_space<vmem>>, %arg4: memref<1x1024x64xbf16, #tpu.memory_space<vmem>>, %arg5: memref<1x2x64xbf16, #tpu.memory_space<vmem>>, %arg6: memref<1x1x1x64xf32, #tpu.memory_space<vmem>>, %arg7: memref<1x1x1x64xf32, #tpu.memory_space<vmem>>, %arg8: memref<2x64xf32, #tpu.memory_space<vmem>>) attributes {dimension_semantics = [#tpu.dimension_semantics<parallel>, #tpu.dimension_semantics<parallel>, #tpu.dimension_semantics<arbitrary>], iteration_bounds = array<i64: 1, 1, 1>, scalar_prefetch = 0 : i64, scratch_operands = 1 : i64, tpu.core_type = #tpu.core_type<tc>, window_params = [{transform_indices = @transform_0, window_bounds = array<i64: 1, 2, 1024>}, {transform_indices = @transform_1, window_bounds = array<i64: 1, 1024, 64>}, {transform_indices = @transform_2, window_bounds = array<i64: 1, 2, 64>}, {transform_indices = @transform_3, window_bounds = array<i64: 1, 1, 1, 64>}, {transform_indices = @transform_4, window_bounds = array<i64: 1, 1, 1, 64>}]} {
    %c0_i32 = arith.constant 0 : i32
    %0 = arith.cmpi eq, %arg2, %c0_i32 : i32
    %1 = arith.extui %0 : i1 to i32
    %c0_i32_0 = arith.constant 0 : i32
    %2 = arith.cmpi ne, %1, %c0_i32_0 : i32
    scf.if %2 {
      %cst_14 = arith.constant 0.000000e+00 : f32
      %19 = vector.broadcast %cst_14 : f32 to vector<2x64xf32>
      %c0_15 = arith.constant 0 : index
      %c0_16 = arith.constant 0 : index
      %20 = vector.load %arg8[%c0_15, %c0_16] : memref<2x64xf32, #tpu.memory_space<vmem>>, vector<2x64xf32>
      tpu.vector_store %arg8[%c0_15, %c0_16], %19 {strides = array<i32>} : memref<2x64xf32, #tpu.memory_space<vmem>>, vector<2x64xf32>,
    } else {
    }
    %c0 = arith.constant 0 : index
    %c0_1 = arith.constant 0 : index
    %c0_2 = arith.constant 0 : index
    %3 = vector.load %arg3[%c0, %c0_1, %c0_2] : memref<1x2x1024xbf16, #tpu.memory_space<vmem>>, vector<1x2x1024xbf16>
    %4 = vector.shape_cast %3 : vector<1x2x1024xbf16> to vector<2x1024xbf16>
    %cst = arith.constant 0.000000e+00 : bf16
    %5 = vector.broadcast %cst : bf16 to vector<2x1024xbf16>
    %6 = arith.cmpf oge, %4, %5 : vector<2x1024xbf16>
    %cst_3 = arith.constant 2.001950e-01 : bf16
    %7 = vector.broadcast %cst_3 : bf16 to vector<2x1024xbf16>
    %8 = arith.mulf %4, %7 : vector<2x1024xbf16>
    %9 = arith.select %6, %4, %8 : vector<2x1024xi1>, vector<2x1024xbf16>
    %c0_4 = arith.constant 0 : index
    %c0_5 = arith.constant 0 : index
    %c0_6 = arith.constant 0 : index
    %10 = vector.load %arg4[%c0_4, %c0_5, %c0_6] : memref<1x1024x64xbf16, #tpu.memory_space<vmem>>, vector<1x1024x64xbf16>
    %11 = vector.shape_cast %10 : vector<1x1024x64xbf16> to vector<1024x64xbf16>
    %cst_7 = arith.constant dense<0.000000e+00> : vector<2x64xf32>
    %12 = tpu.matmul %9, %11, %cst_7 {dimension_numbers = #tpu.dot_dimension_numbers<[1], [0], [0], [1], [0, 0, 1, 1], [], []>} : vector<2x1024xbf16>, vector<1024x64xbf16>, vector<2x64xf32> -> vector<2x64xf32>
    %c0_8 = arith.constant 0 : index
    %c0_9 = arith.constant 0 : index
    %13 = vector.load %arg8[%c0_8, %c0_9] : memref<2x64xf32, #tpu.memory_space<vmem>>, vector<2x64xf32>
    %14 = arith.addf %13, %12 : vector<2x64xf32>
    %c0_10 = arith.constant 0 : index
    %c0_11 = arith.constant 0 : index
    %15 = vector.load %arg8[%c0_10, %c0_11] : memref<2x64xf32, #tpu.memory_space<vmem>>, vector<2x64xf32>
    tpu.vector_store %arg8[%c0_10, %c0_11], %14 {strides = array<i32>} : memref<2x64xf32, #tpu.memory_space<vmem>>, vector<2x64xf32>,
    %c0_i32_12 = arith.constant 0 : i32
    %16 = arith.cmpi eq, %arg2, %c0_i32_12 : i32
    %17 = arith.extui %16 : i1 to i32
    %c0_i32_13 = arith.constant 0 : i32
    %18 = arith.cmpi ne, %17, %c0_i32_13 : i32
    scf.if %18 {
      %c0_14 = arith.constant 0 : index
      %c0_15 = arith.constant 0 : index
      %19 = vector.load %arg8[%c0_14, %c0_15] : memref<2x64xf32, #tpu.memory_space<vmem>>, vector<2x64xf32>
      %cst_16 = arith.constant dense<0.000000e+00> : vector<64xf32>
      %20 = vector.multi_reduction <add>, %19, %cst_16 [0] : vector<2x64xf32> to vector<64xf32>
      %21 = vector.shape_cast %20 : vector<64xf32> to vector<1x64xf32>
      %c0_17 = arith.constant 0 : index
      %c0_18 = arith.constant 0 : index
      %c0_19 = arith.constant 0 : index
      %c0_20 = arith.constant 0 : index
      %22 = vector.load %arg6[%c0_17, %c0_18, %c0_19, %c0_20] : memref<1x1x1x64xf32, #tpu.memory_space<vmem>>, vector<1x1x1x64xf32>
      %23 = vector.shape_cast %22 : vector<1x1x1x64xf32> to vector<1x64xf32>
      %24 = vector.shape_cast %21 : vector<1x64xf32> to vector<1x1x1x64xf32>
      tpu.vector_store %arg6[%c0_17, %c0_18, %c0_19, %c0_20], %24 {strides = array<i32>} : memref<1x1x1x64xf32, #tpu.memory_space<vmem>>, vector<1x1x1x64xf32>,
      %25 = arith.mulf %19, %19 : vector<2x64xf32>
      %cst_21 = arith.constant dense<0.000000e+00> : vector<64xf32>
      %26 = vector.multi_reduction <add>, %25, %cst_21 [0] : vector<2x64xf32> to vector<64xf32>
      %27 = vector.shape_cast %26 : vector<64xf32> to vector<1x64xf32>
      %c0_22 = arith.constant 0 : index
      %c0_23 = arith.constant 0 : index
      %c0_24 = arith.constant 0 : index
      %c0_25 = arith.constant 0 : index
      %28 = vector.load %arg7[%c0_22, %c0_23, %c0_24, %c0_25] : memref<1x1x1x64xf32, #tpu.memory_space<vmem>>, vector<1x1x1x64xf32>
      %29 = vector.shape_cast %28 : vector<1x1x1x64xf32> to vector<1x64xf32>
      %30 = vector.shape_cast %27 : vector<1x64xf32> to vector<1x1x1x64xf32>
      tpu.vector_store %arg7[%c0_22, %c0_23, %c0_24, %c0_25], %30 {strides = array<i32>} : memref<1x1x1x64xf32, #tpu.memory_space<vmem>>, vector<1x1x1x64xf32>,
      %31 = arith.truncf %19 : vector<2x64xf32> to vector<2x64xbf16>
      %c0_26 = arith.constant 0 : index
      %c0_27 = arith.constant 0 : index
      %c0_28 = arith.constant 0 : index
      %32 = vector.load %arg5[%c0_26, %c0_27, %c0_28] : memref<1x2x64xbf16, #tpu.memory_space<vmem>>, vector<1x2x64xbf16>
      %33 = vector.shape_cast %32 : vector<1x2x64xbf16> to vector<2x64xbf16>
      %34 = vector.shape_cast %31 : vector<2x64xbf16> to vector<1x2x64xbf16>
      tpu.vector_store %arg5[%c0_26, %c0_27, %c0_28], %34 {strides = array<i32>} : memref<1x2x64xbf16, #tpu.memory_space<vmem>>, vector<1x2x64xbf16>,
    } else {
    }
    return
  }
  func.func @transform_0(%arg0: i32, %arg1: i32, %arg2: i32) -> (i32, i32, i32) {
    %c0_i32 = arith.constant 0 : i32
    return %arg0, %arg1, %arg2 : i32, i32, i32
  }
  func.func @transform_1(%arg0: i32, %arg1: i32, %arg2: i32) -> (i32, i32, i32) {
    %c0_i32 = arith.constant 0 : i32
    %c0_i32_0 = arith.constant 0 : i32
    return %arg0, %arg2, %c0_i32 : i32, i32, i32
  }
  func.func @transform_2(%arg0: i32, %arg1: i32, %arg2: i32) -> (i32, i32, i32) {
    %c0_i32 = arith.constant 0 : i32
    %c0_i32_0 = arith.constant 0 : i32
    return %arg0, %arg1, %c0_i32 : i32, i32, i32
  }
  func.func @transform_3(%arg0: i32, %arg1: i32, %arg2: i32) -> (i32, i32, i32, i32) {
    %c0_i32 = arith.constant 0 : i32
    %c0_i32_0 = arith.constant 0 : i32
    %c0_i32_1 = arith.constant 0 : i32
    return %arg0, %arg1, %c0_i32, %c0_i32_0 : i32, i32, i32, i32
  }
  func.func @transform_4(%arg0: i32, %arg1: i32, %arg2: i32) -> (i32, i32, i32, i32) {
    %c0_i32 = arith.constant 0 : i32
    %c0_i32_0 = arith.constant 0 : i32
    %c0_i32_1 = arith.constant 0 : i32
    return %arg0, %arg1, %c0_i32, %c0_i32_0 : i32, i32, i32, i32
  }
}

module attributes {stable_mosaic.version = 11 : i64} {
  func.func @kernel(%arg0: i32, %arg1: i32, %arg2: i32, %arg3: memref<1x2x256xbf16, #tpu.memory_space<vmem>>, %arg4: memref<1x256x64xbf16, #tpu.memory_space<vmem>>, %arg5: memref<1x2x64xbf16, #tpu.memory_space<vmem>>, %arg6: memref<1x1x1x64xf32, #tpu.memory_space<vmem>>, %arg7: memref<1x1x1x64xf32, #tpu.memory_space<vmem>>, %arg8: memref<2x64xf32, #tpu.memory_space<vmem>>) attributes {dimension_semantics = [#tpu.dimension_semantics<parallel>, #tpu.dimension_semantics<parallel>, #tpu.dimension_semantics<arbitrary>], iteration_bounds = array<i64: 4, 1, 1>, scalar_prefetch = 0 : i64, scratch_operands = 1 : i64, tpu.core_type = #tpu.core_type<tc>, window_params = [{transform_indices = @transform_0, window_bounds = array<i64: 1, 2, 256>}, {transform_indices = @transform_1, window_bounds = array<i64: 1, 256, 64>}, {transform_indices = @transform_2, window_bounds = array<i64: 1, 2, 64>}, {transform_indices = @transform_3, window_bounds = array<i64: 1, 1, 1, 64>}, {transform_indices = @transform_4, window_bounds = array<i64: 1, 1, 1, 64>}]} {
    %c0_i32 = arith.constant 0 : i32
    %0 = arith.cmpi eq, %arg2, %c0_i32 : i32
    %1 = arith.extui %0 : i1 to i32
    %c0_i32_0 = arith.constant 0 : i32
    %2 = arith.cmpi ne, %1, %c0_i32_0 : i32
    scf.if %2 {
      %cst_13 = arith.constant 0.000000e+00 : f32
      %16 = vector.broadcast %cst_13 : f32 to vector<2x64xf32>
      %c0_14 = arith.constant 0 : index
      %c0_15 = arith.constant 0 : index
      %17 = vector.load %arg8[%c0_14, %c0_15] : memref<2x64xf32, #tpu.memory_space<vmem>>, vector<2x64xf32>
      tpu.vector_store %arg8[%c0_14, %c0_15], %16 {strides = array<i32>} : memref<2x64xf32, #tpu.memory_space<vmem>>, vector<2x64xf32>,
    } else {
    }
    %c0 = arith.constant 0 : index
    %c0_1 = arith.constant 0 : index
    %c0_2 = arith.constant 0 : index
    %3 = vector.load %arg3[%c0, %c0_1, %c0_2] : memref<1x2x256xbf16, #tpu.memory_space<vmem>>, vector<1x2x256xbf16>
    %4 = vector.shape_cast %3 : vector<1x2x256xbf16> to vector<2x256xbf16>
    %cst = arith.constant 0.000000e+00 : bf16
    %5 = vector.broadcast %cst : bf16 to vector<2x256xbf16>
    %6 = arith.maximumf %4, %5 : vector<2x256xbf16>
    %c0_3 = arith.constant 0 : index
    %c0_4 = arith.constant 0 : index
    %c0_5 = arith.constant 0 : index
    %7 = vector.load %arg4[%c0_3, %c0_4, %c0_5] : memref<1x256x64xbf16, #tpu.memory_space<vmem>>, vector<1x256x64xbf16>
    %8 = vector.shape_cast %7 : vector<1x256x64xbf16> to vector<256x64xbf16>
    %cst_6 = arith.constant dense<0.000000e+00> : vector<2x64xf32>
    %9 = tpu.matmul %6, %8, %cst_6 {dimension_numbers = #tpu.dot_dimension_numbers<[1], [0], [0], [1], [0, 0, 1, 1], [], []>} : vector<2x256xbf16>, vector<256x64xbf16>, vector<2x64xf32> -> vector<2x64xf32>
    %c0_7 = arith.constant 0 : index
    %c0_8 = arith.constant 0 : index
    %10 = vector.load %arg8[%c0_7, %c0_8] : memref<2x64xf32, #tpu.memory_space<vmem>>, vector<2x64xf32>
    %11 = arith.addf %10, %9 : vector<2x64xf32>
    %c0_9 = arith.constant 0 : index
    %c0_10 = arith.constant 0 : index
    %12 = vector.load %arg8[%c0_9, %c0_10] : memref<2x64xf32, #tpu.memory_space<vmem>>, vector<2x64xf32>
    tpu.vector_store %arg8[%c0_9, %c0_10], %11 {strides = array<i32>} : memref<2x64xf32, #tpu.memory_space<vmem>>, vector<2x64xf32>,
    %c0_i32_11 = arith.constant 0 : i32
    %13 = arith.cmpi eq, %arg2, %c0_i32_11 : i32
    %14 = arith.extui %13 : i1 to i32
    %c0_i32_12 = arith.constant 0 : i32
    %15 = arith.cmpi ne, %14, %c0_i32_12 : i32
    scf.if %15 {
      %c0_13 = arith.constant 0 : index
      %c0_14 = arith.constant 0 : index
      %16 = vector.load %arg8[%c0_13, %c0_14] : memref<2x64xf32, #tpu.memory_space<vmem>>, vector<2x64xf32>
      %cst_15 = arith.constant dense<0.000000e+00> : vector<64xf32>
      %17 = vector.multi_reduction <add>, %16, %cst_15 [0] : vector<2x64xf32> to vector<64xf32>
      %18 = vector.shape_cast %17 : vector<64xf32> to vector<1x64xf32>
      %c0_16 = arith.constant 0 : index
      %c0_17 = arith.constant 0 : index
      %c0_18 = arith.constant 0 : index
      %c0_19 = arith.constant 0 : index
      %19 = vector.load %arg6[%c0_16, %c0_17, %c0_18, %c0_19] : memref<1x1x1x64xf32, #tpu.memory_space<vmem>>, vector<1x1x1x64xf32>
      %20 = vector.shape_cast %19 : vector<1x1x1x64xf32> to vector<1x64xf32>
      %21 = vector.shape_cast %18 : vector<1x64xf32> to vector<1x1x1x64xf32>
      tpu.vector_store %arg6[%c0_16, %c0_17, %c0_18, %c0_19], %21 {strides = array<i32>} : memref<1x1x1x64xf32, #tpu.memory_space<vmem>>, vector<1x1x1x64xf32>,
      %22 = arith.mulf %16, %16 : vector<2x64xf32>
      %cst_20 = arith.constant dense<0.000000e+00> : vector<64xf32>
      %23 = vector.multi_reduction <add>, %22, %cst_20 [0] : vector<2x64xf32> to vector<64xf32>
      %24 = vector.shape_cast %23 : vector<64xf32> to vector<1x64xf32>
      %c0_21 = arith.constant 0 : index
      %c0_22 = arith.constant 0 : index
      %c0_23 = arith.constant 0 : index
      %c0_24 = arith.constant 0 : index
      %25 = vector.load %arg7[%c0_21, %c0_22, %c0_23, %c0_24] : memref<1x1x1x64xf32, #tpu.memory_space<vmem>>, vector<1x1x1x64xf32>
      %26 = vector.shape_cast %25 : vector<1x1x1x64xf32> to vector<1x64xf32>
      %27 = vector.shape_cast %24 : vector<1x64xf32> to vector<1x1x1x64xf32>
      tpu.vector_store %arg7[%c0_21, %c0_22, %c0_23, %c0_24], %27 {strides = array<i32>} : memref<1x1x1x64xf32, #tpu.memory_space<vmem>>, vector<1x1x1x64xf32>,
      %28 = arith.truncf %16 : vector<2x64xf32> to vector<2x64xbf16>
      %c0_25 = arith.constant 0 : index
      %c0_26 = arith.constant 0 : index
      %c0_27 = arith.constant 0 : index
      %29 = vector.load %arg5[%c0_25, %c0_26, %c0_27] : memref<1x2x64xbf16, #tpu.memory_space<vmem>>, vector<1x2x64xbf16>
      %30 = vector.shape_cast %29 : vector<1x2x64xbf16> to vector<2x64xbf16>
      %31 = vector.shape_cast %28 : vector<2x64xbf16> to vector<1x2x64xbf16>
      tpu.vector_store %arg5[%c0_25, %c0_26, %c0_27], %31 {strides = array<i32>} : memref<1x2x64xbf16, #tpu.memory_space<vmem>>, vector<1x2x64xbf16>,
    } else {
    }
    return
  }
  func.func @transform_0(%arg0: i32, %arg1: i32, %arg2: i32) -> (i32, i32, i32) {
    %c0_i32 = arith.constant 0 : i32
    return %arg0, %arg1, %arg2 : i32, i32, i32
  }
  func.func @transform_1(%arg0: i32, %arg1: i32, %arg2: i32) -> (i32, i32, i32) {
    %c0_i32 = arith.constant 0 : i32
    %c0_i32_0 = arith.constant 0 : i32
    return %arg0, %arg2, %c0_i32 : i32, i32, i32
  }
  func.func @transform_2(%arg0: i32, %arg1: i32, %arg2: i32) -> (i32, i32, i32) {
    %c0_i32 = arith.constant 0 : i32
    %c0_i32_0 = arith.constant 0 : i32
    return %arg0, %arg1, %c0_i32 : i32, i32, i32
  }
  func.func @transform_3(%arg0: i32, %arg1: i32, %arg2: i32) -> (i32, i32, i32, i32) {
    %c0_i32 = arith.constant 0 : i32
    %c0_i32_0 = arith.constant 0 : i32
    %c0_i32_1 = arith.constant 0 : i32
    return %arg0, %arg1, %c0_i32, %c0_i32_0 : i32, i32, i32, i32
  }
  func.func @transform_4(%arg0: i32, %arg1: i32, %arg2: i32) -> (i32, i32, i32, i32) {
    %c0_i32 = arith.constant 0 : i32
    %c0_i32_0 = arith.constant 0 : i32
    %c0_i32_1 = arith.constant 0 : i32
    return %arg0, %arg1, %c0_i32, %c0_i32_0 : i32, i32, i32, i32
  }
}

module attributes {stable_mosaic.version = 11 : i64} {
  func.func @kernel(%arg0: i32, %arg1: i32, %arg2: i32, %arg3: memref<1x8x256xbf16, #tpu.memory_space<vmem>>, %arg4: memref<1x8x256xbf16, #tpu.memory_space<vmem>>, %arg5: memref<1x256x32xbf16, #tpu.memory_space<vmem>>, %arg6: memref<1x256x32xbf16, #tpu.memory_space<vmem>>, %arg7: memref<1x8x32xbf16, #tpu.memory_space<vmem>>, %arg8: memref<1x1x1x32xf32, #tpu.memory_space<vmem>>, %arg9: memref<1x1x1x32xf32, #tpu.memory_space<vmem>>, %arg10: memref<8x32xf32, #tpu.memory_space<vmem>>) attributes {dimension_semantics = [#tpu.dimension_semantics<parallel>, #tpu.dimension_semantics<parallel>, #tpu.dimension_semantics<arbitrary>], iteration_bounds = array<i64: 4, 1, 1>, scalar_prefetch = 0 : i64, scratch_operands = 1 : i64, tpu.core_type = #tpu.core_type<tc>, window_params = [{transform_indices = @transform_0, window_bounds = array<i64: 1, 8, 256>}, {transform_indices = @transform_1, window_bounds = array<i64: 1, 8, 256>}, {transform_indices = @transform_2, window_bounds = array<i64: 1, 256, 32>}, {transform_indices = @transform_3, window_bounds = array<i64: 1, 256, 32>}, {transform_indices = @transform_4, window_bounds = array<i64: 1, 8, 32>}, {transform_indices = @transform_5, window_bounds = array<i64: 1, 1, 1, 32>}, {transform_indices = @transform_6, window_bounds = array<i64: 1, 1, 1, 32>}]} {
    %c0_i32 = arith.constant 0 : i32
    %0 = arith.cmpi eq, %arg2, %c0_i32 : i32
    %1 = arith.extui %0 : i1 to i32
    %c0_i32_0 = arith.constant 0 : i32
    %2 = arith.cmpi ne, %1, %c0_i32_0 : i32
    scf.if %2 {
      %cst_21 = arith.constant 0.000000e+00 : f32
      %24 = vector.broadcast %cst_21 : f32 to vector<8x32xf32>
      %c0_22 = arith.constant 0 : index
      %c0_23 = arith.constant 0 : index
      %25 = vector.load %arg10[%c0_22, %c0_23] : memref<8x32xf32, #tpu.memory_space<vmem>>, vector<8x32xf32>
      tpu.vector_store %arg10[%c0_22, %c0_23], %24 {strides = array<i32>} : memref<8x32xf32, #tpu.memory_space<vmem>>, vector<8x32xf32>,
    } else {
    }
    %c0 = arith.constant 0 : index
    %c0_1 = arith.constant 0 : index
    %c0_2 = arith.constant 0 : index
    %3 = vector.load %arg3[%c0, %c0_1, %c0_2] : memref<1x8x256xbf16, #tpu.memory_space<vmem>>, vector<1x8x256xbf16>
    %4 = vector.shape_cast %3 : vector<1x8x256xbf16> to vector<8x256xbf16>
    %cst = arith.constant 0.000000e+00 : bf16
    %5 = vector.broadcast %cst : bf16 to vector<8x256xbf16>
    %6 = arith.maximumf %4, %5 : vector<8x256xbf16>
    %c0_3 = arith.constant 0 : index
    %c0_4 = arith.constant 0 : index
    %c0_5 = arith.constant 0 : index
    %7 = vector.load %arg5[%c0_3, %c0_4, %c0_5] : memref<1x256x32xbf16, #tpu.memory_space<vmem>>, vector<1x256x32xbf16>
    %8 = vector.shape_cast %7 : vector<1x256x32xbf16> to vector<256x32xbf16>
    %cst_6 = arith.constant dense<0.000000e+00> : vector<8x32xf32>
    %9 = tpu.matmul %6, %8, %cst_6 {dimension_numbers = #tpu.dot_dimension_numbers<[1], [0], [0], [1], [0, 0, 1, 1], [], []>} : vector<8x256xbf16>, vector<256x32xbf16>, vector<8x32xf32> -> vector<8x32xf32>
    %c0_7 = arith.constant 0 : index
    %c0_8 = arith.constant 0 : index
    %c0_9 = arith.constant 0 : index
    %10 = vector.load %arg4[%c0_7, %c0_8, %c0_9] : memref<1x8x256xbf16, #tpu.memory_space<vmem>>, vector<1x8x256xbf16>
    %11 = vector.shape_cast %10 : vector<1x8x256xbf16> to vector<8x256xbf16>
    %cst_10 = arith.constant 0.000000e+00 : bf16
    %12 = vector.broadcast %cst_10 : bf16 to vector<8x256xbf16>
    %13 = arith.maximumf %11, %12 : vector<8x256xbf16>
    %c0_11 = arith.constant 0 : index
    %c0_12 = arith.constant 0 : index
    %c0_13 = arith.constant 0 : index
    %14 = vector.load %arg6[%c0_11, %c0_12, %c0_13] : memref<1x256x32xbf16, #tpu.memory_space<vmem>>, vector<1x256x32xbf16>
    %15 = vector.shape_cast %14 : vector<1x256x32xbf16> to vector<256x32xbf16>
    %cst_14 = arith.constant dense<0.000000e+00> : vector<8x32xf32>
    %16 = tpu.matmul %13, %15, %cst_14 {dimension_numbers = #tpu.dot_dimension_numbers<[1], [0], [0], [1], [0, 0, 1, 1], [], []>} : vector<8x256xbf16>, vector<256x32xbf16>, vector<8x32xf32> -> vector<8x32xf32>
    %17 = arith.addf %9, %16 : vector<8x32xf32>
    %c0_15 = arith.constant 0 : index
    %c0_16 = arith.constant 0 : index
    %18 = vector.load %arg10[%c0_15, %c0_16] : memref<8x32xf32, #tpu.memory_space<vmem>>, vector<8x32xf32>
    %19 = arith.addf %18, %17 : vector<8x32xf32>
    %c0_17 = arith.constant 0 : index
    %c0_18 = arith.constant 0 : index
    %20 = vector.load %arg10[%c0_17, %c0_18] : memref<8x32xf32, #tpu.memory_space<vmem>>, vector<8x32xf32>
    tpu.vector_store %arg10[%c0_17, %c0_18], %19 {strides = array<i32>} : memref<8x32xf32, #tpu.memory_space<vmem>>, vector<8x32xf32>,
    %c0_i32_19 = arith.constant 0 : i32
    %21 = arith.cmpi eq, %arg2, %c0_i32_19 : i32
    %22 = arith.extui %21 : i1 to i32
    %c0_i32_20 = arith.constant 0 : i32
    %23 = arith.cmpi ne, %22, %c0_i32_20 : i32
    scf.if %23 {
      %c0_21 = arith.constant 0 : index
      %c0_22 = arith.constant 0 : index
      %24 = vector.load %arg10[%c0_21, %c0_22] : memref<8x32xf32, #tpu.memory_space<vmem>>, vector<8x32xf32>
      %cst_23 = arith.constant dense<0.000000e+00> : vector<32xf32>
      %25 = vector.multi_reduction <add>, %24, %cst_23 [0] : vector<8x32xf32> to vector<32xf32>
      %26 = vector.shape_cast %25 : vector<32xf32> to vector<1x32xf32>
      %c0_24 = arith.constant 0 : index
      %c0_25 = arith.constant 0 : index
      %c0_26 = arith.constant 0 : index
      %c0_27 = arith.constant 0 : index
      %27 = vector.load %arg8[%c0_24, %c0_25, %c0_26, %c0_27] : memref<1x1x1x32xf32, #tpu.memory_space<vmem>>, vector<1x1x1x32xf32>
      %28 = vector.shape_cast %27 : vector<1x1x1x32xf32> to vector<1x32xf32>
      %29 = vector.shape_cast %26 : vector<1x32xf32> to vector<1x1x1x32xf32>
      tpu.vector_store %arg8[%c0_24, %c0_25, %c0_26, %c0_27], %29 {strides = array<i32>} : memref<1x1x1x32xf32, #tpu.memory_space<vmem>>, vector<1x1x1x32xf32>,
      %30 = arith.mulf %24, %24 : vector<8x32xf32>
      %cst_28 = arith.constant dense<0.000000e+00> : vector<32xf32>
      %31 = vector.multi_reduction <add>, %30, %cst_28 [0] : vector<8x32xf32> to vector<32xf32>
      %32 = vector.shape_cast %31 : vector<32xf32> to vector<1x32xf32>
      %c0_29 = arith.constant 0 : index
      %c0_30 = arith.constant 0 : index
      %c0_31 = arith.constant 0 : index
      %c0_32 = arith.constant 0 : index
      %33 = vector.load %arg9[%c0_29, %c0_30, %c0_31, %c0_32] : memref<1x1x1x32xf32, #tpu.memory_space<vmem>>, vector<1x1x1x32xf32>
      %34 = vector.shape_cast %33 : vector<1x1x1x32xf32> to vector<1x32xf32>
      %35 = vector.shape_cast %32 : vector<1x32xf32> to vector<1x1x1x32xf32>
      tpu.vector_store %arg9[%c0_29, %c0_30, %c0_31, %c0_32], %35 {strides = array<i32>} : memref<1x1x1x32xf32, #tpu.memory_space<vmem>>, vector<1x1x1x32xf32>,
      %36 = arith.truncf %24 : vector<8x32xf32> to vector<8x32xbf16>
      %c0_33 = arith.constant 0 : index
      %c0_34 = arith.constant 0 : index
      %c0_35 = arith.constant 0 : index
      %37 = vector.load %arg7[%c0_33, %c0_34, %c0_35] : memref<1x8x32xbf16, #tpu.memory_space<vmem>>, vector<1x8x32xbf16>
      %38 = vector.shape_cast %37 : vector<1x8x32xbf16> to vector<8x32xbf16>
      %39 = vector.shape_cast %36 : vector<8x32xbf16> to vector<1x8x32xbf16>
      tpu.vector_store %arg7[%c0_33, %c0_34, %c0_35], %39 {strides = array<i32>} : memref<1x8x32xbf16, #tpu.memory_space<vmem>>, vector<1x8x32xbf16>,
    } else {
    }
    return
  }
  func.func @transform_0(%arg0: i32, %arg1: i32, %arg2: i32) -> (i32, i32, i32) {
    %c0_i32 = arith.constant 0 : i32
    return %arg0, %arg1, %arg2 : i32, i32, i32
  }
  func.func @transform_1(%arg0: i32, %arg1: i32, %arg2: i32) -> (i32, i32, i32) {
    %c0_i32 = arith.constant 0 : i32
    return %arg0, %arg1, %arg2 : i32, i32, i32
  }
  func.func @transform_2(%arg0: i32, %arg1: i32, %arg2: i32) -> (i32, i32, i32) {
    %c0_i32 = arith.constant 0 : i32
    %c0_i32_0 = arith.constant 0 : i32
    return %arg0, %arg2, %c0_i32 : i32, i32, i32
  }
  func.func @transform_3(%arg0: i32, %arg1: i32, %arg2: i32) -> (i32, i32, i32) {
    %c0_i32 = arith.constant 0 : i32
    %c0_i32_0 = arith.constant 0 : i32
    return %arg0, %arg2, %c0_i32 : i32, i32, i32
  }
  func.func @transform_4(%arg0: i32, %arg1: i32, %arg2: i32) -> (i32, i32, i32) {
    %c0_i32 = arith.constant 0 : i32
    %c0_i32_0 = arith.constant 0 : i32
    return %arg0, %arg1, %c0_i32 : i32, i32, i32
  }
  func.func @transform_5(%arg0: i32, %arg1: i32, %arg2: i32) -> (i32, i32, i32, i32) {
    %c0_i32 = arith.constant 0 : i32
    %c0_i32_0 = arith.constant 0 : i32
    %c0_i32_1 = arith.constant 0 : i32
    return %arg0, %arg1, %c0_i32, %c0_i32_0 : i32, i32, i32, i32
  }
  func.func @transform_6(%arg0: i32, %arg1: i32, %arg2: i32) -> (i32, i32, i32, i32) {
    %c0_i32 = arith.constant 0 : i32
    %c0_i32_0 = arith.constant 0 : i32
    %c0_i32_1 = arith.constant 0 : i32
    return %arg0, %arg1, %c0_i32, %c0_i32_0 : i32, i32, i32, i32
  }
}

module attributes {stable_mosaic.version = 11 : i64} {
  func.func @kernel(%arg0: i32, %arg1: i32, %arg2: i32, %arg3: memref<1x32x128xbf16, #tpu.memory_space<vmem>>, %arg4: memref<1x32x128xbf16, #tpu.memory_space<vmem>>, %arg5: memref<1x128x16xbf16, #tpu.memory_space<vmem>>, %arg6: memref<1x128x16xbf16, #tpu.memory_space<vmem>>, %arg7: memref<1x32x16xbf16, #tpu.memory_space<vmem>>, %arg8: memref<1x1x1x16xf32, #tpu.memory_space<vmem>>, %arg9: memref<1x1x1x16xf32, #tpu.memory_space<vmem>>, %arg10: memref<32x16xf32, #tpu.memory_space<vmem>>) attributes {dimension_semantics = [#tpu.dimension_semantics<parallel>, #tpu.dimension_semantics<parallel>, #tpu.dimension_semantics<arbitrary>], iteration_bounds = array<i64: 4, 1, 1>, scalar_prefetch = 0 : i64, scratch_operands = 1 : i64, tpu.core_type = #tpu.core_type<tc>, window_params = [{transform_indices = @transform_0, window_bounds = array<i64: 1, 32, 128>}, {transform_indices = @transform_1, window_bounds = array<i64: 1, 32, 128>}, {transform_indices = @transform_2, window_bounds = array<i64: 1, 128, 16>}, {transform_indices = @transform_3, window_bounds = array<i64: 1, 128, 16>}, {transform_indices = @transform_4, window_bounds = array<i64: 1, 32, 16>}, {transform_indices = @transform_5, window_bounds = array<i64: 1, 1, 1, 16>}, {transform_indices = @transform_6, window_bounds = array<i64: 1, 1, 1, 16>}]} {
    %c0_i32 = arith.constant 0 : i32
    %0 = arith.cmpi eq, %arg2, %c0_i32 : i32
    %1 = arith.extui %0 : i1 to i32
    %c0_i32_0 = arith.constant 0 : i32
    %2 = arith.cmpi ne, %1, %c0_i32_0 : i32
    scf.if %2 {
      %cst_21 = arith.constant 0.000000e+00 : f32
      %24 = vector.broadcast %cst_21 : f32 to vector<32x16xf32>
      %c0_22 = arith.constant 0 : index
      %c0_23 = arith.constant 0 : index
      %25 = vector.load %arg10[%c0_22, %c0_23] : memref<32x16xf32, #tpu.memory_space<vmem>>, vector<32x16xf32>
      tpu.vector_store %arg10[%c0_22, %c0_23], %24 {strides = array<i32>} : memref<32x16xf32, #tpu.memory_space<vmem>>, vector<32x16xf32>,
    } else {
    }
    %c0 = arith.constant 0 : index
    %c0_1 = arith.constant 0 : index
    %c0_2 = arith.constant 0 : index
    %3 = vector.load %arg3[%c0, %c0_1, %c0_2] : memref<1x32x128xbf16, #tpu.memory_space<vmem>>, vector<1x32x128xbf16>
    %4 = vector.shape_cast %3 : vector<1x32x128xbf16> to vector<32x128xbf16>
    %cst = arith.constant 0.000000e+00 : bf16
    %5 = vector.broadcast %cst : bf16 to vector<32x128xbf16>
    %6 = arith.maximumf %4, %5 : vector<32x128xbf16>
    %c0_3 = arith.constant 0 : index
    %c0_4 = arith.constant 0 : index
    %c0_5 = arith.constant 0 : index
    %7 = vector.load %arg5[%c0_3, %c0_4, %c0_5] : memref<1x128x16xbf16, #tpu.memory_space<vmem>>, vector<1x128x16xbf16>
    %8 = vector.shape_cast %7 : vector<1x128x16xbf16> to vector<128x16xbf16>
    %cst_6 = arith.constant dense<0.000000e+00> : vector<32x16xf32>
    %9 = tpu.matmul %6, %8, %cst_6 {dimension_numbers = #tpu.dot_dimension_numbers<[1], [0], [0], [1], [0, 0, 1, 1], [], []>} : vector<32x128xbf16>, vector<128x16xbf16>, vector<32x16xf32> -> vector<32x16xf32>
    %c0_7 = arith.constant 0 : index
    %c0_8 = arith.constant 0 : index
    %c0_9 = arith.constant 0 : index
    %10 = vector.load %arg4[%c0_7, %c0_8, %c0_9] : memref<1x32x128xbf16, #tpu.memory_space<vmem>>, vector<1x32x128xbf16>
    %11 = vector.shape_cast %10 : vector<1x32x128xbf16> to vector<32x128xbf16>
    %cst_10 = arith.constant 0.000000e+00 : bf16
    %12 = vector.broadcast %cst_10 : bf16 to vector<32x128xbf16>
    %13 = arith.maximumf %11, %12 : vector<32x128xbf16>
    %c0_11 = arith.constant 0 : index
    %c0_12 = arith.constant 0 : index
    %c0_13 = arith.constant 0 : index
    %14 = vector.load %arg6[%c0_11, %c0_12, %c0_13] : memref<1x128x16xbf16, #tpu.memory_space<vmem>>, vector<1x128x16xbf16>
    %15 = vector.shape_cast %14 : vector<1x128x16xbf16> to vector<128x16xbf16>
    %cst_14 = arith.constant dense<0.000000e+00> : vector<32x16xf32>
    %16 = tpu.matmul %13, %15, %cst_14 {dimension_numbers = #tpu.dot_dimension_numbers<[1], [0], [0], [1], [0, 0, 1, 1], [], []>} : vector<32x128xbf16>, vector<128x16xbf16>, vector<32x16xf32> -> vector<32x16xf32>
    %17 = arith.addf %9, %16 : vector<32x16xf32>
    %c0_15 = arith.constant 0 : index
    %c0_16 = arith.constant 0 : index
    %18 = vector.load %arg10[%c0_15, %c0_16] : memref<32x16xf32, #tpu.memory_space<vmem>>, vector<32x16xf32>
    %19 = arith.addf %18, %17 : vector<32x16xf32>
    %c0_17 = arith.constant 0 : index
    %c0_18 = arith.constant 0 : index
    %20 = vector.load %arg10[%c0_17, %c0_18] : memref<32x16xf32, #tpu.memory_space<vmem>>, vector<32x16xf32>
    tpu.vector_store %arg10[%c0_17, %c0_18], %19 {strides = array<i32>} : memref<32x16xf32, #tpu.memory_space<vmem>>, vector<32x16xf32>,
    %c0_i32_19 = arith.constant 0 : i32
    %21 = arith.cmpi eq, %arg2, %c0_i32_19 : i32
    %22 = arith.extui %21 : i1 to i32
    %c0_i32_20 = arith.constant 0 : i32
    %23 = arith.cmpi ne, %22, %c0_i32_20 : i32
    scf.if %23 {
      %c0_21 = arith.constant 0 : index
      %c0_22 = arith.constant 0 : index
      %24 = vector.load %arg10[%c0_21, %c0_22] : memref<32x16xf32, #tpu.memory_space<vmem>>, vector<32x16xf32>
      %cst_23 = arith.constant dense<0.000000e+00> : vector<16xf32>
      %25 = vector.multi_reduction <add>, %24, %cst_23 [0] : vector<32x16xf32> to vector<16xf32>
      %26 = vector.shape_cast %25 : vector<16xf32> to vector<1x16xf32>
      %c0_24 = arith.constant 0 : index
      %c0_25 = arith.constant 0 : index
      %c0_26 = arith.constant 0 : index
      %c0_27 = arith.constant 0 : index
      %27 = vector.load %arg8[%c0_24, %c0_25, %c0_26, %c0_27] : memref<1x1x1x16xf32, #tpu.memory_space<vmem>>, vector<1x1x1x16xf32>
      %28 = vector.shape_cast %27 : vector<1x1x1x16xf32> to vector<1x16xf32>
      %29 = vector.shape_cast %26 : vector<1x16xf32> to vector<1x1x1x16xf32>
      tpu.vector_store %arg8[%c0_24, %c0_25, %c0_26, %c0_27], %29 {strides = array<i32>} : memref<1x1x1x16xf32, #tpu.memory_space<vmem>>, vector<1x1x1x16xf32>,
      %30 = arith.mulf %24, %24 : vector<32x16xf32>
      %cst_28 = arith.constant dense<0.000000e+00> : vector<16xf32>
      %31 = vector.multi_reduction <add>, %30, %cst_28 [0] : vector<32x16xf32> to vector<16xf32>
      %32 = vector.shape_cast %31 : vector<16xf32> to vector<1x16xf32>
      %c0_29 = arith.constant 0 : index
      %c0_30 = arith.constant 0 : index
      %c0_31 = arith.constant 0 : index
      %c0_32 = arith.constant 0 : index
      %33 = vector.load %arg9[%c0_29, %c0_30, %c0_31, %c0_32] : memref<1x1x1x16xf32, #tpu.memory_space<vmem>>, vector<1x1x1x16xf32>
      %34 = vector.shape_cast %33 : vector<1x1x1x16xf32> to vector<1x16xf32>
      %35 = vector.shape_cast %32 : vector<1x16xf32> to vector<1x1x1x16xf32>
      tpu.vector_store %arg9[%c0_29, %c0_30, %c0_31, %c0_32], %35 {strides = array<i32>} : memref<1x1x1x16xf32, #tpu.memory_space<vmem>>, vector<1x1x1x16xf32>,
      %36 = arith.truncf %24 : vector<32x16xf32> to vector<32x16xbf16>
      %c0_33 = arith.constant 0 : index
      %c0_34 = arith.constant 0 : index
      %c0_35 = arith.constant 0 : index
      %37 = vector.load %arg7[%c0_33, %c0_34, %c0_35] : memref<1x32x16xbf16, #tpu.memory_space<vmem>>, vector<1x32x16xbf16>
      %38 = vector.shape_cast %37 : vector<1x32x16xbf16> to vector<32x16xbf16>
      %39 = vector.shape_cast %36 : vector<32x16xbf16> to vector<1x32x16xbf16>
      tpu.vector_store %arg7[%c0_33, %c0_34, %c0_35], %39 {strides = array<i32>} : memref<1x32x16xbf16, #tpu.memory_space<vmem>>, vector<1x32x16xbf16>,
    } else {
    }
    return
  }
  func.func @transform_0(%arg0: i32, %arg1: i32, %arg2: i32) -> (i32, i32, i32) {
    %c0_i32 = arith.constant 0 : i32
    return %arg0, %arg1, %arg2 : i32, i32, i32
  }
  func.func @transform_1(%arg0: i32, %arg1: i32, %arg2: i32) -> (i32, i32, i32) {
    %c0_i32 = arith.constant 0 : i32
    return %arg0, %arg1, %arg2 : i32, i32, i32
  }
  func.func @transform_2(%arg0: i32, %arg1: i32, %arg2: i32) -> (i32, i32, i32) {
    %c0_i32 = arith.constant 0 : i32
    %c0_i32_0 = arith.constant 0 : i32
    return %arg0, %arg2, %c0_i32 : i32, i32, i32
  }
  func.func @transform_3(%arg0: i32, %arg1: i32, %arg2: i32) -> (i32, i32, i32) {
    %c0_i32 = arith.constant 0 : i32
    %c0_i32_0 = arith.constant 0 : i32
    return %arg0, %arg2, %c0_i32 : i32, i32, i32
  }
  func.func @transform_4(%arg0: i32, %arg1: i32, %arg2: i32) -> (i32, i32, i32) {
    %c0_i32 = arith.constant 0 : i32
    %c0_i32_0 = arith.constant 0 : i32
    return %arg0, %arg1, %c0_i32 : i32, i32, i32
  }
  func.func @transform_5(%arg0: i32, %arg1: i32, %arg2: i32) -> (i32, i32, i32, i32) {
    %c0_i32 = arith.constant 0 : i32
    %c0_i32_0 = arith.constant 0 : i32
    %c0_i32_1 = arith.constant 0 : i32
    return %arg0, %arg1, %c0_i32, %c0_i32_0 : i32, i32, i32, i32
  }
  func.func @transform_6(%arg0: i32, %arg1: i32, %arg2: i32) -> (i32, i32, i32, i32) {
    %c0_i32 = arith.constant 0 : i32
    %c0_i32_0 = arith.constant 0 : i32
    %c0_i32_1 = arith.constant 0 : i32
    return %arg0, %arg1, %c0_i32, %c0_i32_0 : i32, i32, i32, i32
  }
}

module attributes {stable_mosaic.version = 11 : i64} {
  func.func @kernel(%arg0: i32, %arg1: i32, %arg2: i32, %arg3: memref<1x128x64xbf16, #tpu.memory_space<vmem>>, %arg4: memref<1x128x64xbf16, #tpu.memory_space<vmem>>, %arg5: memref<1x64x8xbf16, #tpu.memory_space<vmem>>, %arg6: memref<1x64x8xbf16, #tpu.memory_space<vmem>>, %arg7: memref<1x128x8xbf16, #tpu.memory_space<vmem>>, %arg8: memref<1x1x1x8xf32, #tpu.memory_space<vmem>>, %arg9: memref<1x1x1x8xf32, #tpu.memory_space<vmem>>, %arg10: memref<128x8xf32, #tpu.memory_space<vmem>>) attributes {dimension_semantics = [#tpu.dimension_semantics<parallel>, #tpu.dimension_semantics<parallel>, #tpu.dimension_semantics<arbitrary>], iteration_bounds = array<i64: 4, 1, 1>, scalar_prefetch = 0 : i64, scratch_operands = 1 : i64, tpu.core_type = #tpu.core_type<tc>, window_params = [{transform_indices = @transform_0, window_bounds = array<i64: 1, 128, 64>}, {transform_indices = @transform_1, window_bounds = array<i64: 1, 128, 64>}, {transform_indices = @transform_2, window_bounds = array<i64: 1, 64, 8>}, {transform_indices = @transform_3, window_bounds = array<i64: 1, 64, 8>}, {transform_indices = @transform_4, window_bounds = array<i64: 1, 128, 8>}, {transform_indices = @transform_5, window_bounds = array<i64: 1, 1, 1, 8>}, {transform_indices = @transform_6, window_bounds = array<i64: 1, 1, 1, 8>}]} {
    %c0_i32 = arith.constant 0 : i32
    %0 = arith.cmpi eq, %arg2, %c0_i32 : i32
    %1 = arith.extui %0 : i1 to i32
    %c0_i32_0 = arith.constant 0 : i32
    %2 = arith.cmpi ne, %1, %c0_i32_0 : i32
    scf.if %2 {
      %cst_21 = arith.constant 0.000000e+00 : f32
      %24 = vector.broadcast %cst_21 : f32 to vector<128x8xf32>
      %c0_22 = arith.constant 0 : index
      %c0_23 = arith.constant 0 : index
      %25 = vector.load %arg10[%c0_22, %c0_23] : memref<128x8xf32, #tpu.memory_space<vmem>>, vector<128x8xf32>
      tpu.vector_store %arg10[%c0_22, %c0_23], %24 {strides = array<i32>} : memref<128x8xf32, #tpu.memory_space<vmem>>, vector<128x8xf32>,
    } else {
    }
    %c0 = arith.constant 0 : index
    %c0_1 = arith.constant 0 : index
    %c0_2 = arith.constant 0 : index
    %3 = vector.load %arg3[%c0, %c0_1, %c0_2] : memref<1x128x64xbf16, #tpu.memory_space<vmem>>, vector<1x128x64xbf16>
    %4 = vector.shape_cast %3 : vector<1x128x64xbf16> to vector<128x64xbf16>
    %cst = arith.constant 0.000000e+00 : bf16
    %5 = vector.broadcast %cst : bf16 to vector<128x64xbf16>
    %6 = arith.maximumf %4, %5 : vector<128x64xbf16>
    %c0_3 = arith.constant 0 : index
    %c0_4 = arith.constant 0 : index
    %c0_5 = arith.constant 0 : index
    %7 = vector.load %arg5[%c0_3, %c0_4, %c0_5] : memref<1x64x8xbf16, #tpu.memory_space<vmem>>, vector<1x64x8xbf16>
    %8 = vector.shape_cast %7 : vector<1x64x8xbf16> to vector<64x8xbf16>
    %cst_6 = arith.constant dense<0.000000e+00> : vector<128x8xf32>
    %9 = tpu.matmul %6, %8, %cst_6 {dimension_numbers = #tpu.dot_dimension_numbers<[1], [0], [0], [1], [0, 0, 1, 1], [], []>} : vector<128x64xbf16>, vector<64x8xbf16>, vector<128x8xf32> -> vector<128x8xf32>
    %c0_7 = arith.constant 0 : index
    %c0_8 = arith.constant 0 : index
    %c0_9 = arith.constant 0 : index
    %10 = vector.load %arg4[%c0_7, %c0_8, %c0_9] : memref<1x128x64xbf16, #tpu.memory_space<vmem>>, vector<1x128x64xbf16>
    %11 = vector.shape_cast %10 : vector<1x128x64xbf16> to vector<128x64xbf16>
    %cst_10 = arith.constant 0.000000e+00 : bf16
    %12 = vector.broadcast %cst_10 : bf16 to vector<128x64xbf16>
    %13 = arith.maximumf %11, %12 : vector<128x64xbf16>
    %c0_11 = arith.constant 0 : index
    %c0_12 = arith.constant 0 : index
    %c0_13 = arith.constant 0 : index
    %14 = vector.load %arg6[%c0_11, %c0_12, %c0_13] : memref<1x64x8xbf16, #tpu.memory_space<vmem>>, vector<1x64x8xbf16>
    %15 = vector.shape_cast %14 : vector<1x64x8xbf16> to vector<64x8xbf16>
    %cst_14 = arith.constant dense<0.000000e+00> : vector<128x8xf32>
    %16 = tpu.matmul %13, %15, %cst_14 {dimension_numbers = #tpu.dot_dimension_numbers<[1], [0], [0], [1], [0, 0, 1, 1], [], []>} : vector<128x64xbf16>, vector<64x8xbf16>, vector<128x8xf32> -> vector<128x8xf32>
    %17 = arith.addf %9, %16 : vector<128x8xf32>
    %c0_15 = arith.constant 0 : index
    %c0_16 = arith.constant 0 : index
    %18 = vector.load %arg10[%c0_15, %c0_16] : memref<128x8xf32, #tpu.memory_space<vmem>>, vector<128x8xf32>
    %19 = arith.addf %18, %17 : vector<128x8xf32>
    %c0_17 = arith.constant 0 : index
    %c0_18 = arith.constant 0 : index
    %20 = vector.load %arg10[%c0_17, %c0_18] : memref<128x8xf32, #tpu.memory_space<vmem>>, vector<128x8xf32>
    tpu.vector_store %arg10[%c0_17, %c0_18], %19 {strides = array<i32>} : memref<128x8xf32, #tpu.memory_space<vmem>>, vector<128x8xf32>,
    %c0_i32_19 = arith.constant 0 : i32
    %21 = arith.cmpi eq, %arg2, %c0_i32_19 : i32
    %22 = arith.extui %21 : i1 to i32
    %c0_i32_20 = arith.constant 0 : i32
    %23 = arith.cmpi ne, %22, %c0_i32_20 : i32
    scf.if %23 {
      %c0_21 = arith.constant 0 : index
      %c0_22 = arith.constant 0 : index
      %24 = vector.load %arg10[%c0_21, %c0_22] : memref<128x8xf32, #tpu.memory_space<vmem>>, vector<128x8xf32>
      %cst_23 = arith.constant dense<0.000000e+00> : vector<8xf32>
      %25 = vector.multi_reduction <add>, %24, %cst_23 [0] : vector<128x8xf32> to vector<8xf32>
      %26 = vector.shape_cast %25 : vector<8xf32> to vector<1x8xf32>
      %c0_24 = arith.constant 0 : index
      %c0_25 = arith.constant 0 : index
      %c0_26 = arith.constant 0 : index
      %c0_27 = arith.constant 0 : index
      %27 = vector.load %arg8[%c0_24, %c0_25, %c0_26, %c0_27] : memref<1x1x1x8xf32, #tpu.memory_space<vmem>>, vector<1x1x1x8xf32>
      %28 = vector.shape_cast %27 : vector<1x1x1x8xf32> to vector<1x8xf32>
      %29 = vector.shape_cast %26 : vector<1x8xf32> to vector<1x1x1x8xf32>
      tpu.vector_store %arg8[%c0_24, %c0_25, %c0_26, %c0_27], %29 {strides = array<i32>} : memref<1x1x1x8xf32, #tpu.memory_space<vmem>>, vector<1x1x1x8xf32>,
      %30 = arith.mulf %24, %24 : vector<128x8xf32>
      %cst_28 = arith.constant dense<0.000000e+00> : vector<8xf32>
      %31 = vector.multi_reduction <add>, %30, %cst_28 [0] : vector<128x8xf32> to vector<8xf32>
      %32 = vector.shape_cast %31 : vector<8xf32> to vector<1x8xf32>
      %c0_29 = arith.constant 0 : index
      %c0_30 = arith.constant 0 : index
      %c0_31 = arith.constant 0 : index
      %c0_32 = arith.constant 0 : index
      %33 = vector.load %arg9[%c0_29, %c0_30, %c0_31, %c0_32] : memref<1x1x1x8xf32, #tpu.memory_space<vmem>>, vector<1x1x1x8xf32>
      %34 = vector.shape_cast %33 : vector<1x1x1x8xf32> to vector<1x8xf32>
      %35 = vector.shape_cast %32 : vector<1x8xf32> to vector<1x1x1x8xf32>
      tpu.vector_store %arg9[%c0_29, %c0_30, %c0_31, %c0_32], %35 {strides = array<i32>} : memref<1x1x1x8xf32, #tpu.memory_space<vmem>>, vector<1x1x1x8xf32>,
      %36 = arith.truncf %24 : vector<128x8xf32> to vector<128x8xbf16>
      %c0_33 = arith.constant 0 : index
      %c0_34 = arith.constant 0 : index
      %c0_35 = arith.constant 0 : index
      %37 = vector.load %arg7[%c0_33, %c0_34, %c0_35] : memref<1x128x8xbf16, #tpu.memory_space<vmem>>, vector<1x128x8xbf16>
      %38 = vector.shape_cast %37 : vector<1x128x8xbf16> to vector<128x8xbf16>
      %39 = vector.shape_cast %36 : vector<128x8xbf16> to vector<1x128x8xbf16>
      tpu.vector_store %arg7[%c0_33, %c0_34, %c0_35], %39 {strides = array<i32>} : memref<1x128x8xbf16, #tpu.memory_space<vmem>>, vector<1x128x8xbf16>,
    } else {
    }
    return
  }
  func.func @transform_0(%arg0: i32, %arg1: i32, %arg2: i32) -> (i32, i32, i32) {
    %c0_i32 = arith.constant 0 : i32
    return %arg0, %arg1, %arg2 : i32, i32, i32
  }
  func.func @transform_1(%arg0: i32, %arg1: i32, %arg2: i32) -> (i32, i32, i32) {
    %c0_i32 = arith.constant 0 : i32
    return %arg0, %arg1, %arg2 : i32, i32, i32
  }
  func.func @transform_2(%arg0: i32, %arg1: i32, %arg2: i32) -> (i32, i32, i32) {
    %c0_i32 = arith.constant 0 : i32
    %c0_i32_0 = arith.constant 0 : i32
    return %arg0, %arg2, %c0_i32 : i32, i32, i32
  }
  func.func @transform_3(%arg0: i32, %arg1: i32, %arg2: i32) -> (i32, i32, i32) {
    %c0_i32 = arith.constant 0 : i32
    %c0_i32_0 = arith.constant 0 : i32
    return %arg0, %arg2, %c0_i32 : i32, i32, i32
  }
  func.func @transform_4(%arg0: i32, %arg1: i32, %arg2: i32) -> (i32, i32, i32) {
    %c0_i32 = arith.constant 0 : i32
    %c0_i32_0 = arith.constant 0 : i32
    return %arg0, %arg1, %c0_i32 : i32, i32, i32
  }
  func.func @transform_5(%arg0: i32, %arg1: i32, %arg2: i32) -> (i32, i32, i32, i32) {
    %c0_i32 = arith.constant 0 : i32
    %c0_i32_0 = arith.constant 0 : i32
    %c0_i32_1 = arith.constant 0 : i32
    return %arg0, %arg1, %c0_i32, %c0_i32_0 : i32, i32, i32, i32
  }
  func.func @transform_6(%arg0: i32, %arg1: i32, %arg2: i32) -> (i32, i32, i32, i32) {
    %c0_i32 = arith.constant 0 : i32
    %c0_i32_0 = arith.constant 0 : i32
    %c0_i32_1 = arith.constant 0 : i32
    return %arg0, %arg1, %c0_i32, %c0_i32_0 : i32, i32, i32, i32
  }
}

module attributes {stable_mosaic.version = 11 : i64} {
  func.func @kernel(%arg0: i32, %arg1: i32, %arg2: i32, %arg3: memref<1x512x32xbf16, #tpu.memory_space<vmem>>, %arg4: memref<1x512x32xbf16, #tpu.memory_space<vmem>>, %arg5: memref<1x32x3xbf16, #tpu.memory_space<vmem>>, %arg6: memref<1x32x3xbf16, #tpu.memory_space<vmem>>, %arg7: memref<1x3xf32, #tpu.memory_space<vmem>>, %arg8: memref<1x512x3xf32, #tpu.memory_space<vmem>>, %arg9: memref<1x1x1x3xf32, #tpu.memory_space<vmem>>, %arg10: memref<1x1x1x3xf32, #tpu.memory_space<vmem>>, %arg11: memref<512x3xf32, #tpu.memory_space<vmem>>) attributes {dimension_semantics = [#tpu.dimension_semantics<parallel>, #tpu.dimension_semantics<parallel>, #tpu.dimension_semantics<arbitrary>], iteration_bounds = array<i64: 4, 1, 1>, scalar_prefetch = 0 : i64, scratch_operands = 1 : i64, tpu.core_type = #tpu.core_type<tc>, window_params = [{transform_indices = @transform_0, window_bounds = array<i64: 1, 512, 32>}, {transform_indices = @transform_1, window_bounds = array<i64: 1, 512, 32>}, {transform_indices = @transform_2, window_bounds = array<i64: 1, 32, 3>}, {transform_indices = @transform_3, window_bounds = array<i64: 1, 32, 3>}, {pipeline_mode = #tpu.pipeline_mode<synchronous>, transform_indices = @transform_4, window_bounds = array<i64: 1, 3>}, {transform_indices = @transform_5, window_bounds = array<i64: 1, 512, 3>}, {transform_indices = @transform_6, window_bounds = array<i64: 1, 1, 1, 3>}, {transform_indices = @transform_7, window_bounds = array<i64: 1, 1, 1, 3>}]} {
    %c0_i32 = arith.constant 0 : i32
    %0 = arith.cmpi eq, %arg2, %c0_i32 : i32
    %1 = arith.extui %0 : i1 to i32
    %c0_i32_0 = arith.constant 0 : i32
    %2 = arith.cmpi ne, %1, %c0_i32_0 : i32
    scf.if %2 {
      %cst_21 = arith.constant 0.000000e+00 : f32
      %24 = vector.broadcast %cst_21 : f32 to vector<512x3xf32>
      %c0_22 = arith.constant 0 : index
      %c0_23 = arith.constant 0 : index
      %25 = vector.load %arg11[%c0_22, %c0_23] : memref<512x3xf32, #tpu.memory_space<vmem>>, vector<512x3xf32>
      tpu.vector_store %arg11[%c0_22, %c0_23], %24 {strides = array<i32>} : memref<512x3xf32, #tpu.memory_space<vmem>>, vector<512x3xf32>,
    } else {
    }
    %c0 = arith.constant 0 : index
    %c0_1 = arith.constant 0 : index
    %c0_2 = arith.constant 0 : index
    %3 = vector.load %arg3[%c0, %c0_1, %c0_2] : memref<1x512x32xbf16, #tpu.memory_space<vmem>>, vector<1x512x32xbf16>
    %4 = vector.shape_cast %3 : vector<1x512x32xbf16> to vector<512x32xbf16>
    %cst = arith.constant 0.000000e+00 : bf16
    %5 = vector.broadcast %cst : bf16 to vector<512x32xbf16>
    %6 = arith.maximumf %4, %5 : vector<512x32xbf16>
    %c0_3 = arith.constant 0 : index
    %c0_4 = arith.constant 0 : index
    %c0_5 = arith.constant 0 : index
    %7 = vector.load %arg5[%c0_3, %c0_4, %c0_5] : memref<1x32x3xbf16, #tpu.memory_space<vmem>>, vector<1x32x3xbf16>
    %8 = vector.shape_cast %7 : vector<1x32x3xbf16> to vector<32x3xbf16>
    %cst_6 = arith.constant dense<0.000000e+00> : vector<512x3xf32>
    %9 = tpu.matmul %6, %8, %cst_6 {dimension_numbers = #tpu.dot_dimension_numbers<[1], [0], [0], [1], [0, 0, 1, 1], [], []>} : vector<512x32xbf16>, vector<32x3xbf16>, vector<512x3xf32> -> vector<512x3xf32>
    %c0_7 = arith.constant 0 : index
    %c0_8 = arith.constant 0 : index
    %c0_9 = arith.constant 0 : index
    %10 = vector.load %arg4[%c0_7, %c0_8, %c0_9] : memref<1x512x32xbf16, #tpu.memory_space<vmem>>, vector<1x512x32xbf16>
    %11 = vector.shape_cast %10 : vector<1x512x32xbf16> to vector<512x32xbf16>
    %cst_10 = arith.constant 0.000000e+00 : bf16
    %12 = vector.broadcast %cst_10 : bf16 to vector<512x32xbf16>
    %13 = arith.maximumf %11, %12 : vector<512x32xbf16>
    %c0_11 = arith.constant 0 : index
    %c0_12 = arith.constant 0 : index
    %c0_13 = arith.constant 0 : index
    %14 = vector.load %arg6[%c0_11, %c0_12, %c0_13] : memref<1x32x3xbf16, #tpu.memory_space<vmem>>, vector<1x32x3xbf16>
    %15 = vector.shape_cast %14 : vector<1x32x3xbf16> to vector<32x3xbf16>
    %cst_14 = arith.constant dense<0.000000e+00> : vector<512x3xf32>
    %16 = tpu.matmul %13, %15, %cst_14 {dimension_numbers = #tpu.dot_dimension_numbers<[1], [0], [0], [1], [0, 0, 1, 1], [], []>} : vector<512x32xbf16>, vector<32x3xbf16>, vector<512x3xf32> -> vector<512x3xf32>
    %17 = arith.addf %9, %16 : vector<512x3xf32>
    %c0_15 = arith.constant 0 : index
    %c0_16 = arith.constant 0 : index
    %18 = vector.load %arg11[%c0_15, %c0_16] : memref<512x3xf32, #tpu.memory_space<vmem>>, vector<512x3xf32>
    %19 = arith.addf %18, %17 : vector<512x3xf32>
    %c0_17 = arith.constant 0 : index
    %c0_18 = arith.constant 0 : index
    %20 = vector.load %arg11[%c0_17, %c0_18] : memref<512x3xf32, #tpu.memory_space<vmem>>, vector<512x3xf32>
    tpu.vector_store %arg11[%c0_17, %c0_18], %19 {strides = array<i32>} : memref<512x3xf32, #tpu.memory_space<vmem>>, vector<512x3xf32>,
    %c0_i32_19 = arith.constant 0 : i32
    %21 = arith.cmpi eq, %arg2, %c0_i32_19 : i32
    %22 = arith.extui %21 : i1 to i32
    %c0_i32_20 = arith.constant 0 : i32
    %23 = arith.cmpi ne, %22, %c0_i32_20 : i32
    scf.if %23 {
      %c0_21 = arith.constant 0 : index
      %c0_22 = arith.constant 0 : index
      %24 = vector.load %arg11[%c0_21, %c0_22] : memref<512x3xf32, #tpu.memory_space<vmem>>, vector<512x3xf32>
      %c0_23 = arith.constant 0 : index
      %c0_24 = arith.constant 0 : index
      %25 = vector.load %arg7[%c0_23, %c0_24] : memref<1x3xf32, #tpu.memory_space<vmem>>, vector<1x3xf32>
      %26 = vector.broadcast %25 : vector<1x3xf32> to vector<512x3xf32>
      %27 = arith.addf %24, %26 : vector<512x3xf32>
      %cst_25 = arith.constant dense<0.000000e+00> : vector<3xf32>
      %28 = vector.multi_reduction <add>, %27, %cst_25 [0] : vector<512x3xf32> to vector<3xf32>
      %29 = vector.shape_cast %28 : vector<3xf32> to vector<1x3xf32>
      %c0_26 = arith.constant 0 : index
      %c0_27 = arith.constant 0 : index
      %c0_28 = arith.constant 0 : index
      %c0_29 = arith.constant 0 : index
      %30 = vector.load %arg9[%c0_26, %c0_27, %c0_28, %c0_29] : memref<1x1x1x3xf32, #tpu.memory_space<vmem>>, vector<1x1x1x3xf32>
      %31 = vector.shape_cast %30 : vector<1x1x1x3xf32> to vector<1x3xf32>
      %32 = vector.shape_cast %29 : vector<1x3xf32> to vector<1x1x1x3xf32>
      tpu.vector_store %arg9[%c0_26, %c0_27, %c0_28, %c0_29], %32 {strides = array<i32>} : memref<1x1x1x3xf32, #tpu.memory_space<vmem>>, vector<1x1x1x3xf32>,
      %33 = arith.mulf %27, %27 : vector<512x3xf32>
      %cst_30 = arith.constant dense<0.000000e+00> : vector<3xf32>
      %34 = vector.multi_reduction <add>, %33, %cst_30 [0] : vector<512x3xf32> to vector<3xf32>
      %35 = vector.shape_cast %34 : vector<3xf32> to vector<1x3xf32>
      %c0_31 = arith.constant 0 : index
      %c0_32 = arith.constant 0 : index
      %c0_33 = arith.constant 0 : index
      %c0_34 = arith.constant 0 : index
      %36 = vector.load %arg10[%c0_31, %c0_32, %c0_33, %c0_34] : memref<1x1x1x3xf32, #tpu.memory_space<vmem>>, vector<1x1x1x3xf32>
      %37 = vector.shape_cast %36 : vector<1x1x1x3xf32> to vector<1x3xf32>
      %38 = vector.shape_cast %35 : vector<1x3xf32> to vector<1x1x1x3xf32>
      tpu.vector_store %arg10[%c0_31, %c0_32, %c0_33, %c0_34], %38 {strides = array<i32>} : memref<1x1x1x3xf32, #tpu.memory_space<vmem>>, vector<1x1x1x3xf32>,
      %39 = math.tanh %27 : vector<512x3xf32>
      %c0_35 = arith.constant 0 : index
      %c0_36 = arith.constant 0 : index
      %c0_37 = arith.constant 0 : index
      %40 = vector.load %arg8[%c0_35, %c0_36, %c0_37] : memref<1x512x3xf32, #tpu.memory_space<vmem>>, vector<1x512x3xf32>
      %41 = vector.shape_cast %40 : vector<1x512x3xf32> to vector<512x3xf32>
      %42 = vector.shape_cast %39 : vector<512x3xf32> to vector<1x512x3xf32>
      tpu.vector_store %arg8[%c0_35, %c0_36, %c0_37], %42 {strides = array<i32>} : memref<1x512x3xf32, #tpu.memory_space<vmem>>, vector<1x512x3xf32>,
    } else {
    }
    return
  }
  func.func @transform_0(%arg0: i32, %arg1: i32, %arg2: i32) -> (i32, i32, i32) {
    %c0_i32 = arith.constant 0 : i32
    return %arg0, %arg1, %arg2 : i32, i32, i32
  }
  func.func @transform_1(%arg0: i32, %arg1: i32, %arg2: i32) -> (i32, i32, i32) {
    %c0_i32 = arith.constant 0 : i32
    return %arg0, %arg1, %arg2 : i32, i32, i32
  }
  func.func @transform_2(%arg0: i32, %arg1: i32, %arg2: i32) -> (i32, i32, i32) {
    %c0_i32 = arith.constant 0 : i32
    %c0_i32_0 = arith.constant 0 : i32
    return %arg0, %arg2, %c0_i32 : i32, i32, i32
  }
  func.func @transform_3(%arg0: i32, %arg1: i32, %arg2: i32) -> (i32, i32, i32) {
    %c0_i32 = arith.constant 0 : i32
    %c0_i32_0 = arith.constant 0 : i32
    return %arg0, %arg2, %c0_i32 : i32, i32, i32
  }
  func.func @transform_4(%arg0: i32, %arg1: i32, %arg2: i32) -> (i32, i32) {
    %c0_i32 = arith.constant 0 : i32
    %c0_i32_0 = arith.constant 0 : i32
    %c0_i32_1 = arith.constant 0 : i32
    return %c0_i32, %c0_i32_0 : i32, i32
  }
  func.func @transform_5(%arg0: i32, %arg1: i32, %arg2: i32) -> (i32, i32, i32) {
    %c0_i32 = arith.constant 0 : i32
    %c0_i32_0 = arith.constant 0 : i32
    return %arg0, %arg1, %c0_i32 : i32, i32, i32
  }
  func.func @transform_6(%arg0: i32, %arg1: i32, %arg2: i32) -> (i32, i32, i32, i32) {
    %c0_i32 = arith.constant 0 : i32
    %c0_i32_0 = arith.constant 0 : i32
    %c0_i32_1 = arith.constant 0 : i32
    return %arg0, %arg1, %c0_i32, %c0_i32_0 : i32, i32, i32, i32
  }
  func.func @transform_7(%arg0: i32, %arg1: i32, %arg2: i32) -> (i32, i32, i32, i32) {
    %c0_i32 = arith.constant 0 : i32
    %c0_i32_0 = arith.constant 0 : i32
    %c0_i32_1 = arith.constant 0 : i32
    return %arg0, %arg1, %c0_i32, %c0_i32_0 : i32, i32, i32, i32
  }
}

</mosaic_0001>

<bundles_post_ra>
// kernel: _lambda_.10
= control target key start
LH: loop header
LB: loop body
LE: loop exit
PB: predicated region body
PF: predicated region fallthrough
CT: control target
= control target key end

     0   :  { %10 = vsyncpa [#allocation4], 0  ;;  %s2118_s0 = inlined_call_operand.vmem [shape: bf16[1,512,48], index: 0, kind: input, shape index: {}]   ;;  %s2119_s1 = inlined_call_operand.vmem [shape: bf16[1,48,8], index: 1, kind: input, shape index: {}]   ;;  %s2120_s2 = inlined_call_operand.vmem [shape: bf16[1,512,8], index: 2, kind: output, shape index: {0}]   ;;  %s2121_s3 = inlined_call_operand.hbm [shape: f32[1,2,1,8], index: 3, kind: output, shape index: {1}]   ;;  %s2122_s4 = inlined_call_operand.hbm [shape: f32[1,2,1,8], index: 4, kind: output, shape index: {2}]  }
   0x1   :  { %12 = vsyncpa [#allocation4 + $0x1], 0 }
   0x2   :  { %13 = vsyncpa [#allocation6], 0 }
   0x3   :  { %15 = vsyncpa [#allocation6 + $0x1], 0  ;;  %s1539_s15 = smov 0   ;;  %s1541_s16 = smov 0  }
   0x4   :  { %s1543_s17 = smov 0   ;;  %s1545_s18 = smov 0  }
   0x5   :  { %s1547_s19 = smov 0   ;;  %s1549_s20 = smov 0  }
   0x6 LB: > { %s1208_s21 = sadd.s32 4294967295, %s1511_s20   ;;  %s1209_s22 = sadd.s32 4294967294, %s1511_s20   ;;  %s1511_s20 = sphi %s1549_s20, %s21_s20   ;;  %s1507_s19 = sphi %s1547_s19, %s2129_s19   ;;  %s1503_s18 = sphi %s1545_s18, %s2128_s18   ;;  %s1499_s17 = sphi %s1543_s17, %s2127_s17   ;;  %s1495_s16 = sphi %s1541_s16, %s2126_s16   ;;  %s1491_s15 = sphi %s1539_s15, %s2125_s15  }
   0x7   : > { %s36_s23 = sadd.s32 1, %s1507_s19  ;;  %s135_s24 = sadd.s32 1, %s1499_s17 }
   0x8   : > { %p38_p0 = scmp.ge.s32.totalorder %s36_s23, 2  ;;  %p145_p1 = scmp.ne.s32.totalorder %s1499_s17, %s1495_s16 }
   0x9   : > { %p146_p2 = scmp.eq.s32.totalorder %s1208_s21, 1  ;;  %p151_p3 = scmp.ne.s32.totalorder %s1495_s16, %s1491_s15 }
   0xa   : > { %s2131_s23 = smov (%p38_p0, %s36_s23), 0  ;;  %p152_p5 = scmp.eq.s32.totalorder %s1209_s22, 1 }
   0xb   : > { %p1579_p4 = por %p146_p2, %p145_p1  ;;  %s131_s26 = ssub.s32 %s1507_s19, %s2131_s23 }
   0xc   : > { %p1213_p6 = scmp.ge.s32.totalorder %s1511_s20, 1  ;;  %p133_p7 = scmp.eq.s32.totalorder %s131_s26, 0 }
   0xd   : > { %p1586_p8 = por %p152_p5, %p151_p3  ;;  %p227_p9 = scmp.lt.s32.totalorder %s1511_s20, 3 }
   0xe   : > { %s1592_s28 = scalar_select %p133_p7, %s1499_s17, %s135_s24  }
   0xf   : > { %p228_p10 = pnand %p1213_p6, %p227_p9 }
  0x10   : > { %s1214_s5 = sshll.u32 (!%p228_p10), %s1503_s18, 5  ;;  %s2042_s24 = sand.u32 (!%p228_p10), 1, %s1495_s16  }
  0x11   : > { %231 = sbr.rel (%p228_p10) target bundleno = 304 (0x130), region = 28  ;;  %p284_p11 = scmp.lt.s32.totalorder (!%p228_p10), %s1214_s5, 63 }
  0x12   : > { %s1024_s30 = scalar_lea.hbm (!%p228_p10), %s2121_s3, %s1503_s18  ;;  %s1039_s7 = scalar_lea.hbm (!%p228_p10), %s2122_s4, %s1503_s18 }
  0x13   : > { %s2055_s10 = sshll.u32 (!%p228_p10), %s1024_s30, 4  ;;  %s280_s11 = scalar_lea.vmem (!%p228_p10), [#allocation5], %s2042_s24  ;;  %s1029_s10 = int_to_ptr.hbm [resolvable:$true] %s2055_s10 }
  0x14   : > { %s2058_s12 = sshll.u32 (!%p228_p10), %s280_s11, 4  ;;  %s1006_s18 = scalar_lea.sflag (!%p228_p10), [#allocation4], %s2042_s24  ;;  %s1042_s12 = int_to_ptr.vmem [resolvable:$true] %s2058_s12 }
  0x15   : > { %s1415_s14 = sshra.s32 (!%p228_p10), %s1029_s10, 4  ;;  %s1421_s29 = scalar_lea.hbm (!%p228_p10), %s2121_s3, 2  ;;  %s1416_s14 = int_to_ptr.hbm [resolvable:$true] %s1415_s14 }
  0x16   : > { %v1330_v0 = vld [vmem:[%s2119_s1 + $0x10] sm:$0xff]  ;;  %v1329_v1 = vld [vmem:[%s2119_s1 + $0x8] sm:$0xff]  ;;  %s2133_s5 = smov (!%p284_p11, %s1214_s5), 63  ;;  %v1328_v2 = vld [vmem:[%s2119_s1] sm:$0xff]  ;;  %vm488_vm0 = vcmask 392192   ;;  %vm319_vm1 = vcmask 64512   ;;  %p1422_p1 = scmp.lt.s32.totalorder %s1416_s14, %s2121_s3 }
  0x17   : > { %542 = vmatpush.bf16.msra.mxu0 %v1330_v0  ;;  %1331 = vmatpush.bf16.msra.mxu1 %v1330_v0  ;;  %s1215_s8 = sshll.u32 %s2133_s5, 2  ;;  %v1513_v11 = vmov 0.0   ;;  %vm963_vm2 = vcmask 60416   ;;  %vm827_vm3 = vcmask 57344   ;;  %s1417_s21 = scalar_lea.hbm %s1416_s14, 1 }
  0x18   : > { %1332 = vmatpush.bf16.msra.mxu2 %v1330_v0  ;;  %1333 = vmatpush.bf16.msra.mxu3 %v1330_v0  ;;  %s1612_s13 = scalar_lea.vmem %s2118_s0, %s1215_s8  ;;  %320 = vst.msk [vmem:[#allocation2] sm:$0xff] %vm319_vm1, %v1513_v11  ;;  %s1685_s22 = scalar_lea.vmem %s2120_s2, %s1215_s8 }
  0x19   : > { %v1312_v3 = vld [vmem:[%s1612_s13] sm:$0xff]  ;;  %v1313_v7 = vld [vmem:[%s1612_s13 + $0x8] sm:$0xff]  ;;  %321 = vst.msk [vmem:[#allocation2 + $0x8] sm:$0xff] %vm319_vm1, %v1513_v11  ;;  %v1314_v12 = vld [vmem:[%s1612_s13 + $0x10] sm:$0xff]  ;;  %s274_s8 = scalar_lea.vmem [#allocation3], %s2042_s24  ;;  %p1418_p12 = scmp.ne.s32.totalorder %s1416_s14, %s1417_s21 }
  0x1a   : > { %v1316_v4 = vld [vmem:[%s1612_s13 + $0x20] sm:$0xff]  ;;  %v1317_v8 = vld [vmem:[%s1612_s13 + $0x28] sm:$0xff]  ;;  %322 = vst.msk [vmem:[#allocation2 + $0x10] sm:$0xff] %vm319_vm1, %v1513_v11  ;;  %v1318_v13 = vld [vmem:[%s1612_s13 + $0x30] sm:$0xff]  ;;  %s2053_s9 = sshll.u32 %s274_s8, 4  ;;  %p1423_p2 = scmp.lt.s32.totalorder %s1421_s29, %s1417_s21  ;;  %s1027_s9 = int_to_ptr.vmem [resolvable:$true] %s2053_s9 }
  0x1b   : > { %543 = vmatpush.bf16.msra.mxu0 %v1329_v1  ;;  %1334 = vmatpush.bf16.msra.mxu1 %v1329_v1  ;;  %v1320_v5 = vld [vmem:[%s1612_s13 + $0x40] sm:$0xff]  ;;  %v1321_v9 = vld [vmem:[%s1612_s13 + $0x48] sm:$0xff]  ;;  %323 = vst.msk [vmem:[#allocation2 + $0x18] sm:$0xff] %vm319_vm1, %v1513_v11  ;;  %v1322_v14 = vld [vmem:[%s1612_s13 + $0x50] sm:$0xff]  ;;  %p1419_p13 = pnand %p1418_p12, %p1579_p4 }
  0x1c   : > { %1335 = vmatpush.bf16.msra.mxu2 %v1329_v1  ;;  %1336 = vmatpush.bf16.msra.mxu3 %v1329_v1  ;;  %v1324_v6 = vld [vmem:[%s1612_s13 + $0x60] sm:$0xff]  ;;  %v1325_v10 = vld [vmem:[%s1612_s13 + $0x68] sm:$0xff]  ;;  %324 = vst.msk [vmem:[#allocation2 + $0x20] sm:$0xff] %vm319_vm1, %v1513_v11  ;;  %v1326_v15 = vld [vmem:[%s1612_s13 + $0x70] sm:$0xff]  ;;  %p1424_p3 = por %p1423_p2, %p1422_p1 }
  0x1d   : > { %325 = vst.msk [vmem:[#allocation2 + $0x28] sm:$0xff] %vm319_vm1, %v1513_v11  ;;  %v1315_v16 = vld [vmem:[%s1612_s13 + $0x18] sm:$0xff]  ;;  %p1420_p0 = pneg %p1419_p13 }
  0x1e   : > { %326 = vst.msk [vmem:[#allocation2 + $0x30] sm:$0xff] %vm319_vm1, %v1513_v11  ;;  %v1319_v17 = vld [vmem:[%s1612_s13 + $0x38] sm:$0xff] }
  0x1f   : > { %544 = vmatpush.bf16.msra.mxu0 %v1328_v2  ;;  %1337 = vmatpush.bf16.msra.mxu1 %v1328_v2  ;;  %327 = vst.msk [vmem:[#allocation2 + $0x38] sm:$0xff] %vm319_vm1, %v1513_v11  ;;  %v1323_v18 = vld [vmem:[%s1612_s13 + $0x58] sm:$0xff]  ;;  %v626_v20 = vld [vmem:[#allocation2] sm:$0xff]  ;;  %p1425_p5 = pnand %p1424_p3, %p1420_p0 }
  0x20   : > { %1338 = vmatpush.bf16.msra.mxu2 %v1328_v2  ;;  %1339 = vmatpush.bf16.msra.mxu3 %v1328_v2  ;;  %328 = vst.msk [vmem:[#allocation2 + $0x40] sm:$0xff] %vm319_vm1, %v1513_v11  ;;  %v1327_v19 = vld [vmem:[%s1612_s13 + $0x78] sm:$0xff]  ;;  %v627_v27 = vld [vmem:[#allocation2 + $0x8] sm:$0xff]  ;;  %s2060_s13 = sshll.u32 %s1039_s7, 4  ;;  %s1044_s13 = int_to_ptr.hbm [resolvable:$true] %s2060_s13 }
  0x21   : > { %329 = vst.msk [vmem:[#allocation2 + $0x48] sm:$0xff] %vm319_vm1, %v1513_v11  ;;  %v628_v41 = vld [vmem:[#allocation2 + $0x10] sm:$0xff] }
  0x22   : > { %1294 = vmatmul.msk.bf16.vlgmr.msra.gmra.mxu0 %vm488_vm0, %v1312_v3  ;;  %1298 = vmatmul.msk.bf16.vlgmr.msra.gmra.mxu1 %vm488_vm0, %v1316_v4  ;;  %330 = vst.msk [vmem:[#allocation2 + $0x50] sm:$0xff] %vm319_vm1, %v1513_v11  ;;  %v629_v61 = vld [vmem:[#allocation2 + $0x18] sm:$0xff] }
  0x23   : > { %1302 = vmatmul.msk.bf16.vlgmr.msra.gmra.mxu2 %vm488_vm0, %v1320_v5  ;;  %1306 = vmatmul.msk.bf16.vlgmr.msra.gmra.mxu3 %vm488_vm0, %v1324_v6  ;;  %331 = vst.msk [vmem:[#allocation2 + $0x58] sm:$0xff] %vm319_vm1, %v1513_v11 }
  0x24   : > { %332 = vst.msk [vmem:[#allocation2 + $0x60] sm:$0xff] %vm319_vm1, %v1513_v11 }
  0x25   : > { %333 = vst.msk [vmem:[#allocation2 + $0x68] sm:$0xff] %vm319_vm1, %v1513_v11 }
  0x26   : > { %334 = vst.msk [vmem:[#allocation2 + $0x70] sm:$0xff] %vm319_vm1, %v1513_v11 }
  0x27   : > { %335 = vst.msk [vmem:[#allocation2 + $0x78] sm:$0xff] %vm319_vm1, %v1513_v11  ;;  %v634_v21 = vld [vmem:[#allocation2 + $0x40] sm:$0xff] }
  0x28   : > { %336 = vst.msk [vmem:[#allocation2 + $0x80] sm:$0xff] %vm319_vm1, %v1513_v11  ;;  %v635_v28 = vld [vmem:[#allocation2 + $0x48] sm:$0xff] }
  0x29   : > { %337 = vst.msk [vmem:[#allocation2 + $0x88] sm:$0xff] %vm319_vm1, %v1513_v11  ;;  %v636_v42 = vld [vmem:[#allocation2 + $0x50] sm:$0xff] }
  0x2a   : > { %338 = vst.msk [vmem:[#allocation2 + $0x90] sm:$0xff] %vm319_vm1, %v1513_v11  ;;  %v637_v62 = vld [vmem:[#allocation2 + $0x58] sm:$0xff] }
  0x2b   : > { %339 = vst.msk [vmem:[#allocation2 + $0x98] sm:$0xff] %vm319_vm1, %v1513_v11 }
  0x2c   : > { %340 = vst.msk [vmem:[#allocation2 + $0xa0] sm:$0xff] %vm319_vm1, %v1513_v11 }
  0x2d   : > { %341 = vst.msk [vmem:[#allocation2 + $0xa8] sm:$0xff] %vm319_vm1, %v1513_v11 }
  0x2e   : > { %342 = vst.msk [vmem:[#allocation2 + $0xb0] sm:$0xff] %vm319_vm1, %v1513_v11 }
  0x2f   : > { %343 = vst.msk [vmem:[#allocation2 + $0xb8] sm:$0xff] %vm319_vm1, %v1513_v11  ;;  %v642_v26 = vld [vmem:[#allocation2 + $0x80] sm:$0xff] }
  0x30   : > { %344 = vst.msk [vmem:[#allocation2 + $0xc0] sm:$0xff] %vm319_vm1, %v1513_v11  ;;  %v643_v40 = vld [vmem:[#allocation2 + $0x88] sm:$0xff] }
  0x31   : > { %345 = vst.msk [vmem:[#allocation2 + $0xc8] sm:$0xff] %vm319_vm1, %v1513_v11  ;;  %v644_v59 = vld [vmem:[#allocation2 + $0x90] sm:$0xff] }
  0x32   : > { %1295 = vmatmul.msk.bf16.gmra.mxu0 %vm488_vm0, %v1313_v7  ;;  %1299 = vmatmul.msk.bf16.gmra.mxu1 %vm488_vm0, %v1317_v8  ;;  %346 = vst.msk [vmem:[#allocation2 + $0xd0] sm:$0xff] %vm319_vm1, %v1513_v11 }
  0x33   : > { %1303 = vmatmul.msk.bf16.gmra.mxu2 %vm488_vm0, %v1321_v9  ;;  %1307 = vmatmul.msk.bf16.gmra.mxu3 %vm488_vm0, %v1325_v10  ;;  %347 = vst.msk [vmem:[#allocation2 + $0xd8] sm:$0xff] %vm319_vm1, %v1513_v11 }
  0x34   : > { %348 = vst.msk [vmem:[#allocation2 + $0xe0] sm:$0xff] %vm319_vm1, %v1513_v11 }
  0x35   : > { %349 = vst.msk [vmem:[#allocation2 + $0xe8] sm:$0xff] %vm319_vm1, %v1513_v11 }
  0x36   : > { %350 = vst.msk [vmem:[#allocation2 + $0xf0] sm:$0xff] %vm319_vm1, %v1513_v11 }
  0x37   : > { %351 = vst.msk [vmem:[#allocation2 + $0xf8] sm:$0xff] %vm319_vm1, %v1513_v11  ;;  %v650_v50 = vld [vmem:[#allocation2 + $0xc0] sm:$0xff] }
  0x38   : > { %v651_v53 = vld [vmem:[#allocation2 + $0xc8] sm:$0xff] }
  0x42   : > { %1296 = vmatmul.msk.bf16.gmra.mxu0 %vm488_vm0, %v1314_v12  ;;  %1300 = vmatmul.msk.bf16.gmra.mxu1 %vm488_vm0, %v1318_v13  ;;  %v645_v12 = vld [vmem:[#allocation2 + $0x98] sm:$0xff]  ;;  %v630_v13 = vld [vmem:[#allocation2 + $0x20] sm:$0xff] }
  0x43   : > { %1304 = vmatmul.msk.bf16.gmra.mxu2 %vm488_vm0, %v1322_v14  ;;  %1308 = vmatmul.msk.bf16.gmra.mxu3 %vm488_vm0, %v1326_v15  ;;  %v638_v14 = vld [vmem:[#allocation2 + $0x60] sm:$0xff] }
  0x52   : > { %1297 = vmatmul.msk.bf16.gmra.mxu0 %vm488_vm0, %v1315_v16  ;;  %1301 = vmatmul.msk.bf16.gmra.mxu1 %vm488_vm0, %v1319_v17 }
  0x53   : > { %1305 = vmatmul.msk.bf16.gmra.mxu2 %vm488_vm0, %v1323_v18  ;;  %1309 = vmatmul.msk.bf16.gmra.mxu3 %vm488_vm0, %v1327_v19 }
  0x9f   : > { %v546_v22 = vpop.f32.mrf.mxu0  ;;  %v566_v23 = vpop.f32.mrf.mxu1 }
  0xa0   : > { %v658_v24 = vadd.f32 %v626_v20, %v546_v22  ;;  %v666_v25 = vadd.f32 %v634_v21, %v566_v23  ;;  %v652_v22 = vld [vmem:[#allocation2 + $0xd0] sm:$0xff] }
  0xa2   : > { %691 = vst.msk [vmem:[#allocation2] sm:$0xff] %vm319_vm1, %v658_v24 }
  0xa3   : > { %699 = vst.msk [vmem:[#allocation2 + $0x40] sm:$0xff] %vm319_vm1, %v666_v25  ;;  %v653_v25 = vld [vmem:[#allocation2 + $0xd8] sm:$0xff] }
  0xa6   : > { %v586_v29 = vpop.f32.mrf.mxu2  ;;  %v606_v35 = vpop.f32.mrf.mxu3 }
  0xa7   : > { %v548_v30 = vpop.f32.mrf.mxu0  ;;  %v568_v31 = vpop.f32.mrf.mxu1  ;;  %v674_v32 = vadd.f32 %v642_v26, %v586_v29  ;;  %v682_v58 = vadd.f32 %v650_v50, %v606_v35 }
  0xa8   : > { %v659_v33 = vadd.f32 %v627_v27, %v548_v30  ;;  %v667_v34 = vadd.f32 %v635_v28, %v568_v31  ;;  %v646_v31 = vld [vmem:[#allocation2 + $0xa0] sm:$0xff] }
  0xa9   : > { %v1687_v36 = vld [vmem:[#allocation2] sm:$0xff]  ;;  %707 = vst.msk [vmem:[#allocation2 + $0x80] sm:$0xff] %vm319_vm1, %v674_v32 }
  0xaa   : > { %v931_v37 = vpack.c.bf16 %v1687_v36, %v1687_v36  ;;  %692 = vst.msk [vmem:[#allocation2 + $0x8] sm:$0xff] %vm319_vm1, %v659_v33  ;;  %v1693_v38 = vld [vmem:[#allocation2 + $0x40] sm:$0xff]  ;;  %v631_v33 = vld [vmem:[#allocation2 + $0x28] sm:$0xff] }
  0xab   : > { %v939_v39 = vpack.c.bf16 %v1693_v38, %v1693_v38  ;;  %700 = vst.msk [vmem:[#allocation2 + $0x48] sm:$0xff] %vm319_vm1, %v667_v34  ;;  %v639_v34 = vld [vmem:[#allocation2 + $0x68] sm:$0xff] }
  0xac   : > { %964 = vst.msk [vmem:[%s1685_s22] sm:$0xf] %vm963_vm2, %v931_v37 }
  0xad   : > { %972 = vst.msk [vmem:[%s1685_s22 + $0x20] sm:$0xf] %vm963_vm2, %v939_v39 }
  0xae   : > { %v588_v43 = vpop.f32.mrf.mxu2  ;;  %v608_v51 = vpop.f32.mrf.mxu3  ;;  %715 = vst.msk [vmem:[#allocation2 + $0xc0] sm:$0xff] %vm319_vm1, %v682_v58  ;;  %v632_v58 = vld [vmem:[#allocation2 + $0x30] sm:$0xff] }
  0xaf   : > { %v551_v44 = vpop.f32.mrf.mxu0  ;;  %v571_v45 = vpop.f32.mrf.mxu1  ;;  %v675_v46 = vadd.f32 %v643_v40, %v588_v43  ;;  %v683_v60 = vadd.f32 %v651_v53, %v608_v51 }
  0xb0   : > { %v660_v47 = vadd.f32 %v628_v41, %v551_v44  ;;  %v668_v48 = vadd.f32 %v636_v42, %v571_v45  ;;  %v1702_v49 = vld [vmem:[#allocation2 + $0x80] sm:$0xff] }
  0xb1   : > { %v1704_v52 = vld [vmem:[#allocation2 + $0x8] sm:$0xff]  ;;  %708 = vst.msk [vmem:[#allocation2 + $0x88] sm:$0xff] %vm319_vm1, %v675_v46  ;;  %v947_v56 = vpack.c.bf16 %v1702_v49, %v1702_v49 }
  0xb2   : > { %v932_v54 = vpack.c.bf16 %v1704_v52, %v1704_v52  ;;  %693 = vst.msk [vmem:[#allocation2 + $0x10] sm:$0xff] %vm319_vm1, %v660_v47  ;;  %v1710_v55 = vld [vmem:[#allocation2 + $0x48] sm:$0xff] }
  0xb3   : > { %v940_v57 = vpack.c.bf16 %v1710_v55, %v1710_v55  ;;  %701 = vst.msk [vmem:[#allocation2 + $0x50] sm:$0xff] %vm319_vm1, %v668_v48 }
  0xb4   : > { %965 = vst.msk [vmem:[%s1685_s22 + $0x4] sm:$0xf] %vm963_vm2, %v932_v54 }
  0xb5   : > { %973 = vst.msk [vmem:[%s1685_s22 + $0x24] sm:$0xf] %vm963_vm2, %v940_v57  ;;  %v1771_v45 = vld [vmem:[#allocation2 + $0xc0] sm:$0xff] }
  0xb6   : > { %980 = vst.msk [vmem:[%s1685_s22 + $0x40] sm:$0xf] %vm963_vm2, %v947_v56  ;;  %v591_v63 = vpop.f32.mrf.mxu2  ;;  %v611_v6 = vpop.f32.mrf.mxu3  ;;  %v955_v54 = vpack.c.bf16 %v1771_v45, %v1771_v45  ;;  %v647_v56 = vld [vmem:[#allocation2 + $0xa8] sm:$0xff] }
  0xb7   : > { %v553_v0 = vpop.f32.mrf.mxu0  ;;  %v573_v1 = vpop.f32.mrf.mxu1  ;;  %v676_v2 = vadd.f32 %v644_v59, %v591_v63  ;;  %716 = vst.msk [vmem:[#allocation2 + $0xc8] sm:$0xff] %vm319_vm1, %v683_v60  ;;  %v684_v30 = vadd.f32 %v652_v22, %v611_v6  ;;  %v640_v59 = vld [vmem:[#allocation2 + $0x70] sm:$0xff] }
  0xb8   : > { %v661_v3 = vadd.f32 %v629_v61, %v553_v0  ;;  %v669_v4 = vadd.f32 %v637_v62, %v573_v1  ;;  %v1724_v5 = vld [vmem:[#allocation2 + $0x88] sm:$0xff]  ;;  %988 = vst.msk [vmem:[%s1685_s22 + $0x60] sm:$0xf] %vm963_vm2, %v955_v54 }
  0xb9   : > { %v1727_v7 = vld [vmem:[#allocation2 + $0x10] sm:$0xff]  ;;  %709 = vst.msk [vmem:[#allocation2 + $0x90] sm:$0xff] %vm319_vm1, %v676_v2  ;;  %v948_v10 = vpack.c.bf16 %v1724_v5, %v1724_v5 }
  0xba   : > { %v933_v8 = vpack.c.bf16 %v1727_v7, %v1727_v7  ;;  %694 = vst.msk [vmem:[#allocation2 + $0x18] sm:$0xff] %vm319_vm1, %v661_v3  ;;  %v1733_v9 = vld [vmem:[#allocation2 + $0x50] sm:$0xff]  ;;  %v654_v3 = vld [vmem:[#allocation2 + $0xe0] sm:$0xff] }
  0xbb   : > { %v941_v11 = vpack.c.bf16 %v1733_v9, %v1733_v9  ;;  %702 = vst.msk [vmem:[#allocation2 + $0x58] sm:$0xff] %vm319_vm1, %v669_v4 }
  0xbc   : > { %966 = vst.msk [vmem:[%s1685_s22 + $0x8] sm:$0xf] %vm963_vm2, %v933_v8  ;;  %v655_v8 = vld [vmem:[#allocation2 + $0xe8] sm:$0xff] }
  0xbd   : > { %974 = vst.msk [vmem:[%s1685_s22 + $0x28] sm:$0xf] %vm963_vm2, %v941_v11 }
  0xbe   : > { %981 = vst.msk [vmem:[%s1685_s22 + $0x44] sm:$0xf] %vm963_vm2, %v948_v10  ;;  %v593_v15 = vpop.f32.mrf.mxu2  ;;  %v613_v23 = vpop.f32.mrf.mxu3  ;;  %v1776_v47 = vld [vmem:[#allocation2 + $0xc8] sm:$0xff]  ;;  %v830_v10 = vmul.f32 %v1704_v52, %v1704_v52 }
  0xbf   : > { %v556_v16 = vpop.f32.mrf.mxu0  ;;  %v576_v17 = vpop.f32.mrf.mxu1  ;;  %v677_v18 = vadd.f32 %v645_v12, %v593_v15  ;;  %v685_v32 = vadd.f32 %v653_v25, %v613_v23  ;;  %717 = vst.msk [vmem:[#allocation2 + $0xd0] sm:$0xff] %vm319_vm1, %v684_v30  ;;  %v956_v57 = vpack.c.bf16 %v1776_v47, %v1776_v47  ;;  %v831_v15 = vmul.f32 %v1727_v7, %v1727_v7  ;;  %v633_v23 = vld [vmem:[#allocation2 + $0x38] sm:$0xff] }
  0xc0   : > { %v662_v19 = vadd.f32 %v630_v13, %v556_v16  ;;  %v670_v20 = vadd.f32 %v638_v14, %v576_v17  ;;  %v1746_v21 = vld [vmem:[#allocation2 + $0x90] sm:$0xff]  ;;  %v829_v14 = vmul.f32 %v1687_v36, %v1687_v36  ;;  %v641_v25 = vld [vmem:[#allocation2 + $0x78] sm:$0xff] }
  0xc1   : > { %v1748_v24 = vld [vmem:[#allocation2 + $0x18] sm:$0xff]  ;;  %710 = vst.msk [vmem:[#allocation2 + $0x98] sm:$0xff] %vm319_vm1, %v677_v18  ;;  %v949_v28 = vpack.c.bf16 %v1746_v21, %v1746_v21  ;;  %v759_v18 = vsel %vm319_vm1, %v1704_v52, 0.0 }
  0xc2   : > { %v934_v26 = vpack.c.bf16 %v1748_v24, %v1748_v24  ;;  %695 = vst.msk [vmem:[#allocation2 + $0x20] sm:$0xff] %vm319_vm1, %v662_v19  ;;  %v1754_v27 = vld [vmem:[#allocation2 + $0x58] sm:$0xff]  ;;  %v648_v19 = vld [vmem:[#allocation2 + $0xb0] sm:$0xff]  ;;  %v832_v22 = vmul.f32 %v1748_v24, %v1748_v24  ;;  %v861_v30 = vsel %vm319_vm1, %v829_v14, 0.0 }
  0xc3   : > { %v942_v29 = vpack.c.bf16 %v1754_v27, %v1754_v27  ;;  %703 = vst.msk [vmem:[#allocation2 + $0x60] sm:$0xff] %vm319_vm1, %v670_v20 }
  0xc4   : > { %967 = vst.msk [vmem:[%s1685_s22 + $0xc] sm:$0xf] %vm963_vm2, %v934_v26  ;;  %v758_v26 = vsel %vm319_vm1, %v1687_v36, 0.0  ;;  %v763_v36 = vsel %vm319_vm1, %v1748_v24, 0.0 }
  0xc5   : > { %975 = vst.msk [vmem:[%s1685_s22 + $0x2c] sm:$0xf] %vm963_vm2, %v942_v29  ;;  %v761_v29 = vsel %vm319_vm1, %v1727_v7, 0.0 }
  0xc6   : > { %982 = vst.msk [vmem:[%s1685_s22 + $0x48] sm:$0xf] %vm963_vm2, %v949_v28  ;;  %v596_v35 = vpop.f32.mrf.mxu2  ;;  %v616_v44 = vpop.f32.mrf.mxu3  ;;  %v862_v28 = vsel %vm319_vm1, %v830_v10, 0.0  ;;  %v1846_v54 = vld [vmem:[#allocation2 + $0xd0] sm:$0xff] }
  0xc7   : > { %v558_v37 = vpop.f32.mrf.mxu0  ;;  %v578_v39 = vpop.f32.mrf.mxu1  ;;  %v678_v40 = vadd.f32 %v646_v31, %v596_v35  ;;  %718 = vst.msk [vmem:[#allocation2 + $0xd8] sm:$0xff] %vm319_vm1, %v685_v32  ;;  %v686_v17 = vadd.f32 %v654_v3, %v616_v44  ;;  %v760_v31 = vadd.f32 %v759_v18, %v758_v26  ;;  %v864_v32 = vsel %vm319_vm1, %v831_v15, 0.0 }
  0xc8   : > { %v663_v41 = vadd.f32 %v631_v33, %v558_v37  ;;  %v671_v42 = vadd.f32 %v639_v34, %v578_v39  ;;  %v1768_v43 = vld [vmem:[#allocation2 + $0x98] sm:$0xff]  ;;  %989 = vst.msk [vmem:[%s1685_s22 + $0x64] sm:$0xf] %vm963_vm2, %v956_v57  ;;  %v656_v37 = vld [vmem:[#allocation2 + $0xf0] sm:$0xff]  ;;  %v863_v44 = vadd.f32 %v862_v28, %v861_v30  ;;  %v837_v26 = vmul.f32 %v1693_v38, %v1693_v38 }
  0xc9   : > { %v1773_v46 = vld [vmem:[#allocation2 + $0x20] sm:$0xff]  ;;  %711 = vst.msk [vmem:[#allocation2 + $0xa0] sm:$0xff] %vm319_vm1, %v678_v40  ;;  %v950_v51 = vpack.c.bf16 %v1768_v43, %v1768_v43 }
  0xca   : > { %v935_v48 = vpack.c.bf16 %v1773_v46, %v1773_v46  ;;  %696 = vst.msk [vmem:[#allocation2 + $0x28] sm:$0xff] %vm319_vm1, %v663_v41  ;;  %v1781_v50 = vld [vmem:[#allocation2 + $0x60] sm:$0xff]  ;;  %v833_v7 = vmul.f32 %v1773_v46, %v1773_v46  ;;  %v765_v24 = vsel %vm319_vm1, %v1773_v46, 0.0 }
  0xcb   : > { %v943_v53 = vpack.c.bf16 %v1781_v50, %v1781_v50  ;;  %704 = vst.msk [vmem:[#allocation2 + $0x68] sm:$0xff] %vm319_vm1, %v671_v42 }
  0xcc   : > { %968 = vst.msk [vmem:[%s1685_s22 + $0x10] sm:$0xf] %vm963_vm2, %v935_v48  ;;  %v762_v48 = vadd.f32 %v761_v29, %v760_v31 }
  0xcd   : > { %976 = vst.msk [vmem:[%s1685_s22 + $0x30] sm:$0xf] %vm963_vm2, %v943_v53 }
  0xce   : > { %983 = vst.msk [vmem:[%s1685_s22 + $0x4c] sm:$0xf] %vm963_vm2, %v950_v51  ;;  %v598_v60 = vpop.f32.mrf.mxu2  ;;  %v618_v4 = vpop.f32.mrf.mxu3  ;;  %v866_v51 = vsel %vm319_vm1, %v832_v22, 0.0 }
  0xcf   : > { %v561_v61 = vpop.f32.mrf.mxu0  ;;  %v581_v62 = vpop.f32.mrf.mxu1  ;;  %v679_v63 = vadd.f32 %v647_v56, %v598_v60  ;;  %v687_v20 = vadd.f32 %v655_v8, %v618_v4  ;;  %719 = vst.msk [vmem:[#allocation2 + $0xe0] sm:$0xff] %vm319_vm1, %v686_v17  ;;  %v865_v60 = vadd.f32 %v864_v32, %v863_v44  ;;  %v649_v4 = vld [vmem:[#allocation2 + $0xb8] sm:$0xff]  ;;  %v957_v8 = vpack.c.bf16 %v1846_v54, %v1846_v54 }
  0xd0   : > { %v664_v0 = vadd.f32 %v632_v58, %v561_v61  ;;  %v672_v1 = vadd.f32 %v640_v59, %v581_v62  ;;  %v1800_v2 = vld [vmem:[#allocation2 + $0xa0] sm:$0xff]  ;;  %v764_v61 = vadd.f32 %v763_v36, %v762_v48  ;;  %v838_v44 = vmul.f32 %v1710_v55, %v1710_v55 }
  0xd1   : > { %v731_v6 = vld [vmem:[#allocation2 + $0x28] sm:$0xff]  ;;  %712 = vst.msk [vmem:[#allocation2 + $0xa8] sm:$0xff] %vm319_vm1, %v679_v63  ;;  %v951_v13 = vpack.c.bf16 %v1800_v2, %v1800_v2  ;;  %v1856_v63 = vld [vmem:[#allocation2 + $0xd8] sm:$0xff]  ;;  %v867_v10 = vadd.f32 %v866_v51, %v865_v60 }
  0xd2   : > { %v936_v11 = vpack.c.bf16 %v731_v6, %v731_v6  ;;  %697 = vst.msk [vmem:[#allocation2 + $0x30] sm:$0xff] %vm319_vm1, %v664_v0  ;;  %v1808_v12 = vld [vmem:[#allocation2 + $0x68] sm:$0xff]  ;;  %v834_v56 = vmul.f32 %v731_v6, %v731_v6  ;;  %v868_v0 = vsel %vm319_vm1, %v833_v7, 0.0 }
  0xd3   : > { %v944_v16 = vpack.c.bf16 %v1808_v12, %v1808_v12  ;;  %705 = vst.msk [vmem:[#allocation2 + $0x70] sm:$0xff] %vm319_vm1, %v672_v1  ;;  %v767_v1 = vsel %vm319_vm1, %v731_v6, 0.0  ;;  %v657_v6 = vld [vmem:[#allocation2 + $0xf8] sm:$0xff]  ;;  %v869_v17 = vadd.f32 %v868_v0, %v867_v10  ;;  %v779_v10 = vsel %vm319_vm1, %v1754_v27, 0.0 }
  0xd4   : > { %969 = vst.msk [vmem:[%s1685_s22 + $0x14] sm:$0xf] %vm963_vm2, %v936_v11  ;;  %v766_v11 = vadd.f32 %v765_v24, %v764_v61 }
  0xd5   : > { %977 = vst.msk [vmem:[%s1685_s22 + $0x34] sm:$0xf] %vm963_vm2, %v944_v16  ;;  %v958_v16 = vpack.c.bf16 %v1856_v63, %v1856_v63 }
  0xd6   : > { %984 = vst.msk [vmem:[%s1685_s22 + $0x50] sm:$0xf] %vm963_vm2, %v951_v13  ;;  %v601_v52 = vpop.f32.mrf.mxu2  ;;  %v621_v41 = vpop.f32.mrf.mxu3  ;;  %v870_v13 = vsel %vm319_vm1, %v834_v56, 0.0  ;;  %v768_v18 = vadd.f32 %v767_v1, %v766_v11  ;;  %v876_v56 = vsel %vm319_vm1, %v837_v26, 0.0 }
  0xd7   : > { %v563_v33 = vpop.f32.mrf.mxu0  ;;  %v583_v34 = vpop.f32.mrf.mxu1  ;;  %v680_v35 = vadd.f32 %v648_v19, %v601_v52  ;;  %720 = vst.msk [vmem:[#allocation2 + $0xe8] sm:$0xff] %vm319_vm1, %v687_v20  ;;  %v688_v59 = vadd.f32 %v656_v37, %v621_v41  ;;  %v871_v28 = vadd.f32 %v870_v13, %v869_v17  ;;  %v773_v41 = vsel %vm319_vm1, %v1693_v38, 0.0 }
  0xd8   : > { %v665_v39 = vadd.f32 %v633_v23, %v563_v33  ;;  %v673_v40 = vadd.f32 %v641_v25, %v583_v34  ;;  %v1842_v42 = vld [vmem:[#allocation2 + $0xa8] sm:$0xff]  ;;  %v1878_v25 = vld [vmem:[#allocation2 + $0xe0] sm:$0xff]  ;;  %990 = vst.msk [vmem:[%s1685_s22 + $0x68] sm:$0xf] %vm963_vm2, %v957_v8  ;;  %v775_v38 = vsel %vm319_vm1, %v1710_v55, 0.0  ;;  %v840_v55 = vmul.f32 %v1754_v27, %v1754_v27 }
  0xd9   : > { %v732_v53 = vld [vmem:[#allocation2 + $0x30] sm:$0xff]  ;;  %713 = vst.msk [vmem:[#allocation2 + $0xb0] sm:$0xff] %vm319_vm1, %v680_v35  ;;  %v952_v46 = vpack.c.bf16 %v1842_v42, %v1842_v42  ;;  %v781_v27 = vsel %vm319_vm1, %v1781_v50, 0.0  ;;  %v842_v17 = vmul.f32 %v1808_v12, %v1808_v12 }
  0xda   : > { %v937_v57 = vpack.c.bf16 %v732_v53, %v732_v53  ;;  %698 = vst.msk [vmem:[#allocation2 + $0x38] sm:$0xff] %vm319_vm1, %v665_v39  ;;  %v1851_v58 = vld [vmem:[#allocation2 + $0x70] sm:$0xff]  ;;  %v835_v3 = vmul.f32 %v732_v53, %v732_v53  ;;  %v769_v14 = vsel %vm319_vm1, %v732_v53, 0.0 }
  0xdb   : > { %v945_v62 = vpack.c.bf16 %v1851_v58, %v1851_v58  ;;  %706 = vst.msk [vmem:[#allocation2 + $0x78] sm:$0xff] %vm319_vm1, %v673_v40  ;;  %v770_v29 = vadd.f32 %v769_v14, %v768_v18  ;;  %v959_v40 = vpack.c.bf16 %v1878_v25, %v1878_v25  ;;  %v843_v26 = vmul.f32 %v1851_v58, %v1851_v58 }
  0xdc   : > { %970 = vst.msk [vmem:[%s1685_s22 + $0x18] sm:$0xf] %vm963_vm2, %v937_v57  ;;  %v872_v20 = vsel %vm319_vm1, %v835_v3, 0.0  ;;  %v839_v57 = vmul.f32 %v1733_v9, %v1733_v9 }
  0xdd   : > { %978 = vst.msk [vmem:[%s1685_s22 + $0x38] sm:$0xf] %vm963_vm2, %v945_v62  ;;  %v873_v36 = vadd.f32 %v872_v20, %v871_v28  ;;  %v878_v62 = vsel %vm319_vm1, %v838_v44, 0.0 }
  0xde   : > { %v603_v15 = vpop.f32.mrf.mxu2  ;;  %721 = vst.msk [vmem:[#allocation2 + $0xf0] sm:$0xff] %vm319_vm1, %v688_v59  ;;  %v623_v22 = vpop.f32.mrf.mxu3  ;;  %v1885_v31 = vld [vmem:[#allocation2 + $0xe8] sm:$0xff]  ;;  %v880_v8 = vsel %vm319_vm1, %v839_v57, 0.0 }
  0xdf   : > { %v681_v19 = vadd.f32 %v649_v4, %v603_v15  ;;  %985 = vst.msk [vmem:[%s1685_s22 + $0x54] sm:$0xf] %vm963_vm2, %v952_v46  ;;  %v689_v30 = vadd.f32 %v657_v6, %v623_v22  ;;  %v960_v51 = vpack.c.bf16 %v1885_v31, %v1885_v31  ;;  %v777_v46 = vsel %vm319_vm1, %v1733_v9, 0.0 }
  0xe0   : > { %v1876_v23 = vld [vmem:[#allocation2 + $0xb0] sm:$0xff]  ;;  %991 = vst.msk [vmem:[%s1685_s22 + $0x6c] sm:$0xf] %vm963_vm2, %v958_v16  ;;  %v841_v9 = vmul.f32 %v1781_v50, %v1781_v50  ;;  %v882_v16 = vsel %vm319_vm1, %v840_v55, 0.0  ;;  %v783_v22 = vsel %vm319_vm1, %v1808_v12, 0.0  ;;  %v886_v50 = vsel %vm319_vm1, %v842_v17, 0.0 }
  0xe1   : > { %v733_v52 = vld [vmem:[#allocation2 + $0x38] sm:$0xff]  ;;  %714 = vst.msk [vmem:[#allocation2 + $0xb8] sm:$0xff] %vm319_vm1, %v681_v19  ;;  %v953_v37 = vpack.c.bf16 %v1876_v23, %v1876_v23  ;;  %v853_v17 = vmul.f32 %v1771_v45, %v1771_v45 }
  0xe2   : > { %v771_v32 = vsel %vm319_vm1, %v733_v52, 0.0  ;;  %v836_v33 = vmul.f32 %v733_v52, %v733_v52  ;;  %v938_v34 = vpack.c.bf16 %v733_v52, %v733_v52  ;;  %v741_v35 = vld [vmem:[#allocation2 + $0x78] sm:$0xff]  ;;  %722 = vst.msk [vmem:[#allocation2 + $0xf8] sm:$0xff] %vm319_vm1, %v689_v30  ;;  %v884_v20 = vsel %vm319_vm1, %v841_v9, 0.0 }
  0xe3   : > { %v772_v7 = vadd.f32 %v771_v32, %v770_v29  ;;  %v946_v39 = vpack.c.bf16 %v741_v35, %v741_v35  ;;  %986 = vst.msk [vmem:[%s1685_s22 + $0x58] sm:$0xf] %vm963_vm2, %v953_v37  ;;  %v785_v52 = vsel %vm319_vm1, %v1851_v58, 0.0  ;;  %v844_v30 = vmul.f32 %v741_v35, %v741_v35 }
  0xe4   : > { %v874_v48 = vsel %vm319_vm1, %v836_v33, 0.0  ;;  %971 = vst.msk [vmem:[%s1685_s22 + $0x1c] sm:$0xf] %vm963_vm2, %v938_v34  ;;  %v845_v34 = vmul.f32 %v1702_v49, %v1702_v49  ;;  %v888_v37 = vsel %vm319_vm1, %v843_v26, 0.0  ;;  %v787_v12 = vsel %vm319_vm1, %v741_v35, 0.0 }
  0xe5   : > { %v774_v53 = vadd.f32 %v773_v41, %v772_v7  ;;  %v875_v24 = vadd.f32 %v874_v48, %v873_v36  ;;  %979 = vst.msk [vmem:[%s1685_s22 + $0x3c] sm:$0xf] %vm963_vm2, %v946_v39  ;;  %v1913_v61 = vld [vmem:[#allocation2 + $0xf0] sm:$0xff]  ;;  %v789_v39 = vsel %vm319_vm1, %v1702_v49, 0.0  ;;  %v890_v58 = vsel %vm319_vm1, %v844_v30, 0.0 }
  0xe6   : > { %992 = vst.msk [vmem:[%s1685_s22 + $0x70] sm:$0xf] %vm963_vm2, %v959_v40  ;;  %v961_v13 = vpack.c.bf16 %v1913_v61, %v1913_v61  ;;  %v846_v40 = vmul.f32 %v1724_v5, %v1724_v5  ;;  %v892_v48 = vsel %vm319_vm1, %v845_v34, 0.0  ;;  %v847_v35 = vmul.f32 %v1746_v21, %v1746_v21 }
  0xe7   : > { %v776_v59 = vadd.f32 %v775_v38, %v774_v53  ;;  %v877_v60 = vadd.f32 %v876_v56, %v875_v24  ;;  %993 = vst.msk [vmem:[%s1685_s22 + $0x74] sm:$0xf] %vm963_vm2, %v960_v51  ;;  %v791_v51 = vsel %vm319_vm1, %v1724_v5, 0.0  ;;  %v793_v49 = vsel %vm319_vm1, %v1746_v21, 0.0 }
  0xe8   : > { %v1922_v0 = vld [vmem:[#allocation2 + $0xb8] sm:$0xff]  ;;  %994 = vst.msk [vmem:[%s1685_s22 + $0x78] sm:$0xf] %vm963_vm2, %v961_v13  ;;  %v894_v56 = vsel %vm319_vm1, %v846_v40, 0.0  ;;  %v848_v38 = vmul.f32 %v1768_v43, %v1768_v43  ;;  %v849_v5 = vmul.f32 %v1800_v2, %v1800_v2  ;;  %v850_v21 = vmul.f32 %v1842_v42, %v1842_v42 }
  0xe9   : > { %v778_v1 = vadd.f32 %v777_v46, %v776_v59  ;;  %v879_v3 = vadd.f32 %v878_v62, %v877_v60  ;;  %v954_v4 = vpack.c.bf16 %v1922_v0, %v1922_v0  ;;  %v1933_v11 = vld [vmem:[#allocation2 + $0xf8] sm:$0xff]  ;;  %v795_v60 = vsel %vm319_vm1, %v1768_v43, 0.0 }
  0xea   : > { %v962_v6 = vpack.c.bf16 %v1933_v11, %v1933_v11  ;;  %v896_v62 = vsel %vm319_vm1, %v847_v35, 0.0  ;;  %v799_v43 = vsel %vm319_vm1, %v1842_v42, 0.0  ;;  %v900_v9 = vsel %vm319_vm1, %v849_v5, 0.0 }
  0xeb   : > { %v881_v14 = vadd.f32 %v880_v8, %v879_v3  ;;  %v780_v15 = vadd.f32 %v779_v10, %v778_v1  ;;  %987 = vst.msk [vmem:[%s1685_s22 + $0x5c] sm:$0xf] %vm963_vm2, %v954_v4  ;;  %v797_v1 = vsel %vm319_vm1, %v1800_v2, 0.0  ;;  %v898_v3 = vsel %vm319_vm1, %v848_v38, 0.0 }
  0xec   : > { %995 = vst.msk [vmem:[%s1685_s22 + $0x7c] sm:$0xf] %vm963_vm2, %v962_v6  ;;  %v851_v10 = vmul.f32 %v1876_v23, %v1876_v23  ;;  %v801_v2 = vsel %vm319_vm1, %v1876_v23, 0.0  ;;  %v902_v6 = vsel %vm319_vm1, %v850_v21, 0.0  ;;  %v803_v42 = vsel %vm319_vm1, %v1922_v0, 0.0 }
  0xed   : > { %v782_v18 = vadd.f32 %v781_v27, %v780_v15  ;;  %v883_v19 = vadd.f32 %v882_v16, %v881_v14  ;;  %v852_v15 = vmul.f32 %v1922_v0, %v1922_v0  ;;  %v805_v23 = vsel %vm319_vm1, %v1771_v45, 0.0 }
  0xee   : > { %v807_v0 = vsel %vm319_vm1, %v1776_v47, 0.0  ;;  %v809_v45 = vsel %vm319_vm1, %v1846_v54, 0.0 }
  0xef   : > { %v784_v28 = vadd.f32 %v783_v22, %v782_v18  ;;  %v885_v29 = vadd.f32 %v884_v20, %v883_v19  ;;  %v904_v18 = vsel %vm319_vm1, %v851_v10, 0.0  ;;  %v854_v22 = vmul.f32 %v1776_v47, %v1776_v47 }
  0xf0   : > { %v906_v26 = vsel %vm319_vm1, %v852_v15, 0.0  ;;  %v811_v47 = vsel %vm319_vm1, %v1856_v63, 0.0 }
  0xf1   : > { %v786_v32 = vadd.f32 %v785_v52, %v784_v28  ;;  %v887_v33 = vadd.f32 %v886_v50, %v885_v29  ;;  %v855_v50 = vmul.f32 %v1846_v54, %v1846_v54  ;;  %v908_v52 = vsel %vm319_vm1, %v853_v17, 0.0 }
  0xf2   : > { %v910_v34 = vsel %vm319_vm1, %v854_v22, 0.0  ;;  %v813_v54 = vsel %vm319_vm1, %v1878_v25, 0.0 }
  0xf3   : > { %v889_v36 = vadd.f32 %v888_v37, %v887_v33  ;;  %v788_v7 = vadd.f32 %v787_v12, %v786_v32  ;;  %v856_v33 = vmul.f32 %v1856_v63, %v1856_v63  ;;  %v815_v63 = vsel %vm319_vm1, %v1885_v31, 0.0 }
  0xf5   : > { %v790_v41 = vadd.f32 %v789_v39, %v788_v7  ;;  %v891_v44 = vadd.f32 %v890_v58, %v889_v36  ;;  %v857_v36 = vmul.f32 %v1878_v25, %v1878_v25  ;;  %v912_v7 = vsel %vm319_vm1, %v855_v50, 0.0 }
  0xf6   : > { %v858_v58 = vmul.f32 %v1885_v31, %v1885_v31  ;;  %v817_v25 = vsel %vm319_vm1, %v1913_v61, 0.0  ;;  %v819_v31 = vsel %vm319_vm1, %v1933_v11, 0.0 }
  0xf7   : > { %v792_v53 = vadd.f32 %v791_v51, %v790_v41  ;;  %v893_v24 = vadd.f32 %v892_v48, %v891_v44  ;;  %v914_v41 = vsel %vm319_vm1, %v856_v33, 0.0  ;;  %v859_v51 = vmul.f32 %v1913_v61, %v1913_v61 }
  0xf8   : > { %v916_v35 = vsel %vm319_vm1, %v857_v36, 0.0 }
  0xf9   : > { %v794_v57 = vadd.f32 %v793_v49, %v792_v53  ;;  %v895_v59 = vadd.f32 %v894_v56, %v893_v24  ;;  %v860_v56 = vmul.f32 %v1933_v11, %v1933_v11  ;;  %v918_v49 = vsel %vm319_vm1, %v858_v58, 0.0 }
  0xfb   : > { %v796_v46 = vadd.f32 %v795_v60, %v794_v57  ;;  %v897_v55 = vadd.f32 %v896_v62, %v895_v59  ;;  %v920_v59 = vsel %vm319_vm1, %v859_v51, 0.0  ;;  %v922_v62 = vsel %vm319_vm1, %v860_v56, 0.0 }
  0xfd   : > { %v798_v4 = vadd.f32 %v797_v1, %v796_v46  ;;  %v899_v8 = vadd.f32 %v898_v3, %v897_v55 }
  0xff   : > { %v800_v13 = vadd.f32 %v799_v43, %v798_v4  ;;  %v901_v14 = vadd.f32 %v900_v9, %v899_v8 }
 0x101   : > { %v802_v16 = vadd.f32 %v801_v2, %v800_v13  ;;  %v903_v27 = vadd.f32 %v902_v6, %v901_v14 }
 0x103   : > { %v804_v19 = vadd.f32 %v803_v42, %v802_v16  ;;  %v905_v20 = vadd.f32 %v904_v18, %v903_v27 }
 0x105   : > { %v806_v28 = vadd.f32 %v805_v23, %v804_v19  ;;  %v907_v29 = vadd.f32 %v906_v26, %v905_v20 }
 0x107   : > { %v808_v30 = vadd.f32 %v807_v0, %v806_v28  ;;  %v909_v32 = vadd.f32 %v908_v52, %v907_v29 }
 0x109   : > { %v810_v37 = vadd.f32 %v809_v45, %v808_v30  ;;  %v911_v12 = vadd.f32 %v910_v34, %v909_v32 }
 0x10b   : > { %v812_v39 = vadd.f32 %v811_v47, %v810_v37  ;;  %v913_v40 = vadd.f32 %v912_v7, %v911_v12 }
 0x10d   : > { %v814_v44 = vadd.f32 %v813_v54, %v812_v39  ;;  %v915_v48 = vadd.f32 %v914_v41, %v913_v40 }
 0x10f   : > { %v816_v53 = vadd.f32 %v815_v63, %v814_v44  ;;  %v917_v24 = vadd.f32 %v916_v35, %v915_v48 }
 0x111   : > { %v818_v38 = vadd.f32 %v817_v25, %v816_v53  ;;  %v919_v57 = vadd.f32 %v918_v49, %v917_v24 }
 0x113   : > { %v820_v60 = vadd.f32 %v819_v31, %v818_v38  ;;  %v921_v5 = vadd.f32 %v920_v59, %v919_v57 }
 0x115   : > { %v821_v46 = vrot.slane %v820_v60, 4  ;;  %v923_v61 = vadd.f32 %v922_v62, %v921_v5 }
 0x117   : > { %v822_v55 = vadd.f32 %v821_v46, %v820_v60  ;;  %v924_v1 = vrot.slane %v923_v61, 4 }
 0x119   : > { %v823_v21 = vrot.slane %v822_v55, 2  ;;  %v925_v11 = vadd.f32 %v924_v1, %v923_v61 }
 0x11b   : > { %v824_v3 = vadd.f32 %v823_v21, %v822_v55  ;;  %v926_v4 = vrot.slane %v925_v11, 2 }
 0x11d   : > { %v825_v8 = vrot.slane %v824_v3, 1  ;;  %v927_v43 = vadd.f32 %v926_v4, %v925_v11 }
 0x11f   : > { %v826_v10 = vadd.f32 %v825_v8, %v824_v3  ;;  %v928_v9 = vrot.slane %v927_v43, 1 }
 0x121   : > { %828 = vst.msk [vmem:[%s274_s8] sm:$0x1] %vm827_vm3, %v826_v10  ;;  %v929_v13 = vadd.f32 %v928_v9, %v927_v43 }
 0x122   : > { %1428 = shalt.err (!%p1425_p5)
}
 0x123   : > { %1340 = dma.vmem_to_hbm [thread:$0]  (%p1579_p4), %s1027_s9, 16, %s1029_s10, %s1006_s18   ;;  %930 = vst.msk [vmem:[%s280_s11] sm:$0x1] %vm827_vm3, %v929_v13 }
 0x124   : > { %s1010_s6 = scalar_lea.sflag [#allocation6], %s2042_s24  ;;  %s1443_s7 = sshra.s32 %s1044_s13, 4  ;;  %s1444_s7 = int_to_ptr.hbm [resolvable:$true] %s1443_s7 }
 0x125   : > { %s1445_s8 = scalar_lea.hbm %s1444_s7, 1  ;;  %s1449_s22 = scalar_lea.hbm %s2122_s4, 2 }
 0x126   : > { %p1446_p6 = scmp.ne.s32.totalorder %s1444_s7, %s1445_s8  ;;  %p1450_p10 = scmp.lt.s32.totalorder %s1444_s7, %s2122_s4 }
 0x127   : > { %p1451_p11 = scmp.lt.s32.totalorder %s1449_s22, %s1445_s8 }
 0x128   : > { %p1447_p7 = pnand %p1446_p6, %p1579_p4 }
 0x129   : > { %p1452_p12 = por %p1451_p11, %p1450_p10 }
 0x12a   : > { %p1448_p9 = pneg %p1447_p7 }
 0x12c   : > { %p1453_p13 = pnand %p1452_p12, %p1448_p9 }
 0x12e   : > { %1456 = shalt.err (!%p1453_p13)
}
 0x12f   : > { %1341 = dma.vmem_to_hbm [thread:$0]  (%p1579_p4), %s1042_s12, 16, %s1044_s13, %s1010_s6  }
 0x130 PF: > { %p1351_p0 = scmp.ge.s32.totalorder %s1511_s20, 2  ;;  %s1067_s24 = sand.u32 1, %s1491_s15  }
 0x131   : > { %s1068_s9 = scalar_lea.sflag [#allocation4], %s1067_s24 }
 0x132   : > { %p1345_p1 = pnand %p1351_p0, %p1586_p8 }
 0x134   : > { %p1346_p2 = pneg %p1345_p1 }
 0x136   : > { %1482 = dma.done.wait (%p1346_p2), %s1068_s9, 16  }
 0x137   : > { %1484 = vsyncadd (%p1346_p2), %s1068_s9, 4294967280  ;;  %s1077_s10 = scalar_lea.sflag [#allocation6], %s1067_s24 }
 0x138   : > { %1486 = dma.done.wait (%p1346_p2), %s1077_s10, 16  }
 0x139   : > { %1488 = vsyncadd (%p1346_p2), %s1077_s10, 4294967280  ;;  %s21_s20 = sadd.s32 1, %s1511_s20   ;;  %s2125_s15 = smov %s1495_s16 }
 0x13a   : > { %p18_p3 = scmp.ge.s32.totalorder %s21_s20, 4   ;;  %s2126_s16 = smov %s1499_s17 }
 0x13b   : > { %s2127_s17 = smov %s1592_s28  ;;  %s2128_s18 = smov %s1507_s19 }
 0x13c   : > { %s2129_s19 = smov %s2131_s23  ;;  %20 = sbr.rel (!%p18_p3) target bundleno = 6 (0x6), region = 103 }
 0x141   :  { %1082 = vsyncpa [#allocation4], 1 }
 0x142   :  { %1084 = vsyncpa [#allocation4 + $0x1], 1 }
 0x143   :  { %1085 = vsyncpa [#allocation6], 1 }
 0x144   :  { %1087 = vsyncpa [#allocation6 + $0x1], 1 }

// kernel: _lambda_.11
= control target key start
LH: loop header
LB: loop body
LE: loop exit
PB: predicated region body
PF: predicated region fallthrough
CT: control target
= control target key end

     0   :  { %s1109_s1 = inlined_call_operand.vmem [shape: bf16[1,128,16], index: 1, kind: input, shape index: {}]   ;;  %s1110_s0 = inlined_call_operand.vmem [shape: bf16[1,128,128], index: 0, kind: input, shape index: {}]   ;;  %s1111_s2 = inlined_call_operand.vmem [shape: bf16[1,128,16], index: 2, kind: output, shape index: {0}]   ;;  %s1112_s3 = inlined_call_operand.vmem [shape: f32[1,1,1,16], index: 3, kind: output, shape index: {1}]   ;;  %s1113_s4 = inlined_call_operand.vmem [shape: f32[1,1,1,16], index: 4, kind: output, shape index: {2}]  }
   0x1   :  { %v553_v0 = vld [vmem:[%s1109_s1 + $0x38] sm:$0xff]  ;;  %v552_v1 = vld [vmem:[%s1109_s1 + $0x30] sm:$0xff]  ;;  %v35_v2 = vld [vmem:[%s1110_s0] sm:$0xf] }
   0x2   :  { %259 = vmatpush.bf16.msra.mxu0 %v553_v0  ;;  %554 = vmatpush.bf16.msra.mxu1 %v553_v0  ;;  %v36_v3 = vld [vmem:[%s1110_s0 + $0x4] sm:$0xf]  ;;  %v620_v4 = vld [vmem:[%s1110_s0 + $0x10] sm:$0xf]  ;;  %v625_v5 = vld [vmem:[%s1110_s0 + $0x14] sm:$0xf]  ;;  %v51_v7 = vunpack.c.l.bf16 %v35_v2 }
   0x3   :  { %555 = vmatpush.bf16.msra.mxu2 %v553_v0  ;;  %556 = vmatpush.bf16.msra.mxu3 %v553_v0  ;;  %v551_v6 = vld [vmem:[%s1109_s1 + $0x28] sm:$0xff]  ;;  %v52_v8 = vunpack.c.l.bf16 %v36_v3  ;;  %v633_v9 = vld [vmem:[%s1110_s0 + $0x20] sm:$0xf]  ;;  %v638_v10 = vld [vmem:[%s1110_s0 + $0x24] sm:$0xf]  ;;  %v55_v11 = vunpack.c.l.bf16 %v620_v4  ;;  %v56_v12 = vunpack.c.l.bf16 %v625_v5 }
   0x4   :  { %v645_v13 = vld [vmem:[%s1110_s0 + $0x30] sm:$0xf]  ;;  %v650_v14 = vld [vmem:[%s1110_s0 + $0x34] sm:$0xf]  ;;  %v59_v15 = vunpack.c.l.bf16 %v633_v9  ;;  %v60_v16 = vunpack.c.l.bf16 %v638_v10  ;;  %v550_v17 = vld [vmem:[%s1109_s1 + $0x20] sm:$0xff]  ;;  %vm657_vm0 = vcmp.ge.f32.partialorder %v51_v7, 0.0 }
   0x5   :  { %v83_v19 = vmul.f32 0.20019531, %v51_v7  ;;  %v84_v20 = vmul.f32 0.20019531, %v52_v8  ;;  %vm661_vm1 = vcmp.ge.f32.partialorder %v52_v8, 0.0  ;;  %v63_v22 = vunpack.c.l.bf16 %v645_v13  ;;  %vm115_vm3 = vmpackc.low %vm657_vm0, %vm657_vm0  ;;  %v549_v30 = vld [vmem:[%s1109_s1 + $0x18] sm:$0xff]  ;;  %v548_v43 = vld [vmem:[%s1109_s1 + $0x10] sm:$0xff] }
   0x6   :  { %260 = vmatpush.bf16.msra.mxu0 %v552_v1  ;;  %557 = vmatpush.bf16.msra.mxu1 %v552_v1  ;;  %v64_v23 = vunpack.c.l.bf16 %v650_v14  ;;  %vm667_vm2 = vcmp.ge.f32.partialorder %v55_v11, 0.0  ;;  %v87_v25 = vmul.f32 0.20019531, %v55_v11  ;;  %v88_v26 = vmul.f32 0.20019531, %v56_v12  ;;  %vm116_vm5 = vmpackc.low %vm661_vm1, %vm661_vm1  ;;  %v547_v50 = vld [vmem:[%s1109_s1 + $0x8] sm:$0xff]  ;;  %v766_v57 = vld [vmem:[%s1110_s0 + $0x18] sm:$0xf] }
   0x7   :  { %558 = vmatpush.bf16.msra.mxu2 %v552_v1  ;;  %559 = vmatpush.bf16.msra.mxu3 %v552_v1  ;;  %vm674_vm4 = vcmp.ge.f32.partialorder %v56_v12, 0.0  ;;  %v91_v28 = vmul.f32 0.20019531, %v59_v15  ;;  %v92_v29 = vmul.f32 0.20019531, %v60_v16  ;;  %v99_v31 = vpack.c.bf16 %v83_v19, %v83_v19  ;;  %vm119_vm7 = vmpackc.low %vm667_vm2, %vm667_vm2  ;;  %v756_v55 = vld [vmem:[%s1110_s0 + $0x8] sm:$0xf]  ;;  %v546_v11 = vld [vmem:[%s1109_s1] sm:$0xff] }
   0x8   :  { %v100_v32 = vpack.c.bf16 %v84_v20, %v84_v20  ;;  %vm684_vm6 = vcmp.ge.f32.partialorder %v59_v15, 0.0  ;;  %vm691_vm8 = vcmp.ge.f32.partialorder %v60_v16, 0.0  ;;  %v95_v35 = vmul.f32 0.20019531, %v63_v22  ;;  %vm120_vm9 = vmpackc.low %vm674_vm4, %vm674_vm4  ;;  %v761_v56 = vld [vmem:[%s1110_s0 + $0xc] sm:$0xf] }
   0x9   :  { %v96_v36 = vmul.f32 0.20019531, %v64_v23  ;;  %v103_v37 = vpack.c.bf16 %v87_v25, %v87_v25  ;;  %v104_v38 = vpack.c.bf16 %v88_v26, %v88_v26  ;;  %vm698_vm10 = vcmp.ge.f32.partialorder %v63_v22, 0.0  ;;  %vm123_vm11 = vmpackc.low %vm684_vm6, %vm684_vm6  ;;  %v771_v58 = vld [vmem:[%s1110_s0 + $0x1c] sm:$0xf]  ;;  %v776_v59 = vld [vmem:[%s1110_s0 + $0x28] sm:$0xf] }
   0xa   :  { %261 = vmatpush.bf16.msra.mxu0 %v551_v6  ;;  %560 = vmatpush.bf16.msra.mxu1 %v551_v6  ;;  %v107_v40 = vpack.c.bf16 %v91_v28, %v91_v28  ;;  %v108_v41 = vpack.c.bf16 %v92_v29, %v92_v29  ;;  %vm705_vm12 = vcmp.ge.f32.partialorder %v64_v23, 0.0  ;;  %v131_v44 = vsel %vm115_vm3, %v35_v2, %v99_v31  ;;  %vm124_vm13 = vmpackc.low %vm691_vm8, %vm691_vm8 }
   0xb   :  { %561 = vmatpush.bf16.msra.mxu2 %v551_v6  ;;  %562 = vmatpush.bf16.msra.mxu3 %v551_v6  ;;  %v132_v45 = vsel %vm116_vm5, %v36_v3, %v100_v32  ;;  %v111_v46 = vpack.c.bf16 %v95_v35, %v95_v35  ;;  %v112_v47 = vpack.c.bf16 %v96_v36, %v96_v36  ;;  %vm127_vm14 = vmpackc.low %vm698_vm10, %vm698_vm10  ;;  %v179_v51 = vunpack.c.l.b16 %v131_v44  ;;  %v805_v6 = vld [vmem:[%s1110_s0 + $0x3c] sm:$0xf] }
   0xc   :  { %v135_v48 = vsel %vm119_vm7, %v620_v4, %v103_v37  ;;  %v136_v49 = vsel %vm120_vm9, %v625_v5, %v104_v38  ;;  %vm128_vm15 = vmpackc.low %vm705_vm12, %vm705_vm12  ;;  %v180_v52 = vunpack.c.l.b16 %v132_v45  ;;  %v139_v53 = vsel %vm123_vm11, %v633_v9, %v107_v40  ;;  %v795_v4 = vld [vmem:[%s1110_s0 + $0x2c] sm:$0xf]  ;;  %v800_v5 = vld [vmem:[%s1110_s0 + $0x38] sm:$0xf] }
   0xd   :  { %v140_v54 = vsel %vm124_vm13, %v638_v10, %v108_v41  ;;  %v183_v60 = vunpack.c.l.b16 %v135_v48  ;;  %v184_v61 = vunpack.c.l.b16 %v136_v49  ;;  %v143_v62 = vsel %vm127_vm14, %v645_v13, %v111_v46 }
   0xe   :  { %262 = vmatpush.bf16.msra.mxu0 %v550_v17  ;;  %563 = vmatpush.bf16.msra.mxu1 %v550_v17  ;;  %v144_v63 = vsel %vm128_vm15, %v650_v14, %v112_v47  ;;  %v187_v0 = vunpack.c.l.b16 %v139_v53  ;;  %v188_v1 = vunpack.c.l.b16 %v140_v54  ;;  %v53_v2 = vunpack.c.l.bf16 %v756_v55 }
   0xf   :  { %564 = vmatpush.bf16.msra.mxu2 %v550_v17  ;;  %565 = vmatpush.bf16.msra.mxu3 %v550_v17  ;;  %v54_v3 = vunpack.c.l.bf16 %v761_v56  ;;  %v195_v7 = vpack.c.b16 %v180_v52, %v179_v51  ;;  %v57_v8 = vunpack.c.l.bf16 %v766_v57  ;;  %v58_v9 = vunpack.c.l.bf16 %v771_v58 }
  0x10   :  { %v61_v10 = vunpack.c.l.bf16 %v776_v59  ;;  %v191_v12 = vunpack.c.l.b16 %v143_v62  ;;  %v192_v13 = vunpack.c.l.b16 %v144_v63  ;;  %vm813_vm0 = vcmp.ge.f32.partialorder %v53_v2, 0.0 }
  0x11   :  { %vm817_vm1 = vcmp.ge.f32.partialorder %v54_v3, 0.0  ;;  %v62_v16 = vunpack.c.l.bf16 %v795_v4  ;;  %v65_v17 = vunpack.c.l.bf16 %v800_v5  ;;  %v66_v18 = vunpack.c.l.bf16 %v805_v6  ;;  %vm117_vm4 = vmpackc.low %vm813_vm0, %vm813_vm0 }
  0x12   :  { %263 = vmatpush.bf16.msra.mxu0 %v549_v30  ;;  %566 = vmatpush.bf16.msra.mxu1 %v549_v30  ;;  %vm18_vm2 = vcmask 130048   ;;  %v197_v19 = vpack.c.b16 %v184_v61, %v183_v60  ;;  %v199_v20 = vpack.c.b16 %v188_v1, %v187_v0  ;;  %vm824_vm3 = vcmp.ge.f32.partialorder %v57_v8, 0.0  ;;  %vm118_vm6 = vmpackc.low %vm817_vm1, %vm817_vm1 }
  0x13   :  { %567 = vmatpush.bf16.msra.mxu2 %v549_v30  ;;  %568 = vmatpush.bf16.msra.mxu3 %v549_v30  ;;  %v85_v22 = vmul.f32 0.20019531, %v53_v2  ;;  %v86_v23 = vmul.f32 0.20019531, %v54_v3  ;;  %vm831_vm5 = vcmp.ge.f32.partialorder %v58_v9, 0.0  ;;  %v89_v25 = vmul.f32 0.20019531, %v57_v8  ;;  %vm121_vm8 = vmpackc.low %vm824_vm3, %vm824_vm3 }
  0x14   :  { %v579_v26 = vmov 0.0   ;;  %v201_v27 = vpack.c.b16 %v192_v13, %v191_v12  ;;  %v90_v28 = vmul.f32 0.20019531, %v58_v9  ;;  %vm840_vm7 = vcmp.ge.f32.partialorder %v61_v10, 0.0  ;;  %vm122_vm10 = vmpackc.low %vm831_vm5, %vm831_vm5 }
  0x15   :  { %19 = vst.msk [vmem:[#allocation2] sm:$0xff] %vm18_vm2, %v579_v26  ;;  %v93_v30 = vmul.f32 0.20019531, %v61_v10  ;;  %vm849_vm9 = vcmp.ge.f32.partialorder %v62_v16, 0.0  ;;  %v94_v32 = vmul.f32 0.20019531, %v62_v16  ;;  %v97_v33 = vmul.f32 0.20019531, %v65_v17  ;;  %vm1146_vm0 = vmpackc.low %vm840_vm7, %vm840_vm7 }
  0x16   :  { %264 = vmatpush.bf16.msra.mxu0 %v548_v43  ;;  %569 = vmatpush.bf16.msra.mxu1 %v548_v43  ;;  %20 = vst.msk [vmem:[#allocation2 + $0x8] sm:$0xff] %vm18_vm2, %v579_v26  ;;  %v98_v34 = vmul.f32 0.20019531, %v66_v18  ;;  %vm858_vm11 = vcmp.ge.f32.partialorder %v65_v17, 0.0  ;;  %v101_v36 = vpack.c.bf16 %v85_v22, %v85_v22  ;;  %vm867_vm13 = vcmp.ge.f32.partialorder %v66_v18, 0.0  ;;  %vm126_vm14 = vmpackc.low %vm849_vm9, %vm849_vm9 }
  0x17   :  { %570 = vmatpush.bf16.msra.mxu2 %v548_v43  ;;  %571 = vmatpush.bf16.msra.mxu3 %v548_v43  ;;  %21 = vst.msk [vmem:[#allocation2 + $0x10] sm:$0xff] %vm18_vm2, %v579_v26  ;;  %v102_v38 = vpack.c.bf16 %v86_v23, %v86_v23  ;;  %v105_v39 = vpack.c.bf16 %v89_v25, %v89_v25  ;;  %vm129_vm15 = vmpackc.low %vm858_vm11, %vm858_vm11  ;;  %vm485_vm1 = vcmask 125952   ;;  %vm413_vm3 = vcmask 122880  }
  0x18   :  { %22 = vst.msk [vmem:[#allocation2 + $0x18] sm:$0xff] %vm18_vm2, %v579_v26  ;;  %v106_v40 = vpack.c.bf16 %v90_v28, %v90_v28  ;;  %v109_v41 = vpack.c.bf16 %v93_v30, %v93_v30  ;;  %v110_v42 = vpack.c.bf16 %v94_v32, %v94_v32  ;;  %v113_v43 = vpack.c.bf16 %v97_v33, %v97_v33  ;;  %vm130_vm12 = vmpackc.low %vm867_vm13, %vm867_vm13 }
  0x19   :  { %23 = vst.msk [vmem:[#allocation2 + $0x20] sm:$0xff] %vm18_vm2, %v579_v26  ;;  %v114_v44 = vpack.c.bf16 %v98_v34, %v98_v34  ;;  %v133_v45 = vsel %vm117_vm4, %v756_v55, %v101_v36  ;;  %v134_v46 = vsel %vm118_vm6, %v761_v56, %v102_v38  ;;  %v137_v47 = vsel %vm121_vm8, %v766_v57, %v105_v39 }
  0x1a   :  { %265 = vmatpush.bf16.msra.mxu0 %v547_v50  ;;  %572 = vmatpush.bf16.msra.mxu1 %v547_v50  ;;  %24 = vst.msk [vmem:[#allocation2 + $0x28] sm:$0xff] %vm18_vm2, %v579_v26  ;;  %v138_v48 = vsel %vm122_vm10, %v771_v58, %v106_v40  ;;  %v141_v49 = vsel %vm1146_vm0, %v776_v59, %v109_v41  ;;  %v181_v53 = vunpack.c.l.b16 %v133_v45  ;;  %v182_v54 = vunpack.c.l.b16 %v134_v46 }
  0x1b   :  { %573 = vmatpush.bf16.msra.mxu2 %v547_v50  ;;  %574 = vmatpush.bf16.msra.mxu3 %v547_v50  ;;  %25 = vst.msk [vmem:[#allocation2 + $0x30] sm:$0xff] %vm18_vm2, %v579_v26  ;;  %v142_v50 = vsel %vm126_vm14, %v795_v4, %v110_v42  ;;  %v145_v51 = vsel %vm129_vm15, %v800_v5, %v113_v43  ;;  %v185_v55 = vunpack.c.l.b16 %v137_v47  ;;  %v186_v56 = vunpack.c.l.b16 %v138_v48 }
  0x1c   :  { %26 = vst.msk [vmem:[#allocation2 + $0x38] sm:$0xff] %vm18_vm2, %v579_v26  ;;  %v146_v52 = vsel %vm130_vm12, %v805_v6, %v114_v44  ;;  %v189_v57 = vunpack.c.l.b16 %v141_v49  ;;  %v190_v58 = vunpack.c.l.b16 %v142_v50  ;;  %v193_v59 = vunpack.c.l.b16 %v145_v51  ;;  %v308_v1 = vld [vmem:[#allocation2] sm:$0xff] }
  0x1d   :  { %27 = vst.msk [vmem:[#allocation2 + $0x40] sm:$0xff] %vm18_vm2, %v579_v26  ;;  %v194_v60 = vunpack.c.l.b16 %v146_v52  ;;  %v196_v61 = vpack.c.b16 %v182_v54, %v181_v53  ;;  %v198_v62 = vpack.c.b16 %v186_v56, %v185_v55  ;;  %v309_v8 = vld [vmem:[#allocation2 + $0x8] sm:$0xff] }
  0x1e   :  { %266 = vmatpush.bf16.msra.mxu0 %v546_v11  ;;  %575 = vmatpush.bf16.msra.mxu1 %v546_v11  ;;  %28 = vst.msk [vmem:[#allocation2 + $0x48] sm:$0xff] %vm18_vm2, %v579_v26  ;;  %v200_v63 = vpack.c.b16 %v190_v58, %v189_v57  ;;  %v310_v24 = vld [vmem:[#allocation2 + $0x10] sm:$0xff] }
  0x1f   :  { %576 = vmatpush.bf16.msra.mxu2 %v546_v11  ;;  %577 = vmatpush.bf16.msra.mxu3 %v546_v11  ;;  %29 = vst.msk [vmem:[#allocation2 + $0x50] sm:$0xff] %vm18_vm2, %v579_v26  ;;  %v202_v0 = vpack.c.b16 %v194_v60, %v193_v59  ;;  %v311_v43 = vld [vmem:[#allocation2 + $0x18] sm:$0xff] }
  0x20   :  { %30 = vst.msk [vmem:[#allocation2 + $0x58] sm:$0xff] %vm18_vm2, %v579_v26  ;;  %v312_v2 = vld [vmem:[#allocation2 + $0x20] sm:$0xff] }
  0x21   :  { %267 = vmatmul.bf16.vlgmr.msra.gmra.mxu0 %v195_v7  ;;  %277 = vmatmul.bf16.vlgmr.msra.gmra.mxu1 %v197_v19  ;;  %31 = vst.msk [vmem:[#allocation2 + $0x60] sm:$0xff] %vm18_vm2, %v579_v26  ;;  %v313_v9 = vld [vmem:[#allocation2 + $0x28] sm:$0xff] }
  0x22   :  { %287 = vmatmul.bf16.vlgmr.msra.gmra.mxu2 %v199_v20  ;;  %297 = vmatmul.bf16.vlgmr.msra.gmra.mxu3 %v201_v27  ;;  %32 = vst.msk [vmem:[#allocation2 + $0x68] sm:$0xff] %vm18_vm2, %v579_v26  ;;  %v314_v29 = vld [vmem:[#allocation2 + $0x30] sm:$0xff] }
  0x23   :  { %33 = vst.msk [vmem:[#allocation2 + $0x70] sm:$0xff] %vm18_vm2, %v579_v26  ;;  %v315_v45 = vld [vmem:[#allocation2 + $0x38] sm:$0xff] }
  0x24   :  { %34 = vst.msk [vmem:[#allocation2 + $0x78] sm:$0xff] %vm18_vm2, %v579_v26  ;;  %v316_v7 = vld [vmem:[#allocation2 + $0x40] sm:$0xff] }
  0x25   :  { %v317_v23 = vld [vmem:[#allocation2 + $0x48] sm:$0xff] }
  0x26   :  { %v318_v41 = vld [vmem:[#allocation2 + $0x50] sm:$0xff] }
  0x28   :  { %v320_v15 = vld [vmem:[#allocation2 + $0x60] sm:$0xff] }
  0x29   :  { %v321_v33 = vld [vmem:[#allocation2 + $0x68] sm:$0xff] }
  0x2a   :  { %v322_v51 = vld [vmem:[#allocation2 + $0x70] sm:$0xff] }
  0x31   :  { %272 = vmatmul.bf16.gmra.mxu0 %v196_v61  ;;  %282 = vmatmul.bf16.gmra.mxu1 %v198_v62 }
  0x32   :  { %292 = vmatmul.bf16.gmra.mxu2 %v200_v63  ;;  %302 = vmatmul.bf16.gmra.mxu3 %v202_v0  ;;  %v319_v63 = vld [vmem:[#allocation2 + $0x58] sm:$0xff] }
  0x9e   :  { %v268_v3 = vpop.f32.mrf.mxu0  ;;  %v278_v4 = vpop.f32.mrf.mxu1 }
  0x9f   :  { %v324_v5 = vadd.f32 %v308_v1, %v268_v3  ;;  %v328_v6 = vadd.f32 %v312_v2, %v278_v4 }
  0xa1   :  { %341 = vst.msk [vmem:[#allocation2] sm:$0xff] %vm18_vm2, %v324_v5 }
  0xa2   :  { %345 = vst.msk [vmem:[#allocation2 + $0x20] sm:$0xff] %vm18_vm2, %v328_v6 }
  0xa5   :  { %v288_v10 = vpop.f32.mrf.mxu2  ;;  %v298_v11 = vpop.f32.mrf.mxu3 }
  0xa6   :  { %v270_v12 = vpop.f32.mrf.mxu0  ;;  %v280_v13 = vpop.f32.mrf.mxu1  ;;  %v332_v14 = vadd.f32 %v316_v7, %v288_v10  ;;  %v336_v21 = vadd.f32 %v320_v15, %v298_v11 }
  0xa7   :  { %v325_v16 = vadd.f32 %v309_v8, %v270_v12  ;;  %v329_v17 = vadd.f32 %v313_v9, %v280_v13  ;;  %v323_v8 = vld [vmem:[#allocation2 + $0x78] sm:$0xff] }
  0xa8   :  { %v944_v18 = vld [vmem:[#allocation2] sm:$0xff]  ;;  %349 = vst.msk [vmem:[#allocation2 + $0x40] sm:$0xff] %vm18_vm2, %v332_v14 }
  0xa9   :  { %v469_v19 = vpack.c.bf16 %v944_v18, %v944_v18  ;;  %v949_v20 = vld [vmem:[#allocation2 + $0x20] sm:$0xff]  ;;  %342 = vst.msk [vmem:[#allocation2 + $0x8] sm:$0xff] %vm18_vm2, %v325_v16  ;;  %v415_v60 = vmul.f32 %v944_v18, %v944_v18  ;;  %v376_v1 = vsel %vm18_vm2, %v944_v18, 0.0 }
  0xaa   :  { %v473_v22 = vpack.c.bf16 %v949_v20, %v949_v20  ;;  %346 = vst.msk [vmem:[#allocation2 + $0x28] sm:$0xff] %vm18_vm2, %v329_v17  ;;  %v419_v13 = vmul.f32 %v949_v20, %v949_v20 }
  0xab   :  { %486 = vst.msk [vmem:[%s1111_s2] sm:$0xf] %vm485_vm1, %v469_v19  ;;  %v431_v12 = vsel %vm18_vm2, %v415_v60, 0.0 }
  0xac   :  { %490 = vst.msk [vmem:[%s1111_s2 + $0x10] sm:$0xf] %vm485_vm1, %v473_v22 }
  0xad   :  { %v290_v25 = vpop.f32.mrf.mxu2  ;;  %353 = vst.msk [vmem:[#allocation2 + $0x60] sm:$0xff] %vm18_vm2, %v336_v21  ;;  %v300_v26 = vpop.f32.mrf.mxu3 }
  0xae   :  { %v273_v27 = vpop.f32.mrf.mxu0  ;;  %v283_v28 = vpop.f32.mrf.mxu1  ;;  %v333_v30 = vadd.f32 %v317_v23, %v290_v25  ;;  %v337_v40 = vadd.f32 %v321_v33, %v300_v26 }
  0xaf   :  { %v964_v31 = vld [vmem:[#allocation2 + $0x40] sm:$0xff]  ;;  %v326_v32 = vadd.f32 %v310_v24, %v273_v27  ;;  %v330_v38 = vadd.f32 %v314_v29, %v283_v28  ;;  %v383_v27 = vsel %vm18_vm2, %v949_v20, 0.0 }
  0xb0   :  { %v361_v34 = vld [vmem:[#allocation2 + $0x8] sm:$0xff]  ;;  %v477_v35 = vpack.c.bf16 %v964_v31, %v964_v31  ;;  %350 = vst.msk [vmem:[#allocation2 + $0x48] sm:$0xff] %vm18_vm2, %v333_v30 }
  0xb1   :  { %v470_v36 = vpack.c.bf16 %v361_v34, %v361_v34  ;;  %v969_v37 = vld [vmem:[#allocation2 + $0x28] sm:$0xff]  ;;  %343 = vst.msk [vmem:[#allocation2 + $0x10] sm:$0xff] %vm18_vm2, %v326_v32  ;;  %v416_v57 = vmul.f32 %v361_v34, %v361_v34  ;;  %v377_v61 = vsel %vm18_vm2, %v361_v34, 0.0  ;;  %v438_v32 = vsel %vm18_vm2, %v419_v13, 0.0 }
  0xb2   :  { %v474_v39 = vpack.c.bf16 %v969_v37, %v969_v37  ;;  %494 = vst.msk [vmem:[%s1111_s2 + $0x20] sm:$0xf] %vm485_vm1, %v477_v35  ;;  %v378_v9 = vadd.f32 %v377_v61, %v376_v1  ;;  %v420_v28 = vmul.f32 %v969_v37, %v969_v37  ;;  %v385_v20 = vsel %vm18_vm2, %v969_v37, 0.0 }
  0xb3   :  { %487 = vst.msk [vmem:[%s1111_s2 + $0x4] sm:$0xf] %vm485_vm1, %v470_v36  ;;  %v432_v2 = vsel %vm18_vm2, %v416_v57, 0.0  ;;  %v423_v37 = vmul.f32 %v964_v31, %v964_v31 }
  0xb4   :  { %491 = vst.msk [vmem:[%s1111_s2 + $0x14] sm:$0xf] %vm485_vm1, %v474_v39  ;;  %v986_v42 = vld [vmem:[#allocation2 + $0x60] sm:$0xff]  ;;  %v433_v16 = vadd.f32 %v432_v2, %v431_v12 }
  0xb5   :  { %347 = vst.msk [vmem:[#allocation2 + $0x30] sm:$0xff] %vm18_vm2, %v330_v38  ;;  %v481_v44 = vpack.c.bf16 %v986_v42, %v986_v42  ;;  %v293_v46 = vpop.f32.mrf.mxu2  ;;  %v303_v47 = vpop.f32.mrf.mxu3  ;;  %v446_v61 = vsel %vm18_vm2, %v423_v37, 0.0  ;;  %v399_v12 = vsel %vm18_vm2, %v986_v42, 0.0 }
  0xb6   :  { %v275_v48 = vpop.f32.mrf.mxu0  ;;  %v285_v49 = vpop.f32.mrf.mxu1  ;;  %v334_v50 = vadd.f32 %v318_v41, %v293_v46  ;;  %354 = vst.msk [vmem:[#allocation2 + $0x68] sm:$0xff] %vm18_vm2, %v337_v40  ;;  %v338_v59 = vadd.f32 %v322_v51, %v303_v47 }
  0xb7   :  { %v992_v52 = vld [vmem:[#allocation2 + $0x48] sm:$0xff]  ;;  %498 = vst.msk [vmem:[%s1111_s2 + $0x30] sm:$0xf] %vm485_vm1, %v481_v44  ;;  %v327_v53 = vadd.f32 %v311_v43, %v275_v48  ;;  %v331_v56 = vadd.f32 %v315_v45, %v285_v49  ;;  %v440_v43 = vsel %vm18_vm2, %v420_v28, 0.0 }
  0xb8   :  { %v362_v54 = vld [vmem:[#allocation2 + $0x10] sm:$0xff]  ;;  %v478_v55 = vpack.c.bf16 %v992_v52, %v992_v52  ;;  %351 = vst.msk [vmem:[#allocation2 + $0x50] sm:$0xff] %vm18_vm2, %v334_v50 }
  0xb9   :  { %v471_v58 = vpack.c.bf16 %v362_v54, %v362_v54  ;;  %344 = vst.msk [vmem:[#allocation2 + $0x18] sm:$0xff] %vm18_vm2, %v327_v53  ;;  %v417_v62 = vmul.f32 %v362_v54, %v362_v54  ;;  %v379_v3 = vsel %vm18_vm2, %v362_v54, 0.0 }
  0xba   :  { %495 = vst.msk [vmem:[%s1111_s2 + $0x24] sm:$0xf] %vm485_vm1, %v478_v55  ;;  %v380_v17 = vadd.f32 %v379_v3, %v378_v9  ;;  %v391_v55 = vsel %vm18_vm2, %v964_v31, 0.0 }
  0xbb   :  { %488 = vst.msk [vmem:[%s1111_s2 + $0x8] sm:$0xf] %vm485_vm1, %v471_v58  ;;  %v434_v14 = vsel %vm18_vm2, %v417_v62, 0.0  ;;  %v393_v62 = vsel %vm18_vm2, %v992_v52, 0.0 }
  0xbc   :  { %v366_v0 = vld [vmem:[#allocation2 + $0x30] sm:$0xff]  ;;  %348 = vst.msk [vmem:[#allocation2 + $0x38] sm:$0xff] %vm18_vm2, %v331_v56  ;;  %v435_v25 = vadd.f32 %v434_v14, %v433_v16  ;;  %v424_v56 = vmul.f32 %v992_v52, %v992_v52 }
  0xbd   :  { %v475_v4 = vpack.c.bf16 %v366_v0, %v366_v0  ;;  %v1018_v5 = vld [vmem:[#allocation2 + $0x68] sm:$0xff]  ;;  %v295_v6 = vpop.f32.mrf.mxu2  ;;  %355 = vst.msk [vmem:[#allocation2 + $0x70] sm:$0xff] %vm18_vm2, %v338_v59  ;;  %v305_v7 = vpop.f32.mrf.mxu3  ;;  %v421_v36 = vmul.f32 %v366_v0, %v366_v0  ;;  %v387_v44 = vsel %vm18_vm2, %v366_v0, 0.0 }
  0xbe   :  { %v482_v10 = vpack.c.bf16 %v1018_v5, %v1018_v5  ;;  %v335_v11 = vadd.f32 %v319_v63, %v295_v6  ;;  %v339_v21 = vadd.f32 %v323_v8, %v305_v7  ;;  %v448_v2 = vsel %vm18_vm2, %v424_v56, 0.0 }
  0xbf   :  { %492 = vst.msk [vmem:[%s1111_s2 + $0x18] sm:$0xf] %vm485_vm1, %v475_v4  ;;  %v370_v15 = vld [vmem:[#allocation2 + $0x50] sm:$0xff]  ;;  %v442_v49 = vsel %vm18_vm2, %v421_v36, 0.0  ;;  %v427_v8 = vmul.f32 %v986_v42, %v986_v42  ;;  %v428_v13 = vmul.f32 %v1018_v5, %v1018_v5 }
  0xc0   :  { %v363_v18 = vld [vmem:[#allocation2 + $0x18] sm:$0xff]  ;;  %v479_v19 = vpack.c.bf16 %v370_v15, %v370_v15  ;;  %499 = vst.msk [vmem:[%s1111_s2 + $0x34] sm:$0xf] %vm485_vm1, %v482_v10  ;;  %v425_v63 = vmul.f32 %v370_v15, %v370_v15  ;;  %v395_v3 = vsel %vm18_vm2, %v370_v15, 0.0 }
  0xc1   :  { %v381_v22 = vsel %vm18_vm2, %v363_v18, 0.0  ;;  %v418_v23 = vmul.f32 %v363_v18, %v363_v18  ;;  %v472_v24 = vpack.c.bf16 %v363_v18, %v363_v18  ;;  %352 = vst.msk [vmem:[#allocation2 + $0x58] sm:$0xff] %vm18_vm2, %v335_v11  ;;  %v401_v18 = vsel %vm18_vm2, %v1018_v5, 0.0 }
  0xc2   :  { %v382_v26 = vadd.f32 %v381_v22, %v380_v17  ;;  %496 = vst.msk [vmem:[%s1111_s2 + $0x28] sm:$0xf] %vm485_vm1, %v479_v19  ;;  %v450_v52 = vsel %vm18_vm2, %v425_v63, 0.0  ;;  %v454_v17 = vsel %vm18_vm2, %v427_v8, 0.0 }
  0xc3   :  { %v436_v29 = vsel %vm18_vm2, %v418_v23, 0.0  ;;  %489 = vst.msk [vmem:[%s1111_s2 + $0xc] sm:$0xf] %vm485_vm1, %v472_v24  ;;  %v367_v30 = vld [vmem:[#allocation2 + $0x38] sm:$0xff]  ;;  %v456_v23 = vsel %vm18_vm2, %v428_v13, 0.0 }
  0xc4   :  { %v384_v33 = vadd.f32 %v383_v27, %v382_v26  ;;  %v437_v34 = vadd.f32 %v436_v29, %v435_v25  ;;  %v374_v35 = vld [vmem:[#allocation2 + $0x70] sm:$0xff]  ;;  %356 = vst.msk [vmem:[#allocation2 + $0x78] sm:$0xff] %vm18_vm2, %v339_v21  ;;  %v476_v38 = vpack.c.bf16 %v367_v30, %v367_v30  ;;  %v422_v45 = vmul.f32 %v367_v30, %v367_v30 }
  0xc5   :  { %v483_v39 = vpack.c.bf16 %v374_v35, %v374_v35  ;;  %v389_v50 = vsel %vm18_vm2, %v367_v30, 0.0  ;;  %v429_v19 = vmul.f32 %v374_v35, %v374_v35  ;;  %v403_v24 = vsel %vm18_vm2, %v374_v35, 0.0 }
  0xc6   :  { %v439_v40 = vadd.f32 %v438_v32, %v437_v34  ;;  %v386_v41 = vadd.f32 %v385_v20, %v384_v33  ;;  %493 = vst.msk [vmem:[%s1111_s2 + $0x1c] sm:$0xf] %vm485_vm1, %v476_v38  ;;  %v444_v57 = vsel %vm18_vm2, %v422_v45, 0.0 }
  0xc7   :  { %500 = vst.msk [vmem:[%s1111_s2 + $0x38] sm:$0xf] %vm485_vm1, %v483_v39  ;;  %v458_v27 = vsel %vm18_vm2, %v429_v19, 0.0 }
  0xc8   :  { %v388_v46 = vadd.f32 %v387_v44, %v386_v41  ;;  %v441_v47 = vadd.f32 %v440_v43, %v439_v40  ;;  %v371_v48 = vld [vmem:[#allocation2 + $0x58] sm:$0xff] }
  0xc9   :  { %v480_v51 = vpack.c.bf16 %v371_v48, %v371_v48  ;;  %v426_v4 = vmul.f32 %v371_v48, %v371_v48  ;;  %v397_v9 = vsel %vm18_vm2, %v371_v48, 0.0 }
  0xca   :  { %v390_v53 = vadd.f32 %v389_v50, %v388_v46  ;;  %v443_v54 = vadd.f32 %v442_v49, %v441_v47 }
  0xcb   :  { %497 = vst.msk [vmem:[%s1111_s2 + $0x2c] sm:$0xf] %vm485_vm1, %v480_v51  ;;  %v375_v58 = vld [vmem:[#allocation2 + $0x78] sm:$0xff]  ;;  %v452_v14 = vsel %vm18_vm2, %v426_v4, 0.0 }
  0xcc   :  { %v392_v59 = vadd.f32 %v391_v55, %v390_v53  ;;  %v445_v60 = vadd.f32 %v444_v57, %v443_v54  ;;  %v484_v31 = vpack.c.bf16 %v375_v58, %v375_v58  ;;  %v430_v42 = vmul.f32 %v375_v58, %v375_v58 }
  0xcd   :  { %v405_v28 = vsel %vm18_vm2, %v375_v58, 0.0 }
  0xce   :  { %v447_v0 = vadd.f32 %v446_v61, %v445_v60  ;;  %v394_v1 = vadd.f32 %v393_v62, %v392_v59  ;;  %501 = vst.msk [vmem:[%s1111_s2 + $0x3c] sm:$0xf] %vm485_vm1, %v484_v31  ;;  %v460_v32 = vsel %vm18_vm2, %v430_v42, 0.0 }
  0xd0   :  { %v396_v6 = vadd.f32 %v395_v3, %v394_v1  ;;  %v449_v7 = vadd.f32 %v448_v2, %v447_v0 }
  0xd2   :  { %v451_v10 = vadd.f32 %v450_v52, %v449_v7  ;;  %v398_v11 = vadd.f32 %v397_v9, %v396_v6 }
  0xd4   :  { %v400_v15 = vadd.f32 %v399_v12, %v398_v11  ;;  %v453_v16 = vadd.f32 %v452_v14, %v451_v10 }
  0xd6   :  { %v455_v21 = vadd.f32 %v454_v17, %v453_v16  ;;  %v402_v22 = vadd.f32 %v401_v18, %v400_v15 }
  0xd8   :  { %v404_v25 = vadd.f32 %v403_v24, %v402_v22  ;;  %v457_v26 = vadd.f32 %v456_v23, %v455_v21 }
  0xda   :  { %v459_v29 = vadd.f32 %v458_v27, %v457_v26  ;;  %v406_v30 = vadd.f32 %v405_v28, %v404_v25 }
  0xdc   :  { %v407_v33 = vrot.slane %v406_v30, 4  ;;  %v461_v5 = vadd.f32 %v460_v32, %v459_v29 }
  0xde   :  { %v408_v34 = vadd.f32 %v407_v33, %v406_v30  ;;  %v462_v20 = vrot.slane %v461_v5, 4 }
  0xe0   :  { %v409_v36 = vrot.slane %v408_v34, 2  ;;  %v463_v38 = vadd.f32 %v462_v20, %v461_v5 }
  0xe2   :  { %v410_v39 = vadd.f32 %v409_v36, %v408_v34  ;;  %v464_v40 = vrot.slane %v463_v38, 2 }
  0xe4   :  { %v411_v35 = vrot.slane %v410_v39, 1  ;;  %v465_v41 = vadd.f32 %v464_v40, %v463_v38 }
  0xe6   :  { %v412_v43 = vadd.f32 %v411_v35, %v410_v39  ;;  %v466_v44 = vrot.slane %v465_v41, 1 }
  0xe8   :  { %414 = vst.msk [vmem:[%s1112_s3] sm:$0x1] %vm413_vm3, %v412_v43  ;;  %v467_v45 = vadd.f32 %v466_v44, %v465_v41 }
  0xea   :  { %468 = vst.msk [vmem:[%s1113_s4] sm:$0x1] %vm413_vm3, %v467_v45 }

// kernel: _lambda_.12
= control target key start
LH: loop header
LB: loop body
LE: loop exit
PB: predicated region body
PF: predicated region fallthrough
CT: control target
= control target key end

     0   :  { %vm18_vm12 = vcmask 261120   ;;  %vm306_vm13 = vcmask 257024   ;;  %vm282_vm14 = vcmask 253952   ;;  %s602_s1 = inlined_call_operand.vmem [shape: bf16[1,256,32], index: 1, kind: input, shape index: {}]   ;;  %s603_s0 = inlined_call_operand.vmem [shape: bf16[1,32,256], index: 0, kind: input, shape index: {}]   ;;  %s604_s2 = inlined_call_operand.vmem [shape: bf16[1,32,32], index: 2, kind: output, shape index: {0}]   ;;  %s605_s3 = inlined_call_operand.vmem [shape: f32[1,1,1,32], index: 3, kind: output, shape index: {1}]   ;;  %s606_s4 = inlined_call_operand.vmem [shape: f32[1,1,1,32], index: 4, kind: output, shape index: {2}]  }
   0x1   :  { %v394_v0 = vld [vmem:[%s602_s1 + $0x38] sm:$0xff]  ;;  %v393_v2 = vld [vmem:[%s602_s1 + $0x30] sm:$0xff]  ;;  %v392_v4 = vld [vmem:[%s602_s1 + $0x28] sm:$0xff] }
   0x2   :  { %v402_v1 = vld [vmem:[%s602_s1 + $0x78] sm:$0xff]  ;;  %211 = vmatpush.bf16.msra.mxu0 %v394_v0  ;;  %403 = vmatpush.bf16.msra.mxu2 %v394_v0  ;;  %v401_v3 = vld [vmem:[%s602_s1 + $0x70] sm:$0xff]  ;;  %v23_v5 = vld [vmem:[%s603_s0] sm:$0xff]  ;;  %v420_v0 = vmov 0.0  }
   0x3   :  { %230 = vmatpush.bf16.msra.mxu1 %v402_v1  ;;  %411 = vmatpush.bf16.msra.mxu3 %v402_v1  ;;  %v24_v6 = vld [vmem:[%s603_s0 + $0x8] sm:$0xff]  ;;  %v25_v8 = vld [vmem:[%s603_s0 + $0x10] sm:$0xff]  ;;  %v26_v9 = vld [vmem:[%s603_s0 + $0x18] sm:$0xff]  ;;  %v27_v10 = vunpack.c.l.bf16 %v23_v5  ;;  %v28_v11 = vunpack.c.h.bf16 %v23_v5  ;;  %19 = vst.msk [vmem:[#allocation2] sm:$0xff] %vm18_vm12, %v420_v0 }
   0x4   :  { %v400_v7 = vld [vmem:[%s602_s1 + $0x68] sm:$0xff]  ;;  %v29_v12 = vunpack.c.l.bf16 %v24_v6  ;;  %v30_v13 = vunpack.c.h.bf16 %v24_v6  ;;  %v391_v14 = vld [vmem:[%s602_s1 + $0x20] sm:$0xff]  ;;  %v31_v15 = vunpack.c.l.bf16 %v25_v8  ;;  %v32_v16 = vunpack.c.h.bf16 %v25_v8  ;;  %v390_v28 = vld [vmem:[%s602_s1 + $0x18] sm:$0xff]  ;;  %20 = vst.msk [vmem:[#allocation2 + $0x8] sm:$0xff] %vm18_vm12, %v420_v0 }
   0x5   :  { %v33_v17 = vunpack.c.l.bf16 %v26_v9  ;;  %v34_v18 = vunpack.c.h.bf16 %v26_v9  ;;  %v399_v19 = vld [vmem:[%s602_s1 + $0x60] sm:$0xff]  ;;  %vm482_vm0 = vcmp.ge.f32.partialorder %v27_v10, 0.0  ;;  %vm486_vm1 = vcmp.ge.f32.partialorder %v28_v11, 0.0  ;;  %v398_v33 = vld [vmem:[%s602_s1 + $0x58] sm:$0xff]  ;;  %v389_v39 = vld [vmem:[%s602_s1 + $0x10] sm:$0xff]  ;;  %21 = vst.msk [vmem:[#allocation2 + $0x10] sm:$0xff] %vm18_vm12, %v420_v0 }
   0x6   :  { %212 = vmatpush.bf16.msra.mxu0 %v393_v2  ;;  %404 = vmatpush.bf16.msra.mxu2 %v393_v2  ;;  %vm490_vm2 = vcmp.ge.f32.partialorder %v29_v12, 0.0  ;;  %vm494_vm3 = vcmp.ge.f32.partialorder %v30_v13, 0.0  ;;  %v43_v24 = vmul.f32 0.20019531, %v27_v10  ;;  %v44_v25 = vmul.f32 0.20019531, %v28_v11  ;;  %vm55_vm6 = vmpackc.low %vm486_vm1, %vm482_vm0  ;;  %v397_v43 = vld [vmem:[%s602_s1 + $0x50] sm:$0xff]  ;;  %v388_v45 = vld [vmem:[%s602_s1 + $0x8] sm:$0xff] }
   0x7   :  { %231 = vmatpush.bf16.msra.mxu1 %v401_v3  ;;  %412 = vmatpush.bf16.msra.mxu3 %v401_v3  ;;  %v45_v26 = vmul.f32 0.20019531, %v29_v12  ;;  %v46_v27 = vmul.f32 0.20019531, %v30_v13  ;;  %v47_v29 = vmul.f32 0.20019531, %v31_v15  ;;  %v48_v30 = vmul.f32 0.20019531, %v32_v16  ;;  %vm56_vm9 = vmpackc.low %vm494_vm3, %vm490_vm2  ;;  %v396_v49 = vld [vmem:[%s602_s1 + $0x48] sm:$0xff]  ;;  %v387_v54 = vld [vmem:[%s602_s1] sm:$0xff] }
   0x8   :  { %v49_v31 = vmul.f32 0.20019531, %v33_v17  ;;  %v50_v32 = vmul.f32 0.20019531, %v34_v18  ;;  %vm504_vm4 = vcmp.ge.f32.partialorder %v31_v15, 0.0  ;;  %vm508_vm5 = vcmp.ge.f32.partialorder %v32_v16, 0.0  ;;  %v395_v59 = vld [vmem:[%s602_s1 + $0x40] sm:$0xff]  ;;  %22 = vst.msk [vmem:[#allocation2 + $0x18] sm:$0xff] %vm18_vm12, %v420_v0 }
   0x9   :  { %vm516_vm7 = vcmp.ge.f32.partialorder %v33_v17, 0.0  ;;  %vm520_vm8 = vcmp.ge.f32.partialorder %v34_v18, 0.0  ;;  %v51_v38 = vpack.c.bf16 %v44_v25, %v43_v24  ;;  %v52_v40 = vpack.c.bf16 %v46_v27, %v45_v26  ;;  %vm57_vm10 = vmpackc.low %vm508_vm5, %vm504_vm4 }
   0xa   :  { %213 = vmatpush.bf16.msra.mxu0 %v392_v4  ;;  %405 = vmatpush.bf16.msra.mxu2 %v392_v4  ;;  %v53_v41 = vpack.c.bf16 %v48_v30, %v47_v29  ;;  %v54_v42 = vpack.c.bf16 %v50_v32, %v49_v31  ;;  %vm58_vm11 = vmpackc.low %vm520_vm8, %vm516_vm7  ;;  %v249_v3 = vld [vmem:[#allocation2] sm:$0xff] }
   0xb   :  { %232 = vmatpush.bf16.msra.mxu1 %v400_v7  ;;  %413 = vmatpush.bf16.msra.mxu3 %v400_v7  ;;  %v59_v44 = vsel %vm55_vm6, %v23_v5, %v51_v38  ;;  %v60_v46 = vsel %vm56_vm9, %v24_v6, %v52_v40  ;;  %v250_v12 = vld [vmem:[#allocation2 + $0x8] sm:$0xff] }
   0xc   :  { %v61_v47 = vsel %vm57_vm10, %v25_v8, %v53_v41  ;;  %v62_v48 = vsel %vm58_vm11, %v26_v9, %v54_v42  ;;  %v99_v50 = vunpack.c.l.b16 %v59_v44  ;;  %v101_v51 = vunpack.c.l.b16 %v60_v46  ;;  %v251_v8 = vld [vmem:[#allocation2 + $0x10] sm:$0xff] }
   0xd   :  { %v103_v52 = vunpack.c.l.b16 %v61_v47  ;;  %v105_v53 = vunpack.c.l.b16 %v62_v48  ;;  %v100_v55 = vunpack.c.h.b16 %v59_v44  ;;  %v102_v56 = vunpack.c.h.b16 %v60_v46 }
   0xe   :  { %214 = vmatpush.bf16.msra.mxu0 %v391_v14  ;;  %406 = vmatpush.bf16.msra.mxu2 %v391_v14  ;;  %v104_v57 = vunpack.c.h.b16 %v61_v47  ;;  %v106_v58 = vunpack.c.h.b16 %v62_v48  ;;  %v107_v60 = vpack.c.b16 %v101_v51, %v99_v50 }
   0xf   :  { %233 = vmatpush.bf16.msra.mxu1 %v399_v19  ;;  %414 = vmatpush.bf16.msra.mxu3 %v399_v19  ;;  %v109_v61 = vpack.c.b16 %v105_v53, %v103_v52  ;;  %v108_v62 = vpack.c.b16 %v102_v56, %v100_v55  ;;  %v252_v20 = vld [vmem:[#allocation2 + $0x18] sm:$0xff] }
  0x10   :  { %v110_v63 = vpack.c.b16 %v106_v58, %v104_v57 }
  0x12   :  { %215 = vmatpush.bf16.msra.mxu0 %v390_v28  ;;  %407 = vmatpush.bf16.msra.mxu2 %v390_v28 }
  0x13   :  { %234 = vmatpush.bf16.msra.mxu1 %v398_v33  ;;  %415 = vmatpush.bf16.msra.mxu3 %v398_v33 }
  0x16   :  { %216 = vmatpush.bf16.msra.mxu0 %v389_v39  ;;  %408 = vmatpush.bf16.msra.mxu2 %v389_v39 }
  0x17   :  { %235 = vmatpush.bf16.msra.mxu1 %v397_v43  ;;  %416 = vmatpush.bf16.msra.mxu3 %v397_v43 }
  0x1a   :  { %217 = vmatpush.bf16.msra.mxu0 %v388_v45  ;;  %409 = vmatpush.bf16.msra.mxu2 %v388_v45 }
  0x1b   :  { %236 = vmatpush.bf16.msra.mxu1 %v396_v49  ;;  %417 = vmatpush.bf16.msra.mxu3 %v396_v49 }
  0x1e   :  { %218 = vmatpush.bf16.msra.mxu0 %v387_v54  ;;  %410 = vmatpush.bf16.msra.mxu2 %v387_v54 }
  0x1f   :  { %237 = vmatpush.bf16.msra.mxu1 %v395_v59  ;;  %418 = vmatpush.bf16.msra.mxu3 %v395_v59 }
  0x21   :  { %219 = vmatmul.bf16.vlgmr.msra.gmra.mxu0 %v107_v60  ;;  %224 = vmatmul.bf16.vlgmr.msra.gmra.mxu2 %v109_v61 }
  0x22   :  { %238 = vmatmul.bf16.vlgmr.msra.gmra.mxu1 %v108_v62  ;;  %243 = vmatmul.bf16.vlgmr.msra.gmra.mxu3 %v110_v63 }
  0x9e   :  { %v220_v1 = vpop.f32.mrf.mxu0 }
  0x9f   :  { %v239_v2 = vpop.f32.mrf.mxu1 }
  0xa0   :  { %v240_v4 = vadd.f32 %v239_v2, %v220_v1 }
  0xa2   :  { %v253_v5 = vadd.f32 %v249_v3, %v240_v4 }
  0xa4   :  { %258 = vst.msk [vmem:[#allocation2] sm:$0xff] %vm18_vm12, %v253_v5  ;;  %v225_v6 = vpop.f32.mrf.mxu2 }
  0xa5   :  { %v244_v7 = vpop.f32.mrf.mxu3 }
  0xa6   :  { %v245_v9 = vadd.f32 %v244_v7, %v225_v6  ;;  %v222_v10 = vpop.f32.mrf.mxu0 }
  0xa7   :  { %v241_v11 = vpop.f32.mrf.mxu1 }
  0xa8   :  { %v255_v13 = vadd.f32 %v251_v8, %v245_v9  ;;  %v242_v14 = vadd.f32 %v241_v11, %v222_v10 }
  0xaa   :  { %260 = vst.msk [vmem:[#allocation2 + $0x10] sm:$0xff] %vm18_vm12, %v255_v13  ;;  %v254_v15 = vadd.f32 %v250_v12, %v242_v14 }
  0xab   :  { %v265_v16 = vld [vmem:[#allocation2] sm:$0xff] }
  0xac   :  { %v302_v17 = vpack.c.bf16 %v265_v16, %v265_v16  ;;  %259 = vst.msk [vmem:[#allocation2 + $0x8] sm:$0xff] %vm18_vm12, %v254_v15  ;;  %v227_v18 = vpop.f32.mrf.mxu2  ;;  %v284_v24 = vmul.f32 %v265_v16, %v265_v16  ;;  %v269_v27 = vsel %vm18_vm12, %v265_v16, 0.0 }
  0xad   :  { %v246_v19 = vpop.f32.mrf.mxu3 }
  0xae   :  { %307 = vst.msk [vmem:[%s604_s2] sm:$0xf] %vm306_vm13, %v302_v17  ;;  %v247_v21 = vadd.f32 %v246_v19, %v227_v18  ;;  %v288_v32 = vsel %vm18_vm12, %v284_v24, 0.0 }
  0xb0   :  { %v256_v22 = vadd.f32 %v252_v20, %v247_v21 }
  0xb1   :  { %v267_v23 = vld [vmem:[#allocation2 + $0x10] sm:$0xff] }
  0xb2   :  { %v304_v25 = vpack.c.bf16 %v267_v23, %v267_v23  ;;  %261 = vst.msk [vmem:[#allocation2 + $0x18] sm:$0xff] %vm18_vm12, %v256_v22  ;;  %v286_v33 = vmul.f32 %v267_v23, %v267_v23  ;;  %v272_v36 = vsel %vm18_vm12, %v267_v23, 0.0 }
  0xb3   :  { %v266_v26 = vld [vmem:[#allocation2 + $0x8] sm:$0xff] }
  0xb4   :  { %309 = vst.msk [vmem:[%s604_s2 + $0x8] sm:$0xf] %vm306_vm13, %v304_v25  ;;  %v270_v28 = vsel %vm18_vm12, %v266_v26, 0.0  ;;  %v285_v29 = vmul.f32 %v266_v26, %v266_v26  ;;  %v303_v30 = vpack.c.bf16 %v266_v26, %v266_v26  ;;  %v291_v39 = vsel %vm18_vm12, %v286_v33, 0.0 }
  0xb5   :  { %v271_v31 = vadd.f32 %v270_v28, %v269_v27 }
  0xb6   :  { %v289_v34 = vsel %vm18_vm12, %v285_v29, 0.0  ;;  %308 = vst.msk [vmem:[%s604_s2 + $0x4] sm:$0xf] %vm306_vm13, %v303_v30 }
  0xb7   :  { %v290_v35 = vadd.f32 %v289_v34, %v288_v32  ;;  %v273_v38 = vadd.f32 %v272_v36, %v271_v31 }
  0xb9   :  { %v268_v37 = vld [vmem:[#allocation2 + $0x18] sm:$0xff]  ;;  %v292_v44 = vadd.f32 %v291_v39, %v290_v35 }
  0xba   :  { %v274_v40 = vsel %vm18_vm12, %v268_v37, 0.0  ;;  %v287_v41 = vmul.f32 %v268_v37, %v268_v37  ;;  %v305_v42 = vpack.c.bf16 %v268_v37, %v268_v37 }
  0xbb   :  { %v275_v43 = vadd.f32 %v274_v40, %v273_v38 }
  0xbc   :  { %v293_v45 = vsel %vm18_vm12, %v287_v41, 0.0  ;;  %310 = vst.msk [vmem:[%s604_s2 + $0xc] sm:$0xf] %vm306_vm13, %v305_v42 }
  0xbd   :  { %v276_v46 = vrot.slane %v275_v43, 4  ;;  %v294_v47 = vadd.f32 %v293_v45, %v292_v44 }
  0xbf   :  { %v277_v48 = vadd.f32 %v276_v46, %v275_v43  ;;  %v295_v49 = vrot.slane %v294_v47, 4 }
  0xc1   :  { %v278_v50 = vrot.slane %v277_v48, 2  ;;  %v296_v51 = vadd.f32 %v295_v49, %v294_v47 }
  0xc3   :  { %v279_v52 = vadd.f32 %v278_v50, %v277_v48  ;;  %v297_v53 = vrot.slane %v296_v51, 2 }
  0xc5   :  { %v280_v54 = vrot.slane %v279_v52, 1  ;;  %v298_v55 = vadd.f32 %v297_v53, %v296_v51 }
  0xc7   :  { %v281_v56 = vadd.f32 %v280_v54, %v279_v52  ;;  %v299_v57 = vrot.slane %v298_v55, 1 }
  0xc9   :  { %283 = vst.msk [vmem:[%s605_s3] sm:$0x1] %vm282_vm14, %v281_v56  ;;  %v300_v58 = vadd.f32 %v299_v57, %v298_v55 }
  0xcb   :  { %301 = vst.msk [vmem:[%s606_s4] sm:$0x1] %vm282_vm14, %v300_v58 }

// kernel: _lambda_.13
= control target key start
LH: loop header
LB: loop body
LE: loop exit
PB: predicated region body
PF: predicated region fallthrough
CT: control target
= control target key end

     0   :  { %vm18_vm6 = vcmask 523264   ;;  %v564_v58 = vmov 0.0   ;;  %vm389_vm7 = vcmask 519168   ;;  %vm377_vm8 = vcmask 516096   ;;  %s729_s1 = inlined_call_operand.vmem [shape: bf16[1,512,64], index: 1, kind: input, shape index: {}]   ;;  %s730_s0 = inlined_call_operand.vmem [shape: bf16[1,8,512], index: 0, kind: input, shape index: {}]   ;;  %s731_s2 = inlined_call_operand.vmem [shape: bf16[1,8,64], index: 2, kind: output, shape index: {0}]   ;;  %s732_s3 = inlined_call_operand.vmem [shape: f32[1,1,1,64], index: 3, kind: output, shape index: {1}]   ;;  %s733_s4 = inlined_call_operand.vmem [shape: f32[1,1,1,64], index: 4, kind: output, shape index: {2}]  }
   0x1   :  { %v538_v0 = vld [vmem:[%s729_s1 + $0x38] sm:$0xff]  ;;  %v537_v4 = vld [vmem:[%s729_s1 + $0x30] sm:$0xff]  ;;  %v536_v8 = vld [vmem:[%s729_s1 + $0x28] sm:$0xff]  ;;  %19 = vst.msk [vmem:[#allocation2] sm:$0xff] %vm18_vm6, %v564_v58 }
   0x2   :  { %v546_v1 = vld [vmem:[%s729_s1 + $0x78] sm:$0xff]  ;;  %310 = vmatpush.bf16.msra.mxu0 %v538_v0  ;;  %v545_v5 = vld [vmem:[%s729_s1 + $0x70] sm:$0xff]  ;;  %v544_v9 = vld [vmem:[%s729_s1 + $0x68] sm:$0xff] }
   0x3   :  { %v554_v2 = vld [vmem:[%s729_s1 + $0xb8] sm:$0xff]  ;;  %323 = vmatpush.bf16.msra.mxu1 %v546_v1  ;;  %v553_v6 = vld [vmem:[%s729_s1 + $0xb0] sm:$0xff]  ;;  %v552_v10 = vld [vmem:[%s729_s1 + $0xa8] sm:$0xff] }
   0x4   :  { %v562_v3 = vld [vmem:[%s729_s1 + $0xf8] sm:$0xff]  ;;  %336 = vmatpush.bf16.msra.mxu2 %v554_v2  ;;  %v561_v7 = vld [vmem:[%s729_s1 + $0xf0] sm:$0xff]  ;;  %v560_v11 = vld [vmem:[%s729_s1 + $0xe8] sm:$0xff] }
   0x5   :  { %349 = vmatpush.bf16.msra.mxu3 %v562_v3  ;;  %v535_v12 = vld [vmem:[%s729_s1 + $0x20] sm:$0xff]  ;;  %v21_v19 = vld [vmem:[%s730_s0 + $0x8] sm:$0xff]  ;;  %v534_v22 = vld [vmem:[%s729_s1 + $0x18] sm:$0xff] }
   0x6   :  { %311 = vmatpush.bf16.msra.mxu0 %v537_v4  ;;  %v543_v13 = vld [vmem:[%s729_s1 + $0x60] sm:$0xff]  ;;  %v24_v20 = vunpack.c.l.bf16 %v21_v19  ;;  %v25_v21 = vunpack.c.h.bf16 %v21_v19  ;;  %v542_v23 = vld [vmem:[%s729_s1 + $0x58] sm:$0xff]  ;;  %v533_v34 = vld [vmem:[%s729_s1 + $0x10] sm:$0xff] }
   0x7   :  { %324 = vmatpush.bf16.msra.mxu1 %v545_v5  ;;  %v20_v14 = vld [vmem:[%s730_s0] sm:$0xff]  ;;  %v550_v26 = vld [vmem:[%s729_s1 + $0x98] sm:$0xff]  ;;  %v541_v35 = vld [vmem:[%s729_s1 + $0x50] sm:$0xff] }
   0x8   :  { %337 = vmatpush.bf16.msra.mxu2 %v553_v6  ;;  %v551_v15 = vld [vmem:[%s729_s1 + $0xa0] sm:$0xff]  ;;  %v22_v17 = vunpack.c.l.bf16 %v20_v14  ;;  %v23_v18 = vunpack.c.h.bf16 %v20_v14  ;;  %v558_v27 = vld [vmem:[%s729_s1 + $0xd8] sm:$0xff]  ;;  %v32_v28 = vmul.f32 0.20019531, %v24_v20  ;;  %v33_v29 = vmul.f32 0.20019531, %v25_v21  ;;  %v549_v37 = vld [vmem:[%s729_s1 + $0x90] sm:$0xff] }
   0x9   :  { %350 = vmatpush.bf16.msra.mxu3 %v561_v7  ;;  %v559_v16 = vld [vmem:[%s729_s1 + $0xe0] sm:$0xff]  ;;  %vm664_vm2 = vcmp.ge.f32.partialorder %v24_v20, 0.0  ;;  %vm668_vm3 = vcmp.ge.f32.partialorder %v25_v21, 0.0  ;;  %v557_v38 = vld [vmem:[%s729_s1 + $0xd0] sm:$0xff]  ;;  %v532_v40 = vld [vmem:[%s729_s1 + $0x8] sm:$0xff] }
   0xa   :  { %312 = vmatpush.bf16.msra.mxu0 %v536_v8  ;;  %v30_v24 = vmul.f32 0.20019531, %v22_v17  ;;  %v31_v25 = vmul.f32 0.20019531, %v23_v18  ;;  %vm656_vm0 = vcmp.ge.f32.partialorder %v22_v17, 0.0  ;;  %vm660_vm1 = vcmp.ge.f32.partialorder %v23_v18, 0.0  ;;  %vm37_vm5 = vmpackc.low %vm668_vm3, %vm664_vm2  ;;  %v540_v41 = vld [vmem:[%s729_s1 + $0x48] sm:$0xff]  ;;  %v531_v48 = vld [vmem:[%s729_s1] sm:$0xff] }
   0xb   :  { %325 = vmatpush.bf16.msra.mxu1 %v544_v9  ;;  %vm36_vm4 = vmpackc.low %vm660_vm1, %vm656_vm0  ;;  %v35_v39 = vpack.c.bf16 %v33_v29, %v32_v28  ;;  %v548_v43 = vld [vmem:[%s729_s1 + $0x88] sm:$0xff]  ;;  %v539_v49 = vld [vmem:[%s729_s1 + $0x40] sm:$0xff] }
   0xc   :  { %338 = vmatpush.bf16.msra.mxu2 %v552_v10  ;;  %v34_v36 = vpack.c.bf16 %v31_v25, %v30_v24  ;;  %v556_v44 = vld [vmem:[%s729_s1 + $0xc8] sm:$0xff]  ;;  %v547_v52 = vld [vmem:[%s729_s1 + $0x80] sm:$0xff] }
   0xd   :  { %351 = vmatpush.bf16.msra.mxu3 %v560_v11  ;;  %v39_v45 = vsel %vm37_vm5, %v21_v19, %v35_v39  ;;  %v555_v53 = vld [vmem:[%s729_s1 + $0xc0] sm:$0xff] }
   0xe   :  { %313 = vmatpush.bf16.msra.mxu0 %v535_v12  ;;  %v38_v42 = vsel %vm36_vm4, %v20_v14, %v34_v36  ;;  %v108_v50 = vunpack.c.l.b16 %v39_v45  ;;  %v109_v51 = vunpack.c.h.b16 %v39_v45  ;;  %v362_v3 = vld [vmem:[#allocation2] sm:$0xff] }
   0xf   :  { %326 = vmatpush.bf16.msra.mxu1 %v543_v13  ;;  %v106_v46 = vunpack.c.l.b16 %v38_v42  ;;  %v107_v47 = vunpack.c.h.b16 %v38_v42 }
  0x10   :  { %339 = vmatpush.bf16.msra.mxu2 %v551_v15  ;;  %v112_v56 = vpack.c.b16 %v108_v50, %v108_v50  ;;  %v113_v57 = vpack.c.b16 %v109_v51, %v109_v51 }
  0x11   :  { %352 = vmatpush.bf16.msra.mxu3 %v559_v16  ;;  %v110_v54 = vpack.c.b16 %v106_v46, %v106_v46  ;;  %v111_v55 = vpack.c.b16 %v107_v47, %v107_v47 }
  0x12   :  { %314 = vmatpush.bf16.msra.mxu0 %v534_v22 }
  0x13   :  { %327 = vmatpush.bf16.msra.mxu1 %v542_v23 }
  0x14   :  { %340 = vmatpush.bf16.msra.mxu2 %v550_v26 }
  0x15   :  { %353 = vmatpush.bf16.msra.mxu3 %v558_v27 }
  0x16   :  { %315 = vmatpush.bf16.msra.mxu0 %v533_v34 }
  0x17   :  { %328 = vmatpush.bf16.msra.mxu1 %v541_v35 }
  0x18   :  { %341 = vmatpush.bf16.msra.mxu2 %v549_v37 }
  0x19   :  { %354 = vmatpush.bf16.msra.mxu3 %v557_v38 }
  0x1a   :  { %316 = vmatpush.bf16.msra.mxu0 %v532_v40 }
  0x1b   :  { %329 = vmatpush.bf16.msra.mxu1 %v540_v41 }
  0x1c   :  { %342 = vmatpush.bf16.msra.mxu2 %v548_v43 }
  0x1d   :  { %355 = vmatpush.bf16.msra.mxu3 %v556_v44 }
  0x1e   :  { %317 = vmatpush.bf16.msra.mxu0 %v531_v48 }
  0x1f   :  { %330 = vmatpush.bf16.msra.mxu1 %v539_v49 }
  0x20   :  { %343 = vmatpush.bf16.msra.mxu2 %v547_v52 }
  0x21   :  { %356 = vmatpush.bf16.msra.mxu3 %v555_v53  ;;  %318 = vmatmul.bf16.vlgmr.msra.gmra.mxu0 %v110_v54 }
  0x22   :  { %331 = vmatmul.bf16.vlgmr.msra.gmra.mxu1 %v111_v55 }
  0x23   :  { %344 = vmatmul.bf16.vlgmr.msra.gmra.mxu2 %v112_v56 }
  0x24   :  { %357 = vmatmul.bf16.vlgmr.msra.gmra.mxu3 %v113_v57 }
  0x9e   :  { %v319_v59 = vpop.f32.mrf.mxu0 }
  0x9f   :  { %v332_v60 = vpop.f32.mrf.mxu1 }
  0xa0   :  { %v333_v61 = vadd.f32 %v332_v60, %v319_v59 }
  0xa6   :  { %v345_v62 = vpop.f32.mrf.mxu2  ;;  %v321_v1 = vpop.f32.mrf.mxu0 }
  0xa7   :  { %v358_v63 = vpop.f32.mrf.mxu3  ;;  %v346_v0 = vadd.f32 %v345_v62, %v333_v61  ;;  %v334_v2 = vpop.f32.mrf.mxu1 }
  0xa9   :  { %v359_v4 = vadd.f32 %v358_v63, %v346_v0 }
  0xab   :  { %v363_v5 = vadd.f32 %v362_v3, %v359_v4 }
  0xad   :  { %365 = vst.msk [vmem:[#allocation2] sm:$0xff] %vm18_vm6, %v363_v5 }
  0xae   :  { %v347_v6 = vpop.f32.mrf.mxu2 }
  0xaf   :  { %v360_v7 = vpop.f32.mrf.mxu3 }
  0xb4   :  { %v369_v8 = vld [vmem:[#allocation2] sm:$0xff] }
  0xb5   :  { %v370_v9 = vsel %vm18_vm6, %v369_v8, 0.0  ;;  %v379_v10 = vmul.f32 %v369_v8, %v369_v8  ;;  %v388_v11 = vpack.c.bf16 %v369_v8, %v369_v8 }
  0xb6   :  { %v371_v12 = vrot.slane %v370_v9, 4 }
  0xb7   :  { %v380_v13 = vsel %vm18_vm6, %v379_v10, 0.0  ;;  %390 = vst.msk [vmem:[%s731_s2] sm:$0xf] %vm389_vm7, %v388_v11 }
  0xb8   :  { %v372_v14 = vadd.f32 %v371_v12, %v370_v9  ;;  %v381_v15 = vrot.slane %v380_v13, 4 }
  0xba   :  { %v373_v16 = vrot.slane %v372_v14, 2  ;;  %v382_v17 = vadd.f32 %v381_v15, %v380_v13 }
  0xbc   :  { %v374_v18 = vadd.f32 %v373_v16, %v372_v14  ;;  %v383_v19 = vrot.slane %v382_v17, 2 }
  0xbe   :  { %v375_v20 = vrot.slane %v374_v18, 1  ;;  %v384_v21 = vadd.f32 %v383_v19, %v382_v17 }
  0xc0   :  { %v376_v22 = vadd.f32 %v375_v20, %v374_v18  ;;  %v385_v23 = vrot.slane %v384_v21, 1 }
  0xc2   :  { %378 = vst.msk [vmem:[%s732_s3] sm:$0x1] %vm377_vm8, %v376_v22  ;;  %v386_v24 = vadd.f32 %v385_v23, %v384_v21 }
  0xc4   :  { %387 = vst.msk [vmem:[%s733_s4] sm:$0x1] %vm377_vm8, %v386_v24 }

// kernel: _lambda_.15
= control target key start
LH: loop header
LB: loop body
LE: loop exit
PB: predicated region body
PF: predicated region fallthrough
CT: control target
= control target key end

     0   :  { %s847_s15 = smov 0   ;;  %s849_s16 = smov 0   ;;  %s921_s0 = inlined_call_operand.vmem [shape: bf16[4,2,256], index: 0, kind: input, shape index: {}]   ;;  %s922_s1 = inlined_call_operand.vmem [shape: bf16[4,256,64], index: 1, kind: input, shape index: {}]   ;;  %s923_s2 = inlined_call_operand.vmem [shape: bf16[4,2,64], index: 2, kind: output, shape index: {0}]   ;;  %s924_s3 = inlined_call_operand.vmem [shape: f32[4,1,1,64], index: 3, kind: output, shape index: {1}]   ;;  %s925_s4 = inlined_call_operand.vmem [shape: f32[4,1,1,64], index: 4, kind: output, shape index: {2}]  }
   0x1   :  { %s851_s17 = smov 0  }
   0x2 LB: > { %s34_s18 = sadd.s32 1, %s815_s16  ;;  %p685_p0 = scmp.ge.s32.totalorder %s819_s17, 1  ;;  %s819_s17 = sphi %s851_s17, %s15_s17   ;;  %s815_s16 = sphi %s849_s16, %s927_s16   ;;  %s811_s15 = sphi %s847_s15, %s926_s15  }
   0x3   : > { %p36_p1 = scmp.ge.s32.totalorder %s34_s18, 4  ;;  %p221_p2 = scmp.lt.s32.totalorder %s819_s17, 5 }
   0x5   : > { %s929_s18 = smov (%p36_p1, %s34_s18), 0  ;;  %p222_p3 = pnand %p685_p0, %p221_p2 }
   0x6   : > { %p277_p4 = scmp.lt.s32.totalorder (!%p222_p3), %s811_s15, 3 }
   0x7   : > { %225 = sbr.rel (%p222_p3) target bundleno = 202 (0xca), region = 28 }
   0xc   : > { %s931_s15 = smov (!%p277_p4, %s811_s15), 3  ;;  %vm321_vm0 = vcmask 517120   ;;  %v821_v23 = vmov 0.0   ;;  %vm503_vm1 = vcmask 516096  }
   0xd   : > { %s755_s19 = sshll.u32 %s931_s15, 7  ;;  %s686_s23 = sshll.u32 %s931_s15, 1  ;;  %322 = vst.msk [vmem:[#allocation2] sm:$0x3] %vm321_vm0, %v821_v23 }
   0xe   : > { %s871_s22 = scalar_lea.vmem %s922_s1, %s755_s19  ;;  %s287_s26 = scalar_lea.vmem %s921_s0, %s686_s23 }
   0xf   : > { %v763_v0 = vld [vmem:[%s871_s22 + $0x38] sm:$0xff]  ;;  %v762_v2 = vld [vmem:[%s871_s22 + $0x30] sm:$0xff]  ;;  %v323_v4 = vld [vmem:[%s287_s26] sm:$0x3]  ;;  %s304_s29 = scalar_lea.vmem %s923_s2, %s931_s15  ;;  %s310_s6 = scalar_lea.vmem %s924_s3, %s931_s15 }
  0x10   : > { %v771_v1 = vld [vmem:[%s871_s22 + $0x78] sm:$0xff]  ;;  %462 = vmatpush.bf16.msra.mxu0 %v763_v0  ;;  %v770_v3 = vld [vmem:[%s871_s22 + $0x70] sm:$0xff]  ;;  %v761_v5 = vld [vmem:[%s871_s22 + $0x28] sm:$0xff]  ;;  %v324_v7 = vunpack.c.l.bf16 %v323_v4  ;;  %s316_s9 = scalar_lea.vmem %s925_s4, %s931_s15 }
  0x11   : > { %475 = vmatpush.bf16.msra.mxu1 %v771_v1  ;;  %v769_v6 = vld [vmem:[%s871_s22 + $0x68] sm:$0xff]  ;;  %v760_v9 = vld [vmem:[%s871_s22 + $0x20] sm:$0xff]  ;;  %v759_v11 = vld [vmem:[%s871_s22 + $0x18] sm:$0xff] }
  0x12   : > { %v325_v8 = vmax.f32 %v324_v7, 0.0  ;;  %v768_v10 = vld [vmem:[%s871_s22 + $0x60] sm:$0xff]  ;;  %v767_v12 = vld [vmem:[%s871_s22 + $0x58] sm:$0xff]  ;;  %v758_v13 = vld [vmem:[%s871_s22 + $0x10] sm:$0xff] }
  0x13   : > { %v766_v14 = vld [vmem:[%s871_s22 + $0x50] sm:$0xff]  ;;  %v757_v15 = vld [vmem:[%s871_s22 + $0x8] sm:$0xff]  ;;  %v756_v17 = vld [vmem:[%s871_s22] sm:$0xff] }
  0x14   : > { %463 = vmatpush.bf16.msra.mxu0 %v762_v2  ;;  %327 = vst [vmem:[#allocation1] ss:$4 sm:$0xff] %v325_v8  ;;  %v765_v16 = vld [vmem:[%s871_s22 + $0x48] sm:$0xff]  ;;  %v764_v18 = vld [vmem:[%s871_s22 + $0x40] sm:$0xff] }
  0x15   : > { %476 = vmatpush.bf16.msra.mxu1 %v770_v3  ;;  %v488_v26 = vld [vmem:[#allocation2] sm:$0x3] }
  0x18   : > { %464 = vmatpush.bf16.msra.mxu0 %v761_v5 }
  0x19   : > { %477 = vmatpush.bf16.msra.mxu1 %v769_v6 }
  0x1b   : > { %v328_v19 = vld.sshfl [vmem:[#allocation1] sm:$0xff pattern:$0x73625140]  ;;  %v329_v20 = vld.sshfl [vmem:[#allocation1 + $0x8] sm:$0xff pattern:$0x73625140] }
  0x1c   : > { %465 = vmatpush.bf16.msra.mxu0 %v760_v9  ;;  %v332_v21 = vpack.c.bf16 %v328_v19, %v328_v19  ;;  %v333_v22 = vpack.c.bf16 %v329_v20, %v329_v20 }
  0x1d   : > { %478 = vmatpush.bf16.msra.mxu1 %v768_v10 }
  0x20   : > { %466 = vmatpush.bf16.msra.mxu0 %v759_v11 }
  0x21   : > { %479 = vmatpush.bf16.msra.mxu1 %v767_v12 }
  0x24   : > { %467 = vmatpush.bf16.msra.mxu0 %v758_v13 }
  0x25   : > { %480 = vmatpush.bf16.msra.mxu1 %v766_v14 }
  0x28   : > { %468 = vmatpush.bf16.msra.mxu0 %v757_v15 }
  0x29   : > { %481 = vmatpush.bf16.msra.mxu1 %v765_v16 }
  0x2c   : > { %469 = vmatpush.bf16.msra.mxu0 %v756_v17 }
  0x2d   : > { %482 = vmatpush.bf16.msra.mxu1 %v764_v18 }
  0x2f   : > { %470 = vmatmul.bf16.vlgmr.msra.gmra.mxu0 %v332_v21 }
  0x30   : > { %483 = vmatmul.bf16.vlgmr.msra.gmra.mxu1 %v333_v22 }
  0xac   : > { %v471_v24 = vpop.f32.mrf.mxu0 }
  0xad   : > { %v484_v25 = vpop.f32.mrf.mxu1 }
  0xae   : > { %v485_v27 = vadd.f32 %v484_v25, %v471_v24 }
  0xb0   : > { %v489_v28 = vadd.f32 %v488_v26, %v485_v27 }
  0xb2   : > { %491 = vst.msk [vmem:[#allocation2] sm:$0x3] %vm321_vm0, %v489_v28 }
  0xb4   : > { %v473_v29 = vpop.f32.mrf.mxu0 }
  0xb5   : > { %v486_v30 = vpop.f32.mrf.mxu1 }
  0xb9   : > { %v495_v31 = vld [vmem:[#allocation2] sm:$0x3] }
  0xba   : > { %v496_v32 = vsel %vm321_vm0, %v495_v31, 0.0  ;;  %v505_v33 = vmul.f32 %v495_v31, %v495_v31  ;;  %v514_v34 = vpack.c.bf16 %v495_v31, %v495_v31 }
  0xbb   : > { %v497_v35 = vrot.slane %v496_v32, 4 }
  0xbc   : > { %v506_v36 = vsel %vm321_vm0, %v505_v33, 0.0  ;;  %515 = vst.msk [vmem:[%s304_s29] sm:$0x1] %vm503_vm1, %v514_v34 }
  0xbd   : > { %v498_v37 = vadd.f32 %v497_v35, %v496_v32  ;;  %v507_v38 = vrot.slane %v506_v36, 4 }
  0xbf   : > { %v499_v39 = vrot.slane %v498_v37, 2  ;;  %v508_v40 = vadd.f32 %v507_v38, %v506_v36 }
  0xc1   : > { %v500_v41 = vadd.f32 %v499_v39, %v498_v37  ;;  %v509_v42 = vrot.slane %v508_v40, 2 }
  0xc3   : > { %v501_v43 = vrot.slane %v500_v41, 1  ;;  %v510_v44 = vadd.f32 %v509_v42, %v508_v40 }
  0xc5   : > { %v502_v45 = vadd.f32 %v501_v43, %v500_v41  ;;  %v511_v46 = vrot.slane %v510_v44, 1 }
  0xc7   : > { %504 = vst.msk [vmem:[%s310_s6] sm:$0x1] %vm503_vm1, %v502_v45  ;;  %v512_v47 = vadd.f32 %v511_v46, %v510_v44 }
  0xc9   : > { %513 = vst.msk [vmem:[%s316_s9] sm:$0x1] %vm503_vm1, %v512_v47 }
  0xca PF: > { %s15_s17 = sadd.s32 1, %s819_s17   ;;  %s926_s15 = smov %s815_s16 }
  0xcb   : > { %p12_p5 = scmp.ge.s32.totalorder %s15_s17, 6   ;;  %s927_s16 = smov %s929_s18 }
  0xcd   :  { %14 = sbr.rel (!%p12_p5) target bundleno = 2 (0x2), region = 93 }

// kernel: _lambda_.14
= control target key start
LH: loop header
LB: loop body
LE: loop exit
PB: predicated region body
PF: predicated region fallthrough
CT: control target
= control target key end

     0   :  { %10 = vsyncpa [#allocation4], 0  ;;  %s1439_s0 = inlined_call_operand.vmem [shape: bf16[1,2,1024], index: 0, kind: input, shape index: {}]   ;;  %s1440_s1 = inlined_call_operand.vmem [shape: bf16[1,1024,64], index: 1, kind: input, shape index: {}]   ;;  %s1441_s2 = inlined_call_operand.vmem [shape: bf16[1,2,64], index: 2, kind: output, shape index: {0}]   ;;  %s1442_s3 = inlined_call_operand.hbm [shape: f32[1,1,1,64], index: 3, kind: output, shape index: {1}]   ;;  %s1443_s4 = inlined_call_operand.hbm [shape: f32[1,1,1,64], index: 4, kind: output, shape index: {2}]  }
   0x1   :  { %v1063_v0 = vld [vmem:[%s1440_s1 + $0x38] sm:$0xff]  ;;  %v1062_v4 = vld [vmem:[%s1440_s1 + $0x30] sm:$0xff]  ;;  %v1061_v8 = vld [vmem:[%s1440_s1 + $0x28] sm:$0xff] }
   0x2   :  { %v1071_v1 = vld [vmem:[%s1440_s1 + $0x78] sm:$0xff]  ;;  %630 = vmatpush.bf16.msra.mxu0 %v1063_v0  ;;  %v1070_v5 = vld [vmem:[%s1440_s1 + $0x70] sm:$0xff]  ;;  %v1069_v9 = vld [vmem:[%s1440_s1 + $0x68] sm:$0xff] }
   0x3   :  { %v1079_v2 = vld [vmem:[%s1440_s1 + $0xb8] sm:$0xff]  ;;  %643 = vmatpush.bf16.msra.mxu1 %v1071_v1  ;;  %v1078_v6 = vld [vmem:[%s1440_s1 + $0xb0] sm:$0xff]  ;;  %v1077_v10 = vld [vmem:[%s1440_s1 + $0xa8] sm:$0xff] }
   0x4   :  { %v1087_v3 = vld [vmem:[%s1440_s1 + $0xf8] sm:$0xff]  ;;  %656 = vmatpush.bf16.msra.mxu2 %v1079_v2  ;;  %v1086_v7 = vld [vmem:[%s1440_s1 + $0xf0] sm:$0xff]  ;;  %v1085_v11 = vld [vmem:[%s1440_s1 + $0xe8] sm:$0xff] }
   0x5   :  { %669 = vmatpush.bf16.msra.mxu3 %v1087_v3  ;;  %v1060_v12 = vld [vmem:[%s1440_s1 + $0x20] sm:$0xff]  ;;  %v1059_v17 = vld [vmem:[%s1440_s1 + $0x18] sm:$0xff] }
   0x6   :  { %631 = vmatpush.bf16.msra.mxu0 %v1062_v4  ;;  %v1068_v13 = vld [vmem:[%s1440_s1 + $0x60] sm:$0xff]  ;;  %v1067_v18 = vld [vmem:[%s1440_s1 + $0x58] sm:$0xff] }
   0x7   :  { %644 = vmatpush.bf16.msra.mxu1 %v1070_v5  ;;  %v1076_v14 = vld [vmem:[%s1440_s1 + $0xa0] sm:$0xff]  ;;  %v1075_v21 = vld [vmem:[%s1440_s1 + $0x98] sm:$0xff] }
   0x8   :  { %657 = vmatpush.bf16.msra.mxu2 %v1078_v6  ;;  %v1084_v15 = vld [vmem:[%s1440_s1 + $0xe0] sm:$0xff]  ;;  %v1083_v22 = vld [vmem:[%s1440_s1 + $0xd8] sm:$0xff] }
   0x9   :  { %670 = vmatpush.bf16.msra.mxu3 %v1086_v7  ;;  %v1256_v16 = vld [vmem:[%s1439_s0] sm:$0xff] }
   0xa   :  { %632 = vmatpush.bf16.msra.mxu0 %v1061_v8  ;;  %v24_v19 = vunpack.c.l.bf16 %v1256_v16  ;;  %v25_v20 = vunpack.c.h.bf16 %v1256_v16 }
   0xb   :  { %645 = vmatpush.bf16.msra.mxu1 %v1069_v9 }
   0xc   :  { %658 = vmatpush.bf16.msra.mxu2 %v1077_v10  ;;  %v28_v23 = vmul.f32 0.20019531, %v24_v19  ;;  %v29_v24 = vmul.f32 0.20019531, %v25_v20 }
   0xd   :  { %671 = vmatpush.bf16.msra.mxu3 %v1085_v11 }
   0xe   :  { %633 = vmatpush.bf16.msra.mxu0 %v1060_v12 }
   0xf   :  { %646 = vmatpush.bf16.msra.mxu1 %v1068_v13 }
  0x10   :  { %659 = vmatpush.bf16.msra.mxu2 %v1076_v14 }
  0x11   :  { %672 = vmatpush.bf16.msra.mxu3 %v1084_v15 }
  0x12   :  { %11 = vsyncpa [#allocation6], 0  ;;  %634 = vmatpush.bf16.msra.mxu0 %v1059_v17  ;;  %v1058_v25 = vld [vmem:[%s1440_s1 + $0x10] sm:$0xff]  ;;  %32 = vst [vmem:[#allocation1] ss:$4 sm:$0xff] %v28_v23  ;;  %vm26_vm0 = vcmp.ge.f32.partialorder %v24_v19, 0.0 }
  0x13   :  { %647 = vmatpush.bf16.msra.mxu1 %v1067_v18  ;;  %v1066_v26 = vld [vmem:[%s1440_s1 + $0x50] sm:$0xff]  ;;  %34 = vst [vmem:[#allocation1 + $0x20] ss:$4 sm:$0xff] %v29_v24  ;;  %vm27_vm1 = vcmp.ge.f32.partialorder %v25_v20, 0.0  ;;  %v1057_v29 = vld [vmem:[%s1440_s1 + $0x8] sm:$0xff]  ;;  %v1176_v33 = vmov 0  }
  0x14   :  { %660 = vmatpush.bf16.msra.mxu2 %v1075_v21  ;;  %v1074_v27 = vld [vmem:[%s1440_s1 + $0x90] sm:$0xff]  ;;  %v1065_v30 = vld [vmem:[%s1440_s1 + $0x48] sm:$0xff]  ;;  %v55_v34 = vsel %vm26_vm0, 1, %v1176_v33  ;;  %v56_v35 = vsel %vm27_vm1, 1, %v1176_v33  ;;  %vm76_vm2 = vcmask 1040384   ;;  %vm80_vm3 = vcmask 1042434  }
  0x15   :  { %673 = vmatpush.bf16.msra.mxu3 %v1083_v22  ;;  %v1082_v28 = vld [vmem:[%s1440_s1 + $0xd0] sm:$0xff]  ;;  %v1073_v31 = vld [vmem:[%s1440_s1 + $0x88] sm:$0xff]  ;;  %v1056_v36 = vld [vmem:[%s1440_s1] sm:$0xff]  ;;  %vm84_vm4 = vcmask 1041408   ;;  %vm86_vm5 = vcmask 1044484   ;;  %vm90_vm6 = vcmask 1046534   ;;  %v60_v42 = vunpack.c.l.b16 %v1176_v33 }
  0x16   :  { %635 = vmatpush.bf16.msra.mxu0 %v1058_v25  ;;  %v1081_v32 = vld [vmem:[%s1440_s1 + $0xc8] sm:$0xff]  ;;  %v1064_v37 = vld [vmem:[%s1440_s1 + $0x40] sm:$0xff]  ;;  %vm94_vm7 = vcmask 1045508   ;;  %v1095_v43 = vld [vmem:[%s1440_s1 + $0x138] sm:$0xff]  ;;  %v798_v48 = vunpack.i.l.s16 %v55_v34  ;;  %v799_v49 = vunpack.i.l.s16 %v56_v35  ;;  %v61_v50 = vunpack.c.h.b16 %v1176_v33  ;;  %s1178_s12 = smov [#allocation3]   ;;  %s771_s16 = sshll.u32 %s1442_s3, 4  ;;  %s772_s16 = int_to_ptr.hbm [resolvable:$true] %s771_s16 }
  0x17   :  { %648 = vmatpush.bf16.msra.mxu1 %v1066_v26  ;;  %v1072_v38 = vld [vmem:[%s1440_s1 + $0x80] sm:$0xff]  ;;  %v1103_v44 = vld [vmem:[%s1440_s1 + $0x178] sm:$0xff]  ;;  %v1094_v7 = vld [vmem:[%s1440_s1 + $0x130] sm:$0xff]  ;;  %vm96_vm10 = vcmask 1043456   ;;  %vm21_vm12 = vcmask 517120   ;;  %vm749_vm13 = vcmask 516096  }
  0x18   :  { %661 = vmatpush.bf16.msra.mxu2 %v1074_v27  ;;  %v1080_v39 = vld [vmem:[%s1440_s1 + $0xc0] sm:$0xff]  ;;  %v1111_v57 = vld [vmem:[%s1440_s1 + $0x1b8] sm:$0xff]  ;;  %vm1320_vm8 = vcmp.ne.s32.totalorder %v798_v48, %v60_v42  ;;  %vm1324_vm9 = vcmp.ne.s32.totalorder %v799_v49, %v61_v50  ;;  %v1102_v8 = vld [vmem:[%s1440_s1 + $0x170] sm:$0xff]  ;;  %v1177_v49 = vmov 0.0   ;;  %s769_s13 = sshll.u32 %s1178_s12, 4  ;;  %s1179_s17 = smov [#allocation5]   ;;  %s770_s13 = int_to_ptr.vmem [resolvable:$true] %s769_s13 }
  0x19   :  { %674 = vmatpush.bf16.msra.mxu3 %v1082_v28  ;;  %v35_v40 = vld.sshfl [vmem:[#allocation1] sm:$0xff pattern:$0x73625140]  ;;  %v36_v41 = vld.sshfl [vmem:[#allocation1 + $0x8] sm:$0xff pattern:$0x73625140]  ;;  %vm64_vm11 = vmpackc.low %vm1324_vm9, %vm1320_vm8 }
  0x1a   :  { %636 = vmatpush.bf16.msra.mxu0 %v1057_v29  ;;  %v37_v45 = vld.sshfl [vmem:[#allocation1 + $0x10] sm:$0xff pattern:$0x73625140]  ;;  %v38_v46 = vld.sshfl [vmem:[#allocation1 + $0x18] sm:$0xff pattern:$0x73625140]  ;;  %v51_v47 = vpack.c.bf16 %v36_v41, %v35_v40 }
  0x1b   :  { %649 = vmatpush.bf16.msra.mxu1 %v1065_v30  ;;  %v39_v51 = vld.sshfl [vmem:[#allocation1 + $0x20] sm:$0xff pattern:$0x73625140]  ;;  %v40_v52 = vld.sshfl [vmem:[#allocation1 + $0x28] sm:$0xff pattern:$0x73625140]  ;;  %v52_v53 = vpack.c.bf16 %v38_v46, %v37_v45 }
  0x1c   :  { %662 = vmatpush.bf16.msra.mxu2 %v1073_v31  ;;  %v41_v54 = vld.sshfl [vmem:[#allocation1 + $0x30] sm:$0xff pattern:$0x73625140]  ;;  %v42_v55 = vld.sshfl [vmem:[#allocation1 + $0x38] sm:$0xff pattern:$0x73625140]  ;;  %v53_v56 = vpack.c.bf16 %v40_v52, %v39_v51 }
  0x1d   :  { %675 = vmatpush.bf16.msra.mxu3 %v1081_v32  ;;  %v1119_v58 = vld [vmem:[%s1440_s1 + $0x1f8] sm:$0xff]  ;;  %v54_v59 = vpack.c.bf16 %v42_v55, %v41_v54  ;;  %v69_v60 = vrot.slane %v51_v47, 3  ;;  %v70_v61 = vrot.slane %v52_v53, 6  ;;  %v71_v62 = vrot.slane %v52_v53, 1  ;;  %v1110_v11 = vld [vmem:[%s1440_s1 + $0x1b0] sm:$0xff]  ;;  %v1093_v18 = vld [vmem:[%s1440_s1 + $0x128] sm:$0xff] }
  0x1e   :  { %637 = vmatpush.bf16.msra.mxu0 %v1056_v36  ;;  %v72_v1 = vrot.slane %v53_v56, 4  ;;  %v73_v2 = vrot.slane %v53_v56, 7  ;;  %v1118_v12 = vld [vmem:[%s1440_s1 + $0x1f0] sm:$0xff]  ;;  %v1101_v19 = vld [vmem:[%s1440_s1 + $0x168] sm:$0xff]  ;;  %v1100_v22 = vld [vmem:[%s1440_s1 + $0x160] sm:$0xff]  ;;  %s780_s18 = sshll.u32 %s1179_s17, 4  ;;  %s781_s18 = int_to_ptr.vmem [resolvable:$true] %s780_s18 }
  0x1f   :  { %650 = vmatpush.bf16.msra.mxu1 %v1064_v37  ;;  %v74_v3 = vrot.slane %v54_v59, 2  ;;  %v75_v4 = vrot.slane %v54_v59, 5  ;;  %v79_v5 = vsel %vm76_vm2, %v51_v47, %v69_v60  ;;  %v83_v6 = vsel %vm80_vm3, %v70_v61, %v71_v62  ;;  %v1109_v20 = vld [vmem:[%s1440_s1 + $0x1a8] sm:$0xff]  ;;  %v1108_v23 = vld [vmem:[%s1440_s1 + $0x1a0] sm:$0xff]  ;;  %v1091_v25 = vld [vmem:[%s1440_s1 + $0x118] sm:$0xff]  ;;  %s782_s20 = sshll.u32 %s1443_s4, 4  ;;  %s783_s20 = int_to_ptr.hbm [resolvable:$true] %s782_s20 }
  0x20   :  { %663 = vmatpush.bf16.msra.mxu2 %v1072_v38  ;;  %v85_v9 = vsel %vm84_vm4, %v79_v5, %v83_v6  ;;  %v89_v10 = vsel %vm86_vm5, %v72_v1, %v73_v2  ;;  %v1117_v21 = vld [vmem:[%s1440_s1 + $0x1e8] sm:$0xff]  ;;  %v1116_v24 = vld [vmem:[%s1440_s1 + $0x1e0] sm:$0xff]  ;;  %v1099_v26 = vld [vmem:[%s1440_s1 + $0x158] sm:$0xff]  ;;  %22 = vst.msk [vmem:[#allocation2] sm:$0x3] %vm21_vm12, %v1177_v49 }
  0x21   :  { %676 = vmatpush.bf16.msra.mxu3 %v1080_v39  ;;  %v93_v13 = vsel %vm90_vm6, %v74_v3, %v75_v4  ;;  %v1107_v31 = vld [vmem:[%s1440_s1 + $0x198] sm:$0xff]  ;;  %v1090_v33 = vld [vmem:[%s1440_s1 + $0x110] sm:$0xff]  ;;  %v1089_v37 = vld [vmem:[%s1440_s1 + $0x108] sm:$0xff] }
  0x22   :  { %682 = vmatpush.bf16.msrb.mxu0 %v1095_v43  ;;  %v95_v14 = vsel %vm94_vm7, %v89_v10, %v93_v13  ;;  %v1115_v32 = vld [vmem:[%s1440_s1 + $0x1d8] sm:$0xff]  ;;  %v1098_v34 = vld [vmem:[%s1440_s1 + $0x150] sm:$0xff]  ;;  %v1097_v38 = vld [vmem:[%s1440_s1 + $0x148] sm:$0xff] }
  0x23   :  { %695 = vmatpush.bf16.msrb.mxu1 %v1103_v44  ;;  %v97_v15 = vsel %vm96_vm10, %v85_v9, %v95_v14  ;;  %v1106_v35 = vld [vmem:[%s1440_s1 + $0x190] sm:$0xff]  ;;  %v1105_v39 = vld [vmem:[%s1440_s1 + $0x188] sm:$0xff]  ;;  %v1088_v41 = vld [vmem:[%s1440_s1 + $0x100] sm:$0xff] }
  0x24   :  { %708 = vmatpush.bf16.msrb.mxu2 %v1111_v57  ;;  %v99_v17 = vsel %vm64_vm11, %v1256_v16, %v97_v15  ;;  %v1092_v16 = vld [vmem:[%s1440_s1 + $0x120] sm:$0xff]  ;;  %v1114_v36 = vld [vmem:[%s1440_s1 + $0x1d0] sm:$0xff]  ;;  %v1113_v40 = vld [vmem:[%s1440_s1 + $0x1c8] sm:$0xff] }
  0x25   :  { %721 = vmatpush.bf16.msrb.mxu3 %v1119_v58  ;;  %229 = vst [vmem:[#allocation1] ss:$9 sm:$0xff] %v99_v17  ;;  %v1096_v42 = vld [vmem:[%s1440_s1 + $0x140] sm:$0xff] }
  0x26   :  { %683 = vmatpush.bf16.msrb.mxu0 %v1094_v7  ;;  %v1104_v43 = vld [vmem:[%s1440_s1 + $0x180] sm:$0xff] }
  0x27   :  { %696 = vmatpush.bf16.msrb.mxu1 %v1102_v8  ;;  %v1112_v44 = vld [vmem:[%s1440_s1 + $0x1c0] sm:$0xff]  ;;  %v734_v6 = vld [vmem:[#allocation2] sm:$0x3] }
  0x28   :  { %709 = vmatpush.bf16.msrb.mxu2 %v1110_v11 }
  0x29   :  { %722 = vmatpush.bf16.msrb.mxu3 %v1118_v12 }
  0x2a   :  { %684 = vmatpush.bf16.msrb.mxu0 %v1093_v18 }
  0x2b   :  { %697 = vmatpush.bf16.msrb.mxu1 %v1101_v19 }
  0x2c   :  { %710 = vmatpush.bf16.msrb.mxu2 %v1109_v20  ;;  %v232_v27 = vld [vmem:[#allocation1 + $0x12] sm:$0xff]  ;;  %v230_v28 = vld [vmem:[#allocation1] sm:$0xff]  ;;  %v231_v30 = vld [vmem:[#allocation1 + $0x9] sm:$0xff] }
  0x2d   :  { %723 = vmatpush.bf16.msrb.mxu3 %v1117_v21  ;;  %v233_v29 = vld [vmem:[#allocation1 + $0x1b] sm:$0xff]  ;;  %664 = vmatmul.bf16.vlgmr.msra.gmra.mxu2 %v232_v27  ;;  %v234_v45 = vld [vmem:[#allocation1 + $0x24] sm:$0xff]  ;;  %v235_v46 = vld [vmem:[#allocation1 + $0x2d] sm:$0xff] }
  0x2e   :  { %685 = vmatpush.bf16.msrb.mxu0 %v1092_v16  ;;  %677 = vmatmul.bf16.vlgmr.msra.gmra.mxu3 %v233_v29  ;;  %v236_v47 = vld [vmem:[#allocation1 + $0x36] sm:$0xff]  ;;  %v237_v48 = vld [vmem:[#allocation1 + $0x3f] sm:$0xff] }
  0x2f   :  { %698 = vmatpush.bf16.msrb.mxu1 %v1100_v22  ;;  %638 = vmatmul.bf16.vlgmr.msra.gmra.mxu0 %v230_v28 }
  0x30   :  { %651 = vmatmul.bf16.vlgmr.msra.gmra.mxu1 %v231_v30  ;;  %711 = vmatpush.bf16.msrb.mxu2 %v1108_v23 }
  0x31   :  { %724 = vmatpush.bf16.msrb.mxu3 %v1116_v24 }
  0x32   :  { %686 = vmatpush.bf16.msrb.mxu0 %v1091_v25 }
  0x33   :  { %699 = vmatpush.bf16.msrb.mxu1 %v1099_v26 }
  0x34   :  { %712 = vmatpush.bf16.msrb.mxu2 %v1107_v31 }
  0x35   :  { %725 = vmatpush.bf16.msrb.mxu3 %v1115_v32 }
  0x36   :  { %687 = vmatpush.bf16.msrb.mxu0 %v1090_v33 }
  0x37   :  { %700 = vmatpush.bf16.msrb.mxu1 %v1098_v34 }
  0x38   :  { %713 = vmatpush.bf16.msrb.mxu2 %v1106_v35 }
  0x39   :  { %726 = vmatpush.bf16.msrb.mxu3 %v1114_v36 }
  0x3a   :  { %688 = vmatpush.bf16.msrb.mxu0 %v1089_v37 }
  0x3b   :  { %701 = vmatpush.bf16.msrb.mxu1 %v1097_v38 }
  0x3c   :  { %714 = vmatpush.bf16.msrb.mxu2 %v1105_v39 }
  0x3d   :  { %727 = vmatpush.bf16.msrb.mxu3 %v1113_v40 }
  0x3e   :  { %689 = vmatpush.bf16.msrb.mxu0 %v1088_v41 }
  0x3f   :  { %702 = vmatpush.bf16.msrb.mxu1 %v1096_v42 }
  0x40   :  { %715 = vmatpush.bf16.msrb.mxu2 %v1104_v43 }
  0x41   :  { %728 = vmatpush.bf16.msrb.mxu3 %v1112_v44  ;;  %690 = vmatmul.bf16.vlgmr.msrb.gmra.mxu0 %v234_v45 }
  0x42   :  { %703 = vmatmul.bf16.vlgmr.msrb.gmra.mxu1 %v235_v46 }
  0x43   :  { %716 = vmatmul.bf16.vlgmr.msrb.gmra.mxu2 %v236_v47 }
  0x44   :  { %729 = vmatmul.bf16.vlgmr.msrb.gmra.mxu3 %v237_v48 }
  0xac   :  { %v639_v50 = vpop.f32.mrf.mxu0 }
  0xad   :  { %v652_v51 = vpop.f32.mrf.mxu1 }
  0xae   :  { %v653_v56 = vadd.f32 %v652_v51, %v639_v50 }
  0xb0   :  { %v665_v52 = vpop.f32.mrf.mxu2 }
  0xb1   :  { %v678_v53 = vpop.f32.mrf.mxu3  ;;  %v666_v59 = vadd.f32 %v665_v52, %v653_v56 }
  0xb3   :  { %v679_v62 = vadd.f32 %v678_v53, %v666_v59 }
  0xb4   :  { %v641_v54 = vpop.f32.mrf.mxu0 }
  0xb5   :  { %v654_v55 = vpop.f32.mrf.mxu1 }
  0xb8   :  { %v667_v57 = vpop.f32.mrf.mxu2 }
  0xb9   :  { %v680_v58 = vpop.f32.mrf.mxu3 }
  0xbe   :  { %v691_v60 = vpop.f32.mrf.mxu0 }
  0xbf   :  { %v704_v61 = vpop.f32.mrf.mxu1  ;;  %v692_v63 = vadd.f32 %v691_v60, %v679_v62 }
  0xc1   :  { %v705_v0 = vadd.f32 %v704_v61, %v692_v63 }
  0xc6   :  { %v717_v1 = vpop.f32.mrf.mxu2  ;;  %v693_v4 = vpop.f32.mrf.mxu0 }
  0xc7   :  { %v730_v2 = vpop.f32.mrf.mxu3  ;;  %v718_v3 = vadd.f32 %v717_v1, %v705_v0  ;;  %v706_v5 = vpop.f32.mrf.mxu1 }
  0xc9   :  { %v731_v7 = vadd.f32 %v730_v2, %v718_v3 }
  0xcb   :  { %v735_v8 = vadd.f32 %v734_v6, %v731_v7 }
  0xcd   :  { %737 = vst.msk [vmem:[#allocation2] sm:$0x3] %vm21_vm12, %v735_v8 }
  0xce   :  { %v719_v9 = vpop.f32.mrf.mxu2 }
  0xcf   :  { %v732_v10 = vpop.f32.mrf.mxu3 }
  0xd4   :  { %v741_v11 = vld [vmem:[#allocation2] sm:$0x3] }
  0xd5   :  { %v742_v12 = vsel %vm21_vm12, %v741_v11, 0.0  ;;  %v760_v13 = vpack.c.bf16 %v741_v11, %v741_v11  ;;  %v751_v14 = vmul.f32 %v741_v11, %v741_v11 }
  0xd6   :  { %v743_v15 = vrot.slane %v742_v12, 4 }
  0xd7   :  { %761 = vst.msk [vmem:[%s1441_s2] sm:$0x1] %vm749_vm13, %v760_v13  ;;  %v752_v17 = vsel %vm21_vm12, %v751_v14, 0.0 }
  0xd8   :  { %v744_v18 = vadd.f32 %v743_v15, %v742_v12  ;;  %v753_v19 = vrot.slane %v752_v17, 4 }
  0xda   :  { %v745_v20 = vrot.slane %v744_v18, 2  ;;  %v754_v21 = vadd.f32 %v753_v19, %v752_v17 }
  0xdc   :  { %v746_v16 = vadd.f32 %v745_v20, %v744_v18  ;;  %v755_v22 = vrot.slane %v754_v21, 2 }
  0xde   :  { %v747_v23 = vrot.slane %v746_v16, 1  ;;  %v756_v24 = vadd.f32 %v755_v22, %v754_v21 }
  0xe0   :  { %v748_v25 = vadd.f32 %v747_v23, %v746_v16  ;;  %v757_v26 = vrot.slane %v756_v24, 1 }
  0xe2   :  { %750 = vst.msk [vmem:[#allocation3] sm:$0x1] %vm749_vm13, %v748_v25  ;;  %v758_v27 = vadd.f32 %v757_v26, %v756_v24 }
  0xe3   :  { %774 = dma.vmem_to_hbm [thread:$0]  %s770_s13, 16, %s772_s16, [#allocation4]  }
  0xe4   :  { %759 = vst.msk [vmem:[#allocation5] sm:$0x1] %vm749_vm13, %v758_v27 }
  0xe5   :  { %785 = dma.vmem_to_hbm [thread:$0]  %s781_s18, 16, %s783_s20, [#allocation6]  }
  0xe6   :  { %1172 = dma.done.wait [#allocation4], 16  }
  0xe7   :  { %1173 = vsyncadd [#allocation4], 4294967280 }
  0xe8   :  { %1174 = dma.done.wait [#allocation6], 16  }
  0xe9   :  { %1175 = vsyncadd [#allocation6], 4294967280 }
  0xea   :  { %796 = vsyncpa [#allocation4], 1 }
  0xeb   :  { %797 = vsyncpa [#allocation6], 1 }

// kernel: _lambda_.16
= control target key start
LH: loop header
LB: loop body
LE: loop exit
PB: predicated region body
PF: predicated region fallthrough
CT: control target
= control target key end

     0   :  { %s1300_s21 = smov 0   ;;  %s1302_s22 = smov 0   ;;  %s1395_s0 = inlined_call_operand.vmem [shape: bf16[4,8,256], index: 0, kind: input, shape index: {}]   ;;  %s1396_s1 = inlined_call_operand.vmem [shape: bf16[4,8,256], index: 1, kind: input, shape index: {}]   ;;  %s1397_s2 = inlined_call_operand.vmem [shape: bf16[4,256,32], index: 2, kind: input, shape index: {}]   ;;  %s1398_s3 = inlined_call_operand.vmem [shape: bf16[4,256,32], index: 3, kind: input, shape index: {}]   ;;  %s1399_s4 = inlined_call_operand.vmem [shape: bf16[4,8,32], index: 4, kind: output, shape index: {0}]   ;;  %s1400_s5 = inlined_call_operand.vmem [shape: f32[4,1,1,32], index: 5, kind: output, shape index: {1}]   ;;  %s1401_s6 = inlined_call_operand.vmem [shape: f32[4,1,1,32], index: 6, kind: output, shape index: {2}]  }
   0x1   :  { %s1304_s23 = smov 0  }
   0x2 LB: > { %s36_s24 = sadd.s32 1, %s1258_s22  ;;  %p1039_p0 = scmp.ge.s32.totalorder %s1262_s23, 1  ;;  %s1262_s23 = sphi %s1304_s23, %s17_s23   ;;  %s1258_s22 = sphi %s1302_s22, %s1403_s22   ;;  %s1254_s21 = sphi %s1300_s21, %s1402_s21  }
   0x3   : > { %p38_p1 = scmp.ge.s32.totalorder %s36_s24, 4  ;;  %p312_p2 = scmp.lt.s32.totalorder %s1262_s23, 5 }
   0x5   : > { %s1405_s24 = smov (%p38_p1, %s36_s24), 0  ;;  %p313_p3 = pnand %p1039_p0, %p312_p2 }
   0x6   : > { %p396_p4 = scmp.lt.s32.totalorder (!%p313_p3), %s1254_s21, 3 }
   0x7   : > { %316 = sbr.rel (%p313_p3) target bundleno = 211 (0xd3), region = 36 }
   0xc   : > { %s1407_s21 = smov (!%p396_p4, %s1254_s21), 3  ;;  %vm466_vm0 = vcmask 261120   ;;  %v1264_v46 = vmov 0.0   ;;  %vm817_vm1 = vcmask 257024   ;;  %vm805_vm2 = vcmask 253952  }
   0xd   : > { %s1181_s25 = sshll.u32 %s1407_s21, 7  ;;  %s1179_s8 = sshll.u32 %s1407_s21, 3  ;;  %467 = vst.msk [vmem:[#allocation2] sm:$0xff] %vm466_vm0, %v1264_v46 }
   0xe   : > { %s1324_s28 = scalar_lea.vmem %s1398_s3, %s1181_s25  ;;  %s1329_s7 = scalar_lea.vmem %s1397_s2, %s1181_s25 }
   0xf   : > { %v1206_v0 = vld [vmem:[%s1324_s28 + $0x38] sm:$0xff]  ;;  %v1205_v4 = vld [vmem:[%s1324_s28 + $0x30] sm:$0xff]  ;;  %v1204_v8 = vld [vmem:[%s1324_s28 + $0x28] sm:$0xff]  ;;  %s421_s11 = scalar_lea.vmem %s1396_s1, %s1179_s8  ;;  %s407_s14 = scalar_lea.vmem %s1395_s0, %s1179_s8 }
  0x10   : > { %v1214_v1 = vld [vmem:[%s1324_s28 + $0x78] sm:$0xff]  ;;  %642 = vmatpush.bf16.msra.mxu0 %v1206_v0  ;;  %v1213_v5 = vld [vmem:[%s1324_s28 + $0x70] sm:$0xff]  ;;  %v1212_v9 = vld [vmem:[%s1324_s28 + $0x68] sm:$0xff]  ;;  %s1048_s15 = sshll.u32 %s1407_s21, 2  ;;  %s455_s25 = scalar_lea.vmem %s1400_s5, %s1407_s21 }
  0x11   : > { %v1190_v2 = vld [vmem:[%s1329_s7 + $0x38] sm:$0xff]  ;;  %655 = vmatpush.bf16.msra.mxu1 %v1214_v1  ;;  %v1189_v6 = vld [vmem:[%s1329_s7 + $0x30] sm:$0xff]  ;;  %v1188_v10 = vld [vmem:[%s1329_s7 + $0x28] sm:$0xff]  ;;  %s449_s18 = scalar_lea.vmem %s1399_s4, %s1048_s15 }
  0x12   : > { %v1198_v3 = vld [vmem:[%s1329_s7 + $0x78] sm:$0xff]  ;;  %764 = vmatpush.bf16.msra.mxu2 %v1190_v2  ;;  %v1197_v7 = vld [vmem:[%s1329_s7 + $0x70] sm:$0xff]  ;;  %v1196_v11 = vld [vmem:[%s1329_s7 + $0x68] sm:$0xff] }
  0x13   : > { %777 = vmatpush.bf16.msra.mxu3 %v1198_v3  ;;  %v1203_v12 = vld [vmem:[%s1324_s28 + $0x20] sm:$0xff]  ;;  %v1202_v16 = vld [vmem:[%s1324_s28 + $0x18] sm:$0xff]  ;;  %v1201_v20 = vld [vmem:[%s1324_s28 + $0x10] sm:$0xff] }
  0x14   : > { %643 = vmatpush.bf16.msra.mxu0 %v1205_v4  ;;  %v1211_v13 = vld [vmem:[%s1324_s28 + $0x60] sm:$0xff]  ;;  %v1210_v17 = vld [vmem:[%s1324_s28 + $0x58] sm:$0xff]  ;;  %v1209_v21 = vld [vmem:[%s1324_s28 + $0x50] sm:$0xff] }
  0x15   : > { %656 = vmatpush.bf16.msra.mxu1 %v1213_v5  ;;  %v1187_v14 = vld [vmem:[%s1329_s7 + $0x20] sm:$0xff]  ;;  %v1186_v18 = vld [vmem:[%s1329_s7 + $0x18] sm:$0xff]  ;;  %v1185_v23 = vld [vmem:[%s1329_s7 + $0x10] sm:$0xff] }
  0x16   : > { %765 = vmatpush.bf16.msra.mxu2 %v1189_v6  ;;  %v1195_v15 = vld [vmem:[%s1329_s7 + $0x60] sm:$0xff]  ;;  %v1194_v19 = vld [vmem:[%s1329_s7 + $0x58] sm:$0xff]  ;;  %v1193_v24 = vld [vmem:[%s1329_s7 + $0x50] sm:$0xff] }
  0x17   : > { %778 = vmatpush.bf16.msra.mxu3 %v1197_v7  ;;  %v507_v22 = vld [vmem:[%s421_s11] sm:$0xff]  ;;  %v1200_v28 = vld [vmem:[%s1324_s28 + $0x8] sm:$0xff] }
  0x18   : > { %644 = vmatpush.bf16.msra.mxu0 %v1204_v8  ;;  %v468_v25 = vld [vmem:[%s407_s14] sm:$0xff]  ;;  %v508_v26 = vunpack.c.l.bf16 %v507_v22  ;;  %v509_v27 = vunpack.c.h.bf16 %v507_v22  ;;  %v1208_v29 = vld [vmem:[%s1324_s28 + $0x48] sm:$0xff] }
  0x19   : > { %657 = vmatpush.bf16.msra.mxu1 %v1212_v9  ;;  %v469_v30 = vunpack.c.l.bf16 %v468_v25  ;;  %v470_v31 = vunpack.c.h.bf16 %v468_v25  ;;  %v1184_v32 = vld [vmem:[%s1329_s7 + $0x8] sm:$0xff]  ;;  %v1199_v36 = vld [vmem:[%s1324_s28] sm:$0xff] }
  0x1a   : > { %766 = vmatpush.bf16.msra.mxu2 %v1188_v10  ;;  %v1192_v33 = vld [vmem:[%s1329_s7 + $0x48] sm:$0xff]  ;;  %v510_v34 = vmax.f32 %v508_v26, 0.0  ;;  %v511_v35 = vmax.f32 %v509_v27, 0.0  ;;  %v1207_v37 = vld [vmem:[%s1324_s28 + $0x40] sm:$0xff]  ;;  %s461_s28 = scalar_lea.vmem %s1401_s6, %s1407_s21 }
  0x1b   : > { %779 = vmatpush.bf16.msra.mxu3 %v1196_v11  ;;  %v471_v38 = vmax.f32 %v469_v30, 0.0  ;;  %v472_v39 = vmax.f32 %v470_v31, 0.0  ;;  %v1183_v40 = vld [vmem:[%s1329_s7] sm:$0xff] }
  0x1c   : > { %645 = vmatpush.bf16.msra.mxu0 %v1203_v12  ;;  %v1191_v41 = vld [vmem:[%s1329_s7 + $0x40] sm:$0xff]  ;;  %v512_v42 = vpack.c.bf16 %v510_v34, %v510_v34  ;;  %v513_v43 = vpack.c.bf16 %v511_v35, %v511_v35 }
  0x1d   : > { %658 = vmatpush.bf16.msra.mxu1 %v1211_v13  ;;  %v473_v44 = vpack.c.bf16 %v471_v38, %v471_v38  ;;  %v474_v45 = vpack.c.bf16 %v472_v39, %v472_v39  ;;  %v790_v55 = vld [vmem:[#allocation2] sm:$0xff] }
  0x1e   : > { %767 = vmatpush.bf16.msra.mxu2 %v1187_v14 }
  0x1f   : > { %780 = vmatpush.bf16.msra.mxu3 %v1195_v15 }
  0x20   : > { %646 = vmatpush.bf16.msra.mxu0 %v1202_v16 }
  0x21   : > { %659 = vmatpush.bf16.msra.mxu1 %v1210_v17 }
  0x22   : > { %768 = vmatpush.bf16.msra.mxu2 %v1186_v18 }
  0x23   : > { %781 = vmatpush.bf16.msra.mxu3 %v1194_v19 }
  0x24   : > { %647 = vmatpush.bf16.msra.mxu0 %v1201_v20 }
  0x25   : > { %660 = vmatpush.bf16.msra.mxu1 %v1209_v21 }
  0x26   : > { %769 = vmatpush.bf16.msra.mxu2 %v1185_v23 }
  0x27   : > { %782 = vmatpush.bf16.msra.mxu3 %v1193_v24 }
  0x28   : > { %648 = vmatpush.bf16.msra.mxu0 %v1200_v28 }
  0x29   : > { %661 = vmatpush.bf16.msra.mxu1 %v1208_v29 }
  0x2a   : > { %770 = vmatpush.bf16.msra.mxu2 %v1184_v32 }
  0x2b   : > { %783 = vmatpush.bf16.msra.mxu3 %v1192_v33 }
  0x2c   : > { %649 = vmatpush.bf16.msra.mxu0 %v1199_v36 }
  0x2d   : > { %662 = vmatpush.bf16.msra.mxu1 %v1207_v37 }
  0x2e   : > { %771 = vmatpush.bf16.msra.mxu2 %v1183_v40 }
  0x2f   : > { %784 = vmatpush.bf16.msra.mxu3 %v1191_v41  ;;  %650 = vmatmul.bf16.vlgmr.msra.gmra.mxu0 %v512_v42 }
  0x30   : > { %663 = vmatmul.bf16.vlgmr.msra.gmra.mxu1 %v513_v43 }
  0x31   : > { %772 = vmatmul.bf16.vlgmr.msra.gmra.mxu2 %v473_v44 }
  0x32   : > { %785 = vmatmul.bf16.vlgmr.msra.gmra.mxu3 %v474_v45 }
  0xac   : > { %v651_v47 = vpop.f32.mrf.mxu0 }
  0xad   : > { %v664_v48 = vpop.f32.mrf.mxu1 }
  0xae   : > { %v665_v49 = vadd.f32 %v664_v48, %v651_v47 }
  0xb4   : > { %v773_v50 = vpop.f32.mrf.mxu2  ;;  %v653_v53 = vpop.f32.mrf.mxu0 }
  0xb5   : > { %v786_v51 = vpop.f32.mrf.mxu3  ;;  %v774_v52 = vadd.f32 %v773_v50, %v665_v49  ;;  %v666_v54 = vpop.f32.mrf.mxu1 }
  0xb7   : > { %v787_v56 = vadd.f32 %v786_v51, %v774_v52 }
  0xb9   : > { %v791_v57 = vadd.f32 %v790_v55, %v787_v56 }
  0xbb   : > { %793 = vst.msk [vmem:[#allocation2] sm:$0xff] %vm466_vm0, %v791_v57 }
  0xbc   : > { %v775_v58 = vpop.f32.mrf.mxu2 }
  0xbd   : > { %v788_v59 = vpop.f32.mrf.mxu3 }
  0xc2   : > { %v797_v60 = vld [vmem:[#allocation2] sm:$0xff] }
  0xc3   : > { %v798_v61 = vsel %vm466_vm0, %v797_v60, 0.0  ;;  %v807_v62 = vmul.f32 %v797_v60, %v797_v60  ;;  %v816_v63 = vpack.c.bf16 %v797_v60, %v797_v60 }
  0xc4   : > { %v799_v0 = vrot.slane %v798_v61, 4 }
  0xc5   : > { %v808_v1 = vsel %vm466_vm0, %v807_v62, 0.0  ;;  %818 = vst.msk [vmem:[%s449_s18] sm:$0xf] %vm817_vm1, %v816_v63 }
  0xc6   : > { %v800_v2 = vadd.f32 %v799_v0, %v798_v61  ;;  %v809_v3 = vrot.slane %v808_v1, 4 }
  0xc8   : > { %v801_v4 = vrot.slane %v800_v2, 2  ;;  %v810_v5 = vadd.f32 %v809_v3, %v808_v1 }
  0xca   : > { %v802_v6 = vadd.f32 %v801_v4, %v800_v2  ;;  %v811_v7 = vrot.slane %v810_v5, 2 }
  0xcc   : > { %v803_v8 = vrot.slane %v802_v6, 1  ;;  %v812_v9 = vadd.f32 %v811_v7, %v810_v5 }
  0xce   : > { %v804_v10 = vadd.f32 %v803_v8, %v802_v6  ;;  %v813_v11 = vrot.slane %v812_v9, 1 }
  0xd0   : > { %806 = vst.msk [vmem:[%s455_s25] sm:$0x1] %vm805_vm2, %v804_v10  ;;  %v814_v12 = vadd.f32 %v813_v11, %v812_v9 }
  0xd2   : > { %815 = vst.msk [vmem:[%s461_s28] sm:$0x1] %vm805_vm2, %v814_v12 }
  0xd3 PF: > { %s17_s23 = sadd.s32 1, %s1262_s23   ;;  %s1402_s21 = smov %s1258_s22 }
  0xd4   : > { %p14_p5 = scmp.ge.s32.totalorder %s17_s23, 6   ;;  %s1403_s22 = smov %s1405_s24 }
  0xd6   :  { %16 = sbr.rel (!%p14_p5) target bundleno = 2 (0x2), region = 107 }

// kernel: _lambda_.17
= control target key start
LH: loop header
LB: loop body
LE: loop exit
PB: predicated region body
PF: predicated region fallthrough
CT: control target
= control target key end

     0   :  { %s1167_s21 = smov 0   ;;  %s1169_s22 = smov 0   ;;  %s1272_s0 = inlined_call_operand.vmem [shape: bf16[4,32,128], index: 0, kind: input, shape index: {}]   ;;  %s1273_s1 = inlined_call_operand.vmem [shape: bf16[4,32,128], index: 1, kind: input, shape index: {}]   ;;  %s1274_s2 = inlined_call_operand.vmem [shape: bf16[4,128,16], index: 2, kind: input, shape index: {}]   ;;  %s1275_s3 = inlined_call_operand.vmem [shape: bf16[4,128,16], index: 3, kind: input, shape index: {}]   ;;  %s1276_s4 = inlined_call_operand.vmem [shape: bf16[4,32,16], index: 4, kind: output, shape index: {0}]   ;;  %s1277_s5 = inlined_call_operand.vmem [shape: f32[4,1,1,16], index: 5, kind: output, shape index: {1}]   ;;  %s1278_s6 = inlined_call_operand.vmem [shape: f32[4,1,1,16], index: 6, kind: output, shape index: {2}]  }
   0x1   :  { %s1171_s23 = smov 0  }
   0x2 LB: > { %s36_s24 = sadd.s32 1, %s1125_s22  ;;  %p950_p0 = scmp.ge.s32.totalorder %s1129_s23, 1  ;;  %s1129_s23 = sphi %s1171_s23, %s17_s23   ;;  %s1125_s22 = sphi %s1169_s22, %s1280_s22   ;;  %s1121_s21 = sphi %s1167_s21, %s1279_s21  }
   0x3   : > { %p38_p1 = scmp.ge.s32.totalorder %s36_s24, 4  ;;  %p310_p2 = scmp.lt.s32.totalorder %s1129_s23, 5 }
   0x5   : > { %s1282_s24 = smov (%p38_p1, %s36_s24), 0  ;;  %p311_p3 = pnand %p950_p0, %p310_p2 }
   0x6   : > { %p394_p4 = scmp.lt.s32.totalorder (!%p311_p3), %s1121_s21, 3 }
   0x7   : > { %314 = sbr.rel (%p311_p3) target bundleno = 218 (0xda), region = 36 }
   0xc   : > { %s1284_s21 = smov (!%p394_p4, %s1121_s21), 3  ;;  %vm465_vm0 = vcmask 130048   ;;  %v1131_v40 = vmov 0.0   ;;  %vm721_vm1 = vcmask 125952   ;;  %vm697_vm2 = vcmask 122880  }
   0xd   : > { %s1029_s25 = sshll.u32 %s1284_s21, 6  ;;  %s1207_s8 = sshll.u32 %s1284_s21, 4  ;;  %466 = vst.msk [vmem:[#allocation2] sm:$0xff] %vm465_vm0, %v1131_v40 }
   0xe   : > { %s1191_s28 = scalar_lea.vmem %s1275_s3, %s1029_s25  ;;  %s1196_s7 = scalar_lea.vmem %s1274_s2, %s1029_s25  ;;  %467 = vst.msk [vmem:[#allocation2 + $0x8] sm:$0xff] %vm465_vm0, %v1131_v40 }
   0xf   : > { %v1047_v0 = vld [vmem:[%s1191_s28 + $0x38] sm:$0xff]  ;;  %v1046_v2 = vld [vmem:[%s1191_s28 + $0x30] sm:$0xff]  ;;  %v1045_v4 = vld [vmem:[%s1191_s28 + $0x28] sm:$0xff]  ;;  %s417_s11 = scalar_lea.vmem %s1273_s1, %s1207_s8  ;;  %s404_s14 = scalar_lea.vmem %s1272_s0, %s1207_s8  ;;  %468 = vst.msk [vmem:[#allocation2 + $0x10] sm:$0xff] %vm465_vm0, %v1131_v40 }
  0x10   : > { %v1039_v1 = vld [vmem:[%s1196_s7 + $0x38] sm:$0xff]  ;;  %578 = vmatpush.bf16.msra.mxu0 %v1047_v0  ;;  %1066 = vmatpush.bf16.msra.mxu2 %v1047_v0  ;;  %v1038_v3 = vld [vmem:[%s1196_s7 + $0x30] sm:$0xff]  ;;  %v1037_v5 = vld [vmem:[%s1196_s7 + $0x28] sm:$0xff]  ;;  %469 = vst.msk [vmem:[#allocation2 + $0x18] sm:$0xff] %vm465_vm0, %v1131_v40  ;;  %s1235_s17 = scalar_lea.vmem %s1276_s4, %s1207_s8  ;;  %s454_s20 = scalar_lea.vmem %s1277_s5, %s1284_s21 }
  0x11   : > { %645 = vmatpush.bf16.msra.mxu1 %v1039_v1  ;;  %1074 = vmatpush.bf16.msra.mxu3 %v1039_v1  ;;  %v1044_v6 = vld [vmem:[%s1191_s28 + $0x20] sm:$0xff]  ;;  %v1043_v8 = vld [vmem:[%s1191_s28 + $0x18] sm:$0xff]  ;;  %v1042_v10 = vld [vmem:[%s1191_s28 + $0x10] sm:$0xff]  ;;  %s460_s27 = scalar_lea.vmem %s1278_s6, %s1284_s21 }
  0x12   : > { %v1036_v7 = vld [vmem:[%s1196_s7 + $0x20] sm:$0xff]  ;;  %v1035_v9 = vld [vmem:[%s1196_s7 + $0x18] sm:$0xff]  ;;  %v1065_v12 = vld [vmem:[%s417_s11 + $0x8] sm:$0xff]  }
  0x13   : > { %v1057_v11 = vld [vmem:[%s417_s11] sm:$0xff]   ;;  %v1034_v13 = vld [vmem:[%s1196_s7 + $0x10] sm:$0xff]  ;;  %v1064_v15 = vld [vmem:[%s404_s14 + $0x8] sm:$0xff]   ;;  %v1062_v18 = vunpack.c.l.bf16 %v1065_v12  ;;  %v1063_v19 = vunpack.c.h.bf16 %v1065_v12 }
  0x14   : > { %579 = vmatpush.bf16.msra.mxu0 %v1046_v2  ;;  %1067 = vmatpush.bf16.msra.mxu2 %v1046_v2  ;;  %v1049_v14 = vld [vmem:[%s404_s14] sm:$0xff]   ;;  %v1058_v16 = vunpack.c.l.bf16 %v1057_v11  ;;  %v1059_v17 = vunpack.c.h.bf16 %v1057_v11  ;;  %v1041_v20 = vld [vmem:[%s1191_s28 + $0x8] sm:$0xff]  ;;  %v1054_v23 = vunpack.c.l.bf16 %v1064_v15  ;;  %v1055_v24 = vunpack.c.h.bf16 %v1064_v15 }
  0x15   : > { %646 = vmatpush.bf16.msra.mxu1 %v1038_v3  ;;  %1075 = vmatpush.bf16.msra.mxu3 %v1038_v3  ;;  %v1050_v21 = vunpack.c.l.bf16 %v1049_v14  ;;  %v1051_v22 = vunpack.c.h.bf16 %v1049_v14  ;;  %v1033_v25 = vld [vmem:[%s1196_s7 + $0x8] sm:$0xff]  ;;  %v510_v28 = vmax.f32 %v1062_v18, 0.0  ;;  %v511_v29 = vmax.f32 %v1063_v19, 0.0  ;;  %v1040_v30 = vld [vmem:[%s1191_s28] sm:$0xff] }
  0x16   : > { %v508_v26 = vmax.f32 %v1058_v16, 0.0  ;;  %v509_v27 = vmax.f32 %v1059_v17, 0.0  ;;  %v480_v33 = vmax.f32 %v1054_v23, 0.0  ;;  %v481_v34 = vmax.f32 %v1055_v24, 0.0  ;;  %v1032_v35 = vld [vmem:[%s1196_s7] sm:$0xff]  ;;  %v666_v48 = vld [vmem:[#allocation2 + $0x10] sm:$0xff] }
  0x17   : > { %v478_v31 = vmax.f32 %v1050_v21, 0.0  ;;  %v479_v32 = vmax.f32 %v1051_v22, 0.0  ;;  %v513_v37 = vpack.c.bf16 %v511_v29, %v510_v28  ;;  %v664_v43 = vld [vmem:[#allocation2] sm:$0xff]  ;;  %v665_v52 = vld [vmem:[#allocation2 + $0x8] sm:$0xff]  ;;  %v667_v60 = vld [vmem:[#allocation2 + $0x18] sm:$0xff] }
  0x18   : > { %580 = vmatpush.bf16.msra.mxu0 %v1045_v4  ;;  %1068 = vmatpush.bf16.msra.mxu2 %v1045_v4  ;;  %v512_v36 = vpack.c.bf16 %v509_v27, %v508_v26  ;;  %v483_v39 = vpack.c.bf16 %v481_v34, %v480_v33 }
  0x19   : > { %647 = vmatpush.bf16.msra.mxu1 %v1037_v5  ;;  %1076 = vmatpush.bf16.msra.mxu3 %v1037_v5  ;;  %v482_v38 = vpack.c.bf16 %v479_v32, %v478_v31 }
  0x1c   : > { %581 = vmatpush.bf16.msra.mxu0 %v1044_v6  ;;  %1069 = vmatpush.bf16.msra.mxu2 %v1044_v6 }
  0x1d   : > { %648 = vmatpush.bf16.msra.mxu1 %v1036_v7  ;;  %1077 = vmatpush.bf16.msra.mxu3 %v1036_v7 }
  0x20   : > { %582 = vmatpush.bf16.msra.mxu0 %v1043_v8  ;;  %1070 = vmatpush.bf16.msra.mxu2 %v1043_v8 }
  0x21   : > { %649 = vmatpush.bf16.msra.mxu1 %v1035_v9  ;;  %1078 = vmatpush.bf16.msra.mxu3 %v1035_v9 }
  0x24   : > { %583 = vmatpush.bf16.msra.mxu0 %v1042_v10  ;;  %1071 = vmatpush.bf16.msra.mxu2 %v1042_v10 }
  0x25   : > { %650 = vmatpush.bf16.msra.mxu1 %v1034_v13  ;;  %1079 = vmatpush.bf16.msra.mxu3 %v1034_v13 }
  0x28   : > { %584 = vmatpush.bf16.msra.mxu0 %v1041_v20  ;;  %1072 = vmatpush.bf16.msra.mxu2 %v1041_v20 }
  0x29   : > { %651 = vmatpush.bf16.msra.mxu1 %v1033_v25  ;;  %1080 = vmatpush.bf16.msra.mxu3 %v1033_v25 }
  0x2c   : > { %585 = vmatpush.bf16.msra.mxu0 %v1040_v30  ;;  %1073 = vmatpush.bf16.msra.mxu2 %v1040_v30 }
  0x2d   : > { %652 = vmatpush.bf16.msra.mxu1 %v1032_v35  ;;  %1081 = vmatpush.bf16.msra.mxu3 %v1032_v35 }
  0x2f   : > { %586 = vmatmul.bf16.vlgmr.msra.gmra.mxu0 %v512_v36  ;;  %591 = vmatmul.bf16.vlgmr.msra.gmra.mxu2 %v513_v37 }
  0x30   : > { %653 = vmatmul.bf16.vlgmr.msra.gmra.mxu1 %v482_v38  ;;  %658 = vmatmul.bf16.vlgmr.msra.gmra.mxu3 %v483_v39 }
  0xac   : > { %v587_v41 = vpop.f32.mrf.mxu0 }
  0xad   : > { %v654_v42 = vpop.f32.mrf.mxu1 }
  0xae   : > { %v655_v44 = vadd.f32 %v654_v42, %v587_v41 }
  0xb0   : > { %v668_v45 = vadd.f32 %v664_v43, %v655_v44 }
  0xb2   : > { %673 = vst.msk [vmem:[#allocation2] sm:$0xff] %vm465_vm0, %v668_v45  ;;  %v592_v46 = vpop.f32.mrf.mxu2 }
  0xb3   : > { %v659_v47 = vpop.f32.mrf.mxu3 }
  0xb4   : > { %v660_v49 = vadd.f32 %v659_v47, %v592_v46  ;;  %v589_v50 = vpop.f32.mrf.mxu0 }
  0xb5   : > { %v656_v51 = vpop.f32.mrf.mxu1 }
  0xb6   : > { %v670_v53 = vadd.f32 %v666_v48, %v660_v49  ;;  %v657_v54 = vadd.f32 %v656_v51, %v589_v50 }
  0xb8   : > { %675 = vst.msk [vmem:[#allocation2 + $0x10] sm:$0xff] %vm465_vm0, %v670_v53  ;;  %v669_v55 = vadd.f32 %v665_v52, %v657_v54 }
  0xb9   : > { %v680_v56 = vld [vmem:[#allocation2] sm:$0xff] }
  0xba   : > { %v717_v57 = vpack.c.bf16 %v680_v56, %v680_v56  ;;  %674 = vst.msk [vmem:[#allocation2 + $0x8] sm:$0xff] %vm465_vm0, %v669_v55  ;;  %v594_v58 = vpop.f32.mrf.mxu2  ;;  %v699_v0 = vmul.f32 %v680_v56, %v680_v56  ;;  %v684_v3 = vsel %vm465_vm0, %v680_v56, 0.0 }
  0xbb   : > { %v661_v59 = vpop.f32.mrf.mxu3 }
  0xbc   : > { %722 = vst.msk [vmem:[%s1235_s17] sm:$0xf] %vm721_vm1, %v717_v57  ;;  %v662_v61 = vadd.f32 %v661_v59, %v594_v58  ;;  %v703_v8 = vsel %vm465_vm0, %v699_v0, 0.0 }
  0xbe   : > { %v671_v62 = vadd.f32 %v667_v60, %v662_v61 }
  0xbf   : > { %v682_v63 = vld [vmem:[#allocation2 + $0x10] sm:$0xff] }
  0xc0   : > { %v719_v1 = vpack.c.bf16 %v682_v63, %v682_v63  ;;  %676 = vst.msk [vmem:[#allocation2 + $0x18] sm:$0xff] %vm465_vm0, %v671_v62  ;;  %v701_v9 = vmul.f32 %v682_v63, %v682_v63  ;;  %v687_v12 = vsel %vm465_vm0, %v682_v63, 0.0 }
  0xc1   : > { %v681_v2 = vld [vmem:[#allocation2 + $0x8] sm:$0xff] }
  0xc2   : > { %724 = vst.msk [vmem:[%s1235_s17 + $0x8] sm:$0xf] %vm721_vm1, %v719_v1  ;;  %v685_v4 = vsel %vm465_vm0, %v681_v2, 0.0  ;;  %v700_v5 = vmul.f32 %v681_v2, %v681_v2  ;;  %v718_v6 = vpack.c.bf16 %v681_v2, %v681_v2  ;;  %v706_v15 = vsel %vm465_vm0, %v701_v9, 0.0 }
  0xc3   : > { %v686_v7 = vadd.f32 %v685_v4, %v684_v3 }
  0xc4   : > { %v704_v10 = vsel %vm465_vm0, %v700_v5, 0.0  ;;  %723 = vst.msk [vmem:[%s1235_s17 + $0x4] sm:$0xf] %vm721_vm1, %v718_v6 }
  0xc5   : > { %v705_v11 = vadd.f32 %v704_v10, %v703_v8  ;;  %v688_v14 = vadd.f32 %v687_v12, %v686_v7 }
  0xc7   : > { %v683_v13 = vld [vmem:[#allocation2 + $0x18] sm:$0xff]  ;;  %v707_v20 = vadd.f32 %v706_v15, %v705_v11 }
  0xc8   : > { %v689_v16 = vsel %vm465_vm0, %v683_v13, 0.0  ;;  %v702_v17 = vmul.f32 %v683_v13, %v683_v13  ;;  %v720_v18 = vpack.c.bf16 %v683_v13, %v683_v13 }
  0xc9   : > { %v690_v19 = vadd.f32 %v689_v16, %v688_v14 }
  0xca   : > { %v708_v21 = vsel %vm465_vm0, %v702_v17, 0.0  ;;  %725 = vst.msk [vmem:[%s1235_s17 + $0xc] sm:$0xf] %vm721_vm1, %v720_v18 }
  0xcb   : > { %v691_v22 = vrot.slane %v690_v19, 4  ;;  %v709_v23 = vadd.f32 %v708_v21, %v707_v20 }
  0xcd   : > { %v692_v24 = vadd.f32 %v691_v22, %v690_v19  ;;  %v710_v25 = vrot.slane %v709_v23, 4 }
  0xcf   : > { %v693_v26 = vrot.slane %v692_v24, 2  ;;  %v711_v27 = vadd.f32 %v710_v25, %v709_v23 }
  0xd1   : > { %v694_v28 = vadd.f32 %v693_v26, %v692_v24  ;;  %v712_v29 = vrot.slane %v711_v27, 2 }
  0xd3   : > { %v695_v30 = vrot.slane %v694_v28, 1  ;;  %v713_v31 = vadd.f32 %v712_v29, %v711_v27 }
  0xd5   : > { %v696_v32 = vadd.f32 %v695_v30, %v694_v28  ;;  %v714_v33 = vrot.slane %v713_v31, 1 }
  0xd7   : > { %698 = vst.msk [vmem:[%s454_s20] sm:$0x1] %vm697_vm2, %v696_v32  ;;  %v715_v34 = vadd.f32 %v714_v33, %v713_v31 }
  0xd9   : > { %716 = vst.msk [vmem:[%s460_s27] sm:$0x1] %vm697_vm2, %v715_v34 }
  0xda PF: > { %s17_s23 = sadd.s32 1, %s1129_s23   ;;  %s1279_s21 = smov %s1125_s22 }
  0xdb   : > { %p14_p5 = scmp.ge.s32.totalorder %s17_s23, 6   ;;  %s1280_s22 = smov %s1282_s24 }
  0xdd   :  { %16 = sbr.rel (!%p14_p5) target bundleno = 2 (0x2), region = 107 }

// kernel: _lambda_.18
= control target key start
LH: loop header
LB: loop body
LE: loop exit
PB: predicated region body
PF: predicated region fallthrough
CT: control target
= control target key end

     0   :  { %s1469_s21 = smov 0   ;;  %s1471_s22 = smov 0   ;;  %s1744_s0 = inlined_call_operand.vmem [shape: bf16[4,128,64], index: 0, kind: input, shape index: {}]   ;;  %s1745_s1 = inlined_call_operand.vmem [shape: bf16[4,128,64], index: 1, kind: input, shape index: {}]   ;;  %s1746_s2 = inlined_call_operand.vmem [shape: bf16[4,64,8], index: 2, kind: input, shape index: {}]   ;;  %s1747_s3 = inlined_call_operand.vmem [shape: bf16[4,64,8], index: 3, kind: input, shape index: {}]   ;;  %s1748_s4 = inlined_call_operand.vmem [shape: bf16[4,128,8], index: 4, kind: output, shape index: {0}]   ;;  %s1749_s5 = inlined_call_operand.vmem [shape: f32[4,1,1,8], index: 5, kind: output, shape index: {1}]   ;;  %s1750_s6 = inlined_call_operand.vmem [shape: f32[4,1,1,8], index: 6, kind: output, shape index: {2}]  }
   0x1   :  { %s1473_s23 = smov 0  }
   0x2 LB: > { %s36_s24 = sadd.s32 1, %s1427_s22  ;;  %p1224_p0 = scmp.ge.s32.totalorder %s1431_s23, 1  ;;  %s1431_s23 = sphi %s1473_s23, %s17_s23   ;;  %s1427_s22 = sphi %s1471_s22, %s1752_s22   ;;  %s1423_s21 = sphi %s1469_s21, %s1751_s21  }
   0x3   : > { %p38_p1 = scmp.ge.s32.totalorder %s36_s24, 4  ;;  %p310_p2 = scmp.lt.s32.totalorder %s1431_s23, 5 }
   0x5   : > { %s1754_s24 = smov (%p38_p1, %s36_s24), 0  ;;  %p311_p3 = pnand %p1224_p0, %p310_p2 }
   0x6   : > { %p394_p4 = scmp.lt.s32.totalorder (!%p311_p3), %s1423_s21, 3 }
   0x7   : > { %314 = sbr.rel (%p311_p3) target bundleno = 261 (0x105), region = 36 }
   0xc   : > { %s1756_s21 = smov (!%p394_p4, %s1423_s21), 3  ;;  %vm635_vm0 = vcmask 523264   ;;  %vm466_vm1 = vcmask 64512   ;;  %vm983_vm2 = vcmask 60416   ;;  %vm911_vm3 = vcmask 57344  }
   0xd   : > { %s1287_s25 = sshll.u32 %s1756_s21, 5  ;;  %s1502_s8 = sshll.u32 %s1756_s21, 6 }
   0xe   : > { %s1493_s28 = scalar_lea.vmem %s1747_s3, %s1287_s25  ;;  %s1499_s7 = scalar_lea.vmem %s1746_s2, %s1287_s25 }
   0xf   : > { %v1297_v0 = vld [vmem:[%s1493_s28 + $0x18] sm:$0xff]  ;;  %s1509_s11 = scalar_lea.vmem %s1745_s1, %s1502_s8  ;;  %v1296_v2 = vld [vmem:[%s1493_s28 + $0x10] sm:$0xff]  ;;  %s1518_s14 = scalar_lea.vmem %s1744_s0, %s1502_s8  ;;  %v1295_v12 = vld [vmem:[%s1493_s28 + $0x8] sm:$0xff] }
  0x10   : > { %v1293_v1 = vld [vmem:[%s1499_s7 + $0x18] sm:$0xff]  ;;  %664 = vmatpush.bf16.msra.mxu0 %v1297_v0  ;;  %1376 = vmatpush.bf16.msra.mxu2 %v1297_v0  ;;  %v1292_v3 = vld [vmem:[%s1499_s7 + $0x10] sm:$0xff]  ;;  %v1331_v4 = vld [vmem:[%s1509_s11] sm:$0xff]   ;;  %s1577_s17 = scalar_lea.vmem %s1748_s4, %s1502_s8  ;;  %s454_s20 = scalar_lea.vmem %s1749_s5, %s1756_s21 }
  0x11   : > { %761 = vmatpush.bf16.msra.mxu1 %v1293_v1  ;;  %1380 = vmatpush.bf16.msra.mxu3 %v1293_v1  ;;  %v1299_v5 = vld [vmem:[%s1518_s14] sm:$0xff]   ;;  %v1332_v8 = vunpack.c.l.bf16 %v1331_v4  ;;  %v1333_v9 = vunpack.c.h.bf16 %v1331_v4  ;;  %v1291_v17 = vld [vmem:[%s1499_s7 + $0x8] sm:$0xff]  ;;  %v1370_v56 = vld [vmem:[%s1509_s11 + $0x10] sm:$0xff]   ;;  %s460_s27 = scalar_lea.vmem %s1750_s6, %s1756_s21 }
  0x12   : > { %v1372_v6 = vld [vmem:[%s1509_s11 + $0x20] sm:$0xff]   ;;  %v1300_v13 = vunpack.c.l.bf16 %v1299_v5  ;;  %v1301_v14 = vunpack.c.h.bf16 %v1299_v5  ;;  %v1369_v32 = vld [vmem:[%s1509_s11 + $0x8] sm:$0xff]   ;;  %v1374_v57 = vld [vmem:[%s1509_s11 + $0x30] sm:$0xff]   ;;  %v1340_v60 = vunpack.c.l.bf16 %v1370_v56  ;;  %v1341_v61 = vunpack.c.h.bf16 %v1370_v56 }
  0x13   : > { %v1365_v7 = vld [vmem:[%s1518_s14 + $0x20] sm:$0xff]   ;;  %v1348_v10 = vunpack.c.l.bf16 %v1372_v6  ;;  %v1349_v11 = vunpack.c.h.bf16 %v1372_v6  ;;  %v579_v18 = vmax.f32 %v1332_v8, 0.0  ;;  %v580_v19 = vmax.f32 %v1333_v9, 0.0  ;;  %v1373_v33 = vld [vmem:[%s1509_s11 + $0x28] sm:$0xff]   ;;  %v1363_v58 = vld [vmem:[%s1518_s14 + $0x10] sm:$0xff]  }
  0x14   : > { %665 = vmatpush.bf16.msra.mxu0 %v1296_v2  ;;  %1377 = vmatpush.bf16.msra.mxu2 %v1296_v2  ;;  %v1316_v15 = vunpack.c.l.bf16 %v1365_v7  ;;  %v1317_v16 = vunpack.c.h.bf16 %v1365_v7  ;;  %v1294_v22 = vld [vmem:[%s1493_s28] sm:$0xff]  ;;  %v515_v23 = vmax.f32 %v1300_v13, 0.0  ;;  %v516_v24 = vmax.f32 %v1301_v14, 0.0  ;;  %v1362_v34 = vld [vmem:[%s1518_s14 + $0x8] sm:$0xff]   ;;  %v1367_v59 = vld [vmem:[%s1518_s14 + $0x30] sm:$0xff]  }
  0x15   : > { %762 = vmatpush.bf16.msra.mxu1 %v1292_v3  ;;  %1381 = vmatpush.bf16.msra.mxu3 %v1292_v3  ;;  %v587_v20 = vmax.f32 %v1348_v10, 0.0  ;;  %v588_v21 = vmax.f32 %v1349_v11, 0.0  ;;  %v1290_v27 = vld [vmem:[%s1499_s7] sm:$0xff]  ;;  %v595_v28 = vpack.c.bf16 %v580_v19, %v579_v18  ;;  %v1366_v35 = vld [vmem:[%s1518_s14 + $0x28] sm:$0xff]   ;;  %v1336_v36 = vunpack.c.l.bf16 %v1369_v32  ;;  %v1364_v18 = vld [vmem:[%s1518_s14 + $0x18] sm:$0xff]  }
  0x16   : > { %v523_v25 = vmax.f32 %v1316_v15, 0.0  ;;  %v524_v26 = vmax.f32 %v1317_v16, 0.0  ;;  %v531_v30 = vpack.c.bf16 %v516_v24, %v515_v23  ;;  %v1337_v37 = vunpack.c.h.bf16 %v1369_v32  ;;  %v1371_v16 = vld [vmem:[%s1509_s11 + $0x18] sm:$0xff]  }
  0x17   : > { %v599_v29 = vpack.c.bf16 %v588_v21, %v587_v20  ;;  %v1352_v38 = vunpack.c.l.bf16 %v1373_v33  ;;  %v1353_v39 = vunpack.c.h.bf16 %v1373_v33  ;;  %v1304_v40 = vunpack.c.l.bf16 %v1362_v34  ;;  %v1368_v19 = vld [vmem:[%s1518_s14 + $0x38] sm:$0xff]  }
  0x18   : > { %666 = vmatpush.bf16.msra.mxu0 %v1295_v12  ;;  %1378 = vmatpush.bf16.msra.mxu2 %v1295_v12  ;;  %v535_v31 = vpack.c.bf16 %v524_v26, %v523_v25  ;;  %v1305_v41 = vunpack.c.h.bf16 %v1362_v34  ;;  %v1320_v42 = vunpack.c.l.bf16 %v1366_v35  ;;  %v1321_v43 = vunpack.c.h.bf16 %v1366_v35 }
  0x19   : > { %763 = vmatpush.bf16.msra.mxu1 %v1291_v17  ;;  %1382 = vmatpush.bf16.msra.mxu3 %v1291_v17  ;;  %v581_v44 = vmax.f32 %v1336_v36, 0.0  ;;  %v582_v45 = vmax.f32 %v1337_v37, 0.0  ;;  %v589_v46 = vmax.f32 %v1352_v38, 0.0  ;;  %v590_v47 = vmax.f32 %v1353_v39, 0.0  ;;  %v1375_v17 = vld [vmem:[%s1509_s11 + $0x38] sm:$0xff]  }
  0x1a   : > { %v517_v48 = vmax.f32 %v1304_v40, 0.0  ;;  %v518_v49 = vmax.f32 %v1305_v41, 0.0  ;;  %v525_v50 = vmax.f32 %v1320_v42, 0.0  ;;  %v526_v51 = vmax.f32 %v1321_v43, 0.0 }
  0x1b   : > { %v596_v52 = vpack.c.bf16 %v582_v45, %v581_v44  ;;  %v600_v53 = vpack.c.bf16 %v590_v47, %v589_v46  ;;  %v1356_v62 = vunpack.c.l.bf16 %v1374_v57  ;;  %v1357_v63 = vunpack.c.h.bf16 %v1374_v57 }
  0x1c   : > { %667 = vmatpush.bf16.msra.mxu0 %v1294_v22  ;;  %1379 = vmatpush.bf16.msra.mxu2 %v1294_v22  ;;  %v532_v54 = vpack.c.bf16 %v518_v49, %v517_v48  ;;  %v536_v55 = vpack.c.bf16 %v526_v51, %v525_v50  ;;  %v1308_v0 = vunpack.c.l.bf16 %v1363_v58  ;;  %v1309_v1 = vunpack.c.h.bf16 %v1363_v58 }
  0x1d   : > { %764 = vmatpush.bf16.msra.mxu1 %v1290_v27  ;;  %1383 = vmatpush.bf16.msra.mxu3 %v1290_v27  ;;  %v1324_v2 = vunpack.c.l.bf16 %v1367_v59  ;;  %v1325_v3 = vunpack.c.h.bf16 %v1367_v59  ;;  %v583_v4 = vmax.f32 %v1340_v60, 0.0  ;;  %v584_v5 = vmax.f32 %v1341_v61, 0.0 }
  0x1e   : > { %v591_v6 = vmax.f32 %v1356_v62, 0.0  ;;  %v592_v7 = vmax.f32 %v1357_v63, 0.0  ;;  %v519_v8 = vmax.f32 %v1308_v0, 0.0  ;;  %v520_v9 = vmax.f32 %v1309_v1, 0.0 }
  0x1f   : > { %1251 = vmatmul.msk.bf16.vlgmr.msra.gmra.mxu0 %vm635_vm0, %v595_v28  ;;  %1255 = vmatmul.msk.bf16.vlgmr.msra.gmra.mxu2 %vm635_vm0, %v599_v29  ;;  %v527_v10 = vmax.f32 %v1324_v2, 0.0  ;;  %v528_v11 = vmax.f32 %v1325_v3, 0.0  ;;  %v597_v12 = vpack.c.bf16 %v584_v5, %v583_v4  ;;  %v1344_v20 = vunpack.c.l.bf16 %v1371_v16 }
  0x20   : > { %1275 = vmatmul.msk.bf16.vlgmr.msra.gmra.mxu1 %vm635_vm0, %v531_v30  ;;  %1279 = vmatmul.msk.bf16.vlgmr.msra.gmra.mxu3 %vm635_vm0, %v535_v31  ;;  %v601_v13 = vpack.c.bf16 %v592_v7, %v591_v6  ;;  %v533_v14 = vpack.c.bf16 %v520_v9, %v519_v8  ;;  %v1345_v21 = vunpack.c.h.bf16 %v1371_v16  ;;  %v1360_v22 = vunpack.c.l.bf16 %v1375_v17 }
  0x21   : > { %v537_v15 = vpack.c.bf16 %v528_v11, %v527_v10  ;;  %v1361_v23 = vunpack.c.h.bf16 %v1375_v17  ;;  %v1312_v24 = vunpack.c.l.bf16 %v1364_v18  ;;  %v1313_v25 = vunpack.c.h.bf16 %v1364_v18 }
  0x22   : > { %v1328_v26 = vunpack.c.l.bf16 %v1368_v19  ;;  %v1329_v27 = vunpack.c.h.bf16 %v1368_v19  ;;  %v585_v28 = vmax.f32 %v1344_v20, 0.0  ;;  %v586_v29 = vmax.f32 %v1345_v21, 0.0 }
  0x23   : > { %v593_v30 = vmax.f32 %v1360_v22, 0.0  ;;  %v594_v31 = vmax.f32 %v1361_v23, 0.0  ;;  %v521_v32 = vmax.f32 %v1312_v24, 0.0  ;;  %v522_v33 = vmax.f32 %v1313_v25, 0.0 }
  0x24   : > { %v529_v34 = vmax.f32 %v1328_v26, 0.0  ;;  %v530_v35 = vmax.f32 %v1329_v27, 0.0  ;;  %v598_v36 = vpack.c.bf16 %v586_v29, %v585_v28  ;;  %v1433_v40 = vmov 0.0  }
  0x25   : > { %v602_v37 = vpack.c.bf16 %v594_v31, %v593_v30  ;;  %v534_v38 = vpack.c.bf16 %v522_v33, %v521_v32  ;;  %467 = vst.msk [vmem:[#allocation2] sm:$0xff] %vm466_vm1, %v1433_v40 }
  0x26   : > { %v538_v39 = vpack.c.bf16 %v530_v35, %v529_v34  ;;  %468 = vst.msk [vmem:[#allocation2 + $0x8] sm:$0xff] %vm466_vm1, %v1433_v40 }
  0x27   : > { %469 = vst.msk [vmem:[#allocation2 + $0x10] sm:$0xff] %vm466_vm1, %v1433_v40 }
  0x28   : > { %470 = vst.msk [vmem:[#allocation2 + $0x18] sm:$0xff] %vm466_vm1, %v1433_v40 }
  0x29   : > { %471 = vst.msk [vmem:[#allocation2 + $0x20] sm:$0xff] %vm466_vm1, %v1433_v40 }
  0x2a   : > { %472 = vst.msk [vmem:[#allocation2 + $0x28] sm:$0xff] %vm466_vm1, %v1433_v40 }
  0x2b   : > { %473 = vst.msk [vmem:[#allocation2 + $0x30] sm:$0xff] %vm466_vm1, %v1433_v40 }
  0x2c   : > { %474 = vst.msk [vmem:[#allocation2 + $0x38] sm:$0xff] %vm466_vm1, %v1433_v40  ;;  %v806_v43 = vld [vmem:[#allocation2] sm:$0xff] }
  0x2d   : > { %475 = vst.msk [vmem:[#allocation2 + $0x40] sm:$0xff] %vm466_vm1, %v1433_v40 }
  0x2e   : > { %476 = vst.msk [vmem:[#allocation2 + $0x48] sm:$0xff] %vm466_vm1, %v1433_v40  ;;  %v808_v0 = vld [vmem:[#allocation2 + $0x10] sm:$0xff] }
  0x2f   : > { %1252 = vmatmul.msk.bf16.gmra.mxu0 %vm635_vm0, %v596_v52  ;;  %1256 = vmatmul.msk.bf16.gmra.mxu2 %vm635_vm0, %v600_v53  ;;  %477 = vst.msk [vmem:[#allocation2 + $0x50] sm:$0xff] %vm466_vm1, %v1433_v40  ;;  %v807_v52 = vld [vmem:[#allocation2 + $0x8] sm:$0xff] }
  0x30   : > { %1276 = vmatmul.msk.bf16.gmra.mxu1 %vm635_vm0, %v532_v54  ;;  %1280 = vmatmul.msk.bf16.gmra.mxu3 %vm635_vm0, %v536_v55  ;;  %478 = vst.msk [vmem:[#allocation2 + $0x58] sm:$0xff] %vm466_vm1, %v1433_v40  ;;  %v810_v28 = vld [vmem:[#allocation2 + $0x20] sm:$0xff] }
  0x31   : > { %479 = vst.msk [vmem:[#allocation2 + $0x60] sm:$0xff] %vm466_vm1, %v1433_v40 }
  0x32   : > { %480 = vst.msk [vmem:[#allocation2 + $0x68] sm:$0xff] %vm466_vm1, %v1433_v40 }
  0x33   : > { %481 = vst.msk [vmem:[#allocation2 + $0x70] sm:$0xff] %vm466_vm1, %v1433_v40 }
  0x34   : > { %482 = vst.msk [vmem:[#allocation2 + $0x78] sm:$0xff] %vm466_vm1, %v1433_v40  ;;  %v814_v48 = vld [vmem:[#allocation2 + $0x40] sm:$0xff] }
  0x35   : > { %v815_v60 = vld [vmem:[#allocation2 + $0x48] sm:$0xff] }
  0x36   : > { %v816_v10 = vld [vmem:[#allocation2 + $0x50] sm:$0xff] }
  0x37   : > { %v817_v24 = vld [vmem:[#allocation2 + $0x58] sm:$0xff] }
  0x3f   : > { %1253 = vmatmul.msk.bf16.gmra.mxu0 %vm635_vm0, %v597_v12  ;;  %1257 = vmatmul.msk.bf16.gmra.mxu2 %vm635_vm0, %v601_v13 }
  0x40   : > { %1277 = vmatmul.msk.bf16.gmra.mxu1 %vm635_vm0, %v533_v14  ;;  %1281 = vmatmul.msk.bf16.gmra.mxu3 %vm635_vm0, %v537_v15  ;;  %v809_v14 = vld [vmem:[#allocation2 + $0x18] sm:$0xff] }
  0x4f   : > { %1254 = vmatmul.msk.bf16.gmra.mxu0 %vm635_vm0, %v598_v36  ;;  %1258 = vmatmul.msk.bf16.gmra.mxu2 %vm635_vm0, %v602_v37 }
  0x50   : > { %1278 = vmatmul.msk.bf16.gmra.mxu1 %vm635_vm0, %v534_v38  ;;  %1282 = vmatmul.msk.bf16.gmra.mxu3 %vm635_vm0, %v538_v39  ;;  %v818_v38 = vld [vmem:[#allocation2 + $0x60] sm:$0xff] }
  0x9c   : > { %v669_v41 = vpop.f32.mrf.mxu0 }
  0x9d   : > { %v766_v42 = vpop.f32.mrf.mxu1 }
  0x9e   : > { %v767_v44 = vadd.f32 %v766_v42, %v669_v41  ;;  %v811_v42 = vld [vmem:[#allocation2 + $0x28] sm:$0xff] }
  0xa0   : > { %v822_v45 = vadd.f32 %v806_v43, %v767_v44 }
  0xa2   : > { %839 = vst.msk [vmem:[#allocation2] sm:$0xff] %vm466_vm1, %v822_v45  ;;  %v689_v46 = vpop.f32.mrf.mxu2 }
  0xa3   : > { %v786_v47 = vpop.f32.mrf.mxu3 }
  0xa4   : > { %v671_v49 = vpop.f32.mrf.mxu0  ;;  %v787_v50 = vadd.f32 %v786_v47, %v689_v46 }
  0xa5   : > { %v768_v51 = vpop.f32.mrf.mxu1 }
  0xa6   : > { %v769_v53 = vadd.f32 %v768_v51, %v671_v49  ;;  %v830_v54 = vadd.f32 %v814_v48, %v787_v50 }
  0xa8   : > { %v823_v55 = vadd.f32 %v807_v52, %v769_v53  ;;  %847 = vst.msk [vmem:[#allocation2 + $0x40] sm:$0xff] %vm466_vm1, %v830_v54  ;;  %v819_v52 = vld [vmem:[#allocation2 + $0x68] sm:$0xff] }
  0xa9   : > { %v1579_v56 = vld [vmem:[#allocation2] sm:$0xff] }
  0xaa   : > { %v967_v57 = vpack.c.bf16 %v1579_v56, %v1579_v56  ;;  %840 = vst.msk [vmem:[#allocation2 + $0x8] sm:$0xff] %vm466_vm1, %v823_v55  ;;  %v691_v58 = vpop.f32.mrf.mxu2 }
  0xab   : > { %v788_v59 = vpop.f32.mrf.mxu3 }
  0xac   : > { %984 = vst.msk [vmem:[%s1577_s17] sm:$0xf] %vm983_vm2, %v967_v57  ;;  %v674_v61 = vpop.f32.mrf.mxu0  ;;  %v789_v62 = vadd.f32 %v788_v59, %v691_v58  ;;  %v812_v57 = vld [vmem:[#allocation2 + $0x30] sm:$0xff] }
  0xad   : > { %v771_v63 = vpop.f32.mrf.mxu1 }
  0xae   : > { %v772_v1 = vadd.f32 %v771_v63, %v674_v61  ;;  %v831_v2 = vadd.f32 %v815_v60, %v789_v62 }
  0xaf   : > { %v1586_v3 = vld [vmem:[#allocation2 + $0x40] sm:$0xff] }
  0xb0   : > { %v975_v4 = vpack.c.bf16 %v1586_v3, %v1586_v3  ;;  %v824_v5 = vadd.f32 %v808_v0, %v772_v1  ;;  %848 = vst.msk [vmem:[#allocation2 + $0x48] sm:$0xff] %vm466_vm1, %v831_v2 }
  0xb1   : > { %v1591_v6 = vld [vmem:[#allocation2 + $0x8] sm:$0xff] }
  0xb2   : > { %v968_v7 = vpack.c.bf16 %v1591_v6, %v1591_v6  ;;  %992 = vst.msk [vmem:[%s1577_s17 + $0x20] sm:$0xf] %vm983_vm2, %v975_v4  ;;  %v694_v8 = vpop.f32.mrf.mxu2  ;;  %v914_v1 = vmul.f32 %v1591_v6, %v1591_v6 }
  0xb3   : > { %841 = vst.msk [vmem:[#allocation2 + $0x10] sm:$0xff] %vm466_vm1, %v824_v5  ;;  %v791_v9 = vpop.f32.mrf.mxu3  ;;  %v820_v5 = vld [vmem:[#allocation2 + $0x70] sm:$0xff] }
  0xb4   : > { %985 = vst.msk [vmem:[%s1577_s17 + $0x4] sm:$0xf] %vm983_vm2, %v968_v7  ;;  %v676_v11 = vpop.f32.mrf.mxu0  ;;  %v792_v12 = vadd.f32 %v791_v9, %v694_v8  ;;  %v913_v9 = vmul.f32 %v1579_v56, %v1579_v56 }
  0xb5   : > { %v773_v13 = vpop.f32.mrf.mxu1 }
  0xb6   : > { %v774_v15 = vadd.f32 %v773_v13, %v676_v11  ;;  %v832_v16 = vadd.f32 %v816_v10, %v792_v12  ;;  %v875_v10 = vsel %vm466_vm1, %v1591_v6, 0.0  ;;  %v813_v13 = vld [vmem:[#allocation2 + $0x38] sm:$0xff] }
  0xb7   : > { %v1600_v17 = vld [vmem:[#allocation2 + $0x48] sm:$0xff] }
  0xb8   : > { %v976_v18 = vpack.c.bf16 %v1600_v17, %v1600_v17  ;;  %v825_v19 = vadd.f32 %v809_v14, %v774_v15  ;;  %849 = vst.msk [vmem:[#allocation2 + $0x50] sm:$0xff] %vm466_vm1, %v832_v16  ;;  %v874_v16 = vsel %vm466_vm1, %v1579_v56, 0.0  ;;  %v929_v56 = vsel %vm466_vm1, %v913_v9, 0.0 }
  0xba   : > { %v1605_v20 = vld [vmem:[#allocation2 + $0x10] sm:$0xff]  ;;  %993 = vst.msk [vmem:[%s1577_s17 + $0x24] sm:$0xf] %vm983_vm2, %v976_v18  ;;  %v696_v21 = vpop.f32.mrf.mxu2  ;;  %v930_v18 = vsel %vm466_vm1, %v914_v1, 0.0 }
  0xbb   : > { %v969_v22 = vpack.c.bf16 %v1605_v20, %v1605_v20  ;;  %842 = vst.msk [vmem:[#allocation2 + $0x18] sm:$0xff] %vm466_vm1, %v825_v19  ;;  %v793_v23 = vpop.f32.mrf.mxu3  ;;  %v915_v11 = vmul.f32 %v1605_v20, %v1605_v20  ;;  %v877_v19 = vsel %vm466_vm1, %v1605_v20, 0.0 }
  0xbc   : > { %v679_v25 = vpop.f32.mrf.mxu0  ;;  %v794_v26 = vadd.f32 %v793_v23, %v696_v21 }
  0xbd   : > { %986 = vst.msk [vmem:[%s1577_s17 + $0x8] sm:$0xf] %vm983_vm2, %v969_v22  ;;  %v776_v27 = vpop.f32.mrf.mxu1  ;;  %v876_v22 = vadd.f32 %v875_v10, %v874_v16  ;;  %v891_v10 = vsel %vm466_vm1, %v1600_v17, 0.0 }
  0xbe   : > { %v777_v29 = vadd.f32 %v776_v27, %v679_v25  ;;  %v833_v30 = vadd.f32 %v817_v24, %v794_v26  ;;  %v932_v25 = vsel %vm466_vm1, %v915_v11, 0.0  ;;  %v931_v27 = vadd.f32 %v930_v18, %v929_v56 }
  0xbf   : > { %v1614_v31 = vld [vmem:[#allocation2 + $0x50] sm:$0xff] }
  0xc0   : > { %v977_v32 = vpack.c.bf16 %v1614_v31, %v1614_v31  ;;  %v826_v33 = vadd.f32 %v810_v28, %v777_v29  ;;  %850 = vst.msk [vmem:[#allocation2 + $0x58] sm:$0xff] %vm466_vm1, %v833_v30  ;;  %v878_v28 = vadd.f32 %v877_v19, %v876_v22  ;;  %v923_v11 = vmul.f32 %v1614_v31, %v1614_v31 }
  0xc2   : > { %v1619_v34 = vld [vmem:[#allocation2 + $0x18] sm:$0xff]  ;;  %994 = vst.msk [vmem:[%s1577_s17 + $0x28] sm:$0xf] %vm983_vm2, %v977_v32  ;;  %v699_v35 = vpop.f32.mrf.mxu2  ;;  %v948_v22 = vsel %vm466_vm1, %v923_v11, 0.0 }
  0xc3   : > { %v970_v36 = vpack.c.bf16 %v1619_v34, %v1619_v34  ;;  %843 = vst.msk [vmem:[#allocation2 + $0x20] sm:$0xff] %vm466_vm1, %v826_v33  ;;  %v796_v37 = vpop.f32.mrf.mxu3  ;;  %v916_v6 = vmul.f32 %v1619_v34, %v1619_v34  ;;  %v879_v26 = vsel %vm466_vm1, %v1619_v34, 0.0 }
  0xc4   : > { %v681_v39 = vpop.f32.mrf.mxu0  ;;  %v797_v40 = vadd.f32 %v796_v37, %v699_v35  ;;  %v880_v34 = vadd.f32 %v879_v26, %v878_v28 }
  0xc5   : > { %987 = vst.msk [vmem:[%s1577_s17 + $0xc] sm:$0xf] %vm983_vm2, %v970_v36  ;;  %v778_v41 = vpop.f32.mrf.mxu1  ;;  %v934_v32 = vsel %vm466_vm1, %v916_v6, 0.0 }
  0xc6   : > { %v779_v43 = vadd.f32 %v778_v41, %v681_v39  ;;  %v834_v44 = vadd.f32 %v818_v38, %v797_v40  ;;  %v821_v38 = vld [vmem:[#allocation2 + $0x78] sm:$0xff]  ;;  %v933_v39 = vadd.f32 %v932_v25, %v931_v27 }
  0xc7   : > { %v1628_v45 = vld [vmem:[#allocation2 + $0x58] sm:$0xff] }
  0xc8   : > { %v978_v46 = vpack.c.bf16 %v1628_v45, %v1628_v45  ;;  %v827_v47 = vadd.f32 %v811_v42, %v779_v43  ;;  %851 = vst.msk [vmem:[#allocation2 + $0x60] sm:$0xff] %vm466_vm1, %v834_v44  ;;  %v935_v44 = vadd.f32 %v934_v32, %v933_v39  ;;  %v924_v16 = vmul.f32 %v1628_v45, %v1628_v45 }
  0xca   : > { %v862_v48 = vld [vmem:[#allocation2 + $0x20] sm:$0xff]  ;;  %995 = vst.msk [vmem:[%s1577_s17 + $0x2c] sm:$0xf] %vm983_vm2, %v978_v46  ;;  %v701_v49 = vpop.f32.mrf.mxu2 }
  0xcb   : > { %v971_v50 = vpack.c.bf16 %v862_v48, %v862_v48  ;;  %844 = vst.msk [vmem:[#allocation2 + $0x28] sm:$0xff] %vm466_vm1, %v827_v47  ;;  %v798_v51 = vpop.f32.mrf.mxu3  ;;  %v917_v20 = vmul.f32 %v862_v48, %v862_v48  ;;  %v881_v33 = vsel %vm466_vm1, %v862_v48, 0.0 }
  0xcc   : > { %v684_v53 = vpop.f32.mrf.mxu0  ;;  %v799_v54 = vadd.f32 %v798_v51, %v701_v49  ;;  %v882_v46 = vadd.f32 %v881_v33, %v880_v34 }
  0xcd   : > { %988 = vst.msk [vmem:[%s1577_s17 + $0x10] sm:$0xf] %vm983_vm2, %v971_v50  ;;  %v781_v55 = vpop.f32.mrf.mxu1  ;;  %v936_v41 = vsel %vm466_vm1, %v917_v20, 0.0 }
  0xce   : > { %v782_v58 = vadd.f32 %v781_v55, %v684_v53  ;;  %v835_v59 = vadd.f32 %v819_v52, %v799_v54  ;;  %v937_v51 = vadd.f32 %v936_v41, %v935_v44 }
  0xcf   : > { %v1638_v60 = vld [vmem:[#allocation2 + $0x60] sm:$0xff] }
  0xd0   : > { %v979_v61 = vpack.c.bf16 %v1638_v60, %v1638_v60  ;;  %v828_v62 = vadd.f32 %v812_v57, %v782_v58  ;;  %852 = vst.msk [vmem:[#allocation2 + $0x68] sm:$0xff] %vm466_vm1, %v835_v59  ;;  %v921_v59 = vmul.f32 %v1586_v3, %v1586_v3  ;;  %v897_v25 = vsel %vm466_vm1, %v1638_v60, 0.0 }
  0xd2   : > { %v863_v63 = vld [vmem:[#allocation2 + $0x28] sm:$0xff]  ;;  %996 = vst.msk [vmem:[%s1577_s17 + $0x30] sm:$0xf] %vm983_vm2, %v979_v61  ;;  %v704_v0 = vpop.f32.mrf.mxu2  ;;  %v944_v9 = vsel %vm466_vm1, %v921_v59, 0.0 }
  0xd3   : > { %v972_v2 = vpack.c.bf16 %v863_v63, %v863_v63  ;;  %845 = vst.msk [vmem:[#allocation2 + $0x30] sm:$0xff] %vm466_vm1, %v828_v62  ;;  %v801_v4 = vpop.f32.mrf.mxu3  ;;  %v918_v35 = vmul.f32 %v863_v63, %v863_v63  ;;  %v883_v42 = vsel %vm466_vm1, %v863_v63, 0.0 }
  0xd4   : > { %v686_v7 = vpop.f32.mrf.mxu0  ;;  %v802_v8 = vadd.f32 %v801_v4, %v704_v0  ;;  %v884_v52 = vadd.f32 %v883_v42, %v882_v46  ;;  %v922_v4 = vmul.f32 %v1600_v17, %v1600_v17  ;;  %v895_v17 = vsel %vm466_vm1, %v1628_v45, 0.0 }
  0xd5   : > { %989 = vst.msk [vmem:[%s1577_s17 + $0x14] sm:$0xf] %vm983_vm2, %v972_v2  ;;  %v783_v12 = vpop.f32.mrf.mxu1  ;;  %v938_v48 = vsel %vm466_vm1, %v918_v35, 0.0  ;;  %v889_v2 = vsel %vm466_vm1, %v1586_v3, 0.0 }
  0xd6   : > { %v784_v14 = vadd.f32 %v783_v12, %v686_v7  ;;  %v836_v15 = vadd.f32 %v820_v5, %v802_v8  ;;  %v939_v55 = vadd.f32 %v938_v48, %v937_v51 }
  0xd7   : > { %v1663_v21 = vld [vmem:[#allocation2 + $0x68] sm:$0xff] }
  0xd8   : > { %v980_v23 = vpack.c.bf16 %v1663_v21, %v1663_v21  ;;  %v829_v24 = vadd.f32 %v813_v13, %v784_v14  ;;  %853 = vst.msk [vmem:[#allocation2 + $0x70] sm:$0xff] %vm466_vm1, %v836_v15  ;;  %v946_v14 = vsel %vm466_vm1, %v922_v4, 0.0  ;;  %v893_v15 = vsel %vm466_vm1, %v1614_v31, 0.0 }
  0xd9   : > { %v950_v31 = vsel %vm466_vm1, %v924_v16, 0.0  ;;  %v926_v26 = vmul.f32 %v1663_v21, %v1663_v21  ;;  %v899_v45 = vsel %vm466_vm1, %v1663_v21, 0.0 }
  0xda   : > { %v864_v29 = vld [vmem:[#allocation2 + $0x30] sm:$0xff]  ;;  %997 = vst.msk [vmem:[%s1577_s17 + $0x34] sm:$0xf] %vm983_vm2, %v980_v23  ;;  %v706_v30 = vpop.f32.mrf.mxu2  ;;  %v925_v23 = vmul.f32 %v1638_v60, %v1638_v60 }
  0xdb   : > { %v973_v36 = vpack.c.bf16 %v864_v29, %v864_v29  ;;  %846 = vst.msk [vmem:[#allocation2 + $0x38] sm:$0xff] %vm466_vm1, %v829_v24  ;;  %v803_v37 = vpop.f32.mrf.mxu3  ;;  %v919_v43 = vmul.f32 %v864_v29, %v864_v29  ;;  %v885_v49 = vsel %vm466_vm1, %v864_v29, 0.0  ;;  %v954_v33 = vsel %vm466_vm1, %v926_v26, 0.0 }
  0xdc   : > { %v804_v40 = vadd.f32 %v803_v37, %v706_v30  ;;  %v886_v57 = vadd.f32 %v885_v49, %v884_v52  ;;  %v952_v28 = vsel %vm466_vm1, %v925_v23, 0.0 }
  0xdd   : > { %990 = vst.msk [vmem:[%s1577_s17 + $0x18] sm:$0xf] %vm983_vm2, %v973_v36  ;;  %v940_v54 = vsel %vm466_vm1, %v919_v43, 0.0 }
  0xde   : > { %v837_v47 = vadd.f32 %v821_v38, %v804_v40  ;;  %v941_v0 = vadd.f32 %v940_v54, %v939_v55 }
  0xdf   : > { %v872_v50 = vld [vmem:[#allocation2 + $0x70] sm:$0xff] }
  0xe0   : > { %v981_v53 = vpack.c.bf16 %v872_v50, %v872_v50  ;;  %854 = vst.msk [vmem:[#allocation2 + $0x78] sm:$0xff] %vm466_vm1, %v837_v47  ;;  %v927_v29 = vmul.f32 %v872_v50, %v872_v50  ;;  %v901_v35 = vsel %vm466_vm1, %v872_v50, 0.0 }
  0xe2   : > { %v865_v58 = vld [vmem:[#allocation2 + $0x38] sm:$0xff]  ;;  %998 = vst.msk [vmem:[%s1577_s17 + $0x38] sm:$0xf] %vm983_vm2, %v981_v53  ;;  %v956_v38 = vsel %vm466_vm1, %v927_v29, 0.0 }
  0xe3   : > { %v887_v61 = vsel %vm466_vm1, %v865_v58, 0.0  ;;  %v920_v62 = vmul.f32 %v865_v58, %v865_v58  ;;  %v974_v63 = vpack.c.bf16 %v865_v58, %v865_v58 }
  0xe4   : > { %v888_v1 = vadd.f32 %v887_v61, %v886_v57 }
  0xe5   : > { %v942_v5 = vsel %vm466_vm1, %v920_v62, 0.0  ;;  %991 = vst.msk [vmem:[%s1577_s17 + $0x1c] sm:$0xf] %vm983_vm2, %v974_v63 }
  0xe6   : > { %v890_v7 = vadd.f32 %v889_v2, %v888_v1  ;;  %v943_v8 = vadd.f32 %v942_v5, %v941_v0 }
  0xe7   : > { %v873_v12 = vld [vmem:[#allocation2 + $0x78] sm:$0xff] }
  0xe8   : > { %v892_v3 = vadd.f32 %v891_v10, %v890_v7  ;;  %v945_v13 = vadd.f32 %v944_v9, %v943_v8  ;;  %v982_v18 = vpack.c.bf16 %v873_v12, %v873_v12  ;;  %v928_v36 = vmul.f32 %v873_v12, %v873_v12 }
  0xe9   : > { %v903_v39 = vsel %vm466_vm1, %v873_v12, 0.0 }
  0xea   : > { %v894_v19 = vadd.f32 %v893_v15, %v892_v3  ;;  %v947_v6 = vadd.f32 %v946_v14, %v945_v13  ;;  %999 = vst.msk [vmem:[%s1577_s17 + $0x3c] sm:$0xf] %vm983_vm2, %v982_v18  ;;  %v958_v21 = vsel %vm466_vm1, %v928_v36, 0.0 }
  0xec   : > { %v949_v24 = vadd.f32 %v948_v22, %v947_v6  ;;  %v896_v56 = vadd.f32 %v895_v17, %v894_v19 }
  0xee   : > { %v898_v20 = vadd.f32 %v897_v25, %v896_v56  ;;  %v951_v27 = vadd.f32 %v950_v31, %v949_v24 }
  0xf0   : > { %v900_v30 = vadd.f32 %v899_v45, %v898_v20  ;;  %v953_v32 = vadd.f32 %v952_v28, %v951_v27 }
  0xf2   : > { %v902_v37 = vadd.f32 %v901_v35, %v900_v30  ;;  %v955_v60 = vadd.f32 %v954_v33, %v953_v32 }
  0xf4   : > { %v957_v34 = vadd.f32 %v956_v38, %v955_v60  ;;  %v904_v40 = vadd.f32 %v903_v39, %v902_v37 }
  0xf6   : > { %v905_v41 = vrot.slane %v904_v40, 4  ;;  %v959_v42 = vadd.f32 %v958_v21, %v957_v34 }
  0xf8   : > { %v906_v43 = vadd.f32 %v905_v41, %v904_v40  ;;  %v960_v44 = vrot.slane %v959_v42, 4 }
  0xfa   : > { %v907_v46 = vrot.slane %v906_v43, 2  ;;  %v961_v47 = vadd.f32 %v960_v44, %v959_v42 }
  0xfc   : > { %v908_v48 = vadd.f32 %v907_v46, %v906_v43  ;;  %v962_v49 = vrot.slane %v961_v47, 2 }
  0xfe   : > { %v909_v50 = vrot.slane %v908_v48, 1  ;;  %v963_v51 = vadd.f32 %v962_v49, %v961_v47 }
 0x100   : > { %v910_v52 = vadd.f32 %v909_v50, %v908_v48  ;;  %v964_v53 = vrot.slane %v963_v51, 1 }
 0x102   : > { %912 = vst.msk [vmem:[%s454_s20] sm:$0x1] %vm911_vm3, %v910_v52  ;;  %v965_v54 = vadd.f32 %v964_v53, %v963_v51 }
 0x104   : > { %966 = vst.msk [vmem:[%s460_s27] sm:$0x1] %vm911_vm3, %v965_v54 }
 0x105 PF: > { %s17_s23 = sadd.s32 1, %s1431_s23   ;;  %s1751_s21 = smov %s1427_s22 }
 0x106   : > { %p14_p5 = scmp.ge.s32.totalorder %s17_s23, 6   ;;  %s1752_s22 = smov %s1754_s24 }
 0x108   :  { %16 = sbr.rel (!%p14_p5) target bundleno = 2 (0x2), region = 107 }

// kernel: _lambda_.19
= control target key start
LH: loop header
LB: loop body
LE: loop exit
PB: predicated region body
PF: predicated region fallthrough
CT: control target
= control target key end

     0   :  { %13 = vsyncpa [#allocation4], 0  ;;  %s4429_s0 = inlined_call_operand.vmem [shape: bf16[4,512,32], index: 0, kind: input, shape index: {}]   ;;  %s4430_s1 = inlined_call_operand.vmem [shape: bf16[4,512,32], index: 1, kind: input, shape index: {}]   ;;  %s4431_s2 = inlined_call_operand.vmem [shape: bf16[4,32,3], index: 2, kind: input, shape index: {}]   ;;  %s4432_s3 = inlined_call_operand.vmem [shape: bf16[4,32,3], index: 3, kind: input, shape index: {}]   ;;  %s4433_s4 = inlined_call_operand.vmem [shape: f32[1,3], index: 4, kind: input, shape index: {}]   ;;  %s4434_s5 = inlined_call_operand.vmem [shape: f32[4,512,3], index: 5, kind: output, shape index: {0}]   ;;  %s4435_s6 = inlined_call_operand.hbm [shape: f32[4,1,1,3], index: 6, kind: output, shape index: {1}]   ;;  %s4436_s7 = inlined_call_operand.hbm [shape: f32[4,1,1,3], index: 7, kind: output, shape index: {2}]  }
   0x1   :  { %15 = vsyncpa [#allocation4 + $0x1], 0 }
   0x2   :  { %16 = vsyncpa [#allocation6], 0 }
   0x3   :  { %18 = vsyncpa [#allocation6 + $0x1], 0  ;;  %s3365_s24 = smov 0   ;;  %s3367_s25 = smov 0  }
   0x4   :  { %s3369_s26 = smov 0   ;;  %s3371_s27 = smov 0  }
   0x5   :  { %s3373_s28 = smov 0   ;;  %s3375_s29 = smov 0  }
   0x6 LB: > { %s2592_s30 = sadd.s32 4294967295, %s3322_s29   ;;  %s2593_s8 = sadd.s32 4294967294, %s3322_s29   ;;  %s3322_s29 = sphi %s3375_s29, %s24_s29   ;;  %s3318_s28 = sphi %s3373_s28, %s4446_s28   ;;  %s3314_s27 = sphi %s3371_s27, %s4445_s27   ;;  %s3310_s26 = sphi %s3369_s26, %s4444_s26   ;;  %s3306_s25 = sphi %s3367_s25, %s4443_s25   ;;  %s3302_s24 = sphi %s3365_s24, %s4442_s24  }
   0x7   : > { %s43_s9 = sadd.s32 1, %s3318_s28  ;;  %s217_s10 = sadd.s32 1, %s3310_s26 }
   0x8   : > { %p45_p0 = scmp.ge.s32.totalorder %s43_s9, 4  ;;  %p227_p1 = scmp.ne.s32.totalorder %s3310_s26, %s3306_s25 }
   0x9   : > { %p228_p2 = scmp.eq.s32.totalorder %s2592_s30, 3  ;;  %p233_p3 = scmp.ne.s32.totalorder %s3306_s25, %s3302_s24 }
   0xa   : > { %s4448_s9 = smov (%p45_p0, %s43_s9), 0  ;;  %p234_p5 = scmp.eq.s32.totalorder %s2593_s8, 3 }
   0xb   : > { %4438 = sst [smem:[#allocation9_spill]] %s4448_s9  ;;  %p3405_p4 = por %p228_p2, %p227_p1 }
   0xc   : > { %s212_s12 = ssub.s32 %s3318_s28, %s4448_s9  ;;  %p2596_p6 = scmp.ge.s32.totalorder %s3322_s29, 1 }
   0xd   : > { %p215_p7 = scmp.eq.s32.totalorder %s212_s12, 0  ;;  %p3412_p8 = por %p234_p5, %p233_p3 }
   0xe   : > { %p341_p9 = scmp.lt.s32.totalorder %s3322_s29, 5 }
   0xf   : > { %s3418_s14 = scalar_select %p215_p7, %s3310_s26, %s217_s10  }
  0x10   : > { %p342_p10 = pnand %p2596_p6, %p341_p9 }
  0x11   : > { %p423_p11 = scmp.lt.s32.totalorder (!%p342_p10), %s3314_s27, 3  ;;  %s4353_s8 = sand.u32 (!%p342_p10), 1, %s3306_s25  }
  0x12   : > { %345 = sbr.rel (%p342_p10) target bundleno = 519 (0x207), region = 40  ;;  %s415_s19 = scalar_lea.vmem (!%p342_p10), [#allocation3], %s4353_s8 }
  0x13   : > { %s421_s22 = scalar_lea.vmem (!%p342_p10), [#allocation5], %s4353_s8  ;;  %s3232_s9 = scalar_lea.hbm (!%p342_p10), %s4435_s6, 4 }
  0x14   : > { %s4369_s30 = sshll.u32 (!%p342_p10), %s421_s22, 4  ;;  %s2392_s30 = int_to_ptr.vmem [resolvable:$true] %s4369_s30 }
  0x17   : > { %s3422_s15 = scalar_select %p423_p11, %s3314_s27, 3  ;;  %vm1016_vm0 = vcmask 261120   ;;  %vm483_vm1 = vcmask 23552   ;;  %vm2020_vm2 = vcmask 16384  }
  0x19   : > { %s2689_s16 = sshll.u32 %s3422_s15, 8  ;;  %s2691_s17 = sshll.u32 %s3422_s15, 4 }
  0x1a   : > { %s3429_s20 = scalar_lea.vmem %s4429_s0, %s2689_s16  ;;  %s3434_s23 = scalar_lea.vmem %s4430_s1, %s2689_s16 }
  0x1b   : > { %s466_s10 = scalar_lea.vmem %s4432_s3, %s2691_s17  ;;  %v2827_v0 = vld [vmem:[%s3434_s23] sm:$0xff]   ;;  %s456_s18 = scalar_lea.vmem %s4431_s2, %s2691_s17  ;;  %v2985_v16 = vld [vmem:[%s3434_s23 + $0x8] sm:$0xff]   ;;  %v2986_v38 = vld [vmem:[%s3434_s23 + $0x10] sm:$0xff]  }
  0x1c   : > { %v2699_v1 = vld [vmem:[%s3429_s20] sm:$0xff]   ;;  %v2697_v2 = vld [vmem:[%s466_s10 + $0x8] sm:$0xff]  ;;  %v2828_v3 = vunpack.c.l.bf16 %v2827_v0  ;;  %v2829_v4 = vunpack.c.h.bf16 %v2827_v0  ;;  %v2832_v18 = vunpack.c.l.bf16 %v2985_v16  ;;  %v2833_v19 = vunpack.c.h.bf16 %v2985_v16  ;;  %v2955_v40 = vld [vmem:[%s3429_s20 + $0x10] sm:$0xff]   ;;  %s2693_s17 = sshll.u32 %s3422_s15, 9  ;;  %s4364_s15 = sshll.u32 %s415_s19, 4  ;;  %s2378_s15 = int_to_ptr.vmem [resolvable:$true] %s4364_s15 }
  0x1d   : > { %v2700_v5 = vunpack.c.l.bf16 %v2699_v1  ;;  %v2701_v6 = vunpack.c.h.bf16 %v2699_v1  ;;  %v2695_v7 = vld [vmem:[%s456_s18 + $0x8] sm:$0xff]  ;;  %1119 = vmatpush.bf16.msra.mxu0 %v2697_v2  ;;  %v2696_v8 = vld [vmem:[%s466_s10] sm:$0xff]  ;;  %3016 = vmatpush.bf16.msra.mxu2 %v2697_v2  ;;  %v2836_v42 = vunpack.c.l.bf16 %v2986_v38  ;;  %v2837_v43 = vunpack.c.h.bf16 %v2986_v38  ;;  %v2987_v62 = vld [vmem:[%s3434_s23 + $0x18] sm:$0xff]   ;;  %s3635_s21 = scalar_lea.vmem %s4434_s5, %s2693_s17  ;;  %s2389_s17 = scalar_lea.hbm %s4436_s7, %s3314_s27 }
  0x1e   : > { %v904_v9 = vmax.f32 %v2828_v3, 0.0  ;;  %v905_v10 = vmax.f32 %v2829_v4, 0.0  ;;  %1396 = vmatpush.bf16.msra.mxu1 %v2695_v7  ;;  %v2694_v13 = vld [vmem:[%s456_s18] sm:$0xff]  ;;  %3018 = vmatpush.bf16.msra.mxu3 %v2695_v7  ;;  %v2954_v17 = vld [vmem:[%s3429_s20 + $0x8] sm:$0xff]   ;;  %v906_v22 = vmax.f32 %v2832_v18, 0.0  ;;  %v907_v23 = vmax.f32 %v2833_v19, 0.0  ;;  %s2375_s18 = scalar_lea.hbm %s4435_s6, %s3314_s27 }
  0x1f   : > { %v676_v11 = vmax.f32 %v2700_v5, 0.0  ;;  %v677_v12 = vmax.f32 %v2701_v6, 0.0  ;;  %v2704_v20 = vunpack.c.l.bf16 %v2954_v17  ;;  %v2705_v21 = vunpack.c.h.bf16 %v2954_v17  ;;  %v3000_v27 = vld [vmem:[%s3434_s23 + $0x80] sm:$0xff]   ;;  %v3001_v51 = vld [vmem:[%s3434_s23 + $0x88] sm:$0xff]   ;;  %v2956_v0 = vld [vmem:[%s3429_s20 + $0x18] sm:$0xff]   ;;  %s2358_s27 = scalar_lea.sflag [#allocation4], %s4353_s8 }
  0x20   : > { %v968_v14 = vpack.c.bf16 %v905_v10, %v904_v9  ;;  %v969_v26 = vpack.c.bf16 %v907_v23, %v906_v22  ;;  %v2969_v28 = vld [vmem:[%s3429_s20 + $0x80] sm:$0xff]   ;;  %v2892_v30 = vunpack.c.l.bf16 %v3000_v27  ;;  %v2893_v31 = vunpack.c.h.bf16 %v3000_v27  ;;  %v2970_v52 = vld [vmem:[%s3429_s20 + $0x88] sm:$0xff]  }
  0x21   : > { %1120 = vmatpush.bf16.msra.mxu0 %v2696_v8  ;;  %v740_v15 = vpack.c.bf16 %v677_v12, %v676_v11  ;;  %3017 = vmatpush.bf16.msra.mxu2 %v2696_v8  ;;  %v678_v24 = vmax.f32 %v2704_v20, 0.0  ;;  %v679_v25 = vmax.f32 %v2705_v21, 0.0  ;;  %v2764_v32 = vunpack.c.l.bf16 %v2969_v28  ;;  %v3002_v11 = vld [vmem:[%s3434_s23 + $0x90] sm:$0xff]   ;;  %v2988_v22 = vld [vmem:[%s3434_s23 + $0x20] sm:$0xff]  }
  0x22   : > { %1397 = vmatpush.bf16.msra.mxu1 %v2694_v13  ;;  %3019 = vmatpush.bf16.msra.mxu3 %v2694_v13  ;;  %v2765_v33 = vunpack.c.h.bf16 %v2969_v28  ;;  %v936_v34 = vmax.f32 %v2892_v30, 0.0  ;;  %v937_v35 = vmax.f32 %v2893_v31, 0.0  ;;  %v2708_v44 = vunpack.c.l.bf16 %v2955_v40  ;;  %v2971_v12 = vld [vmem:[%s3429_s20 + $0x90] sm:$0xff]  }
  0x23   : > { %v741_v29 = vpack.c.bf16 %v679_v25, %v678_v24  ;;  %v708_v36 = vmax.f32 %v2764_v32, 0.0  ;;  %v2709_v45 = vunpack.c.h.bf16 %v2955_v40  ;;  %v908_v46 = vmax.f32 %v2836_v42, 0.0  ;;  %v2957_v24 = vld [vmem:[%s3429_s20 + $0x20] sm:$0xff]  }
  0x24   : > { %2615 = vmatmul.msk.bf16.vlgmr.msra.gmra.mxu0 %vm1016_vm0, %v968_v14  ;;  %v709_v37 = vmax.f32 %v2765_v33, 0.0  ;;  %v984_v39 = vpack.c.bf16 %v937_v35, %v936_v34  ;;  %v909_v47 = vmax.f32 %v2837_v43, 0.0  ;;  %v680_v48 = vmax.f32 %v2708_v44, 0.0  ;;  %v3003_v35 = vld [vmem:[%s3434_s23 + $0x98] sm:$0xff]  }
  0x25   : > { %2655 = vmatmul.msk.bf16.vlgmr.msra.gmra.mxu1 %vm1016_vm0, %v740_v15  ;;  %v681_v49 = vmax.f32 %v2709_v45, 0.0  ;;  %v2896_v54 = vunpack.c.l.bf16 %v3001_v51  ;;  %v2897_v55 = vunpack.c.h.bf16 %v3001_v51  ;;  %v2768_v56 = vunpack.c.l.bf16 %v2970_v52 }
  0x26   : > { %v756_v41 = vpack.c.bf16 %v709_v37, %v708_v36  ;;  %2631 = vmatmul.msk.bf16.vlgmr.msra.gmra.mxu2 %vm1016_vm0, %v984_v39  ;;  %v970_v50 = vpack.c.bf16 %v909_v47, %v908_v46  ;;  %v2769_v57 = vunpack.c.h.bf16 %v2970_v52  ;;  %v2840_v2 = vunpack.c.l.bf16 %v2987_v62  ;;  %v2972_v36 = vld [vmem:[%s3429_s20 + $0x98] sm:$0xff]   ;;  %v2989_v46 = vld [vmem:[%s3434_s23 + $0x28] sm:$0xff]  }
  0x27   : > { %v742_v53 = vpack.c.bf16 %v681_v49, %v680_v48  ;;  %v938_v58 = vmax.f32 %v2896_v54, 0.0  ;;  %v939_v59 = vmax.f32 %v2897_v55, 0.0  ;;  %v710_v60 = vmax.f32 %v2768_v56, 0.0  ;;  %v2958_v48 = vld [vmem:[%s3429_s20 + $0x28] sm:$0xff]  }
  0x28   : > { %2671 = vmatmul.msk.bf16.vlgmr.msra.gmra.mxu3 %vm1016_vm0, %v756_v41  ;;  %v711_v61 = vmax.f32 %v2769_v57, 0.0  ;;  %v2841_v3 = vunpack.c.h.bf16 %v2987_v62  ;;  %v2712_v4 = vunpack.c.l.bf16 %v2956_v0  ;;  %v2713_v5 = vunpack.c.h.bf16 %v2956_v0 }
  0x29   : > { %v985_v63 = vpack.c.bf16 %v939_v59, %v938_v58  ;;  %v910_v6 = vmax.f32 %v2840_v2, 0.0  ;;  %v2900_v14 = vunpack.c.l.bf16 %v3002_v11  ;;  %v2901_v15 = vunpack.c.h.bf16 %v3002_v11  ;;  %v3004_v59 = vld [vmem:[%s3434_s23 + $0xa0] sm:$0xff]  }
  0x2a   : > { %v757_v1 = vpack.c.bf16 %v711_v61, %v710_v60  ;;  %v911_v7 = vmax.f32 %v2841_v3, 0.0  ;;  %v682_v8 = vmax.f32 %v2712_v4, 0.0  ;;  %v683_v9 = vmax.f32 %v2713_v5, 0.0  ;;  %v2973_v60 = vld [vmem:[%s3429_s20 + $0xa0] sm:$0xff]  }
  0x2b   : > { %v2772_v16 = vunpack.c.l.bf16 %v2971_v12  ;;  %v2773_v17 = vunpack.c.h.bf16 %v2971_v12  ;;  %v940_v18 = vmax.f32 %v2900_v14, 0.0  ;;  %v941_v19 = vmax.f32 %v2901_v15, 0.0 }
  0x2c   : > { %v971_v10 = vpack.c.bf16 %v911_v7, %v910_v6  ;;  %v743_v13 = vpack.c.bf16 %v683_v9, %v682_v8  ;;  %v2845_v27 = vunpack.c.h.bf16 %v2988_v22  ;;  %v2716_v28 = vunpack.c.l.bf16 %v2957_v24  ;;  %v2990_v6 = vld [vmem:[%s3434_s23 + $0x30] sm:$0xff]  }
  0x2d   : > { %v712_v20 = vmax.f32 %v2772_v16, 0.0  ;;  %v713_v21 = vmax.f32 %v2773_v17, 0.0  ;;  %v986_v23 = vpack.c.bf16 %v941_v19, %v940_v18  ;;  %v2904_v38 = vunpack.c.l.bf16 %v3003_v35  ;;  %v2959_v8 = vld [vmem:[%s3429_s20 + $0x30] sm:$0xff]  }
  0x2e   : > { %v913_v31 = vmax.f32 %v2845_v27, 0.0  ;;  %v684_v32 = vmax.f32 %v2716_v28, 0.0  ;;  %v2905_v39 = vunpack.c.h.bf16 %v3003_v35  ;;  %v2776_v40 = vunpack.c.l.bf16 %v2972_v36 }
  0x2f   : > { %v758_v25 = vpack.c.bf16 %v713_v21, %v712_v20  ;;  %v2777_v41 = vunpack.c.h.bf16 %v2972_v36  ;;  %v942_v42 = vmax.f32 %v2904_v38, 0.0  ;;  %v2849_v51 = vunpack.c.h.bf16 %v2989_v46  ;;  %v3005_v20 = vld [vmem:[%s3434_s23 + $0xa8] sm:$0xff]  }
  0x30   : > { %v943_v43 = vmax.f32 %v2905_v39, 0.0  ;;  %v714_v44 = vmax.f32 %v2776_v40, 0.0  ;;  %v2720_v52 = vunpack.c.l.bf16 %v2958_v48  ;;  %v2908_v62 = vunpack.c.l.bf16 %v3004_v59  ;;  %v2974_v21 = vld [vmem:[%s3429_s20 + $0xa8] sm:$0xff]  }
  0x31   : > { %v715_v45 = vmax.f32 %v2777_v41, 0.0  ;;  %v915_v55 = vmax.f32 %v2849_v51, 0.0  ;;  %v2780_v0 = vunpack.c.l.bf16 %v2973_v60  ;;  %v2853_v11 = vunpack.c.h.bf16 %v2990_v6 }
  0x32   : > { %v987_v47 = vpack.c.bf16 %v943_v43, %v942_v42  ;;  %v686_v56 = vmax.f32 %v2720_v52, 0.0  ;;  %v944_v2 = vmax.f32 %v2908_v62, 0.0  ;;  %v2724_v12 = vunpack.c.l.bf16 %v2959_v8 }
  0x33   : > { %v759_v49 = vpack.c.bf16 %v715_v45, %v714_v44  ;;  %v716_v4 = vmax.f32 %v2780_v0, 0.0  ;;  %v917_v15 = vmax.f32 %v2853_v11, 0.0  ;;  %v3324_v18 = vmov 0.0   ;;  %v2992_v45 = vld [vmem:[%s3434_s23 + $0x40] sm:$0xff]  }
  0x34   : > { %2616 = vmatmul.msk.bf16.gmra.mxu0 %vm1016_vm0, %v969_v26  ;;  %v2844_v26 = vunpack.c.l.bf16 %v2988_v22  ;;  %v688_v16 = vmax.f32 %v2724_v12, 0.0  ;;  %484 = vst.msk [vmem:[#allocation2] sm:$0xff] %vm483_vm1, %v3324_v18 }
  0x35   : > { %2656 = vmatmul.msk.bf16.gmra.mxu1 %vm1016_vm0, %v741_v29  ;;  %v2717_v29 = vunpack.c.h.bf16 %v2957_v24  ;;  %485 = vst.msk [vmem:[#allocation2 + $0x8] sm:$0xff] %vm483_vm1, %v3324_v18  ;;  %v2913_v24 = vunpack.c.h.bf16 %v3005_v20 }
  0x36   : > { %2632 = vmatmul.msk.bf16.gmra.mxu2 %vm1016_vm0, %v985_v63  ;;  %v912_v30 = vmax.f32 %v2844_v26, 0.0  ;;  %v2909_v63 = vunpack.c.h.bf16 %v3004_v59  ;;  %486 = vst.msk [vmem:[#allocation2 + $0x10] sm:$0xff] %vm483_vm1, %v3324_v18  ;;  %v2785_v26 = vunpack.c.h.bf16 %v2974_v21 }
  0x37   : > { %v685_v33 = vmax.f32 %v2717_v29, 0.0  ;;  %487 = vst.msk [vmem:[#allocation2 + $0x18] sm:$0xff] %vm483_vm1, %v3324_v18  ;;  %v947_v28 = vmax.f32 %v2913_v24, 0.0 }
  0x38   : > { %2672 = vmatmul.msk.bf16.gmra.mxu3 %vm1016_vm0, %v757_v1  ;;  %v972_v34 = vpack.c.bf16 %v913_v31, %v912_v30  ;;  %v2781_v1 = vunpack.c.h.bf16 %v2973_v60  ;;  %v945_v3 = vmax.f32 %v2909_v63, 0.0  ;;  %488 = vst.msk [vmem:[#allocation2 + $0x20] sm:$0xff] %vm483_vm1, %v3324_v18  ;;  %v719_v30 = vmax.f32 %v2785_v26, 0.0  ;;  %v2991_v31 = vld [vmem:[%s3434_s23 + $0x38] sm:$0xff]  }
  0x39   : > { %v744_v37 = vpack.c.bf16 %v685_v33, %v684_v32  ;;  %489 = vst.msk [vmem:[#allocation2 + $0x28] sm:$0xff] %vm483_vm1, %v3324_v18  ;;  %v2960_v32 = vld [vmem:[%s3429_s20 + $0x38] sm:$0xff]   ;;  %v2856_v35 = vunpack.c.l.bf16 %v2991_v31  ;;  %v2857_v36 = vunpack.c.h.bf16 %v2991_v31 }
  0x3a   : > { %v717_v5 = vmax.f32 %v2781_v1, 0.0  ;;  %v988_v7 = vpack.c.bf16 %v945_v3, %v944_v2  ;;  %490 = vst.msk [vmem:[#allocation2 + $0x30] sm:$0xff] %vm483_vm1, %v3324_v18  ;;  %v2729_v38 = vunpack.c.h.bf16 %v2960_v32 }
  0x3b   : > { %491 = vst.msk [vmem:[#allocation2 + $0x38] sm:$0xff] %vm483_vm1, %v3324_v18  ;;  %v918_v39 = vmax.f32 %v2856_v35, 0.0  ;;  %v919_v40 = vmax.f32 %v2857_v36, 0.0 }
  0x3c   : > { %v760_v9 = vpack.c.bf16 %v717_v5, %v716_v4  ;;  %492 = vst.msk [vmem:[#allocation2 + $0x40] sm:$0xff] %vm483_vm1, %v3324_v18  ;;  %v691_v42 = vmax.f32 %v2729_v38, 0.0 }
  0x3d   : > { %493 = vst.msk [vmem:[#allocation2 + $0x48] sm:$0xff] %vm483_vm1, %v3324_v18  ;;  %v975_v43 = vpack.c.bf16 %v919_v40, %v918_v39  ;;  %v2963_v40 = vld [vmem:[%s3429_s20 + $0x50] sm:$0xff]  }
  0x3e   : > { %494 = vst.msk [vmem:[#allocation2 + $0x50] sm:$0xff] %vm483_vm1, %v3324_v18 }
  0x3f   : > { %495 = vst.msk [vmem:[#allocation2 + $0x58] sm:$0xff] %vm483_vm1, %v3324_v18 }
  0x40   : > { %496 = vst.msk [vmem:[#allocation2 + $0x60] sm:$0xff] %vm483_vm1, %v3324_v18 }
  0x41   : > { %497 = vst.msk [vmem:[#allocation2 + $0x68] sm:$0xff] %vm483_vm1, %v3324_v18 }
  0x42   : > { %498 = vst.msk [vmem:[#allocation2 + $0x70] sm:$0xff] %vm483_vm1, %v3324_v18 }
  0x43   : > { %499 = vst.msk [vmem:[#allocation2 + $0x78] sm:$0xff] %vm483_vm1, %v3324_v18 }
  0x44   : > { %2617 = vmatmul.msk.bf16.gmra.mxu0 %vm1016_vm0, %v970_v50  ;;  %v2848_v50 = vunpack.c.l.bf16 %v2989_v46  ;;  %500 = vst.msk [vmem:[#allocation2 + $0x80] sm:$0xff] %vm483_vm1, %v3324_v18  ;;  %v2961_v46 = vld [vmem:[%s3429_s20 + $0x40] sm:$0xff]  }
  0x45   : > { %2657 = vmatmul.msk.bf16.gmra.mxu1 %vm1016_vm0, %v742_v53  ;;  %v2721_v53 = vunpack.c.h.bf16 %v2958_v48  ;;  %501 = vst.msk [vmem:[#allocation2 + $0x88] sm:$0xff] %vm483_vm1, %v3324_v18  ;;  %v2861_v48 = vunpack.c.h.bf16 %v2992_v45 }
  0x46   : > { %2633 = vmatmul.msk.bf16.gmra.mxu2 %vm1016_vm0, %v986_v23  ;;  %v914_v54 = vmax.f32 %v2848_v50, 0.0  ;;  %v2912_v23 = vunpack.c.l.bf16 %v3005_v20  ;;  %502 = vst.msk [vmem:[#allocation2 + $0x90] sm:$0xff] %vm483_vm1, %v3324_v18  ;;  %v2733_v50 = vunpack.c.h.bf16 %v2961_v46 }
  0x47   : > { %v687_v57 = vmax.f32 %v2721_v53, 0.0  ;;  %503 = vst.msk [vmem:[#allocation2 + $0x98] sm:$0xff] %vm483_vm1, %v3324_v18  ;;  %v921_v52 = vmax.f32 %v2861_v48, 0.0 }
  0x48   : > { %2673 = vmatmul.msk.bf16.gmra.mxu3 %vm1016_vm0, %v758_v25  ;;  %v973_v58 = vpack.c.bf16 %v915_v55, %v914_v54  ;;  %v2784_v25 = vunpack.c.l.bf16 %v2974_v21  ;;  %v946_v27 = vmax.f32 %v2912_v23, 0.0  ;;  %504 = vst.msk [vmem:[#allocation2 + $0xa0] sm:$0xff] %vm483_vm1, %v3324_v18  ;;  %v693_v54 = vmax.f32 %v2733_v50, 0.0  ;;  %v1561_v50 = vld [vmem:[#allocation2 + $0x10] sm:$0xff] }
  0x49   : > { %v745_v61 = vpack.c.bf16 %v687_v57, %v686_v56  ;;  %505 = vst.msk [vmem:[#allocation2 + $0xa8] sm:$0xff] %vm483_vm1, %v3324_v18  ;;  %v3006_v56 = vld [vmem:[%s3434_s23 + $0xb0] sm:$0xff]  }
  0x4a   : > { %v718_v29 = vmax.f32 %v2784_v25, 0.0  ;;  %v989_v33 = vpack.c.bf16 %v947_v28, %v946_v27  ;;  %506 = vst.msk [vmem:[#allocation2 + $0xb0] sm:$0xff] %vm483_vm1, %v3324_v18  ;;  %v2975_v57 = vld [vmem:[%s3429_s20 + $0xb0] sm:$0xff]   ;;  %v2916_v62 = vunpack.c.l.bf16 %v3006_v56  ;;  %v2917_v63 = vunpack.c.h.bf16 %v3006_v56  ;;  %v3007_v27 = vld [vmem:[%s3434_s23 + $0xb8] sm:$0xff]  }
  0x4b   : > { %507 = vst.msk [vmem:[#allocation2 + $0xb8] sm:$0xff] %vm483_vm1, %v3324_v18  ;;  %v2788_v0 = vunpack.c.l.bf16 %v2975_v57  ;;  %v2789_v1 = vunpack.c.h.bf16 %v2975_v57  ;;  %v2976_v28 = vld [vmem:[%s3429_s20 + $0xb8] sm:$0xff]  }
  0x4c   : > { %508 = vst.msk [vmem:[#allocation2 + $0xc0] sm:$0xff] %vm483_vm1, %v3324_v18  ;;  %v948_v3 = vmax.f32 %v2916_v62, 0.0  ;;  %v949_v4 = vmax.f32 %v2917_v63, 0.0  ;;  %v2793_v36 = vunpack.c.h.bf16 %v2976_v28 }
  0x4d   : > { %509 = vst.msk [vmem:[#allocation2 + $0xc8] sm:$0xff] %vm483_vm1, %v3324_v18  ;;  %v720_v5 = vmax.f32 %v2788_v0, 0.0 }
  0x4e   : > { %510 = vst.msk [vmem:[#allocation2 + $0xd0] sm:$0xff] %vm483_vm1, %v3324_v18 }
  0x4f   : > { %511 = vst.msk [vmem:[#allocation2 + $0xd8] sm:$0xff] %vm483_vm1, %v3324_v18 }
  0x50   : > { %512 = vst.msk [vmem:[#allocation2 + $0xe0] sm:$0xff] %vm483_vm1, %v3324_v18 }
  0x51   : > { %513 = vst.msk [vmem:[#allocation2 + $0xe8] sm:$0xff] %vm483_vm1, %v3324_v18 }
  0x52   : > { %514 = vst.msk [vmem:[#allocation2 + $0xf0] sm:$0xff] %vm483_vm1, %v3324_v18 }
  0x53   : > { %515 = vst.msk [vmem:[#allocation2 + $0xf8] sm:$0xff] %vm483_vm1, %v3324_v18 }
  0x54   : > { %2618 = vmatmul.msk.bf16.gmra.mxu0 %vm1016_vm0, %v971_v10  ;;  %v2852_v10 = vunpack.c.l.bf16 %v2990_v6  ;;  %516 = vst.msk [vmem:[#allocation2 + $0x100] sm:$0xff] %vm483_vm1, %v3324_v18  ;;  %v721_v6 = vmax.f32 %v2789_v1, 0.0  ;;  %v2995_v1 = vld [vmem:[%s3434_s23 + $0x58] sm:$0xff]  }
  0x55   : > { %2658 = vmatmul.msk.bf16.gmra.mxu1 %vm1016_vm0, %v743_v13  ;;  %v2725_v13 = vunpack.c.h.bf16 %v2959_v8  ;;  %517 = vst.msk [vmem:[#allocation2 + $0x108] sm:$0xff] %vm483_vm1, %v3324_v18  ;;  %v2993_v8 = vld [vmem:[%s3434_s23 + $0x48] sm:$0xff]  }
  0x56   : > { %2634 = vmatmul.msk.bf16.gmra.mxu2 %vm1016_vm0, %v987_v47  ;;  %v916_v14 = vmax.f32 %v2852_v10, 0.0  ;;  %v2860_v47 = vunpack.c.l.bf16 %v2992_v45  ;;  %518 = vst.msk [vmem:[#allocation2 + $0x110] sm:$0xff] %vm483_vm1, %v3324_v18  ;;  %v990_v10 = vpack.c.bf16 %v949_v4, %v948_v3  ;;  %v762_v11 = vpack.c.bf16 %v721_v6, %v720_v5  ;;  %v1560_v45 = vld [vmem:[#allocation2 + $0x8] sm:$0xff]  ;;  %v2977_v3 = vld [vmem:[%s3429_s20 + $0xc0] sm:$0xff]  }
  0x57   : > { %v689_v17 = vmax.f32 %v2725_v13, 0.0  ;;  %519 = vst.msk [vmem:[#allocation2 + $0x118] sm:$0xff] %vm483_vm1, %v3324_v18  ;;  %v2864_v12 = vunpack.c.l.bf16 %v2993_v8  ;;  %v2865_v13 = vunpack.c.h.bf16 %v2993_v8 }
  0x58   : > { %2674 = vmatmul.msk.bf16.gmra.mxu3 %vm1016_vm0, %v759_v49  ;;  %v974_v19 = vpack.c.bf16 %v917_v15, %v916_v14  ;;  %v2732_v49 = vunpack.c.l.bf16 %v2961_v46  ;;  %v920_v51 = vmax.f32 %v2860_v47, 0.0  ;;  %520 = vst.msk [vmem:[#allocation2 + $0x120] sm:$0xff] %vm483_vm1, %v3324_v18 }
  0x59   : > { %v746_v22 = vpack.c.bf16 %v689_v17, %v688_v16  ;;  %521 = vst.msk [vmem:[#allocation2 + $0x128] sm:$0xff] %vm483_vm1, %v3324_v18  ;;  %v922_v20 = vmax.f32 %v2864_v12, 0.0  ;;  %v923_v21 = vmax.f32 %v2865_v13, 0.0  ;;  %v2872_v13 = vunpack.c.l.bf16 %v2995_v1 }
  0x5a   : > { %v692_v53 = vmax.f32 %v2732_v49, 0.0  ;;  %v976_v55 = vpack.c.bf16 %v921_v52, %v920_v51  ;;  %522 = vst.msk [vmem:[#allocation2 + $0x130] sm:$0xff] %vm483_vm1, %v3324_v18  ;;  %v2740_v52 = vunpack.c.l.bf16 %v2963_v40 }
  0x5b   : > { %523 = vst.msk [vmem:[#allocation2 + $0x138] sm:$0xff] %vm483_vm1, %v3324_v18  ;;  %v977_v26 = vpack.c.bf16 %v923_v21, %v922_v20 }
  0x5c   : > { %v748_v59 = vpack.c.bf16 %v693_v54, %v692_v53  ;;  %524 = vst.msk [vmem:[#allocation2 + $0x140] sm:$0xff] %vm483_vm1, %v3324_v18  ;;  %v2741_v53 = vunpack.c.h.bf16 %v2963_v40  ;;  %v696_v62 = vmax.f32 %v2740_v52, 0.0 }
  0x5d   : > { %525 = vst.msk [vmem:[#allocation2 + $0x148] sm:$0xff] %vm483_vm1, %v3324_v18 }
  0x5e   : > { %526 = vst.msk [vmem:[#allocation2 + $0x150] sm:$0xff] %vm483_vm1, %v3324_v18  ;;  %v697_v63 = vmax.f32 %v2741_v53, 0.0  ;;  %v1564_v53 = vld [vmem:[#allocation2 + $0x28] sm:$0xff] }
  0x5f   : > { %527 = vst.msk [vmem:[#allocation2 + $0x158] sm:$0xff] %vm483_vm1, %v3324_v18 }
  0x60   : > { %528 = vst.msk [vmem:[#allocation2 + $0x160] sm:$0xff] %vm483_vm1, %v3324_v18  ;;  %v750_v5 = vpack.c.bf16 %v697_v63, %v696_v62 }
  0x61   : > { %529 = vst.msk [vmem:[#allocation2 + $0x168] sm:$0xff] %vm483_vm1, %v3324_v18 }
  0x62   : > { %530 = vst.msk [vmem:[#allocation2 + $0x170] sm:$0xff] %vm483_vm1, %v3324_v18 }
  0x63   : > { %531 = vst.msk [vmem:[#allocation2 + $0x178] sm:$0xff] %vm483_vm1, %v3324_v18 }
  0x64   : > { %2619 = vmatmul.msk.bf16.gmra.mxu0 %vm1016_vm0, %v972_v34  ;;  %v761_v34 = vpack.c.bf16 %v719_v30, %v718_v29  ;;  %532 = vst.msk [vmem:[#allocation2 + $0x180] sm:$0xff] %vm483_vm1, %v3324_v18 }
  0x65   : > { %2659 = vmatmul.msk.bf16.gmra.mxu1 %vm1016_vm0, %v744_v37  ;;  %v2728_v37 = vunpack.c.l.bf16 %v2960_v32  ;;  %533 = vst.msk [vmem:[#allocation2 + $0x188] sm:$0xff] %vm483_vm1, %v3324_v18  ;;  %v2920_v32 = vunpack.c.l.bf16 %v3007_v27 }
  0x66   : > { %2635 = vmatmul.msk.bf16.gmra.mxu2 %vm1016_vm0, %v988_v7  ;;  %534 = vst.msk [vmem:[#allocation2 + $0x190] sm:$0xff] %vm483_vm1, %v3324_v18 }
  0x67   : > { %v690_v41 = vmax.f32 %v2728_v37, 0.0  ;;  %535 = vst.msk [vmem:[#allocation2 + $0x198] sm:$0xff] %vm483_vm1, %v3324_v18  ;;  %v950_v35 = vmax.f32 %v2920_v32, 0.0  ;;  %v2994_v37 = vld [vmem:[%s3434_s23 + $0x50] sm:$0xff]  }
  0x68   : > { %2675 = vmatmul.msk.bf16.gmra.mxu3 %vm1016_vm0, %v760_v9  ;;  %v2962_v9 = vld [vmem:[%s3429_s20 + $0x48] sm:$0xff]   ;;  %536 = vst.msk [vmem:[#allocation2 + $0x1a0] sm:$0xff] %vm483_vm1, %v3324_v18  ;;  %v2868_v47 = vunpack.c.l.bf16 %v2994_v37  ;;  %v2869_v48 = vunpack.c.h.bf16 %v2994_v37 }
  0x69   : > { %v747_v44 = vpack.c.bf16 %v691_v42, %v690_v41  ;;  %v2736_v15 = vunpack.c.l.bf16 %v2962_v9  ;;  %v2737_v16 = vunpack.c.h.bf16 %v2962_v9  ;;  %537 = vst.msk [vmem:[#allocation2 + $0x1a8] sm:$0xff] %vm483_vm1, %v3324_v18  ;;  %v723_v41 = vmax.f32 %v2793_v36, 0.0 }
  0x6a   : > { %538 = vst.msk [vmem:[#allocation2 + $0x1b0] sm:$0xff] %vm483_vm1, %v3324_v18 }
  0x6b   : > { %v695_v23 = vmax.f32 %v2737_v16, 0.0  ;;  %539 = vst.msk [vmem:[#allocation2 + $0x1b8] sm:$0xff] %vm483_vm1, %v3324_v18 }
  0x6c   : > { %540 = vst.msk [vmem:[#allocation2 + $0x1c0] sm:$0xff] %vm483_vm1, %v3324_v18 }
  0x6d   : > { %541 = vst.msk [vmem:[#allocation2 + $0x1c8] sm:$0xff] %vm483_vm1, %v3324_v18 }
  0x6e   : > { %542 = vst.msk [vmem:[#allocation2 + $0x1d0] sm:$0xff] %vm483_vm1, %v3324_v18 }
  0x6f   : > { %543 = vst.msk [vmem:[#allocation2 + $0x1d8] sm:$0xff] %vm483_vm1, %v3324_v18 }
  0x70   : > { %544 = vst.msk [vmem:[#allocation2 + $0x1e0] sm:$0xff] %vm483_vm1, %v3324_v18 }
  0x71   : > { %545 = vst.msk [vmem:[#allocation2 + $0x1e8] sm:$0xff] %vm483_vm1, %v3324_v18 }
  0x72   : > { %546 = vst.msk [vmem:[#allocation2 + $0x1f0] sm:$0xff] %vm483_vm1, %v3324_v18 }
  0x73   : > { %547 = vst.msk [vmem:[#allocation2 + $0x1f8] sm:$0xff] %vm483_vm1, %v3324_v18 }
  0x74   : > { %2620 = vmatmul.msk.bf16.gmra.mxu0 %vm1016_vm0, %v973_v58 }
  0x75   : > { %2660 = vmatmul.msk.bf16.gmra.mxu1 %vm1016_vm0, %v745_v61  ;;  %v1559_v61 = vld [vmem:[#allocation2] sm:$0xff] }
  0x76   : > { %2636 = vmatmul.msk.bf16.gmra.mxu2 %vm1016_vm0, %v989_v33  ;;  %v2921_v33 = vunpack.c.h.bf16 %v3007_v27 }
  0x78   : > { %2676 = vmatmul.msk.bf16.gmra.mxu3 %vm1016_vm0, %v761_v34  ;;  %v2792_v34 = vunpack.c.l.bf16 %v2976_v28  ;;  %v951_v38 = vmax.f32 %v2921_v33, 0.0 }
  0x7a   : > { %v722_v39 = vmax.f32 %v2792_v34, 0.0  ;;  %v3679_v34 = vmax.f32 %v2872_v13, 0.0 }
  0x7c   : > { %v763_v49 = vpack.c.bf16 %v723_v41, %v722_v39 }
  0x84   : > { %2621 = vmatmul.msk.bf16.gmra.mxu0 %vm1016_vm0, %v974_v19  ;;  %v3602_v19 = vld [vmem:[%s4433_s4] ss:$0 sm:$0xff] }
  0x85   : > { %2661 = vmatmul.msk.bf16.gmra.mxu1 %vm1016_vm0, %v746_v22  ;;  %v694_v22 = vmax.f32 %v2736_v15, 0.0  ;;  %v2964_v15 = vld [vmem:[%s3429_s20 + $0x58] sm:$0xff]  }
  0x86   : > { %2637 = vmatmul.msk.bf16.gmra.mxu2 %vm1016_vm0, %v990_v10  ;;  %v2796_v10 = vunpack.c.l.bf16 %v2977_v3  ;;  %v2745_v36 = vunpack.c.h.bf16 %v2964_v15 }
  0x87   : > { %v749_v30 = vpack.c.bf16 %v695_v23, %v694_v22 }
  0x88   : > { %2677 = vmatmul.msk.bf16.gmra.mxu3 %vm1016_vm0, %v762_v11  ;;  %v2797_v11 = vunpack.c.h.bf16 %v2977_v3  ;;  %v724_v20 = vmax.f32 %v2796_v10, 0.0  ;;  %v1591_v3 = vld [vmem:[#allocation2 + $0x100] sm:$0xff]  ;;  %v3009_v10 = vld [vmem:[%s3434_s23 + $0xc8] sm:$0xff]  }
  0x8a   : > { %v725_v21 = vmax.f32 %v2797_v11, 0.0 }
  0x94   : > { %2622 = vmatmul.msk.bf16.gmra.mxu0 %vm1016_vm0, %v975_v43 }
  0x95   : > { %2662 = vmatmul.msk.bf16.gmra.mxu1 %vm1016_vm0, %v747_v44  ;;  %v991_v44 = vpack.c.bf16 %v951_v38, %v950_v35 }
  0x97   : > { %2638 = vmatmul.msk.bf16.gmra.mxu2 %vm1016_vm0, %v991_v44 }
  0x98   : > { %2678 = vmatmul.msk.bf16.gmra.mxu3 %vm1016_vm0, %v763_v49 }
  0xa1   : > { %v1122_v58 = vpop.f32.mrf.mxu0 }
  0xa2   : > { %v1399_v60 = vpop.f32.mrf.mxu1 }
  0xa3   : > { %v1400_v2 = vadd.f32 %v1399_v60, %v1122_v58  ;;  %v925_v60 = vmax.f32 %v2869_v48, 0.0 }
  0xa4   : > { %2623 = vmatmul.msk.bf16.gmra.mxu0 %vm1016_vm0, %v976_v55  ;;  %v1562_v55 = vld [vmem:[#allocation2 + $0x18] sm:$0xff] }
  0xa5   : > { %v1623_v7 = vadd.f32 %v1559_v61, %v1400_v2  ;;  %2663 = vmatmul.msk.bf16.gmra.mxu1 %vm1016_vm0, %v748_v59  ;;  %v924_v59 = vmax.f32 %v2868_v47, 0.0  ;;  %v3008_v2 = vld [vmem:[%s3434_s23 + $0xc0] sm:$0xff]  }
  0xa6   : > { %v2924_v8 = vunpack.c.l.bf16 %v3008_v2  ;;  %v2925_v9 = vunpack.c.h.bf16 %v3008_v2 }
  0xa7   : > { %1688 = vst.msk [vmem:[#allocation2] sm:$0xff] %vm483_vm1, %v1623_v7  ;;  %v978_v0 = vpack.c.bf16 %v925_v60, %v924_v59  ;;  %v1563_v7 = vld [vmem:[#allocation2 + $0x20] sm:$0xff] }
  0xa8   : > { %v952_v16 = vmax.f32 %v2924_v8, 0.0 }
  0xa9   : > { %v1124_v14 = vpop.f32.mrf.mxu0  ;;  %v1202_v37 = vpop.f32.mrf.mxu2 }
  0xaa   : > { %v1401_v17 = vpop.f32.mrf.mxu1 }
  0xab   : > { %v1402_v43 = vadd.f32 %v1401_v17, %v1124_v14  ;;  %v2873_v14 = vunpack.c.h.bf16 %v2995_v1  ;;  %v953_v17 = vmax.f32 %v2925_v9, 0.0 }
  0xad   : > { %v1624_v56 = vadd.f32 %v1560_v45, %v1402_v43  ;;  %v927_v35 = vmax.f32 %v2873_v14, 0.0  ;;  %v1479_v45 = vpop.f32.mrf.mxu3 }
  0xae   : > { %v1755_v24 = vld [vmem:[#allocation2] sm:$0xff]  ;;  %v1480_v2 = vadd.f32 %v1479_v45, %v1202_v37  ;;  %v1566_v45 = vld [vmem:[#allocation2 + $0x38] sm:$0xff] }
  0xaf   : > { %v3613_v25 = vadd.f32 %v3602_v19, %v1755_v24  ;;  %1689 = vst.msk [vmem:[#allocation2 + $0x8] sm:$0xff] %vm483_vm1, %v1624_v56  ;;  %v992_v24 = vpack.c.bf16 %v953_v17, %v952_v16  ;;  %v699_v56 = vmax.f32 %v2745_v36, 0.0  ;;  %v979_v1 = vpack.c.bf16 %v927_v35, %v3679_v34 }
  0xb0   : > { %v1655_v13 = vadd.f32 %v1591_v3, %v1480_v2 }
  0xb1   : > { %3082 = vtanh.f32 %v3613_v25  ;;  %v1127_v29 = vpop.f32.mrf.mxu0  ;;  %v2022_v18 = vmul.f32 %v3613_v25, %v3613_v25  ;;  %v1887_v27 = vsel %vm483_vm1, %v3613_v25, 0.0  ;;  %2639 = vmatmul.msk.bf16.gmra.mxu2 %vm1016_vm0, %v992_v24  ;;  %v2928_v24 = vunpack.c.l.bf16 %v3009_v10 }
  0xb2   : > { %v1404_v31 = vpop.f32.mrf.mxu1  ;;  %1720 = vst.msk [vmem:[#allocation2 + $0x100] sm:$0xff] %vm483_vm1, %v1655_v13 }
  0xb3   : > { %v1405_v46 = vadd.f32 %v1404_v31, %v1127_v29  ;;  %v2086_v28 = vsel %vm483_vm1, %v2022_v18, 0.0  ;;  %v2744_v31 = vunpack.c.l.bf16 %v2964_v15  ;;  %v2978_v15 = vld [vmem:[%s3429_s20 + $0xc8] sm:$0xff]  }
  0xb4   : > { %2624 = vmatmul.msk.bf16.gmra.mxu0 %vm1016_vm0, %v977_v26  ;;  %v764_v26 = vpack.c.bf16 %v725_v21, %v724_v20 }
  0xb5   : > { %2664 = vmatmul.msk.bf16.gmra.mxu1 %vm1016_vm0, %v749_v30  ;;  %v1625_v58 = vadd.f32 %v1561_v50, %v1405_v46  ;;  %v1481_v14 = vpop.f32.mrf.mxu3 }
  0xb6   : > { %v1756_v23 = vld [vmem:[#allocation2 + $0x8] sm:$0xff]  ;;  %2679 = vmatmul.msk.bf16.gmra.mxu3 %vm1016_vm0, %v764_v26  ;;  %v2929_v26 = vunpack.c.h.bf16 %v3009_v10 }
  0xb7   : > { %v3083_v42 = vpop.eup %3082  ;;  %1690 = vst.msk [vmem:[#allocation2 + $0x10] sm:$0xff] %vm483_vm1, %v1625_v58  ;;  %v1824_v29 = vadd.f32 %v3602_v19, %v1756_v23  ;;  %v2996_v23 = vld [vmem:[%s3434_s23 + $0x60] sm:$0xff]  }
  0xb8   : > { %2284 = vst.msk [vmem:[%s3635_s21] sm:$0xff] %vm483_vm1, %v3083_v42  ;;  %v2876_v35 = vunpack.c.l.bf16 %v2996_v23  ;;  %v2877_v36 = vunpack.c.h.bf16 %v2996_v23 }
  0xb9   : > { %v1129_v51 = vpop.f32.mrf.mxu0  ;;  %v1888_v38 = vsel %vm483_vm1, %v1824_v29, 0.0  ;;  %v2023_v39 = vmul.f32 %v1824_v29, %v1824_v29  ;;  %3084 = vtanh.f32 %v1824_v29  ;;  %v2965_v29 = vld [vmem:[%s3429_s20 + $0x60] sm:$0xff]  }
  0xba   : > { %v1406_v54 = vpop.f32.mrf.mxu1  ;;  %v1889_v41 = vadd.f32 %v1888_v38, %v1887_v27  ;;  %v2748_v38 = vunpack.c.l.bf16 %v2965_v29 }
  0xbb   : > { %v1407_v57 = vadd.f32 %v1406_v54, %v1129_v51  ;;  %v2087_v46 = vsel %vm483_vm1, %v2023_v39, 0.0  ;;  %v2749_v39 = vunpack.c.h.bf16 %v2965_v29 }
  0xbc   : > { %v2088_v49 = vadd.f32 %v2087_v46, %v2086_v28 }
  0xbd   : > { %v1626_v61 = vadd.f32 %v1562_v55, %v1407_v57  ;;  %v698_v55 = vmax.f32 %v2744_v31, 0.0  ;;  %v954_v31 = vmax.f32 %v2928_v24, 0.0 }
  0xbe   : > { %v1757_v30 = vld [vmem:[#allocation2 + $0x10] sm:$0xff] }
  0xbf   : > { %1691 = vst.msk [vmem:[#allocation2 + $0x18] sm:$0xff] %vm483_vm1, %v1626_v61  ;;  %v1825_v32 = vadd.f32 %v3602_v19, %v1757_v30  ;;  %v3085_v60 = vpop.eup %3084  ;;  %v751_v9 = vpack.c.bf16 %v699_v56, %v698_v55  ;;  %v2800_v30 = vunpack.c.l.bf16 %v2978_v15  ;;  %v701_v55 = vmax.f32 %v2749_v39, 0.0 }
  0xc0   : > { %2285 = vst.msk [vmem:[%s3635_s21 + $0x8] sm:$0xff] %vm483_vm1, %v3085_v60 }
  0xc1   : > { %v1132_v4 = vpop.f32.mrf.mxu0  ;;  %v1890_v42 = vsel %vm483_vm1, %v1825_v32, 0.0  ;;  %v2024_v43 = vmul.f32 %v1825_v32, %v1825_v32  ;;  %3086 = vtanh.f32 %v1825_v32  ;;  %v955_v32 = vmax.f32 %v2929_v26, 0.0  ;;  %v1594_v26 = vld [vmem:[#allocation2 + $0x118] sm:$0xff] }
  0xc2   : > { %v1409_v6 = vpop.f32.mrf.mxu1  ;;  %v1891_v50 = vadd.f32 %v1890_v42, %v1889_v41  ;;  %v726_v37 = vmax.f32 %v2800_v30, 0.0 }
  0xc3   : > { %v1410_v12 = vadd.f32 %v1409_v6, %v1132_v4  ;;  %v2089_v51 = vsel %vm483_vm1, %v2024_v43, 0.0  ;;  %v1204_v4 = vpop.f32.mrf.mxu2 }
  0xc4   : > { %2625 = vmatmul.msk.bf16.gmra.mxu0 %vm1016_vm0, %v978_v0  ;;  %v2090_v57 = vadd.f32 %v2089_v51, %v2088_v49  ;;  %v1482_v20 = vadd.f32 %v1481_v14, %v1204_v4  ;;  %v928_v51 = vmax.f32 %v2876_v35, 0.0  ;;  %v1593_v4 = vld [vmem:[#allocation2 + $0x110] sm:$0xff]  ;;  %v2997_v14 = vld [vmem:[%s3434_s23 + $0x68] sm:$0xff]  }
  0xc5   : > { %v1627_v22 = vadd.f32 %v1563_v7, %v1410_v12  ;;  %2665 = vmatmul.msk.bf16.gmra.mxu1 %vm1016_vm0, %v750_v5  ;;  %v1565_v12 = vld [vmem:[#allocation2 + $0x30] sm:$0xff]  ;;  %v2880_v29 = vunpack.c.l.bf16 %v2997_v14 }
  0xc6   : > { %v1758_v33 = vld [vmem:[#allocation2 + $0x18] sm:$0xff] }
  0xc7   : > { %1692 = vst.msk [vmem:[#allocation2 + $0x20] sm:$0xff] %vm483_vm1, %v1627_v22  ;;  %v1826_v25 = vadd.f32 %v3602_v19, %v1758_v33  ;;  %v3087_v63 = vpop.eup %3086  ;;  %v1592_v22 = vld [vmem:[#allocation2 + $0x108] sm:$0xff]  ;;  %v2801_v33 = vunpack.c.h.bf16 %v2978_v15 }
  0xc8   : > { %2286 = vst.msk [vmem:[%s3635_s21 + $0x10] sm:$0xff] %vm483_vm1, %v3087_v63  ;;  %v1656_v28 = vadd.f32 %v1592_v22, %v1482_v20  ;;  %v3010_v20 = vld [vmem:[%s3434_s23 + $0xd0] sm:$0xff]  }
  0xc9   : > { %v1134_v40 = vpop.f32.mrf.mxu0  ;;  %v1892_v47 = vsel %vm483_vm1, %v1826_v25, 0.0  ;;  %v2025_v48 = vmul.f32 %v1826_v25, %v1826_v25  ;;  %3088 = vtanh.f32 %v1826_v25  ;;  %v993_v25 = vpack.c.bf16 %v955_v32, %v954_v31 }
  0xca   : > { %v1411_v44 = vpop.f32.mrf.mxu1  ;;  %v1893_v58 = vadd.f32 %v1892_v47, %v1891_v50  ;;  %1721 = vst.msk [vmem:[#allocation2 + $0x108] sm:$0xff] %vm483_vm1, %v1656_v28  ;;  %v1484_v47 = vpop.f32.mrf.mxu3  ;;  %v1787_v50 = vld [vmem:[#allocation2 + $0x100] sm:$0xff]  ;;  %v2932_v32 = vunpack.c.l.bf16 %v3010_v20 }
  0xcb   : > { %v1412_v52 = vadd.f32 %v1411_v44, %v1134_v40  ;;  %v2091_v54 = vsel %vm483_vm1, %v2025_v48, 0.0  ;;  %v727_v40 = vmax.f32 %v2801_v33, 0.0  ;;  %v1207_v41 = vpop.f32.mrf.mxu2  ;;  %2640 = vmatmul.msk.bf16.gmra.mxu2 %vm1016_vm0, %v993_v25  ;;  %v2933_v33 = vunpack.c.h.bf16 %v3010_v20 }
  0xcc   : > { %v2092_v0 = vadd.f32 %v2091_v54, %v2090_v57  ;;  %v700_v54 = vmax.f32 %v2748_v38, 0.0  ;;  %v1485_v3 = vadd.f32 %v1484_v47, %v1207_v41 }
  0xcd   : > { %v1628_v62 = vadd.f32 %v1564_v53, %v1412_v52  ;;  %v765_v46 = vpack.c.bf16 %v727_v40, %v726_v37  ;;  %v3715_v52 = vadd.f32 %v3602_v19, %v1787_v50  ;;  %v929_v53 = vmax.f32 %v2877_v36, 0.0 }
  0xce   : > { %v1759_v59 = vld [vmem:[#allocation2 + $0x20] sm:$0xff]  ;;  %v752_v2 = vpack.c.bf16 %v701_v55, %v700_v54  ;;  %v2881_v37 = vunpack.c.h.bf16 %v2997_v14  ;;  %v956_v40 = vmax.f32 %v2932_v32, 0.0  ;;  %v957_v41 = vmax.f32 %v2933_v33, 0.0  ;;  %v2967_v32 = vld [vmem:[%s3429_s20 + $0x70] sm:$0xff]  }
  0xcf   : > { %v1827_v61 = vadd.f32 %v3602_v19, %v1759_v59  ;;  %v3089_v5 = vpop.eup %3088  ;;  %1693 = vst.msk [vmem:[#allocation2 + $0x28] sm:$0xff] %vm483_vm1, %v1628_v62  ;;  %2680 = vmatmul.msk.bf16.gmra.mxu3 %vm1016_vm0, %v765_v46 }
  0xd0   : > { %2287 = vst.msk [vmem:[%s3635_s21 + $0x18] sm:$0xff] %vm483_vm1, %v3089_v5  ;;  %v994_v50 = vpack.c.bf16 %v957_v41, %v956_v40 }
  0xd1   : > { %v1894_v6 = vsel %vm483_vm1, %v1827_v61, 0.0  ;;  %v2026_v7 = vmul.f32 %v1827_v61, %v1827_v61  ;;  %3090 = vtanh.f32 %v1827_v61  ;;  %v1137_v8 = vpop.f32.mrf.mxu0 }
  0xd2   : > { %v1895_v11 = vadd.f32 %v1894_v6, %v1893_v58  ;;  %v1414_v18 = vpop.f32.mrf.mxu1  ;;  %v1486_v13 = vpop.f32.mrf.mxu3 }
  0xd3   : > { %v2093_v16 = vsel %vm483_vm1, %v2026_v7, 0.0  ;;  %v1415_v17 = vadd.f32 %v1414_v18, %v1137_v8  ;;  %v1209_v5 = vpop.f32.mrf.mxu2  ;;  %v1567_v18 = vld [vmem:[#allocation2 + $0x40] sm:$0xff] }
  0xd4   : > { %v2094_v21 = vadd.f32 %v2093_v16, %v2092_v0  ;;  %2626 = vmatmul.msk.bf16.gmra.mxu0 %vm1016_vm0, %v979_v1  ;;  %v1788_v0 = vld [vmem:[#allocation2 + $0x108] sm:$0xff]  ;;  %v980_v1 = vpack.c.bf16 %v929_v53, %v928_v51  ;;  %v1487_v24 = vadd.f32 %v1486_v13, %v1209_v5 }
  0xd5   : > { %v1629_v27 = vadd.f32 %v1565_v12, %v1415_v17  ;;  %2666 = vmatmul.msk.bf16.gmra.mxu1 %vm1016_vm0, %v751_v9  ;;  %v3725_v9 = vadd.f32 %v3602_v19, %v1788_v0  ;;  %v1657_v12 = vadd.f32 %v1593_v4, %v1485_v3 }
  0xd6   : > { %v1760_v43 = vld [vmem:[#allocation2 + $0x28] sm:$0xff]  ;;  %v1658_v31 = vadd.f32 %v1594_v26, %v1487_v24  ;;  %v3011_v24 = vld [vmem:[%s3434_s23 + $0xd8] sm:$0xff]  }
  0xd7   : > { %v3091_v34 = vpop.eup %3090  ;;  %1694 = vst.msk [vmem:[#allocation2 + $0x30] sm:$0xff] %vm483_vm1, %v1629_v27  ;;  %v1828_v48 = vadd.f32 %v3602_v19, %v1760_v43  ;;  %v2966_v27 = vld [vmem:[%s3429_s20 + $0x68] sm:$0xff]  }
  0xd8   : > { %2288 = vst.msk [vmem:[%s3635_s21 + $0x20] sm:$0xff] %vm483_vm1, %v3091_v34  ;;  %v2752_v38 = vunpack.c.l.bf16 %v2966_v27  ;;  %v2753_v25 = vunpack.c.h.bf16 %v2966_v27 }
  0xd9   : > { %v1139_v42 = vpop.f32.mrf.mxu0  ;;  %v1896_v56 = vsel %vm483_vm1, %v1828_v48, 0.0  ;;  %v2027_v57 = vmul.f32 %v1828_v48, %v1828_v48  ;;  %3092 = vtanh.f32 %v1828_v48  ;;  %1722 = vst.msk [vmem:[#allocation2 + $0x110] sm:$0xff] %vm483_vm1, %v1657_v12 }
  0xda   : > { %v1416_v44 = vpop.f32.mrf.mxu1  ;;  %v1897_v59 = vadd.f32 %v1896_v56, %v1895_v11  ;;  %3094 = vtanh.f32 %v3715_v52  ;;  %1723 = vst.msk [vmem:[#allocation2 + $0x118] sm:$0xff] %vm483_vm1, %v1658_v31  ;;  %v930_v56 = vmax.f32 %v2880_v29, 0.0  ;;  %v2998_v29 = vld [vmem:[%s3434_s23 + $0x70] sm:$0xff]  }
  0xdb   : > { %v1417_v49 = vadd.f32 %v1416_v44, %v1139_v42  ;;  %v2095_v61 = vsel %vm483_vm1, %v2027_v57, 0.0  ;;  %v1212_v53 = vpop.f32.mrf.mxu2  ;;  %v931_v57 = vmax.f32 %v2881_v37, 0.0  ;;  %2641 = vmatmul.msk.bf16.gmra.mxu2 %vm1016_vm0, %v994_v50  ;;  %v2937_v37 = vunpack.c.h.bf16 %v3011_v24 }
  0xdc   : > { %v2096_v63 = vadd.f32 %v2095_v61, %v2094_v21  ;;  %v2979_v21 = vld [vmem:[%s3429_s20 + $0xd0] sm:$0xff]   ;;  %v703_v61 = vmax.f32 %v2753_v25, 0.0  ;;  %v2884_v25 = vunpack.c.l.bf16 %v2998_v29 }
  0xdd   : > { %v1630_v58 = vadd.f32 %v1566_v45, %v1417_v49  ;;  %v2804_v34 = vunpack.c.l.bf16 %v2979_v21  ;;  %v2805_v39 = vunpack.c.h.bf16 %v2979_v21  ;;  %v1568_v49 = vld [vmem:[#allocation2 + $0x48] sm:$0xff] }
  0xde   : > { %v1761_v60 = vld [vmem:[#allocation2 + $0x30] sm:$0xff] }
  0xdf   : > { %v1829_v62 = vadd.f32 %v3602_v19, %v1761_v60  ;;  %1695 = vst.msk [vmem:[#allocation2 + $0x38] sm:$0xff] %vm483_vm1, %v1630_v58  ;;  %v3093_v15 = vpop.eup %3092  ;;  %v728_v42 = vmax.f32 %v2804_v34, 0.0  ;;  %v729_v51 = vmax.f32 %v2805_v39, 0.0  ;;  %v1489_v58 = vpop.f32.mrf.mxu3  ;;  %v702_v60 = vmax.f32 %v2752_v38, 0.0 }
  0xe0   : > { %v3095_v22 = vpop.eup %3094  ;;  %2289 = vst.msk [vmem:[%s3635_s21 + $0x28] sm:$0xff] %vm483_vm1, %v3093_v15  ;;  %v1789_v0 = vld [vmem:[#allocation2 + $0x110] sm:$0xff] }
  0xe1   : > { %v1898_v6 = vsel %vm483_vm1, %v1829_v62, 0.0  ;;  %v2028_v7 = vmul.f32 %v1829_v62, %v1829_v62  ;;  %3096 = vtanh.f32 %v1829_v62  ;;  %v1142_v8 = vpop.f32.mrf.mxu0  ;;  %2316 = vst.msk [vmem:[%s3635_s21 + $0x100] sm:$0xff] %vm483_vm1, %v3095_v22  ;;  %v766_v62 = vpack.c.bf16 %v729_v51, %v728_v42  ;;  %v1790_v5 = vld [vmem:[#allocation2 + $0x118] sm:$0xff] }
  0xe2   : > { %v1899_v10 = vadd.f32 %v1898_v6, %v1897_v59  ;;  %v1419_v11 = vpop.f32.mrf.mxu1  ;;  %3098 = vtanh.f32 %v3725_v9  ;;  %v981_v6 = vpack.c.bf16 %v931_v57, %v930_v56  ;;  %v3761_v13 = vadd.f32 %v3602_v19, %v1790_v5 }
  0xe3   : > { %v2097_v16 = vsel %vm483_vm1, %v2028_v7, 0.0  ;;  %v1420_v17 = vadd.f32 %v1419_v11, %v1142_v8  ;;  %2681 = vmatmul.msk.bf16.gmra.mxu3 %vm1016_vm0, %v766_v62  ;;  %v753_v7 = vpack.c.bf16 %v703_v61, %v702_v60  ;;  %v1490_v8 = vadd.f32 %v1489_v58, %v1212_v53  ;;  %v1214_v20 = vpop.f32.mrf.mxu2 }
  0xe4   : > { %v2098_v23 = vadd.f32 %v2097_v16, %v2096_v63  ;;  %2627 = vmatmul.msk.bf16.gmra.mxu0 %vm1016_vm0, %v980_v1  ;;  %v1569_v16 = vld [vmem:[#allocation2 + $0x50] sm:$0xff]  ;;  %v2885_v42 = vunpack.c.h.bf16 %v2998_v29  ;;  %v932_v62 = vmax.f32 %v2884_v25, 0.0 }
  0xe5   : > { %v1631_v28 = vadd.f32 %v1567_v18, %v1420_v17  ;;  %2667 = vmatmul.msk.bf16.gmra.mxu1 %vm1016_vm0, %v752_v2  ;;  %v3751_v2 = vadd.f32 %v3602_v19, %v1789_v0 }
  0xe6   : > { %v1762_v30 = vld [vmem:[#allocation2 + $0x38] sm:$0xff] }
  0xe7   : > { %v3097_v35 = vpop.eup %3096  ;;  %v1830_v36 = vadd.f32 %v3602_v19, %v1762_v30  ;;  %1696 = vst.msk [vmem:[#allocation2 + $0x40] sm:$0xff] %vm483_vm1, %v1631_v28  ;;  %v1596_v28 = vld [vmem:[#allocation2 + $0x128] sm:$0xff]  ;;  %v2980_v30 = vld [vmem:[%s3429_s20 + $0xd8] sm:$0xff]  }
  0xe8   : > { %2290 = vst.msk [vmem:[%s3635_s21 + $0x30] sm:$0xff] %vm483_vm1, %v3097_v35  ;;  %v3099_v46 = vpop.eup %3098  ;;  %v2808_v40 = vunpack.c.l.bf16 %v2980_v30  ;;  %v2809_v41 = vunpack.c.h.bf16 %v2980_v30 }
  0xe9   : > { %v1900_v43 = vsel %vm483_vm1, %v1830_v36, 0.0  ;;  %v2029_v44 = vmul.f32 %v1830_v36, %v1830_v36  ;;  %3100 = vtanh.f32 %v1830_v36  ;;  %v1144_v45 = vpop.f32.mrf.mxu0  ;;  %2317 = vst.msk [vmem:[%s3635_s21 + $0x108] sm:$0xff] %vm483_vm1, %v3099_v46  ;;  %v2936_v36 = vunpack.c.l.bf16 %v3011_v24 }
  0xea   : > { %v1901_v47 = vadd.f32 %v1900_v43, %v1899_v10  ;;  %v1421_v48 = vpop.f32.mrf.mxu1  ;;  %3102 = vtanh.f32 %v3751_v2  ;;  %v1595_v10 = vld [vmem:[#allocation2 + $0x120] sm:$0xff]  ;;  %v2756_v43 = vunpack.c.l.bf16 %v2967_v32  ;;  %v730_v56 = vmax.f32 %v2808_v40, 0.0 }
  0xeb   : > { %v2099_v54 = vsel %vm483_vm1, %v2029_v44, 0.0  ;;  %v1422_v55 = vadd.f32 %v1421_v48, %v1144_v45  ;;  %v1659_v17 = vadd.f32 %v1595_v10, %v1490_v8  ;;  %v958_v44 = vmax.f32 %v2936_v36, 0.0  ;;  %v1217_v58 = vpop.f32.mrf.mxu2  ;;  %v1598_v36 = vld [vmem:[#allocation2 + $0x138] sm:$0xff] }
  0xec   : > { %v2100_v59 = vadd.f32 %v2099_v54, %v2098_v23  ;;  %v1491_v23 = vpop.f32.mrf.mxu3  ;;  %v959_v45 = vmax.f32 %v2937_v37, 0.0  ;;  %v1570_v54 = vld [vmem:[#allocation2 + $0x58] sm:$0xff]  ;;  %v731_v57 = vmax.f32 %v2809_v41, 0.0  ;;  %v2981_v37 = vld [vmem:[%s3429_s20 + $0xe0] sm:$0xff]  }
  0xed   : > { %v1632_v63 = vadd.f32 %v1568_v49, %v1422_v55  ;;  %1724 = vst.msk [vmem:[#allocation2 + $0x120] sm:$0xff] %vm483_vm1, %v1659_v17  ;;  %v1492_v27 = vadd.f32 %v1491_v23, %v1214_v20  ;;  %v2757_v49 = vunpack.c.h.bf16 %v2967_v32  ;;  %v3012_v20 = vld [vmem:[%s3434_s23 + $0xe0] sm:$0xff]  }
  0xee   : > { %v1763_v1 = vld [vmem:[#allocation2 + $0x40] sm:$0xff]  ;;  %v995_v55 = vpack.c.bf16 %v959_v45, %v958_v44  ;;  %v2941_v45 = vunpack.c.h.bf16 %v3012_v20 }
  0xef   : > { %v3101_v3 = vpop.eup %3100  ;;  %v1831_v4 = vadd.f32 %v3602_v19, %v1763_v1  ;;  %1697 = vst.msk [vmem:[#allocation2 + $0x48] sm:$0xff] %vm483_vm1, %v1632_v63  ;;  %v1660_v35 = vadd.f32 %v1596_v28, %v1492_v27  ;;  %v2999_v27 = vld [vmem:[%s3434_s23 + $0x78] sm:$0xff]   ;;  %v2940_v28 = vunpack.c.l.bf16 %v3012_v20 }
  0xf0   : > { %2291 = vst.msk [vmem:[%s3635_s21 + $0x38] sm:$0xff] %vm483_vm1, %v3101_v3  ;;  %v3103_v33 = vpop.eup %3102  ;;  %v933_v3 = vmax.f32 %v2885_v42, 0.0  ;;  %2642 = vmatmul.msk.bf16.gmra.mxu2 %vm1016_vm0, %v995_v55  ;;  %v2888_v40 = vunpack.c.l.bf16 %v2999_v27 }
  0xf1   : > { %v1902_v11 = vsel %vm483_vm1, %v1831_v4, 0.0  ;;  %v2030_v18 = vmul.f32 %v1831_v4, %v1831_v4  ;;  %3104 = vtanh.f32 %v1831_v4  ;;  %v1147_v12 = vpop.f32.mrf.mxu0  ;;  %2318 = vst.msk [vmem:[%s3635_s21 + $0x110] sm:$0xff] %vm483_vm1, %v3103_v33  ;;  %v767_v4 = vpack.c.bf16 %v731_v57, %v730_v56  ;;  %v2968_v33 = vld [vmem:[%s3429_s20 + $0x78] sm:$0xff]  }
  0xf2   : > { %v1903_v14 = vadd.f32 %v1902_v11, %v1901_v47  ;;  %v1424_v15 = vpop.f32.mrf.mxu1  ;;  %3106 = vtanh.f32 %v3761_v13  ;;  %1725 = vst.msk [vmem:[#allocation2 + $0x128] sm:$0xff] %vm483_vm1, %v1660_v35  ;;  %v982_v11 = vpack.c.bf16 %v933_v3, %v932_v62  ;;  %v2760_v44 = vunpack.c.l.bf16 %v2968_v33  ;;  %v1572_v62 = vld [vmem:[#allocation2 + $0x68] sm:$0xff] }
  0xf3   : > { %v2101_v21 = vsel %vm483_vm1, %v2030_v18, 0.0  ;;  %v1425_v22 = vadd.f32 %v1424_v15, %v1147_v12  ;;  %2682 = vmatmul.msk.bf16.gmra.mxu3 %vm1016_vm0, %v767_v4  ;;  %v1597_v12 = vld [vmem:[#allocation2 + $0x130] sm:$0xff] }
  0xf4   : > { %v2102_v26 = vadd.f32 %v2101_v21, %v2100_v59  ;;  %2628 = vmatmul.msk.bf16.gmra.mxu0 %vm1016_vm0, %v981_v6  ;;  %v1791_v61 = vld [vmem:[#allocation2 + $0x120] sm:$0xff]  ;;  %v1494_v63 = vpop.f32.mrf.mxu3  ;;  %v704_v6 = vmax.f32 %v2756_v43, 0.0  ;;  %v2889_v43 = vunpack.c.h.bf16 %v2999_v27 }
  0xf5   : > { %v1633_v31 = vadd.f32 %v1569_v16, %v1425_v22  ;;  %2668 = vmatmul.msk.bf16.gmra.mxu1 %vm1016_vm0, %v753_v7  ;;  %v3784_v1 = vadd.f32 %v3602_v19, %v1791_v61  ;;  %v705_v7 = vmax.f32 %v2757_v49, 0.0  ;;  %v1495_v18 = vadd.f32 %v1494_v63, %v1217_v58  ;;  %v1571_v22 = vld [vmem:[#allocation2 + $0x60] sm:$0xff] }
  0xf6   : > { %v1764_v34 = vld [vmem:[#allocation2 + $0x48] sm:$0xff]  ;;  %v2812_v49 = vunpack.c.l.bf16 %v2981_v37  ;;  %v934_v63 = vmax.f32 %v2888_v40, 0.0 }
  0xf7   : > { %v3105_v38 = vpop.eup %3104  ;;  %v1832_v39 = vadd.f32 %v3602_v19, %v1764_v34  ;;  %1698 = vst.msk [vmem:[#allocation2 + $0x50] sm:$0xff] %vm483_vm1, %v1633_v31  ;;  %v754_v17 = vpack.c.bf16 %v705_v7, %v704_v6  ;;  %v1661_v24 = vadd.f32 %v1597_v12, %v1495_v18  ;;  %v2982_v40 = vld [vmem:[%s3429_s20 + $0xe8] sm:$0xff]  }
  0xf8   : > { %2292 = vst.msk [vmem:[%s3635_s21 + $0x40] sm:$0xff] %vm483_vm1, %v3105_v38  ;;  %v3107_v50 = vpop.eup %3106  ;;  %v732_v58 = vmax.f32 %v2812_v49, 0.0 }
  0xf9   : > { %v1904_v46 = vsel %vm483_vm1, %v1832_v39, 0.0  ;;  %v2031_v47 = vmul.f32 %v1832_v39, %v1832_v39  ;;  %3108 = vtanh.f32 %v1832_v39  ;;  %v1149_v48 = vpop.f32.mrf.mxu0  ;;  %2319 = vst.msk [vmem:[%s3635_s21 + $0x118] sm:$0xff] %vm483_vm1, %v3107_v50  ;;  %v1792_v16 = vld [vmem:[#allocation2 + $0x128] sm:$0xff]  ;;  %v2761_v50 = vunpack.c.h.bf16 %v2968_v33 }
  0xfa   : > { %v1905_v51 = vadd.f32 %v1904_v46, %v1903_v14  ;;  %v1426_v53 = vpop.f32.mrf.mxu1  ;;  %3110 = vtanh.f32 %v3784_v1  ;;  %v3795_v23 = vadd.f32 %v3602_v19, %v1792_v16  ;;  %1726 = vst.msk [vmem:[#allocation2 + $0x130] sm:$0xff] %vm483_vm1, %v1661_v24  ;;  %v3013_v33 = vld [vmem:[%s3434_s23 + $0xe8] sm:$0xff]  }
  0xfb   : > { %v2103_v59 = vsel %vm483_vm1, %v2031_v47, 0.0  ;;  %v1427_v60 = vadd.f32 %v1426_v53, %v1149_v48  ;;  %v960_v48 = vmax.f32 %v2940_v28, 0.0  ;;  %v2813_v53 = vunpack.c.h.bf16 %v2981_v37  ;;  %v1599_v28 = vld [vmem:[#allocation2 + $0x140] sm:$0xff] }
  0xfc   : > { %v2104_v0 = vadd.f32 %v2103_v59, %v2102_v26  ;;  %v1219_v26 = vpop.f32.mrf.mxu2  ;;  %v1496_v32 = vpop.f32.mrf.mxu3 }
  0xfd   : > { %v1634_v5 = vadd.f32 %v1570_v54, %v1427_v60  ;;  %v1497_v25 = vadd.f32 %v1496_v32, %v1219_v26  ;;  %v733_v3 = vmax.f32 %v2813_v53, 0.0 }
  0xfe   : > { %v1765_v10 = vld [vmem:[#allocation2 + $0x50] sm:$0xff] }
  0xff   : > { %v3109_v8 = vpop.eup %3108  ;;  %1699 = vst.msk [vmem:[#allocation2 + $0x58] sm:$0xff] %vm483_vm1, %v1634_v5  ;;  %v1833_v14 = vadd.f32 %v3602_v19, %v1765_v10  ;;  %v1662_v47 = vadd.f32 %v1598_v36, %v1497_v25  ;;  %v706_v10 = vmax.f32 %v2760_v44, 0.0  ;;  %v1573_v36 = vld [vmem:[#allocation2 + $0x70] sm:$0xff]  ;;  %v2945_v25 = vunpack.c.h.bf16 %v3013_v33 }
 0x100   : > { %2293 = vst.msk [vmem:[%s3635_s21 + $0x48] sm:$0xff] %vm483_vm1, %v3109_v8  ;;  %v3111_v34 = vpop.eup %3110  ;;  %v935_v8 = vmax.f32 %v2889_v43, 0.0 }
 0x101   : > { %v1152_v15 = vpop.f32.mrf.mxu0  ;;  %v1906_v29 = vsel %vm483_vm1, %v1833_v14, 0.0  ;;  %v2032_v30 = vmul.f32 %v1833_v14, %v1833_v14  ;;  %3112 = vtanh.f32 %v1833_v14  ;;  %2320 = vst.msk [vmem:[%s3635_s21 + $0x120] sm:$0xff] %vm483_vm1, %v3111_v34  ;;  %v1793_v7 = vld [vmem:[#allocation2 + $0x130] sm:$0xff]  ;;  %v707_v14 = vmax.f32 %v2761_v50, 0.0 }
 0x102   : > { %v1429_v21 = vpop.f32.mrf.mxu1  ;;  %v1907_v35 = vadd.f32 %v1906_v29, %v1905_v51  ;;  %3114 = vtanh.f32 %v3795_v23  ;;  %v961_v51 = vmax.f32 %v2941_v45, 0.0  ;;  %1727 = vst.msk [vmem:[#allocation2 + $0x138] sm:$0xff] %vm483_vm1, %v1662_v47  ;;  %v3818_v12 = vadd.f32 %v3602_v19, %v1793_v7 }
 0x103   : > { %v1430_v31 = vadd.f32 %v1429_v21, %v1152_v15  ;;  %v2105_v38 = vsel %vm483_vm1, %v2032_v30, 0.0  ;;  %v768_v15 = vpack.c.bf16 %v733_v3, %v732_v58  ;;  %v983_v24 = vpack.c.bf16 %v935_v8, %v934_v63 }
 0x104   : > { %2629 = vmatmul.msk.bf16.gmra.mxu0 %vm1016_vm0, %v982_v11  ;;  %v2106_v41 = vadd.f32 %v2105_v38, %v2104_v0  ;;  %v996_v0 = vpack.c.bf16 %v961_v51, %v960_v48  ;;  %v1222_v4 = vpop.f32.mrf.mxu2  ;;  %v1499_v11 = vpop.f32.mrf.mxu3  ;;  %v755_v26 = vpack.c.bf16 %v707_v14, %v706_v10  ;;  %v963_v49 = vmax.f32 %v2945_v25, 0.0  ;;  %v2983_v25 = vld [vmem:[%s3429_s20 + $0xf0] sm:$0xff]  }
 0x105   : > { %v1635_v39 = vadd.f32 %v1571_v22, %v1430_v31  ;;  %2669 = vmatmul.msk.bf16.gmra.mxu1 %vm1016_vm0, %v754_v17  ;;  %2683 = vmatmul.msk.bf16.gmra.mxu3 %vm1016_vm0, %v768_v15  ;;  %v1500_v27 = vadd.f32 %v1499_v11, %v1222_v4  ;;  %v2816_v50 = vunpack.c.l.bf16 %v2982_v40 }
 0x106   : > { %v1766_v42 = vld [vmem:[#allocation2 + $0x58] sm:$0xff]  ;;  %2643 = vmatmul.msk.bf16.gmra.mxu2 %vm1016_vm0, %v996_v0 }
 0x107   : > { %v1834_v46 = vadd.f32 %v3602_v19, %v1766_v42  ;;  %1700 = vst.msk [vmem:[#allocation2 + $0x60] sm:$0xff] %vm483_vm1, %v1635_v39  ;;  %v3113_v54 = vpop.eup %3112  ;;  %v1663_v37 = vadd.f32 %v1599_v28, %v1500_v27  ;;  %v2944_v39 = vunpack.c.l.bf16 %v3013_v33  ;;  %v734_v58 = vmax.f32 %v2816_v50, 0.0 }
 0x108   : > { %v3115_v59 = vpop.eup %3114  ;;  %2294 = vst.msk [vmem:[%s3635_s21 + $0x50] sm:$0xff] %vm483_vm1, %v3113_v54  ;;  %v2817_v54 = vunpack.c.h.bf16 %v2982_v40 }
 0x109   : > { %v1908_v55 = vsel %vm483_vm1, %v1834_v46, 0.0  ;;  %v2033_v56 = vmul.f32 %v1834_v46, %v1834_v46  ;;  %3116 = vtanh.f32 %v1834_v46  ;;  %v1154_v57 = vpop.f32.mrf.mxu0  ;;  %2321 = vst.msk [vmem:[%s3635_s21 + $0x128] sm:$0xff] %vm483_vm1, %v3115_v59  ;;  %v1794_v22 = vld [vmem:[#allocation2 + $0x138] sm:$0xff]  ;;  %v1600_v46 = vld [vmem:[#allocation2 + $0x148] sm:$0xff]  ;;  %v962_v47 = vmax.f32 %v2944_v39, 0.0 }
 0x10a   : > { %v1909_v60 = vadd.f32 %v1908_v55, %v1907_v35  ;;  %v1431_v61 = vpop.f32.mrf.mxu1  ;;  %3118 = vtanh.f32 %v3818_v12  ;;  %v3829_v32 = vadd.f32 %v3602_v19, %v1794_v22  ;;  %1728 = vst.msk [vmem:[#allocation2 + $0x140] sm:$0xff] %vm483_vm1, %v1663_v37 }
 0x10b   : > { %v2107_v5 = vsel %vm483_vm1, %v2033_v56, 0.0  ;;  %v1432_v6 = vadd.f32 %v1431_v61, %v1154_v57  ;;  %v3843_v56 = vld [vmem:[%s4433_s4] ss:$0 sm:$0xff]  ;;  %v997_v59 = vpack.c.bf16 %v963_v49, %v962_v47  ;;  %v2820_v49 = vunpack.c.l.bf16 %v2983_v25 }
 0x10c   : > { %v2108_v18 = vadd.f32 %v2107_v5, %v2106_v41  ;;  %v1224_v38 = vpop.f32.mrf.mxu2  ;;  %v1501_v43 = vpop.f32.mrf.mxu3  ;;  %v1574_v5 = vld [vmem:[#allocation2 + $0x78] sm:$0xff] }
 0x10d   : > { %v1636_v16 = vadd.f32 %v1572_v62, %v1432_v6 }
 0x10e   : > { %v1767_v17 = vld [vmem:[#allocation2 + $0x60] sm:$0xff] }
 0x10f   : > { %v3117_v20 = vpop.eup %3116  ;;  %v1835_v21 = vadd.f32 %v3602_v19, %v1767_v17  ;;  %1701 = vst.msk [vmem:[#allocation2 + $0x68] sm:$0xff] %vm483_vm1, %v1636_v16  ;;  %v1502_v19 = vadd.f32 %v1501_v43, %v1224_v38 }
 0x110   : > { %2295 = vst.msk [vmem:[%s3635_s21 + $0x58] sm:$0xff] %vm483_vm1, %v3117_v20  ;;  %v3119_v44 = vpop.eup %3118 }
 0x111   : > { %v1910_v29 = vsel %vm483_vm1, %v1835_v21, 0.0  ;;  %v2034_v30 = vmul.f32 %v1835_v21, %v1835_v21  ;;  %3120 = vtanh.f32 %v1835_v21  ;;  %v1157_v31 = vpop.f32.mrf.mxu0  ;;  %2322 = vst.msk [vmem:[%s3635_s21 + $0x130] sm:$0xff] %vm483_vm1, %v3119_v44  ;;  %v1664_v53 = vadd.f32 %v1600_v46, %v1502_v19  ;;  %v1795_v11 = vld [vmem:[#allocation2 + $0x140] sm:$0xff]  ;;  %v1602_v19 = vld [vmem:[#allocation2 + $0x158] sm:$0xff] }
 0x112   : > { %v1911_v34 = vadd.f32 %v1910_v29, %v1909_v60  ;;  %v1434_v35 = vpop.f32.mrf.mxu1  ;;  %3122 = vtanh.f32 %v3829_v32  ;;  %v735_v60 = vmax.f32 %v2817_v54, 0.0  ;;  %v3855_v15 = vadd.f32 %v3843_v56, %v1795_v11 }
 0x113   : > { %v2109_v41 = vsel %vm483_vm1, %v2034_v30, 0.0  ;;  %v1435_v42 = vadd.f32 %v1434_v35, %v1157_v31  ;;  %1729 = vst.msk [vmem:[#allocation2 + $0x148] sm:$0xff] %vm483_vm1, %v1664_v53  ;;  %v3014_v31 = vld [vmem:[%s3434_s23 + $0xf0] sm:$0xff]   ;;  %v1575_v35 = vld [vmem:[#allocation2 + $0x80] sm:$0xff]  ;;  %v2821_v53 = vunpack.c.h.bf16 %v2983_v25  ;;  %v2984_v25 = vld [vmem:[%s3429_s20 + $0xf8] sm:$0xff]   ;;  %s4371_s20 = sshll.u32 %s2389_s17, 4  ;;  %s2394_s20 = int_to_ptr.hbm [resolvable:$true] %s4371_s20 }
 0x114   : > { %v2110_v45 = vadd.f32 %v2109_v41, %v2108_v18  ;;  %2630 = vmatmul.msk.bf16.gmra.mxu0 %vm1016_vm0, %v983_v24  ;;  %v769_v6 = vpack.c.bf16 %v735_v60, %v734_v58  ;;  %v1227_v7 = vpop.f32.mrf.mxu2  ;;  %v1504_v18 = vpop.f32.mrf.mxu3  ;;  %v2948_v38 = vunpack.c.l.bf16 %v3014_v31  ;;  %v2949_v39 = vunpack.c.h.bf16 %v3014_v31 }
 0x115   : > { %v1637_v48 = vadd.f32 %v1573_v36, %v1435_v42  ;;  %2670 = vmatmul.msk.bf16.gmra.mxu1 %vm1016_vm0, %v755_v26  ;;  %v1505_v24 = vadd.f32 %v1504_v18, %v1227_v7  ;;  %v1601_v26 = vld [vmem:[#allocation2 + $0x150] sm:$0xff] }
 0x116   : > { %v1768_v51 = vld [vmem:[#allocation2 + $0x68] sm:$0xff]  ;;  %2644 = vmatmul.msk.bf16.gmra.mxu2 %vm1016_vm0, %v997_v59  ;;  %2684 = vmatmul.msk.bf16.gmra.mxu3 %vm1016_vm0, %v769_v6  ;;  %v964_v46 = vmax.f32 %v2948_v38, 0.0  ;;  %v737_v59 = vmax.f32 %v2821_v53, 0.0 }
 0x117   : > { %v3121_v55 = vpop.eup %3120  ;;  %v1836_v57 = vadd.f32 %v3843_v56, %v1768_v51  ;;  %1702 = vst.msk [vmem:[#allocation2 + $0x70] sm:$0xff] %vm483_vm1, %v1637_v48  ;;  %v1665_v36 = vadd.f32 %v1601_v26, %v1505_v24  ;;  %v965_v48 = vmax.f32 %v2949_v39, 0.0  ;;  %v1603_v26 = vld [vmem:[#allocation2 + $0x160] sm:$0xff] }
 0x118   : > { %2296 = vst.msk [vmem:[%s3635_s21 + $0x60] sm:$0xff] %vm483_vm1, %v3121_v55  ;;  %v3123_v0 = vpop.eup %3122 }
 0x119   : > { %v1912_v61 = vsel %vm483_vm1, %v1836_v57, 0.0  ;;  %v2035_v62 = vmul.f32 %v1836_v57, %v1836_v57  ;;  %3124 = vtanh.f32 %v1836_v57  ;;  %v1159_v63 = vpop.f32.mrf.mxu0  ;;  %2323 = vst.msk [vmem:[%s3635_s21 + $0x138] sm:$0xff] %vm483_vm1, %v3123_v0  ;;  %v736_v57 = vmax.f32 %v2820_v49, 0.0 }
 0x11a   : > { %v1913_v3 = vadd.f32 %v1912_v61, %v1911_v34  ;;  %v1436_v4 = vpop.f32.mrf.mxu1  ;;  %3126 = vtanh.f32 %v3855_v15  ;;  %v1796_v22 = vld [vmem:[#allocation2 + $0x148] sm:$0xff]  ;;  %1730 = vst.msk [vmem:[#allocation2 + $0x150] sm:$0xff] %vm483_vm1, %v1665_v36  ;;  %v998_v58 = vpack.c.bf16 %v965_v48, %v964_v46  ;;  %v1577_v36 = vld [vmem:[#allocation2 + $0x90] sm:$0xff] }
 0x11b   : > { %v2111_v8 = vsel %vm483_vm1, %v2035_v62, 0.0  ;;  %v1437_v10 = vadd.f32 %v1436_v4, %v1159_v63  ;;  %v3866_v30 = vadd.f32 %v3843_v56, %v1796_v22  ;;  %v1576_v4 = vld [vmem:[#allocation2 + $0x88] sm:$0xff] }
 0x11c   : > { %v2112_v14 = vadd.f32 %v2111_v8, %v2110_v45  ;;  %v1229_v37 = vpop.f32.mrf.mxu2  ;;  %v1506_v42 = vpop.f32.mrf.mxu3  ;;  %v1604_v46 = vld [vmem:[#allocation2 + $0x168] sm:$0xff] }
 0x11d   : > { %v1638_v16 = vadd.f32 %v1574_v5, %v1437_v10  ;;  %v1507_v45 = vadd.f32 %v1506_v42, %v1229_v37  ;;  %v770_v5 = vpack.c.bf16 %v737_v59, %v736_v57 }
 0x11e   : > { %v1769_v17 = vld [vmem:[#allocation2 + $0x70] sm:$0xff] }
 0x11f   : > { %v3125_v20 = vpop.eup %3124  ;;  %v1837_v21 = vadd.f32 %v3843_v56, %v1769_v17  ;;  %1703 = vst.msk [vmem:[#allocation2 + $0x78] sm:$0xff] %vm483_vm1, %v1638_v16  ;;  %v1666_v51 = vadd.f32 %v1602_v19, %v1507_v45 }
 0x120   : > { %2297 = vst.msk [vmem:[%s3635_s21 + $0x68] sm:$0xff] %vm483_vm1, %v3125_v20  ;;  %v3127_v43 = vpop.eup %3126 }
 0x121   : > { %v1914_v27 = vsel %vm483_vm1, %v1837_v21, 0.0  ;;  %v2036_v28 = vmul.f32 %v1837_v21, %v1837_v21  ;;  %3128 = vtanh.f32 %v1837_v21  ;;  %v1162_v29 = vpop.f32.mrf.mxu0  ;;  %2324 = vst.msk [vmem:[%s3635_s21 + $0x140] sm:$0xff] %vm483_vm1, %v3127_v43  ;;  %v1797_v8 = vld [vmem:[#allocation2 + $0x150] sm:$0xff] }
 0x122   : > { %v1915_v33 = vadd.f32 %v1914_v27, %v1913_v3  ;;  %v1439_v34 = vpop.f32.mrf.mxu1  ;;  %3130 = vtanh.f32 %v3866_v30  ;;  %1731 = vst.msk [vmem:[#allocation2 + $0x158] sm:$0xff] %vm483_vm1, %v1666_v51 }
 0x123   : > { %v2113_v40 = vsel %vm483_vm1, %v2036_v28, 0.0  ;;  %v1440_v41 = vadd.f32 %v1439_v34, %v1162_v29 }
 0x124   : > { %v2114_v44 = vadd.f32 %v2113_v40, %v2112_v14  ;;  %v1232_v10 = vpop.f32.mrf.mxu2  ;;  %v1509_v11 = vpop.f32.mrf.mxu3  ;;  %v3885_v14 = vadd.f32 %v3843_v56, %v1797_v8 }
 0x125   : > { %v1639_v47 = vadd.f32 %v1575_v35, %v1440_v41  ;;  %v1510_v24 = vadd.f32 %v1509_v11, %v1232_v10 }
 0x126   : > { %v1770_v50 = vld [vmem:[#allocation2 + $0x78] sm:$0xff]  ;;  %2645 = vmatmul.msk.bf16.gmra.mxu2 %vm1016_vm0, %v998_v58  ;;  %2685 = vmatmul.msk.bf16.gmra.mxu3 %vm1016_vm0, %v770_v5 }
 0x127   : > { %v3129_v54 = vpop.eup %3128  ;;  %v1838_v55 = vadd.f32 %v3843_v56, %v1770_v50  ;;  %1704 = vst.msk [vmem:[#allocation2 + $0x80] sm:$0xff] %vm483_vm1, %v1639_v47  ;;  %v1667_v37 = vadd.f32 %v1603_v26, %v1510_v24  ;;  %v2824_v50 = vunpack.c.l.bf16 %v2984_v25  ;;  %v1578_v5 = vld [vmem:[#allocation2 + $0x98] sm:$0xff] }
 0x128   : > { %2298 = vst.msk [vmem:[%s3635_s21 + $0x70] sm:$0xff] %vm483_vm1, %v3129_v54  ;;  %v3131_v63 = vpop.eup %3130  ;;  %v2825_v54 = vunpack.c.h.bf16 %v2984_v25 }
 0x129   : > { %v1916_v60 = vsel %vm483_vm1, %v1838_v55, 0.0  ;;  %v2037_v61 = vmul.f32 %v1838_v55, %v1838_v55  ;;  %3132 = vtanh.f32 %v1838_v55  ;;  %v1164_v62 = vpop.f32.mrf.mxu0  ;;  %2325 = vst.msk [vmem:[%s3635_s21 + $0x148] sm:$0xff] %vm483_vm1, %v3131_v63  ;;  %v1798_v22 = vld [vmem:[#allocation2 + $0x158] sm:$0xff]  ;;  %v738_v58 = vmax.f32 %v2824_v50, 0.0 }
 0x12a   : > { %v1917_v0 = vadd.f32 %v1916_v60, %v1915_v33  ;;  %v1441_v3 = vpop.f32.mrf.mxu1  ;;  %3134 = vtanh.f32 %v3885_v14  ;;  %v3896_v31 = vadd.f32 %v3843_v56, %v1798_v22  ;;  %v3015_v33 = vld [vmem:[%s3434_s23 + $0xf8] sm:$0xff]   ;;  %1732 = vst.msk [vmem:[#allocation2 + $0x160] sm:$0xff] %vm483_vm1, %v1667_v37  ;;  %v739_v60 = vmax.f32 %v2825_v54, 0.0 }
 0x12b   : > { %v2115_v6 = vsel %vm483_vm1, %v2037_v61, 0.0  ;;  %v1442_v7 = vadd.f32 %v1441_v3, %v1164_v62  ;;  %v2952_v38 = vunpack.c.l.bf16 %v3015_v33  ;;  %v2953_v39 = vunpack.c.h.bf16 %v3015_v33 }
 0x12c   : > { %v2116_v18 = vadd.f32 %v2115_v6, %v2114_v44  ;;  %v1234_v42 = vpop.f32.mrf.mxu2  ;;  %v1511_v43 = vpop.f32.mrf.mxu3  ;;  %v771_v6 = vpack.c.bf16 %v739_v60, %v738_v58 }
 0x12d   : > { %v1640_v16 = vadd.f32 %v1576_v4, %v1442_v7  ;;  %v1512_v19 = vadd.f32 %v1511_v43, %v1234_v42  ;;  %v966_v47 = vmax.f32 %v2952_v38, 0.0  ;;  %v967_v49 = vmax.f32 %v2953_v39, 0.0  ;;  %v1579_v38 = vld [vmem:[#allocation2 + $0xa0] sm:$0xff] }
 0x12e   : > { %v1771_v17 = vld [vmem:[#allocation2 + $0x80] sm:$0xff] }
 0x12f   : > { %v3133_v20 = vpop.eup %3132  ;;  %v1839_v21 = vadd.f32 %v3843_v56, %v1771_v17  ;;  %1705 = vst.msk [vmem:[#allocation2 + $0x88] sm:$0xff] %vm483_vm1, %v1640_v16  ;;  %v1668_v53 = vadd.f32 %v1604_v46, %v1512_v19  ;;  %v999_v59 = vpack.c.bf16 %v967_v49, %v966_v47  ;;  %v1606_v19 = vld [vmem:[#allocation2 + $0x178] sm:$0xff] }
 0x130   : > { %2299 = vst.msk [vmem:[%s3635_s21 + $0x78] sm:$0xff] %vm483_vm1, %v3133_v20  ;;  %v3135_v44 = vpop.eup %3134 }
 0x131   : > { %v1918_v27 = vsel %vm483_vm1, %v1839_v21, 0.0  ;;  %v2038_v28 = vmul.f32 %v1839_v21, %v1839_v21  ;;  %3136 = vtanh.f32 %v1839_v21  ;;  %v1167_v29 = vpop.f32.mrf.mxu0  ;;  %2326 = vst.msk [vmem:[%s3635_s21 + $0x150] sm:$0xff] %vm483_vm1, %v3135_v44  ;;  %v1799_v10 = vld [vmem:[#allocation2 + $0x160] sm:$0xff] }
 0x132   : > { %v1919_v34 = vadd.f32 %v1918_v27, %v1917_v0  ;;  %v1444_v35 = vpop.f32.mrf.mxu1  ;;  %3138 = vtanh.f32 %v3896_v31  ;;  %1733 = vst.msk [vmem:[#allocation2 + $0x168] sm:$0xff] %vm483_vm1, %v1668_v53 }
 0x133   : > { %v2117_v40 = vsel %vm483_vm1, %v2038_v28, 0.0  ;;  %v1445_v41 = vadd.f32 %v1444_v35, %v1167_v29  ;;  %v1605_v28 = vld [vmem:[#allocation2 + $0x170] sm:$0xff] }
 0x134   : > { %v2118_v45 = vadd.f32 %v2117_v40, %v2116_v18  ;;  %v3915_v18 = vadd.f32 %v3843_v56, %v1799_v10  ;;  %v1237_v16 = vpop.f32.mrf.mxu2  ;;  %v1514_v20 = vpop.f32.mrf.mxu3 }
 0x135   : > { %v1641_v48 = vadd.f32 %v1577_v36, %v1445_v41  ;;  %v1515_v27 = vadd.f32 %v1514_v20, %v1237_v16 }
 0x136   : > { %v1772_v51 = vld [vmem:[#allocation2 + $0x88] sm:$0xff]  ;;  %2646 = vmatmul.msk.bf16.gmra.mxu2 %vm1016_vm0, %v999_v59  ;;  %2686 = vmatmul.msk.bf16.gmra.mxu3 %vm1016_vm0, %v771_v6 }
 0x137   : > { %v3137_v55 = vpop.eup %3136  ;;  %v1840_v57 = vadd.f32 %v3843_v56, %v1772_v51  ;;  %1706 = vst.msk [vmem:[#allocation2 + $0x90] sm:$0xff] %vm483_vm1, %v1641_v48  ;;  %v1669_v39 = vadd.f32 %v1605_v28, %v1515_v27  ;;  %v1580_v59 = vld [vmem:[#allocation2 + $0xa8] sm:$0xff] }
 0x138   : > { %2300 = vst.msk [vmem:[%s3635_s21 + $0x80] sm:$0xff] %vm483_vm1, %v3137_v55  ;;  %v3139_v0 = vpop.eup %3138 }
 0x139   : > { %v1920_v61 = vsel %vm483_vm1, %v1840_v57, 0.0  ;;  %v2039_v62 = vmul.f32 %v1840_v57, %v1840_v57  ;;  %3140 = vtanh.f32 %v1840_v57  ;;  %v1169_v63 = vpop.f32.mrf.mxu0  ;;  %2327 = vst.msk [vmem:[%s3635_s21 + $0x158] sm:$0xff] %vm483_vm1, %v3139_v0  ;;  %v1800_v26 = vld [vmem:[#allocation2 + $0x168] sm:$0xff] }
 0x13a   : > { %v1921_v3 = vadd.f32 %v1920_v61, %v1919_v34  ;;  %v1446_v4 = vpop.f32.mrf.mxu1  ;;  %3142 = vtanh.f32 %v3915_v18  ;;  %v3926_v35 = vadd.f32 %v3843_v56, %v1800_v26  ;;  %1734 = vst.msk [vmem:[#allocation2 + $0x170] sm:$0xff] %vm483_vm1, %v1669_v39  ;;  %v1581_v26 = vld [vmem:[#allocation2 + $0xb0] sm:$0xff] }
 0x13b   : > { %v2119_v7 = vsel %vm483_vm1, %v2039_v62, 0.0  ;;  %v1447_v8 = vadd.f32 %v1446_v4, %v1169_v63 }
 0x13c   : > { %v2120_v11 = vadd.f32 %v2119_v7, %v2118_v45  ;;  %v1239_v43 = vpop.f32.mrf.mxu2  ;;  %v1516_v45 = vpop.f32.mrf.mxu3 }
 0x13d   : > { %v1642_v17 = vadd.f32 %v1578_v5, %v1447_v8  ;;  %v1517_v47 = vadd.f32 %v1516_v45, %v1239_v43 }
 0x13e   : > { %v1773_v21 = vld [vmem:[#allocation2 + $0x90] sm:$0xff] }
 0x13f   : > { %v3141_v22 = vpop.eup %3140  ;;  %v1841_v24 = vadd.f32 %v3843_v56, %v1773_v21  ;;  %1707 = vst.msk [vmem:[#allocation2 + $0x98] sm:$0xff] %vm483_vm1, %v1642_v17  ;;  %v1670_v50 = vadd.f32 %v1606_v19, %v1517_v47  ;;  %v1582_v47 = vld [vmem:[#allocation2 + $0xb8] sm:$0xff] }
 0x140   : > { %2301 = vst.msk [vmem:[%s3635_s21 + $0x88] sm:$0xff] %vm483_vm1, %v3141_v22  ;;  %v3143_v41 = vpop.eup %3142 }
 0x141   : > { %v1922_v29 = vsel %vm483_vm1, %v1841_v24, 0.0  ;;  %v2040_v33 = vmul.f32 %v1841_v24, %v1841_v24  ;;  %3144 = vtanh.f32 %v1841_v24  ;;  %v1172_v34 = vpop.f32.mrf.mxu0  ;;  %2328 = vst.msk [vmem:[%s3635_s21 + $0x160] sm:$0xff] %vm483_vm1, %v3143_v41  ;;  %v1801_v62 = vld [vmem:[#allocation2 + $0x170] sm:$0xff] }
 0x142   : > { %v1923_v36 = vadd.f32 %v1922_v29, %v1921_v3  ;;  %v1449_v37 = vpop.f32.mrf.mxu1  ;;  %3146 = vtanh.f32 %v3926_v35  ;;  %1735 = vst.msk [vmem:[#allocation2 + $0x178] sm:$0xff] %vm483_vm1, %v1670_v50  ;;  %v3943_v0 = vadd.f32 %v3843_v56, %v1801_v62 }
 0x143   : > { %v2121_v25 = vsel %vm483_vm1, %v2040_v33, 0.0  ;;  %v1450_v40 = vadd.f32 %v1449_v37, %v1172_v34 }
 0x144   : > { %v2122_v42 = vadd.f32 %v2121_v25, %v2120_v11  ;;  %v1242_v3 = vpop.f32.mrf.mxu2  ;;  %v1519_v5 = vpop.f32.mrf.mxu3  ;;  %v1607_v11 = vld [vmem:[#allocation2 + $0x180] sm:$0xff]  ;;  %v1608_v25 = vld [vmem:[#allocation2 + $0x188] sm:$0xff] }
 0x145   : > { %v1643_v44 = vadd.f32 %v1579_v38, %v1450_v40  ;;  %v1520_v10 = vadd.f32 %v1519_v5, %v1242_v3  ;;  %v1583_v3 = vld [vmem:[#allocation2 + $0xc0] sm:$0xff] }
 0x146   : > { %v1774_v46 = vld [vmem:[#allocation2 + $0x98] sm:$0xff] }
 0x147   : > { %v3145_v48 = vpop.eup %3144  ;;  %v1842_v49 = vadd.f32 %v3843_v56, %v1774_v46  ;;  %1708 = vst.msk [vmem:[#allocation2 + $0xa0] sm:$0xff] %vm483_vm1, %v1643_v44  ;;  %v1671_v28 = vadd.f32 %v1607_v11, %v1520_v10 }
 0x148   : > { %2302 = vst.msk [vmem:[%s3635_s21 + $0x90] sm:$0xff] %vm483_vm1, %v3145_v48  ;;  %v3147_v55 = vpop.eup %3146 }
 0x149   : > { %v1924_v51 = vsel %vm483_vm1, %v1842_v49, 0.0  ;;  %v2041_v53 = vmul.f32 %v1842_v49, %v1842_v49  ;;  %3148 = vtanh.f32 %v1842_v49  ;;  %v1174_v54 = vpop.f32.mrf.mxu0  ;;  %2329 = vst.msk [vmem:[%s3635_s21 + $0x168] sm:$0xff] %vm483_vm1, %v3147_v55  ;;  %v1802_v21 = vld [vmem:[#allocation2 + $0x178] sm:$0xff] }
 0x14a   : > { %v1925_v57 = vadd.f32 %v1924_v51, %v1923_v36  ;;  %v1451_v58 = vpop.f32.mrf.mxu1  ;;  %3150 = vtanh.f32 %v3943_v0  ;;  %v3954_v27 = vadd.f32 %v3843_v56, %v1802_v21  ;;  %1736 = vst.msk [vmem:[#allocation2 + $0x180] sm:$0xff] %vm483_vm1, %v1671_v28  ;;  %v1610_v21 = vld [vmem:[#allocation2 + $0x198] sm:$0xff] }
 0x14b   : > { %v2123_v60 = vsel %vm483_vm1, %v2041_v53, 0.0  ;;  %v1452_v61 = vadd.f32 %v1451_v58, %v1174_v54 }
 0x14c   : > { %v2124_v63 = vadd.f32 %v2123_v60, %v2122_v42  ;;  %v1244_v37 = vpop.f32.mrf.mxu2  ;;  %v1521_v39 = vpop.f32.mrf.mxu3  ;;  %v1609_v60 = vld [vmem:[#allocation2 + $0x190] sm:$0xff] }
 0x14d   : > { %v1644_v4 = vadd.f32 %v1580_v59, %v1452_v61  ;;  %v1522_v41 = vadd.f32 %v1521_v39, %v1244_v37 }
 0x14e   : > { %v1775_v6 = vld [vmem:[#allocation2 + $0xa0] sm:$0xff] }
 0x14f   : > { %v3149_v7 = vpop.eup %3148  ;;  %v1843_v8 = vadd.f32 %v3843_v56, %v1775_v6  ;;  %1709 = vst.msk [vmem:[#allocation2 + $0xa8] sm:$0xff] %vm483_vm1, %v1644_v4  ;;  %v1672_v44 = vadd.f32 %v1608_v25, %v1522_v41 }
 0x150   : > { %2303 = vst.msk [vmem:[%s3635_s21 + $0x98] sm:$0xff] %vm483_vm1, %v3149_v7  ;;  %v3151_v34 = vpop.eup %3150 }
 0x151   : > { %v1926_v16 = vsel %vm483_vm1, %v1843_v8, 0.0  ;;  %v2042_v17 = vmul.f32 %v1843_v8, %v1843_v8  ;;  %3152 = vtanh.f32 %v1843_v8  ;;  %v1177_v20 = vpop.f32.mrf.mxu0  ;;  %2330 = vst.msk [vmem:[%s3635_s21 + $0x170] sm:$0xff] %vm483_vm1, %v3151_v34  ;;  %v1803_v49 = vld [vmem:[#allocation2 + $0x180] sm:$0xff] }
 0x152   : > { %v3951_v22 = vadd.f32 %v1926_v16, %v1925_v57  ;;  %v1454_v24 = vpop.f32.mrf.mxu1  ;;  %3154 = vtanh.f32 %v3954_v27  ;;  %1737 = vst.msk [vmem:[#allocation2 + $0x188] sm:$0xff] %vm483_vm1, %v1672_v44  ;;  %v3974_v50 = vadd.f32 %v3843_v56, %v1803_v49 }
 0x153   : > { %v2125_v29 = vsel %vm483_vm1, %v2042_v17, 0.0  ;;  %v1455_v33 = vadd.f32 %v1454_v24, %v1177_v20 }
 0x154   : > { %v3957_v36 = vadd.f32 %v2125_v29, %v2124_v63  ;;  %v1247_v53 = vpop.f32.mrf.mxu2  ;;  %v1524_v58 = vpop.f32.mrf.mxu3 }
 0x155   : > { %v1645_v38 = vadd.f32 %v1581_v26, %v1455_v33  ;;  %v1525_v59 = vadd.f32 %v1524_v58, %v1247_v53  ;;  %v1584_v33 = vld [vmem:[#allocation2 + $0xc8] sm:$0xff] }
 0x156   : > { %v1776_v40 = vld [vmem:[#allocation2 + $0xa8] sm:$0xff] }
 0x157   : > { %v3153_v42 = vpop.eup %3152  ;;  %v3964_v43 = vadd.f32 %v3843_v56, %v1776_v40  ;;  %1710 = vst.msk [vmem:[#allocation2 + $0xb0] sm:$0xff] %vm483_vm1, %v1645_v38  ;;  %v1673_v5 = vadd.f32 %v1609_v60, %v1525_v59 }
 0x158   : > { %2304 = vst.msk [vmem:[%s3635_s21 + $0xa0] sm:$0xff] %vm483_vm1, %v3153_v42  ;;  %v3155_v19 = vpop.eup %3154 }
 0x159   : > { %3156 = vtanh.f32 %v3964_v43  ;;  %v1179_v45 = vpop.f32.mrf.mxu0  ;;  %2331 = vst.msk [vmem:[%s3635_s21 + $0x178] sm:$0xff] %vm483_vm1, %v3155_v19  ;;  %v1804_v62 = vld [vmem:[#allocation2 + $0x188] sm:$0xff] }
 0x15a   : > { %v1456_v46 = vpop.f32.mrf.mxu1  ;;  %3158 = vtanh.f32 %v3974_v50  ;;  %v3985_v4 = vadd.f32 %v3843_v56, %v1804_v62  ;;  %1738 = vst.msk [vmem:[#allocation2 + $0x190] sm:$0xff] %vm483_vm1, %v1673_v5 }
 0x15b   : > { %v1457_v48 = vadd.f32 %v1456_v46, %v1179_v45  ;;  %v1611_v46 = vld [vmem:[#allocation2 + $0x1a0] sm:$0xff] }
 0x15c   : > { %v1249_v10 = vpop.f32.mrf.mxu2  ;;  %v1526_v20 = vpop.f32.mrf.mxu3 }
 0x15d   : > { %v1646_v51 = vadd.f32 %v1582_v47, %v1457_v48  ;;  %v1527_v24 = vadd.f32 %v1526_v20, %v1249_v10  ;;  %v1585_v48 = vld [vmem:[#allocation2 + $0xd0] sm:$0xff] }
 0x15e   : > { %v1777_v54 = vld [vmem:[#allocation2 + $0xb0] sm:$0xff] }
 0x15f   : > { %v3157_v55 = vpop.eup %3156  ;;  %v3978_v57 = vadd.f32 %v3843_v56, %v1777_v54  ;;  %1711 = vst.msk [vmem:[#allocation2 + $0xb8] sm:$0xff] %vm483_vm1, %v1646_v51  ;;  %v1674_v34 = vadd.f32 %v1610_v21, %v1527_v24 }
 0x160   : > { %2305 = vst.msk [vmem:[%s3635_s21 + $0xa8] sm:$0xff] %vm483_vm1, %v3157_v55  ;;  %v3159_v7 = vpop.eup %3158 }
 0x161   : > { %3160 = vtanh.f32 %v3978_v57  ;;  %v1182_v61 = vpop.f32.mrf.mxu0  ;;  %2332 = vst.msk [vmem:[%s3635_s21 + $0x180] sm:$0xff] %vm483_vm1, %v3159_v7  ;;  %v1805_v38 = vld [vmem:[#allocation2 + $0x190] sm:$0xff] }
 0x162   : > { %v1459_v63 = vpop.f32.mrf.mxu1  ;;  %3162 = vtanh.f32 %v3985_v4  ;;  %v4001_v39 = vadd.f32 %v3843_v56, %v1805_v38  ;;  %1739 = vst.msk [vmem:[#allocation2 + $0x198] sm:$0xff] %vm483_vm1, %v1674_v34 }
 0x163   : > { %v1460_v6 = vadd.f32 %v1459_v63, %v1182_v61 }
 0x164   : > { %v1252_v44 = vpop.f32.mrf.mxu2 }
 0x165   : > { %v1647_v8 = vadd.f32 %v1583_v3, %v1460_v6  ;;  %v1612_v6 = vld [vmem:[#allocation2 + $0x1a8] sm:$0xff] }
 0x166   : > { %v1778_v11 = vld [vmem:[#allocation2 + $0xb8] sm:$0xff]  ;;  %v1529_v19 = vpop.f32.mrf.mxu3 }
 0x167   : > { %v3161_v16 = vpop.eup %3160  ;;  %v3992_v17 = vadd.f32 %v3843_v56, %v1778_v11  ;;  %1712 = vst.msk [vmem:[#allocation2 + $0xc0] sm:$0xff] %vm483_vm1, %v1647_v8  ;;  %v1530_v49 = vadd.f32 %v1529_v19, %v1252_v44  ;;  %v1586_v8 = vld [vmem:[#allocation2 + $0xd8] sm:$0xff] }
 0x168   : > { %2306 = vst.msk [vmem:[%s3635_s21 + $0xb0] sm:$0xff] %vm483_vm1, %v3161_v16  ;;  %v3163_v28 = vpop.eup %3162 }
 0x169   : > { %3164 = vtanh.f32 %v3992_v17  ;;  %v1184_v26 = vpop.f32.mrf.mxu0  ;;  %2333 = vst.msk [vmem:[%s3635_s21 + $0x188] sm:$0xff] %vm483_vm1, %v3163_v28  ;;  %v1806_v53 = vld [vmem:[#allocation2 + $0x198] sm:$0xff]  ;;  %v1675_v58 = vadd.f32 %v1611_v46, %v1530_v49 }
 0x16a   : > { %v1461_v29 = vpop.f32.mrf.mxu1  ;;  %3166 = vtanh.f32 %v4001_v39  ;;  %v4013_v55 = vadd.f32 %v3843_v56, %v1806_v53 }
 0x16b   : > { %v1462_v37 = vadd.f32 %v1461_v29, %v1184_v26  ;;  %1740 = vst.msk [vmem:[#allocation2 + $0x1a0] sm:$0xff] %vm483_vm1, %v1675_v58 }
 0x16c   : > { %v1254_v63 = vpop.f32.mrf.mxu2 }
 0x16d   : > { %v1648_v25 = vadd.f32 %v1584_v33, %v1462_v37 }
 0x16e   : > { %v1779_v40 = vld [vmem:[#allocation2 + $0xc0] sm:$0xff]  ;;  %v1531_v5 = vpop.f32.mrf.mxu3 }
 0x16f   : > { %v3165_v41 = vpop.eup %3164  ;;  %v4006_v42 = vadd.f32 %v3843_v56, %v1779_v40  ;;  %1713 = vst.msk [vmem:[#allocation2 + $0xc8] sm:$0xff] %vm483_vm1, %v1648_v25  ;;  %v1532_v10 = vadd.f32 %v1531_v5, %v1254_v63  ;;  %v1613_v25 = vld [vmem:[#allocation2 + $0x1b0] sm:$0xff] }
 0x170   : > { %2307 = vst.msk [vmem:[%s3635_s21 + $0xb8] sm:$0xff] %vm483_vm1, %v3165_v41  ;;  %v3167_v54 = vpop.eup %3166  ;;  %v1587_v41 = vld [vmem:[#allocation2 + $0xe0] sm:$0xff] }
 0x171   : > { %3168 = vtanh.f32 %v4006_v42  ;;  %v1187_v45 = vpop.f32.mrf.mxu0  ;;  %2334 = vst.msk [vmem:[%s3635_s21 + $0x190] sm:$0xff] %vm483_vm1, %v3167_v54  ;;  %v1676_v20 = vadd.f32 %v1612_v6, %v1532_v10 }
 0x172   : > { %v1464_v47 = vpop.f32.mrf.mxu1  ;;  %3170 = vtanh.f32 %v4013_v55  ;;  %v1807_v24 = vld [vmem:[#allocation2 + $0x1a0] sm:$0xff] }
 0x173   : > { %v1465_v51 = vadd.f32 %v1464_v47, %v1187_v45  ;;  %v4029_v28 = vadd.f32 %v3843_v56, %v1807_v24  ;;  %1741 = vst.msk [vmem:[#allocation2 + $0x1a8] sm:$0xff] %vm483_vm1, %v1676_v20 }
 0x174   : > { %v1257_v34 = vpop.f32.mrf.mxu2 }
 0x175   : > { %v1649_v59 = vadd.f32 %v1585_v48, %v1465_v51 }
 0x176   : > { %v1780_v60 = vld [vmem:[#allocation2 + $0xc8] sm:$0xff]  ;;  %v1534_v38 = vpop.f32.mrf.mxu3 }
 0x177   : > { %v3169_v61 = vpop.eup %3168  ;;  %v4020_v62 = vadd.f32 %v3843_v56, %v1780_v60  ;;  %1714 = vst.msk [vmem:[#allocation2 + $0xd0] sm:$0xff] %vm483_vm1, %v1649_v59  ;;  %v1535_v44 = vadd.f32 %v1534_v38, %v1257_v34 }
 0x178   : > { %2308 = vst.msk [vmem:[%s3635_s21 + $0xc0] sm:$0xff] %vm483_vm1, %v3169_v61  ;;  %v3171_v16 = vpop.eup %3170  ;;  %v1614_v61 = vld [vmem:[#allocation2 + $0x1b8] sm:$0xff] }
 0x179   : > { %3172 = vtanh.f32 %v4020_v62  ;;  %v1189_v3 = vpop.f32.mrf.mxu0  ;;  %2335 = vst.msk [vmem:[%s3635_s21 + $0x198] sm:$0xff] %vm483_vm1, %v3171_v16  ;;  %v1677_v19 = vadd.f32 %v1613_v25, %v1535_v44  ;;  %v1589_v25 = vld [vmem:[#allocation2 + $0xf0] sm:$0xff] }
 0x17a   : > { %v1466_v7 = vpop.f32.mrf.mxu1  ;;  %3174 = vtanh.f32 %v4029_v28  ;;  %v1808_v47 = vld [vmem:[#allocation2 + $0x1a8] sm:$0xff] }
 0x17b   : > { %v1467_v11 = vadd.f32 %v1466_v7, %v1189_v3  ;;  %1742 = vst.msk [vmem:[#allocation2 + $0x1b0] sm:$0xff] %vm483_vm1, %v1677_v19  ;;  %v4042_v51 = vadd.f32 %v3843_v56, %v1808_v47  ;;  %v1588_v3 = vld [vmem:[#allocation2 + $0xe8] sm:$0xff]  ;;  %v1615_v19 = vld [vmem:[#allocation2 + $0x1c0] sm:$0xff]  ;;  %v1930_v47 = vsel %vm483_vm1, %v3978_v57, 0.0 }
 0x17c   : > { %v1259_v58 = vpop.f32.mrf.mxu2 }
 0x17d   : > { %v1650_v21 = vadd.f32 %v1586_v8, %v1467_v11 }
 0x17e   : > { %v1781_v26 = vld [vmem:[#allocation2 + $0xd0] sm:$0xff]  ;;  %v1536_v60 = vpop.f32.mrf.mxu3 }
 0x17f   : > { %v3173_v29 = vpop.eup %3172  ;;  %v4033_v33 = vadd.f32 %v3843_v56, %v1781_v26  ;;  %1715 = vst.msk [vmem:[#allocation2 + $0xd8] sm:$0xff] %vm483_vm1, %v1650_v21  ;;  %v1537_v5 = vadd.f32 %v1536_v60, %v1259_v58  ;;  %v2043_v26 = vmul.f32 %v3964_v43, %v3964_v43 }
 0x180   : > { %2309 = vst.msk [vmem:[%s3635_s21 + $0xc8] sm:$0xff] %vm483_vm1, %v3173_v29  ;;  %v3175_v48 = vpop.eup %3174 }
 0x181   : > { %3176 = vtanh.f32 %v4033_v33  ;;  %v1192_v37 = vpop.f32.mrf.mxu0  ;;  %2336 = vst.msk [vmem:[%s3635_s21 + $0x1a0] sm:$0xff] %vm483_vm1, %v3175_v48  ;;  %v1678_v7 = vadd.f32 %v1614_v61, %v1537_v5  ;;  %v2045_v48 = vmul.f32 %v3992_v17, %v3992_v17 }
 0x182   : > { %v1469_v40 = vpop.f32.mrf.mxu1  ;;  %3178 = vtanh.f32 %v4042_v51  ;;  %v1809_v11 = vld [vmem:[#allocation2 + $0x1b0] sm:$0xff] }
 0x183   : > { %v1470_v45 = vadd.f32 %v1469_v40, %v1192_v37  ;;  %1743 = vst.msk [vmem:[#allocation2 + $0x1b8] sm:$0xff] %vm483_vm1, %v1678_v7  ;;  %v4057_v21 = vadd.f32 %v3843_v56, %v1809_v11  ;;  %v1928_v40 = vsel %vm483_vm1, %v3964_v43, 0.0  ;;  %v2047_v11 = vmul.f32 %v4020_v62, %v4020_v62 }
 0x184   : > { %v1929_v43 = vadd.f32 %v1928_v40, %v3951_v22  ;;  %v2048_v40 = vmul.f32 %v4033_v33, %v4033_v33 }
 0x185   : > { %v1651_v46 = vadd.f32 %v1587_v41, %v1470_v45  ;;  %v2044_v41 = vmul.f32 %v3978_v57, %v3978_v57  ;;  %v2046_v57 = vmul.f32 %v4006_v42, %v4006_v42 }
 0x186   : > { %v1782_v49 = vld [vmem:[#allocation2 + $0xd8] sm:$0xff]  ;;  %v1931_v7 = vadd.f32 %v1930_v47, %v1929_v43  ;;  %v1938_v47 = vsel %vm483_vm1, %v4033_v33, 0.0 }
 0x187   : > { %v3177_v53 = vpop.eup %3176  ;;  %v4045_v54 = vadd.f32 %v3843_v56, %v1782_v49  ;;  %1716 = vst.msk [vmem:[#allocation2 + $0xe0] sm:$0xff] %vm483_vm1, %v1651_v46  ;;  %v2127_v46 = vsel %vm483_vm1, %v2043_v26, 0.0 }
 0x188   : > { %2310 = vst.msk [vmem:[%s3635_s21 + $0xd0] sm:$0xff] %vm483_vm1, %v3177_v53  ;;  %v3179_v10 = vpop.eup %3178  ;;  %v1539_v37 = vpop.f32.mrf.mxu3 }
 0x189   : > { %3180 = vtanh.f32 %v4045_v54  ;;  %v1194_v59 = vpop.f32.mrf.mxu0  ;;  %v1262_v20 = vpop.f32.mrf.mxu2  ;;  %2337 = vst.msk [vmem:[%s3635_s21 + $0x1a8] sm:$0xff] %vm483_vm1, %v3179_v10  ;;  %v1934_v10 = vsel %vm483_vm1, %v4006_v42, 0.0  ;;  %v1936_v42 = vsel %vm483_vm1, %v4020_v62, 0.0 }
 0x18a   : > { %v1471_v63 = vpop.f32.mrf.mxu1  ;;  %3182 = vtanh.f32 %v4057_v21  ;;  %v1540_v45 = vadd.f32 %v1539_v37, %v1262_v20  ;;  %v1810_v53 = vld [vmem:[#allocation2 + $0x1b8] sm:$0xff] }
 0x18b   : > { %v1472_v6 = vadd.f32 %v1471_v63, %v1194_v59  ;;  %v4081_v60 = vadd.f32 %v3843_v56, %v1810_v53  ;;  %v2129_v63 = vsel %vm483_vm1, %v2044_v41, 0.0  ;;  %v1590_v37 = vld [vmem:[#allocation2 + $0xf8] sm:$0xff] }
 0x18c   : > { %v1679_v59 = vadd.f32 %v1615_v19, %v1540_v45 }
 0x18d   : > { %v1652_v8 = vadd.f32 %v1588_v3, %v1472_v6  ;;  %v1932_v3 = vsel %vm483_vm1, %v3992_v17, 0.0  ;;  %v2128_v6 = vadd.f32 %v2127_v46, %v3957_v36  ;;  %v2131_v17 = vsel %vm483_vm1, %v2045_v48, 0.0 }
 0x18e   : > { %v1783_v24 = vld [vmem:[#allocation2 + $0xe0] sm:$0xff]  ;;  %1744 = vst.msk [vmem:[#allocation2 + $0x1c0] sm:$0xff] %vm483_vm1, %v1679_v59  ;;  %v1933_v26 = vadd.f32 %v1932_v3, %v1931_v7  ;;  %v2135_v46 = vsel %vm483_vm1, %v2047_v11, 0.0  ;;  %v2049_v48 = vmul.f32 %v4045_v54, %v4045_v54 }
 0x18f   : > { %v3181_v16 = vpop.eup %3180  ;;  %1717 = vst.msk [vmem:[#allocation2 + $0xe8] sm:$0xff] %vm483_vm1, %v1652_v8  ;;  %v4064_v29 = vadd.f32 %v3843_v56, %v1783_v24  ;;  %v1616_v24 = vld [vmem:[#allocation2 + $0x1c8] sm:$0xff]  ;;  %v2130_v36 = vadd.f32 %v2129_v63, %v2128_v6  ;;  %v1940_v63 = vsel %vm483_vm1, %v4045_v54, 0.0 }
 0x190   : > { %2311 = vst.msk [vmem:[%s3635_s21 + $0xd8] sm:$0xff] %vm483_vm1, %v3181_v16  ;;  %v3183_v61 = vpop.eup %3182  ;;  %v1541_v20 = vpop.f32.mrf.mxu3  ;;  %v1935_v45 = vadd.f32 %v1934_v10, %v1933_v26 }
 0x191   : > { %v1197_v34 = vpop.f32.mrf.mxu0  ;;  %3184 = vtanh.f32 %v4064_v29  ;;  %v1264_v22 = vpop.f32.mrf.mxu2  ;;  %2338 = vst.msk [vmem:[%s3635_s21 + $0x1b0] sm:$0xff] %vm483_vm1, %v3183_v61  ;;  %v2137_v61 = vsel %vm483_vm1, %v2048_v40, 0.0  ;;  %v2050_v33 = vmul.f32 %v4064_v29, %v4064_v29  ;;  %v1942_v54 = vsel %vm483_vm1, %v4064_v29, 0.0 }
 0x192   : > { %v1474_v38 = vpop.f32.mrf.mxu1  ;;  %3186 = vtanh.f32 %v4081_v60  ;;  %v1937_v62 = vadd.f32 %v1936_v42, %v1935_v45 }
 0x193   : > { %v1475_v44 = vadd.f32 %v1474_v38, %v1197_v34  ;;  %v1542_v38 = vadd.f32 %v1541_v20, %v1264_v22  ;;  %v2141_v26 = vsel %vm483_vm1, %v2050_v33, 0.0  ;;  %v1618_v33 = vld [vmem:[#allocation2 + $0x1d8] sm:$0xff] }
 0x194   : > { %v1939_v7 = vadd.f32 %v1938_v47, %v1937_v62 }
 0x195   : > { %v1653_v49 = vadd.f32 %v1589_v25, %v1475_v44  ;;  %v2133_v25 = vsel %vm483_vm1, %v2046_v57, 0.0  ;;  %v2132_v44 = vadd.f32 %v2131_v17, %v2130_v36  ;;  %v1680_v19 = vadd.f32 %v1616_v24, %v1542_v38  ;;  %v1811_v22 = vld [vmem:[#allocation2 + $0x1c0] sm:$0xff] }
 0x196   : > { %v1784_v58 = vld [vmem:[#allocation2 + $0xe8] sm:$0xff]  ;;  %v2139_v17 = vsel %vm483_vm1, %v2049_v48, 0.0  ;;  %v1941_v24 = vadd.f32 %v1940_v63, %v1939_v7 }
 0x197   : > { %v1852_v5 = vadd.f32 %v3843_v56, %v1784_v58  ;;  %1718 = vst.msk [vmem:[#allocation2 + $0xf0] sm:$0xff] %vm483_vm1, %v1653_v49  ;;  %v3185_v8 = vpop.eup %3184  ;;  %v2134_v43 = vadd.f32 %v2133_v25, %v2132_v44 }
 0x198   : > { %2312 = vst.msk [vmem:[%s3635_s21 + $0xe0] sm:$0xff] %vm483_vm1, %v3185_v8  ;;  %v3187_v53 = vpop.eup %3186  ;;  %v4123_v8 = vadd.f32 %v3843_v56, %v1811_v22  ;;  %v1943_v25 = vadd.f32 %v1942_v54, %v1941_v24  ;;  %v1950_v22 = vsel %vm483_vm1, %v3715_v52, 0.0 }
 0x199   : > { %3188 = vtanh.f32 %v1852_v5  ;;  %v1199_v16 = vpop.f32.mrf.mxu0  ;;  %1745 = vst.msk [vmem:[#allocation2 + $0x1c8] sm:$0xff] %vm483_vm1, %v1680_v19  ;;  %v1267_v57 = vpop.f32.mrf.mxu2  ;;  %v2136_v6 = vadd.f32 %v2135_v46, %v2134_v43  ;;  %v2051_v10 = vmul.f32 %v1852_v5, %v1852_v5 }
 0x19a   : > { %v1476_v34 = vpop.f32.mrf.mxu1  ;;  %v1544_v11 = vpop.f32.mrf.mxu3  ;;  %2339 = vst.msk [vmem:[%s3635_s21 + $0x1b8] sm:$0xff] %vm483_vm1, %v3187_v53 }
 0x19b   : > { %v1477_v41 = vadd.f32 %v1476_v34, %v1199_v16  ;;  %v1617_v16 = vld [vmem:[#allocation2 + $0x1d0] sm:$0xff]  ;;  %v2138_v20 = vadd.f32 %v2137_v61, %v2136_v6  ;;  %v1545_v36 = vadd.f32 %v1544_v11, %v1267_v57  ;;  %v1944_v34 = vsel %vm483_vm1, %v1852_v5, 0.0 }
 0x19c   : > { %v2143_v29 = vsel %vm483_vm1, %v2051_v10, 0.0  ;;  %v1945_v45 = vadd.f32 %v1944_v34, %v1943_v25  ;;  %v2055_v6 = vmul.f32 %v3725_v9, %v3725_v9  ;;  %v2057_v25 = vmul.f32 %v3761_v13, %v3761_v13 }
 0x19d   : > { %v1654_v49 = vadd.f32 %v1590_v37, %v1477_v41  ;;  %v2140_v38 = vadd.f32 %v2139_v17, %v2138_v20  ;;  %v1681_v42 = vadd.f32 %v1617_v16, %v1545_v36  ;;  %v1952_v16 = vsel %vm483_vm1, %v3725_v9, 0.0 }
 0x19e   : > { %v1785_v58 = vld [vmem:[#allocation2 + $0xf0] sm:$0xff]  ;;  %v2056_v20 = vmul.f32 %v3751_v2, %v3751_v2 }
 0x19f   : > { %v3189_v59 = vpop.eup %3188  ;;  %v1853_v3 = vadd.f32 %v3843_v56, %v1785_v58  ;;  %1719 = vst.msk [vmem:[#allocation2 + $0xf8] sm:$0xff] %vm483_vm1, %v1654_v49  ;;  %v2142_v44 = vadd.f32 %v2141_v26, %v2140_v38  ;;  %v2054_v58 = vmul.f32 %v3715_v52, %v3715_v52  ;;  %v1954_v38 = vsel %vm483_vm1, %v3751_v2, 0.0 }
 0x1a0   : > { %2313 = vst.msk [vmem:[%s3635_s21 + $0xe8] sm:$0xff] %vm483_vm1, %v3189_v59  ;;  %v1812_v41 = vld [vmem:[#allocation2 + $0x1c8] sm:$0xff]  ;;  %v2153_v2 = vsel %vm483_vm1, %v2056_v20, 0.0  ;;  %v2062_v20 = vmul.f32 %v3855_v15, %v3855_v15 }
 0x1a1   : > { %3190 = vtanh.f32 %v1853_v3  ;;  %v2052_v37 = vmul.f32 %v1853_v3, %v1853_v3  ;;  %v1946_v40 = vsel %vm483_vm1, %v1853_v3, 0.0  ;;  %1746 = vst.msk [vmem:[#allocation2 + $0x1d0] sm:$0xff] %vm483_vm1, %v1681_v42  ;;  %v4137_v46 = vadd.f32 %v3843_v56, %v1812_v41  ;;  %v1269_v49 = vpop.f32.mrf.mxu2  ;;  %v4168_v42 = vld [vmem:[%s4433_s4] ss:$0 sm:$0xff] }
 0x1a2   : > { %3192 = vtanh.f32 %v4123_v8  ;;  %v2144_v43 = vadd.f32 %v2143_v29, %v2142_v44  ;;  %v1947_v62 = vadd.f32 %v1946_v40, %v1945_v45  ;;  %v1546_v63 = vpop.f32.mrf.mxu3  ;;  %v2149_v11 = vsel %vm483_vm1, %v2054_v58, 0.0 }
 0x1a3   : > { %v2145_v47 = vsel %vm483_vm1, %v2052_v37, 0.0  ;;  %3194 = vtanh.f32 %v4137_v46  ;;  %v1547_v57 = vadd.f32 %v1546_v63, %v1269_v49  ;;  %v2151_v37 = vsel %vm483_vm1, %v2055_v6, 0.0 }
 0x1a4   : > { %v1956_v44 = vsel %vm483_vm1, %v3761_v13, 0.0  ;;  %v2058_v45 = vmul.f32 %v3784_v1, %v3784_v1  ;;  %v1960_v63 = vsel %vm483_vm1, %v3795_v23, 0.0 }
 0x1a5   : > { %v1682_v10 = vadd.f32 %v1618_v33, %v1547_v57  ;;  %v2060_v33 = vmul.f32 %v3818_v12, %v3818_v12 }
 0x1a6   : > { %v1786_v19 = vld [vmem:[#allocation2 + $0xf8] sm:$0xff] }
 0x1a7   : > { %v3191_v5 = vpop.eup %3190  ;;  %v1854_v48 = vadd.f32 %v3843_v56, %v1786_v19  ;;  %v2146_v56 = vadd.f32 %v2145_v47, %v2144_v43  ;;  %1747 = vst.msk [vmem:[#allocation2 + $0x1d8] sm:$0xff] %vm483_vm1, %v1682_v10  ;;  %v1958_v43 = vsel %vm483_vm1, %v3784_v1, 0.0 }
 0x1a8   : > { %v3193_v53 = vpop.eup %3192  ;;  %2314 = vst.msk [vmem:[%s3635_s21 + $0xf0] sm:$0xff] %vm483_vm1, %v3191_v5  ;;  %v1813_v26 = vld [vmem:[#allocation2 + $0x1d0] sm:$0xff]  ;;  %v1619_v5 = vld [vmem:[#allocation2 + $0x1e0] sm:$0xff] }
 0x1a9   : > { %v1948_v59 = vsel %vm483_vm1, %v1854_v48, 0.0  ;;  %v2053_v61 = vmul.f32 %v1854_v48, %v1854_v48  ;;  %3196 = vtanh.f32 %v1854_v48  ;;  %2340 = vst.msk [vmem:[%s3635_s21 + $0x1c0] sm:$0xff] %vm483_vm1, %v3193_v53  ;;  %v3195_v24 = vpop.eup %3194  ;;  %v1272_v9 = vpop.f32.mrf.mxu2  ;;  %v4171_v29 = vadd.f32 %v4168_v42, %v1813_v26 }
 0x1aa   : > { %v1949_v3 = vadd.f32 %v1948_v59, %v1947_v62  ;;  %2341 = vst.msk [vmem:[%s3635_s21 + $0x1c8] sm:$0xff] %vm483_vm1, %v3195_v24  ;;  %v1549_v19 = vpop.f32.mrf.mxu3  ;;  %v2155_v53 = vsel %vm483_vm1, %v2057_v25, 0.0  ;;  %v2059_v62 = vmul.f32 %v3795_v23, %v3795_v23  ;;  %v2061_v23 = vmul.f32 %v3829_v32, %v3829_v32 }
 0x1ab   : > { %v2147_v7 = vsel %vm483_vm1, %v2053_v61, 0.0  ;;  %3198 = vtanh.f32 %v4171_v29  ;;  %v1550_v49 = vadd.f32 %v1549_v19, %v1272_v9  ;;  %v2157_v61 = vsel %vm483_vm1, %v2058_v45, 0.0 }
 0x1ac   : > { %v1951_v17 = vadd.f32 %v1950_v22, %v1949_v3  ;;  %v2148_v54 = vadd.f32 %v2147_v7, %v2146_v56  ;;  %v2159_v6 = vsel %vm483_vm1, %v2059_v62, 0.0  ;;  %v1962_v7 = vsel %vm483_vm1, %v3818_v12, 0.0  ;;  %v1620_v12 = vld [vmem:[#allocation2 + $0x1e8] sm:$0xff] }
 0x1ad   : > { %v1683_v59 = vadd.f32 %v1619_v5, %v1550_v49 }
 0x1ae   : > { %v1953_v52 = vadd.f32 %v1952_v16, %v1951_v17  ;;  %v2150_v36 = vadd.f32 %v2149_v11, %v2148_v54  ;;  %v1814_v56 = vld [vmem:[#allocation2 + $0x1d8] sm:$0xff]  ;;  %v2161_v11 = vsel %vm483_vm1, %v2060_v33, 0.0  ;;  %v1964_v16 = vsel %vm483_vm1, %v3829_v32, 0.0 }
 0x1af   : > { %v3197_v34 = vpop.eup %3196  ;;  %1748 = vst.msk [vmem:[#allocation2 + $0x1e0] sm:$0xff] %vm483_vm1, %v1683_v59  ;;  %v4195_v1 = vadd.f32 %v4168_v42, %v1814_v56 }
 0x1b0   : > { %v1955_v40 = vadd.f32 %v1954_v38, %v1953_v52  ;;  %v2152_v41 = vadd.f32 %v2151_v37, %v2150_v36  ;;  %2315 = vst.msk [vmem:[%s3635_s21 + $0xf8] sm:$0xff] %vm483_vm1, %v3197_v34  ;;  %v2163_v34 = vsel %vm483_vm1, %v2061_v23, 0.0  ;;  %v1966_v37 = vsel %vm483_vm1, %v3855_v15, 0.0 }
 0x1b1   : > { %v3199_v22 = vpop.eup %3198  ;;  %v1274_v17 = vpop.f32.mrf.mxu2  ;;  %3200 = vtanh.f32 %v4195_v1  ;;  %v2063_v38 = vmul.f32 %v3866_v30, %v3866_v30  ;;  %v1976_v23 = vsel %vm483_vm1, %v3926_v35, 0.0 }
 0x1b2   : > { %v1957_v47 = vadd.f32 %v1956_v44, %v1955_v40  ;;  %v2154_v48 = vadd.f32 %v2153_v2, %v2152_v41  ;;  %2342 = vst.msk [vmem:[%s3635_s21 + $0x1d0] sm:$0xff] %vm483_vm1, %v3199_v22  ;;  %v1551_v24 = vpop.f32.mrf.mxu3  ;;  %v2165_v40 = vsel %vm483_vm1, %v2062_v20, 0.0  ;;  %v1968_v41 = vsel %vm483_vm1, %v3866_v30, 0.0 }
 0x1b3   : > { %v1552_v36 = vadd.f32 %v1551_v24, %v1274_v17  ;;  %v2064_v2 = vmul.f32 %v3885_v14, %v3885_v14  ;;  %v2065_v30 = vmul.f32 %v3896_v31, %v3896_v31  ;;  %v1978_v20 = vsel %vm483_vm1, %v3943_v0, 0.0 }
 0x1b4   : > { %v1959_v58 = vadd.f32 %v1958_v43, %v1957_v47  ;;  %v2156_v13 = vadd.f32 %v2155_v53, %v2154_v48  ;;  %v2167_v47 = vsel %vm483_vm1, %v2063_v38, 0.0  ;;  %v1970_v48 = vsel %vm483_vm1, %v3885_v14, 0.0 }
 0x1b5   : > { %v1684_v25 = vadd.f32 %v1620_v12, %v1552_v36  ;;  %v2169_v62 = vsel %vm483_vm1, %v2064_v2, 0.0  ;;  %v2171_v56 = vsel %vm483_vm1, %v2065_v30, 0.0  ;;  %v1980_v36 = vsel %vm483_vm1, %v3954_v27, 0.0 }
 0x1b6   : > { %v1961_v3 = vadd.f32 %v1960_v63, %v1959_v58  ;;  %v2158_v57 = vadd.f32 %v2157_v61, %v2156_v13  ;;  %v1815_v44 = vld [vmem:[#allocation2 + $0x1e0] sm:$0xff]  ;;  %v1972_v58 = vsel %vm483_vm1, %v3896_v31, 0.0  ;;  %v2066_v13 = vmul.f32 %v3915_v18, %v3915_v18  ;;  %v1621_v61 = vld [vmem:[#allocation2 + $0x1f0] sm:$0xff] }
 0x1b7   : > { %v3201_v45 = vpop.eup %3200  ;;  %1749 = vst.msk [vmem:[#allocation2 + $0x1e8] sm:$0xff] %vm483_vm1, %v1684_v25  ;;  %v4222_v15 = vadd.f32 %v4168_v42, %v1815_v44  ;;  %v2072_v30 = vmul.f32 %v4001_v39, %v4001_v39 }
 0x1b8   : > { %v1963_v54 = vadd.f32 %v1962_v7, %v1961_v3  ;;  %v2160_v10 = vadd.f32 %v2159_v6, %v2158_v57  ;;  %2343 = vst.msk [vmem:[%s3635_s21 + $0x1d8] sm:$0xff] %vm483_vm1, %v3201_v45  ;;  %v1974_v3 = vsel %vm483_vm1, %v3915_v18, 0.0  ;;  %v2067_v57 = vmul.f32 %v3926_v35, %v3926_v35 }
 0x1b9   : > { %v1277_v49 = vpop.f32.mrf.mxu2  ;;  %3202 = vtanh.f32 %v4222_v15  ;;  %v2173_v7 = vsel %vm483_vm1, %v2066_v13, 0.0  ;;  %v2069_v35 = vmul.f32 %v3954_v27, %v3954_v27  ;;  %v2071_v27 = vmul.f32 %v3985_v4, %v3985_v4 }
 0x1ba   : > { %v2162_v52 = vadd.f32 %v2161_v11, %v2160_v10  ;;  %v1965_v26 = vadd.f32 %v1964_v16, %v1963_v54  ;;  %v1554_v59 = vpop.f32.mrf.mxu3  ;;  %v2068_v54 = vmul.f32 %v3943_v0, %v3943_v0  ;;  %v2175_v12 = vsel %vm483_vm1, %v2067_v57, 0.0 }
 0x1bb   : > { %v1555_v14 = vadd.f32 %v1554_v59, %v1277_v49  ;;  %v2070_v0 = vmul.f32 %v3974_v50, %v3974_v50  ;;  %v2179_v44 = vsel %vm483_vm1, %v2069_v35, 0.0  ;;  %v1988_v13 = vsel %vm483_vm1, %v4013_v55, 0.0 }
 0x1bc   : > { %v1967_v9 = vadd.f32 %v1966_v37, %v1965_v26  ;;  %v2164_v32 = vadd.f32 %v2163_v34, %v2162_v52  ;;  %v1622_v34 = vld [vmem:[#allocation2 + $0x1f8] sm:$0xff]  ;;  %v2177_v38 = vsel %vm483_vm1, %v2068_v54, 0.0  ;;  %v1994_v54 = vsel %vm483_vm1, %v4057_v21, 0.0 }
 0x1bd   : > { %v1685_v22 = vadd.f32 %v1621_v61, %v1555_v14  ;;  %v2181_v49 = vsel %vm483_vm1, %v2070_v0, 0.0  ;;  %v2074_v14 = vmul.f32 %v4029_v28, %v4029_v28  ;;  %v1998_v35 = vsel %vm483_vm1, %v4123_v8, 0.0 }
 0x1be   : > { %v1969_v19 = vadd.f32 %v1968_v41, %v1967_v9  ;;  %v2166_v5 = vadd.f32 %v2165_v40, %v2164_v32  ;;  %v1816_v17 = vld [vmem:[#allocation2 + $0x1e8] sm:$0xff]  ;;  %v1982_v32 = vsel %vm483_vm1, %v3974_v50, 0.0 }
 0x1bf   : > { %1750 = vst.msk [vmem:[#allocation2 + $0x1f0] sm:$0xff] %vm483_vm1, %v1685_v22  ;;  %v4249_v18 = vadd.f32 %v4168_v42, %v1816_v17  ;;  %v3203_v16 = vpop.eup %3202  ;;  %v1992_v22 = vsel %vm483_vm1, %v4042_v51, 0.0 }
 0x1c0   : > { %v1971_v53 = vadd.f32 %v1970_v48, %v1969_v19  ;;  %v2168_v43 = vadd.f32 %v2167_v47, %v2166_v5  ;;  %2344 = vst.msk [vmem:[%s3635_s21 + $0x1e0] sm:$0xff] %vm483_vm1, %v3203_v16  ;;  %v1984_v19 = vsel %vm483_vm1, %v3985_v4, 0.0  ;;  %v1996_v16 = vsel %vm483_vm1, %v4081_v60, 0.0 }
 0x1c1   : > { %v1279_v24 = vpop.f32.mrf.mxu2  ;;  %3204 = vtanh.f32 %v4249_v18 }
 0x1c2   : > { %v1973_v63 = vadd.f32 %v1972_v58, %v1971_v53  ;;  %v2170_v33 = vadd.f32 %v2169_v62, %v2168_v43  ;;  %v1556_v26 = vpop.f32.mrf.mxu3  ;;  %v1986_v53 = vsel %vm483_vm1, %v4001_v39, 0.0  ;;  %v2073_v62 = vmul.f32 %v4013_v55, %v4013_v55 }
 0x1c3   : > { %v1557_v25 = vadd.f32 %v1556_v26, %v1279_v24  ;;  %v2183_v58 = vsel %vm483_vm1, %v2071_v27, 0.0  ;;  %v2185_v39 = vsel %vm483_vm1, %v2072_v30, 0.0  ;;  %v2079_v26 = vmul.f32 %v4137_v46, %v4137_v46 }
 0x1c4   : > { %v1975_v31 = vadd.f32 %v1974_v3, %v1973_v63  ;;  %v2172_v6 = vadd.f32 %v2171_v56, %v2170_v33  ;;  %v1990_v63 = vsel %vm483_vm1, %v4029_v28, 0.0  ;;  %v2075_v3 = vmul.f32 %v4042_v51, %v4042_v51 }
 0x1c5   : > { %v1686_v41 = vadd.f32 %v1622_v34, %v1557_v25  ;;  %v2187_v55 = vsel %vm483_vm1, %v2073_v62, 0.0  ;;  %v2189_v28 = vsel %vm483_vm1, %v2074_v14, 0.0  ;;  %v2077_v51 = vmul.f32 %v4081_v60, %v4081_v60 }
 0x1c6   : > { %v1977_v10 = vadd.f32 %v1976_v23, %v1975_v31  ;;  %v2174_v11 = vadd.f32 %v2173_v7, %v2172_v6  ;;  %v1817_v45 = vld [vmem:[#allocation2 + $0x1f0] sm:$0xff]  ;;  %v2076_v23 = vmul.f32 %v4057_v21, %v4057_v21  ;;  %v2000_v60 = vsel %vm483_vm1, %v4137_v46, 0.0 }
 0x1c7   : > { %v3205_v47 = vpop.eup %3204  ;;  %1751 = vst.msk [vmem:[#allocation2 + $0x1f8] sm:$0xff] %vm483_vm1, %v1686_v41  ;;  %v4273_v48 = vadd.f32 %v4168_v42, %v1817_v45  ;;  %v2195_v34 = vsel %vm483_vm1, %v2077_v51, 0.0  ;;  %v2080_v25 = vmul.f32 %v4171_v29, %v4171_v29  ;;  %v2081_v41 = vmul.f32 %v4195_v1, %v4195_v1 }
 0x1c8   : > { %v1979_v52 = vadd.f32 %v1978_v20, %v1977_v10  ;;  %v2176_v37 = vadd.f32 %v2175_v12, %v2174_v11  ;;  %2345 = vst.msk [vmem:[%s3635_s21 + $0x1e8] sm:$0xff] %vm483_vm1, %v3205_v47  ;;  %v2078_v12 = vmul.f32 %v4123_v8, %v4123_v8  ;;  %v2193_v21 = vsel %vm483_vm1, %v2076_v23, 0.0 }
 0x1c9   : > { %3206 = vtanh.f32 %v4273_v48  ;;  %v2002_v8 = vsel %vm483_vm1, %v4171_v29, 0.0  ;;  %v2199_v46 = vsel %vm483_vm1, %v2079_v26, 0.0  ;;  %v2082_v45 = vmul.f32 %v4222_v15, %v4222_v15 }
 0x1ca   : > { %v1981_v9 = vadd.f32 %v1980_v36, %v1979_v52  ;;  %v2178_v40 = vadd.f32 %v2177_v38, %v2176_v37  ;;  %v2006_v29 = vsel %vm483_vm1, %v4222_v15, 0.0  ;;  %v2203_v30 = vsel %vm483_vm1, %v2081_v41, 0.0 }
 0x1cb   : > { %v2010_v15 = vsel %vm483_vm1, %v4273_v48, 0.0 }
 0x1cc   : > { %v1983_v2 = vadd.f32 %v1982_v32, %v1981_v9  ;;  %v2180_v5 = vadd.f32 %v2179_v44, %v2178_v40  ;;  %v2197_v9 = vsel %vm483_vm1, %v2078_v12, 0.0 }
 0x1ce   : > { %v1985_v50 = vadd.f32 %v1984_v19, %v1983_v2  ;;  %v2182_v43 = vadd.f32 %v2181_v49, %v2180_v5  ;;  %v1818_v57 = vld [vmem:[#allocation2 + $0x1f8] sm:$0xff]  ;;  %v2004_v2 = vsel %vm483_vm1, %v4195_v1, 0.0  ;;  %v2201_v19 = vsel %vm483_vm1, %v2080_v25, 0.0 }
 0x1cf   : > { %v1886_v6 = vadd.f32 %v4168_v42, %v1818_v57  ;;  %v3207_v17 = vpop.eup %3206  ;;  %v2191_v42 = vsel %vm483_vm1, %v2075_v3, 0.0  ;;  %v2008_v1 = vsel %vm483_vm1, %v4249_v18, 0.0 }
 0x1d0   : > { %v1987_v4 = vadd.f32 %v1986_v53, %v1985_v50  ;;  %v2184_v59 = vadd.f32 %v2183_v58, %v2182_v43  ;;  %2346 = vst.msk [vmem:[%s3635_s21 + $0x1f0] sm:$0xff] %vm483_vm1, %v3207_v17  ;;  %v2083_v50 = vmul.f32 %v4249_v18, %v4249_v18  ;;  %v2084_v43 = vmul.f32 %v4273_v48, %v4273_v48 }
 0x1d1   : > { %3208 = vtanh.f32 %v1886_v6  ;;  %v2012_v18 = vsel %vm483_vm1, %v1886_v6, 0.0 }
 0x1d2   : > { %v1989_v61 = vadd.f32 %v1988_v13, %v1987_v4  ;;  %v2186_v33 = vadd.f32 %v2185_v39, %v2184_v59  ;;  %v2205_v4 = vsel %vm483_vm1, %v2082_v45, 0.0  ;;  %v2085_v13 = vmul.f32 %v1886_v6, %v1886_v6 }
 0x1d3   : > { %v2207_v59 = vsel %vm483_vm1, %v2083_v50, 0.0  ;;  %v2209_v39 = vsel %vm483_vm1, %v2084_v43, 0.0 }
 0x1d4   : > { %v1991_v56 = vadd.f32 %v1990_v63, %v1989_v61  ;;  %v2188_v31 = vadd.f32 %v2187_v55, %v2186_v33 }
 0x1d6   : > { %v1993_v7 = vadd.f32 %v1992_v22, %v1991_v56  ;;  %v2190_v10 = vadd.f32 %v2189_v28, %v2188_v31  ;;  %v2211_v56 = vsel %vm483_vm1, %v2085_v13, 0.0 }
 0x1d7   : > { %v3209_v38 = vpop.eup %3208 }
 0x1d8   : > { %v1995_v11 = vadd.f32 %v1994_v54, %v1993_v7  ;;  %v2192_v20 = vadd.f32 %v2191_v42, %v2190_v10  ;;  %2347 = vst.msk [vmem:[%s3635_s21 + $0x1f8] sm:$0xff] %vm483_vm1, %v3209_v38  ;;  %s4366_s21 = sshll.u32 %s2375_s18, 4  ;;  %s2380_s21 = int_to_ptr.hbm [resolvable:$true] %s4366_s21 }
 0x1d9   : > { %s3226_s23 = sshra.s32 %s2380_s21, 4  ;;  %s3227_s23 = int_to_ptr.hbm [resolvable:$true] %s3226_s23 }
 0x1da   : > { %v1997_v24 = vadd.f32 %v1996_v16, %v1995_v11  ;;  %v2194_v52 = vadd.f32 %v2193_v21, %v2192_v20  ;;  %s3228_s10 = scalar_lea.hbm %s3227_s23, 1  ;;  %p3233_p1 = scmp.lt.s32.totalorder %s3227_s23, %s4435_s6 }
 0x1db   : > { %p3229_p12 = scmp.ne.s32.totalorder %s3227_s23, %s3228_s10  ;;  %p3234_p2 = scmp.lt.s32.totalorder %s3232_s9, %s3228_s10 }
 0x1dc   : > { %v1999_v36 = vadd.f32 %v1998_v35, %v1997_v24  ;;  %v2196_v37 = vadd.f32 %v2195_v34, %v2194_v52 }
 0x1dd   : > { %p3230_p13 = pnand %p3229_p12, %p3405_p4  ;;  %p3235_p3 = por %p3234_p2, %p3233_p1 }
 0x1de   : > { %v2001_v0 = vadd.f32 %v2000_v60, %v1999_v36  ;;  %v2198_v32 = vadd.f32 %v2197_v9, %v2196_v37 }
 0x1df   : > { %p3231_p0 = pneg %p3230_p13 }
 0x1e0   : > { %v2003_v40 = vadd.f32 %v2002_v8, %v2001_v0  ;;  %v2200_v27 = vadd.f32 %v2199_v46, %v2198_v32 }
 0x1e1   : > { %p3236_p5 = pnand %p3235_p3, %p3231_p0 }
 0x1e2   : > { %v2005_v44 = vadd.f32 %v2004_v2, %v2003_v40  ;;  %v2202_v5 = vadd.f32 %v2201_v19, %v2200_v27 }
 0x1e4   : > { %v2007_v47 = vadd.f32 %v2006_v29, %v2005_v44  ;;  %v2204_v49 = vadd.f32 %v2203_v30, %v2202_v5 }
 0x1e6   : > { %v2009_v53 = vadd.f32 %v2008_v1, %v2007_v47  ;;  %v2206_v62 = vadd.f32 %v2205_v4, %v2204_v49 }
 0x1e8   : > { %v2011_v58 = vadd.f32 %v2010_v15, %v2009_v53  ;;  %v2208_v61 = vadd.f32 %v2207_v59, %v2206_v62 }
 0x1ea   : > { %v2013_v14 = vadd.f32 %v2012_v18, %v2011_v58  ;;  %v2210_v63 = vadd.f32 %v2209_v39, %v2208_v61 }
 0x1ec   : > { %v2014_v33 = vrot.slane %v2013_v14, 4  ;;  %v2212_v48 = vadd.f32 %v2211_v56, %v2210_v63 }
 0x1ee   : > { %v2015_v3 = vadd.f32 %v2014_v33, %v2013_v14  ;;  %v2213_v55 = vrot.slane %v2212_v48, 4 }
 0x1f0   : > { %v2016_v57 = vrot.slane %v2015_v3, 2  ;;  %v2214_v22 = vadd.f32 %v2213_v55, %v2212_v48 }
 0x1f2   : > { %v2017_v31 = vadd.f32 %v2016_v57, %v2015_v3  ;;  %v2215_v6 = vrot.slane %v2214_v22, 2 }
 0x1f4   : > { %v2018_v7 = vrot.slane %v2017_v31, 1  ;;  %v2216_v23 = vadd.f32 %v2215_v6, %v2214_v22 }
 0x1f6   : > { %v2019_v28 = vadd.f32 %v2018_v7, %v2017_v31  ;;  %v2217_v17 = vrot.slane %v2216_v23, 1 }
 0x1f8   : > { %2021 = vst.msk [vmem:[%s415_s19] sm:$0x1] %vm2020_vm2, %v2019_v28 }
 0x1f9   : > { %3239 = shalt.err (!%p3236_p5)
}
 0x1fa   : > { %3020 = dma.vmem_to_hbm [thread:$0]  (%p3405_p4), %s2378_s15, 16, %s2380_s21, %s2358_s27   ;;  %v2218_v54 = vadd.f32 %v2217_v17, %v2216_v23 }
 0x1fb   : > { %s2362_s19 = scalar_lea.sflag [#allocation6], %s4353_s8  ;;  %s3254_s12 = sshra.s32 %s2394_s20, 4  ;;  %s3255_s12 = int_to_ptr.hbm [resolvable:$true] %s3254_s12 }
 0x1fc   : > { %2219 = vst.msk [vmem:[%s421_s22] sm:$0x1] %vm2020_vm2, %v2218_v54  ;;  %s3256_s18 = scalar_lea.hbm %s3255_s12, 1  ;;  %s3260_s9 = scalar_lea.hbm %s4436_s7, 4 }
 0x1fd   : > { %p3257_p6 = scmp.ne.s32.totalorder %s3255_s12, %s3256_s18  ;;  %p3261_p10 = scmp.lt.s32.totalorder %s3255_s12, %s4436_s7 }
 0x1fe   : > { %p3262_p11 = scmp.lt.s32.totalorder %s3260_s9, %s3256_s18 }
 0x1ff   : > { %p3258_p7 = pnand %p3257_p6, %p3405_p4 }
 0x200   : > { %p3263_p12 = por %p3262_p11, %p3261_p10 }
 0x201   : > { %p3259_p9 = pneg %p3258_p7 }
 0x203   : > { %p3264_p13 = pnand %p3263_p12, %p3259_p9 }
 0x205   : > { %3267 = shalt.err (!%p3264_p13)
}
 0x206   : > { %3021 = dma.vmem_to_hbm [thread:$0]  (%p3405_p4), %s2392_s30, 16, %s2394_s20, %s2362_s19  }
 0x207 PF: > { %p3031_p0 = scmp.ge.s32.totalorder %s3322_s29, 2  ;;  %s2417_s8 = sand.u32 1, %s3302_s24  }
 0x208   : > { %s2418_s15 = scalar_lea.sflag [#allocation4], %s2417_s8 }
 0x209   : > { %p3025_p1 = pnand %p3031_p0, %p3412_p8 }
 0x20b   : > { %p3026_p2 = pneg %p3025_p1 }
 0x20d   : > { %3293 = dma.done.wait (%p3026_p2), %s2418_s15, 16  }
 0x20e   : > { %3295 = vsyncadd (%p3026_p2), %s2418_s15, 4294967280  ;;  %s2427_s21 = scalar_lea.sflag [#allocation6], %s2417_s8 }
 0x20f   : > { %3297 = dma.done.wait (%p3026_p2), %s2427_s21, 16  }
 0x210   : > { %3299 = vsyncadd (%p3026_p2), %s2427_s21, 4294967280  ;;  %s24_s29 = sadd.s32 1, %s3322_s29   ;;  %s4441_s11 = sld [smem:[#allocation9_spill]] }
 0x211   : > { %p21_p3 = scmp.ge.s32.totalorder %s24_s29, 6   ;;  %s4442_s24 = smov %s3306_s25 }
 0x212   : > { %s4443_s25 = smov %s3310_s26  ;;  %s4444_s26 = smov %s3418_s14 }
 0x213   : > { %s4445_s27 = smov %s3318_s28  ;;  %23 = sbr.rel (!%p21_p3) target bundleno = 6 (0x6), region = 121 }
 0x216   : > { %s4446_s28 = smov %s4441_s11 }
 0x218   :  { %2432 = vsyncpa [#allocation4], 1 }
 0x219   :  { %2434 = vsyncpa [#allocation4 + $0x1], 1 }
 0x21a   :  { %2435 = vsyncpa [#allocation6], 1 }
 0x21b   :  { %2437 = vsyncpa [#allocation6 + $0x1], 1 }

</bundles_post_ra>
